<compile_context>
chip_gen: v7x
topology: tpu7x:2x2x1
jax: 0.10.0
libtpu: 0.0.40
codegen_flags: <defaults>
</compile_context>

<pallas_src>
import jax
import jax.numpy as jnp
from jax import lax
from jax.experimental import pallas as pl
from jax.experimental.pallas import tpu as pltpu

N_BATCH = 2  # the precomputed constants below are specialized to this batch size

_VMEM = pl.BlockSpec(memory_space=pltpu.MemorySpace.VMEM)


# ----------------------------- fused Pallas kernel ---------------------------

def _branchynet_kernel(
    x0_ref,
    a0_ref, s0_ref,
    ae1_ref, se1_ref, ewe1_ref,
    ab1_ref, sb1_ref, ewb1_ref,
    ab2_ref, sb2_ref, ewb2_ref,
    wee1_ref, bee1_ref,
    wbb_ref, bbb_ref,
    weef_ref, beef_ref,
    res0_ref, res1_ref,
):
  f32 = jnp.float32

  def conv_pool(x, a_ref, s_ref):
    """Fused Conv2d(bias=False) -> MaxPool2d(2,2) -> ReLU on a VMEM value.

    x:     (rows_in, N*Wp)   padded input, rows=(cin, y), lanes=(n, x)
    a_ref: (KW, 2*Cout*Ho2, rows_in)  block-Toeplitz conv constants, output rows
           ordered (pool_row_phase, cout, pooled_row)
    s_ref: (2, Lw, N*Wo2)    0/1 pool column-phase selectors (even / odd)
    returns (Cout*Ho2, N*Wo2): pooled+ReLU map, rows=(cout, row), lanes=(n, col)
    """
    kw_taps = a_ref.shape[0]
    r = a_ref.shape[1] // 2
    lw = s_ref.shape[1]
    acc = jnp.dot(a_ref[0], x[:, 0:lw], preferred_element_type=f32)
    for kw in range(1, kw_taps):
      acc = acc + jnp.dot(a_ref[kw], x[:, kw:kw + lw],
                          preferred_element_type=f32)
    ym = jnp.maximum(acc[:r, :], acc[r:, :])            # max over pool row phase
    p_even = jnp.dot(ym, s_ref[0], preferred_element_type=f32)
    p_odd = jnp.dot(ym, s_ref[1], preferred_element_type=f32)
    return jnp.maximum(jnp.maximum(p_even, p_odd), 0.0)  # pool col phase + ReLU

  def fc(x_n, w_ref, bias):
    """Per-sample Linear on a (features, Wc) block: bias + sum_b W_b @ x[:, b]."""
    acc = bias
    for b in range(w_ref.shape[0]):
      acc = acc + jnp.dot(w_ref[b], x_n[:, b:b + 1],
                          preferred_element_type=f32)
    return acc                                          # (out, 1) column

  # backbone[0]: ConvPoolAc(1, 5, k=5, p=4)   (28x28 -> 16x16)
  p_b0 = conv_pool(x0_ref[...], a0_ref, s0_ref)          # (5*16, N*16)

  # exits[0]: ConvPoolAc(5, 10, k=3, p=1) -> Flatten -> Linear(640, 10)
  x_e1 = jnp.dot(p_b0, ewe1_ref[...], preferred_element_type=f32)
  p_e1 = conv_pool(x_e1, ae1_ref, se1_ref)               # (10*8, N*8)

  # backbone[1]: ConvPoolAc(5,10,k=5,p=4) -> ConvPoolAc(10,20,k=5,p=3)
  #              -> Flatten -> Linear(720, 84)
  x_b1 = jnp.dot(p_b0, ewb1_ref[...], preferred_element_type=f32)
  p_b1 = conv_pool(x_b1, ab1_ref, sb1_ref)               # (10*10, N*10)
  x_b2 = jnp.dot(p_b1, ewb2_ref[...], preferred_element_type=f32)
  p_b2 = conv_pool(x_b2, ab2_ref, sb2_ref)               # (20*6, N*6)

  # fully-connected heads (per sample), exits[1]: Linear(84, 10)
  wc_e1 = wee1_ref.shape[0]   # 8
  wc_b2 = wbb_ref.shape[0]    # 6
  bee1 = bee1_ref[...]
  bbb = bbb_ref[...]
  weef = weef_ref[...]
  beef = beef_ref[...]

  res0_cols = jnp.zeros((10, N_BATCH), f32)
  res1_cols = jnp.zeros((10, N_BATCH), f32)
  lane_ids = lax.broadcasted_iota(jnp.int32, (1, N_BATCH), 1)
  for n in range(N_BATCH):
    r0 = fc(p_e1[:, n * wc_e1:(n + 1) * wc_e1], wee1_ref, bee1)       # (10, 1)
    feat = fc(p_b2[:, n * wc_b2:(n + 1) * wc_b2], wbb_ref, bbb)       # (84, 1)
    r1 = jnp.dot(weef, feat, preferred_element_type=f32) + beef       # (10, 1)
    res0_cols = jnp.where(lane_ids == n, r0, res0_cols)
    res1_cols = jnp.where(lane_ids == n, r1, res1_cols)

  res0_ref[...] = res0_cols.T
  res1_ref[...] = res1_cols.T


# ----------------------------- constant preparation --------------------------

def _make_conv_mats(wt, h_cols, pad, n_batch, w_in):
  """Constants for one ConvPoolAc layer.

  wt:     (Cout, Cin, KH, KW) conv weight
  h_cols: input rows per channel as seen by the kernel (= padded height for the
          first layer, unpadded pooled height for later layers)
  pad:    vertical/horizontal padding folded into the row indexing (0 for the
          first layer, whose input is pre-padded on the host)
  w_in:   per-sample lane width of the kernel's input (= padded width)
  """
  cout, cin, khs, kws = wt.shape
  hp = h_cols + 2 * pad
  ho = hp - khs + 1
  ho2 = ho // 2
  wo = w_in - kws + 1
  wo2 = wo // 2

  dh = jnp.arange(2)[:, None, None, None]
  a = jnp.arange(ho2)[None, :, None, None]
  h = jnp.arange(h_cols)[None, None, :, None]
  kh = jnp.arange(khs)[None, None, None, :]
  onehot = ((h + pad - 2 * a - dh) == kh).astype(wt.dtype)  # (2, ho2, h_cols, KH)
  a_mat = jnp.einsum('dahk,ockw->wdoach', onehot, wt)
  a_mat = a_mat.reshape(kws, 2 * cout * ho2, cin * h_cols)

  lw = (n_batch - 1) * w_in + wo
  lam = jnp.arange(lw)[:, None]
  nn = jnp.arange(n_batch)[:, None]
  bb = jnp.arange(wo2)[None, :]
  tgt_e = (nn * w_in + 2 * bb).reshape(1, n_batch * wo2)
  tgt_o = (nn * w_in + 2 * bb + 1).reshape(1, n_batch * wo2)
  s_mat = jnp.stack([(lam == tgt_e).astype(jnp.float32),
                     (lam == tgt_o).astype(jnp.float32)], axis=0)
  return a_mat, s_mat


def _make_embed(wc, pad, n_batch):
  """0/1 matrix embedding pooled lanes (n, b) into padded lanes (n, b + pad)."""
  wp = wc + 2 * pad
  src = jnp.arange(n_batch * wc)[:, None]
  n = src // wc
  b = src % wc
  tgt = jnp.arange(n_batch * wp)[None, :]
  return ((n * wp + b + pad) == tgt).astype(jnp.float32)   # (N*wc, N*wp)


def prepare_constants(params, n_batch=N_BATCH):
  """Precompute every kernel constant (depends only on the parameters)."""
  # backbone[0]: ConvPoolAc(1, 5, k=5, p=4); input 28 -> padded 36 on host
  a0, s0 = _make_conv_mats(params["bb0_w"], h_cols=36, pad=0,
                           n_batch=n_batch, w_in=36)
  # exits[0] conv: ConvPoolAc(5, 10, k=3, p=1); consumes the 16x16 pooled map
  ae1, se1 = _make_conv_mats(params["ee1_conv_w"], h_cols=16, pad=1,
                             n_batch=n_batch, w_in=18)
  ewe1 = _make_embed(wc=16, pad=1, n_batch=n_batch)
  # backbone[1][0]: ConvPoolAc(5, 10, k=5, p=4); consumes the 16x16 pooled map
  ab1, sb1 = _make_conv_mats(params["bb1_w"], h_cols=16, pad=4,
                             n_batch=n_batch, w_in=24)
  ewb1 = _make_embed(wc=16, pad=4, n_batch=n_batch)
  # backbone[1][1]: ConvPoolAc(10, 20, k=5, p=3); consumes the 10x10 pooled map
  ab2, sb2 = _make_conv_mats(params["bb2_w"], h_cols=10, pad=3,
                             n_batch=n_batch, w_in=16)
  ewb2 = _make_embed(wc=10, pad=3, n_batch=n_batch)
  # FC weights permuted once so the flatten order matches the kernel layout
  wee1 = params["ee1_fc_w"].reshape(10, 10, 8, 8).transpose(3, 0, 1, 2)
  wee1 = wee1.reshape(8, 10, 80)
  bee1 = params["ee1_fc_b"].reshape(10, 1)
  wbb = params["bb_fc_w"].reshape(84, 20, 6, 6).transpose(3, 0, 1, 2)
  wbb = wbb.reshape(6, 84, 120)
  bbb = params["bb_fc_b"].reshape(84, 1)
  weef = params["eeF_w"]
  beef = params["eeF_b"].reshape(10, 1)
  return (a0, s0, ae1, se1, ewe1, ab1, sb1, ewb1, ab2, sb2, ewb2,
          wee1, bee1, wbb, bbb, weef, beef)


# ----------------------------- forward wrappers -------------------------------

def _forward_impl(x, consts):
  n = x.shape[0]
  assert n == N_BATCH, "constants are specialized to N_BATCH samples"
  xpad = jnp.pad(x, ((0, 0), (0, 0), (4, 4), (4, 4)))          # (N, 1, 36, 36)
  x0 = jnp.transpose(xpad, (1, 2, 0, 3)).reshape(36, n * 36)   # rows=(c,y), lanes=(n,x)
  out_shape = (jax.ShapeDtypeStruct((n, 10), jnp.float32),
               jax.ShapeDtypeStruct((n, 10), jnp.float32))
  res0, res1 = pl.pallas_call(
      _branchynet_kernel,
      out_shape=out_shape,
      in_specs=[_VMEM] * (1 + len(consts)),
      out_specs=[_VMEM, _VMEM],
  )(x0, *consts)
  return res0, res1


_forward_jit = jax.jit(_forward_impl)


def branchynet_forward(x, consts, send_exits=False):
  """Training-mode forward of Branchynet (fast_inference_mode=False)."""
  res0, res1 = _forward_jit(x, consts)
  res = [res0, res1]
  if send_exits:
    return res, [jnp.argmax(res0, axis=1), jnp.argmax(res1, axis=1)]
  return res
  # TODO(synk): fast_inference_mode early-exit (data-dependent Python control
  # flow + print + exit_criterion_top1 threshold) has no clean static-graph
  # Pallas equivalent; only the training-mode forward is implemented.


# ----------------------------- pure-JAX reference -----------------------------

def _ref_conv_pool_relu(x, w, padding):
  y = lax.conv_general_dilated(
      x, w, window_strides=(1, 1),
      padding=[(padding, padding), (padding, padding)],
      dimension_numbers=("NCHW", "OIHW", "NCHW"))
  y = lax.reduce_window(y, -jnp.inf, lax.max,
                        (1, 1, 2, 2), (1, 1, 2, 2), "VALID")
  return jnp.maximum(y, 0.0)


def _ref_forward(x, params):
  b0 = _ref_conv_pool_relu(x, params["bb0_w"], 4)
  e1 = _ref_conv_pool_relu(b0, params["ee1_conv_w"], 1)
  res0 = e1.reshape(e1.shape[0], -1) @ params["ee1_fc_w"].T + params["ee1_fc_b"]
  b1 = _ref_conv_pool_relu(b0, params["bb1_w"], 4)
  b2 = _ref_conv_pool_relu(b1, params["bb2_w"], 3)
  feat = b2.reshape(b2.shape[0], -1) @ params["bb_fc_w"].T + params["bb_fc_b"]
  res1 = feat @ params["eeF_w"].T + params["eeF_b"]
  return [res0, res1]


# ----------------------------- params -----------------------------------------

def init_params(key):
  def u(k, shape, fan_in):
    bound = 1.0 / float(fan_in) ** 0.5
    return jax.random.uniform(k, shape, jnp.float32, -bound, bound)

  ks = jax.random.split(key, 10)
  return {
      "bb0_w":      u(ks[0], (5, 1, 5, 5),   1 * 5 * 5),
      "bb1_w":      u(ks[1], (10, 5, 5, 5),  5 * 5 * 5),
      "bb2_w":      u(ks[2], (20, 10, 5, 5), 10 * 5 * 5),
      "bb_fc_w":    u(ks[3], (84, 720), 720),
      "bb_fc_b":    u(ks[4], (84,), 720),
      "ee1_conv_w": u(ks[5], (10, 5, 3, 3),  5 * 3 * 3),
      "ee1_fc_w":   u(ks[6], (10, 640), 640),
      "ee1_fc_b":   u(ks[7], (10,), 640),
      "eeF_w":      u(ks[8], (10, 84), 84),
      "eeF_b":      u(ks[9], (10,), 84),
  }


# ----------------------------- main --------------------------------------------

if __name__ == "__main__":
  key = jax.random.PRNGKey(0)
  pkey, xkey = jax.random.split(key)
  params = init_params(pkey)
  # MNIST-like input implied by Linear(720,84)/Linear(640,10): (N, 1, 28, 28)
  x = jax.random.normal(xkey, (N_BATCH, 1, 28, 28), jnp.float32)

  consts = prepare_constants(params)           # built once from the parameters
  res = branchynet_forward(x, consts)
  res = [jax.block_until_ready(r) for r in res]

  ref = _ref_forward(x, params)
  for got, want in zip(res, ref):
    assert got.shape == (N_BATCH, 10) and got.dtype == jnp.float32
    if not jnp.allclose(got, want, rtol=1e-4, atol=1e-4):
      raise AssertionError("Pallas output mismatch vs pure-JAX reference")

  print("KERNEL_OK")
</pallas_src>

<mosaic_0001>
module attributes {stable_mosaic.version = 11 : i64} {
  func.func @_branchynet_kernel(%arg0: memref<36x72xf32, #tpu.memory_space<vmem>>, %arg1: memref<5x160x36xf32, #tpu.memory_space<vmem>>, %arg2: memref<2x68x32xf32, #tpu.memory_space<vmem>>, %arg3: memref<3x160x80xf32, #tpu.memory_space<vmem>>, %arg4: memref<2x34x16xf32, #tpu.memory_space<vmem>>, %arg5: memref<32x36xf32, #tpu.memory_space<vmem>>, %arg6: memref<5x200x80xf32, #tpu.memory_space<vmem>>, %arg7: memref<2x44x20xf32, #tpu.memory_space<vmem>>, %arg8: memref<32x48xf32, #tpu.memory_space<vmem>>, %arg9: memref<5x240x100xf32, #tpu.memory_space<vmem>>, %arg10: memref<2x28x12xf32, #tpu.memory_space<vmem>>, %arg11: memref<20x32xf32, #tpu.memory_space<vmem>>, %arg12: memref<8x10x80xf32, #tpu.memory_space<vmem>>, %arg13: memref<10x1xf32, #tpu.memory_space<vmem>>, %arg14: memref<6x84x120xf32, #tpu.memory_space<vmem>>, %arg15: memref<84x1xf32, #tpu.memory_space<vmem>>, %arg16: memref<10x84xf32, #tpu.memory_space<vmem>>, %arg17: memref<10x1xf32, #tpu.memory_space<vmem>>, %arg18: memref<2x10xf32, #tpu.memory_space<vmem>>, %arg19: memref<2x10xf32, #tpu.memory_space<vmem>>) attributes {dimension_semantics = [], scalar_prefetch = 0 : i64, scratch_operands = 0 : i64, tpu.core_type = #tpu.core_type<tc>} {
    %c0 = arith.constant 0 : index
    %c0_0 = arith.constant 0 : index
    %0 = vector.load %arg0[%c0, %c0_0] : memref<36x72xf32, #tpu.memory_space<vmem>>, vector<36x72xf32>
    %c0_1 = arith.constant 0 : index
    %c0_2 = arith.constant 0 : index
    %c0_3 = arith.constant 0 : index
    %1 = vector.load %arg1[%c0_1, %c0_2, %c0_3] : memref<5x160x36xf32, #tpu.memory_space<vmem>>, vector<1x160x36xf32>
    %2 = vector.shape_cast %1 : vector<1x160x36xf32> to vector<160x36xf32>
    %3 = vector.extract_strided_slice %0 {offsets = [0, 0], sizes = [36, 68], strides = [1, 1]} : vector<36x72xf32> to vector<36x68xf32>
    %cst = arith.constant dense<0.000000e+00> : vector<160x68xf32>
    %4 = tpu.matmul %2, %3, %cst {dimension_numbers = #tpu.dot_dimension_numbers<[1], [0], [0], [1], [0, 0, 1, 1], [], []>} : vector<160x36xf32>, vector<36x68xf32>, vector<160x68xf32> -> vector<160x68xf32>
    %c1 = arith.constant 1 : index
    %c0_4 = arith.constant 0 : index
    %c0_5 = arith.constant 0 : index
    %5 = vector.load %arg1[%c1, %c0_4, %c0_5] : memref<5x160x36xf32, #tpu.memory_space<vmem>>, vector<1x160x36xf32>
    %6 = vector.shape_cast %5 : vector<1x160x36xf32> to vector<160x36xf32>
    %7 = vector.extract_strided_slice %0 {offsets = [0, 1], sizes = [36, 68], strides = [1, 1]} : vector<36x72xf32> to vector<36x68xf32>
    %cst_6 = arith.constant dense<0.000000e+00> : vector<160x68xf32>
    %8 = tpu.matmul %6, %7, %cst_6 {dimension_numbers = #tpu.dot_dimension_numbers<[1], [0], [0], [1], [0, 0, 1, 1], [], []>} : vector<160x36xf32>, vector<36x68xf32>, vector<160x68xf32> -> vector<160x68xf32>
    %9 = arith.addf %4, %8 : vector<160x68xf32>
    %c2 = arith.constant 2 : index
    %c0_7 = arith.constant 0 : index
    %c0_8 = arith.constant 0 : index
    %10 = vector.load %arg1[%c2, %c0_7, %c0_8] : memref<5x160x36xf32, #tpu.memory_space<vmem>>, vector<1x160x36xf32>
    %11 = vector.shape_cast %10 : vector<1x160x36xf32> to vector<160x36xf32>
    %12 = vector.extract_strided_slice %0 {offsets = [0, 2], sizes = [36, 68], strides = [1, 1]} : vector<36x72xf32> to vector<36x68xf32>
    %cst_9 = arith.constant dense<0.000000e+00> : vector<160x68xf32>
    %13 = tpu.matmul %11, %12, %cst_9 {dimension_numbers = #tpu.dot_dimension_numbers<[1], [0], [0], [1], [0, 0, 1, 1], [], []>} : vector<160x36xf32>, vector<36x68xf32>, vector<160x68xf32> -> vector<160x68xf32>
    %14 = arith.addf %9, %13 : vector<160x68xf32>
    %c3 = arith.constant 3 : index
    %c0_10 = arith.constant 0 : index
    %c0_11 = arith.constant 0 : index
    %15 = vector.load %arg1[%c3, %c0_10, %c0_11] : memref<5x160x36xf32, #tpu.memory_space<vmem>>, vector<1x160x36xf32>
    %16 = vector.shape_cast %15 : vector<1x160x36xf32> to vector<160x36xf32>
    %17 = vector.extract_strided_slice %0 {offsets = [0, 3], sizes = [36, 68], strides = [1, 1]} : vector<36x72xf32> to vector<36x68xf32>
    %cst_12 = arith.constant dense<0.000000e+00> : vector<160x68xf32>
    %18 = tpu.matmul %16, %17, %cst_12 {dimension_numbers = #tpu.dot_dimension_numbers<[1], [0], [0], [1], [0, 0, 1, 1], [], []>} : vector<160x36xf32>, vector<36x68xf32>, vector<160x68xf32> -> vector<160x68xf32>
    %19 = arith.addf %14, %18 : vector<160x68xf32>
    %c4 = arith.constant 4 : index
    %c0_13 = arith.constant 0 : index
    %c0_14 = arith.constant 0 : index
    %20 = vector.load %arg1[%c4, %c0_13, %c0_14] : memref<5x160x36xf32, #tpu.memory_space<vmem>>, vector<1x160x36xf32>
    %21 = vector.shape_cast %20 : vector<1x160x36xf32> to vector<160x36xf32>
    %22 = vector.extract_strided_slice %0 {offsets = [0, 4], sizes = [36, 68], strides = [1, 1]} : vector<36x72xf32> to vector<36x68xf32>
    %cst_15 = arith.constant dense<0.000000e+00> : vector<160x68xf32>
    %23 = tpu.matmul %21, %22, %cst_15 {dimension_numbers = #tpu.dot_dimension_numbers<[1], [0], [0], [1], [0, 0, 1, 1], [], []>} : vector<160x36xf32>, vector<36x68xf32>, vector<160x68xf32> -> vector<160x68xf32>
    %24 = arith.addf %19, %23 : vector<160x68xf32>
    %25 = vector.extract_strided_slice %24 {offsets = [0, 0], sizes = [80, 68], strides = [1, 1]} : vector<160x68xf32> to vector<80x68xf32>
    %26 = vector.extract_strided_slice %24 {offsets = [80, 0], sizes = [80, 68], strides = [1, 1]} : vector<160x68xf32> to vector<80x68xf32>
    %27 = arith.maximumf %25, %26 : vector<80x68xf32>
    %c0_16 = arith.constant 0 : index
    %c0_17 = arith.constant 0 : index
    %c0_18 = arith.constant 0 : index
    %28 = vector.load %arg2[%c0_16, %c0_17, %c0_18] : memref<2x68x32xf32, #tpu.memory_space<vmem>>, vector<1x68x32xf32>
    %29 = vector.shape_cast %28 : vector<1x68x32xf32> to vector<68x32xf32>
    %cst_19 = arith.constant dense<0.000000e+00> : vector<80x32xf32>
    %30 = tpu.matmul %27, %29, %cst_19 {dimension_numbers = #tpu.dot_dimension_numbers<[1], [0], [0], [1], [0, 0, 1, 1], [], []>} : vector<80x68xf32>, vector<68x32xf32>, vector<80x32xf32> -> vector<80x32xf32>
    %c1_20 = arith.constant 1 : index
    %c0_21 = arith.constant 0 : index
    %c0_22 = arith.constant 0 : index
    %31 = vector.load %arg2[%c1_20, %c0_21, %c0_22] : memref<2x68x32xf32, #tpu.memory_space<vmem>>, vector<1x68x32xf32>
    %32 = vector.shape_cast %31 : vector<1x68x32xf32> to vector<68x32xf32>
    %cst_23 = arith.constant dense<0.000000e+00> : vector<80x32xf32>
    %33 = tpu.matmul %27, %32, %cst_23 {dimension_numbers = #tpu.dot_dimension_numbers<[1], [0], [0], [1], [0, 0, 1, 1], [], []>} : vector<80x68xf32>, vector<68x32xf32>, vector<80x32xf32> -> vector<80x32xf32>
    %34 = arith.maximumf %30, %33 : vector<80x32xf32>
    %cst_24 = arith.constant 0.000000e+00 : f32
    %35 = vector.broadcast %cst_24 : f32 to vector<80x32xf32>
    %36 = arith.maximumf %34, %35 : vector<80x32xf32>
    %c0_25 = arith.constant 0 : index
    %c0_26 = arith.constant 0 : index
    %37 = vector.load %arg5[%c0_25, %c0_26] : memref<32x36xf32, #tpu.memory_space<vmem>>, vector<32x36xf32>
    %cst_27 = arith.constant dense<0.000000e+00> : vector<80x36xf32>
    %38 = tpu.matmul %36, %37, %cst_27 {dimension_numbers = #tpu.dot_dimension_numbers<[1], [0], [0], [1], [0, 0, 1, 1], [], []>} : vector<80x32xf32>, vector<32x36xf32>, vector<80x36xf32> -> vector<80x36xf32>
    %c0_28 = arith.constant 0 : index
    %c0_29 = arith.constant 0 : index
    %c0_30 = arith.constant 0 : index
    %39 = vector.load %arg3[%c0_28, %c0_29, %c0_30] : memref<3x160x80xf32, #tpu.memory_space<vmem>>, vector<1x160x80xf32>
    %40 = vector.shape_cast %39 : vector<1x160x80xf32> to vector<160x80xf32>
    %41 = vector.extract_strided_slice %38 {offsets = [0, 0], sizes = [80, 34], strides = [1, 1]} : vector<80x36xf32> to vector<80x34xf32>
    %cst_31 = arith.constant dense<0.000000e+00> : vector<160x34xf32>
    %42 = tpu.matmul %40, %41, %cst_31 {dimension_numbers = #tpu.dot_dimension_numbers<[1], [0], [0], [1], [0, 0, 1, 1], [], []>} : vector<160x80xf32>, vector<80x34xf32>, vector<160x34xf32> -> vector<160x34xf32>
    %c1_32 = arith.constant 1 : index
    %c0_33 = arith.constant 0 : index
    %c0_34 = arith.constant 0 : index
    %43 = vector.load %arg3[%c1_32, %c0_33, %c0_34] : memref<3x160x80xf32, #tpu.memory_space<vmem>>, vector<1x160x80xf32>
    %44 = vector.shape_cast %43 : vector<1x160x80xf32> to vector<160x80xf32>
    %45 = vector.extract_strided_slice %38 {offsets = [0, 1], sizes = [80, 34], strides = [1, 1]} : vector<80x36xf32> to vector<80x34xf32>
    %cst_35 = arith.constant dense<0.000000e+00> : vector<160x34xf32>
    %46 = tpu.matmul %44, %45, %cst_35 {dimension_numbers = #tpu.dot_dimension_numbers<[1], [0], [0], [1], [0, 0, 1, 1], [], []>} : vector<160x80xf32>, vector<80x34xf32>, vector<160x34xf32> -> vector<160x34xf32>
    %47 = arith.addf %42, %46 : vector<160x34xf32>
    %c2_36 = arith.constant 2 : index
    %c0_37 = arith.constant 0 : index
    %c0_38 = arith.constant 0 : index
    %48 = vector.load %arg3[%c2_36, %c0_37, %c0_38] : memref<3x160x80xf32, #tpu.memory_space<vmem>>, vector<1x160x80xf32>
    %49 = vector.shape_cast %48 : vector<1x160x80xf32> to vector<160x80xf32>
    %50 = vector.extract_strided_slice %38 {offsets = [0, 2], sizes = [80, 34], strides = [1, 1]} : vector<80x36xf32> to vector<80x34xf32>
    %cst_39 = arith.constant dense<0.000000e+00> : vector<160x34xf32>
    %51 = tpu.matmul %49, %50, %cst_39 {dimension_numbers = #tpu.dot_dimension_numbers<[1], [0], [0], [1], [0, 0, 1, 1], [], []>} : vector<160x80xf32>, vector<80x34xf32>, vector<160x34xf32> -> vector<160x34xf32>
    %52 = arith.addf %47, %51 : vector<160x34xf32>
    %53 = vector.extract_strided_slice %52 {offsets = [0, 0], sizes = [80, 34], strides = [1, 1]} : vector<160x34xf32> to vector<80x34xf32>
    %54 = vector.extract_strided_slice %52 {offsets = [80, 0], sizes = [80, 34], strides = [1, 1]} : vector<160x34xf32> to vector<80x34xf32>
    %55 = arith.maximumf %53, %54 : vector<80x34xf32>
    %c0_40 = arith.constant 0 : index
    %c0_41 = arith.constant 0 : index
    %c0_42 = arith.constant 0 : index
    %56 = vector.load %arg4[%c0_40, %c0_41, %c0_42] : memref<2x34x16xf32, #tpu.memory_space<vmem>>, vector<1x34x16xf32>
    %57 = vector.shape_cast %56 : vector<1x34x16xf32> to vector<34x16xf32>
    %cst_43 = arith.constant dense<0.000000e+00> : vector<80x16xf32>
    %58 = tpu.matmul %55, %57, %cst_43 {dimension_numbers = #tpu.dot_dimension_numbers<[1], [0], [0], [1], [0, 0, 1, 1], [], []>} : vector<80x34xf32>, vector<34x16xf32>, vector<80x16xf32> -> vector<80x16xf32>
    %c1_44 = arith.constant 1 : index
    %c0_45 = arith.constant 0 : index
    %c0_46 = arith.constant 0 : index
    %59 = vector.load %arg4[%c1_44, %c0_45, %c0_46] : memref<2x34x16xf32, #tpu.memory_space<vmem>>, vector<1x34x16xf32>
    %60 = vector.shape_cast %59 : vector<1x34x16xf32> to vector<34x16xf32>
    %cst_47 = arith.constant dense<0.000000e+00> : vector<80x16xf32>
    %61 = tpu.matmul %55, %60, %cst_47 {dimension_numbers = #tpu.dot_dimension_numbers<[1], [0], [0], [1], [0, 0, 1, 1], [], []>} : vector<80x34xf32>, vector<34x16xf32>, vector<80x16xf32> -> vector<80x16xf32>
    %62 = arith.maximumf %58, %61 : vector<80x16xf32>
    %cst_48 = arith.constant 0.000000e+00 : f32
    %63 = vector.broadcast %cst_48 : f32 to vector<80x16xf32>
    %64 = arith.maximumf %62, %63 : vector<80x16xf32>
    %c0_49 = arith.constant 0 : index
    %c0_50 = arith.constant 0 : index
    %65 = vector.load %arg8[%c0_49, %c0_50] : memref<32x48xf32, #tpu.memory_space<vmem>>, vector<32x48xf32>
    %cst_51 = arith.constant dense<0.000000e+00> : vector<80x48xf32>
    %66 = tpu.matmul %36, %65, %cst_51 {dimension_numbers = #tpu.dot_dimension_numbers<[1], [0], [0], [1], [0, 0, 1, 1], [], []>} : vector<80x32xf32>, vector<32x48xf32>, vector<80x48xf32> -> vector<80x48xf32>
    %c0_52 = arith.constant 0 : index
    %c0_53 = arith.constant 0 : index
    %c0_54 = arith.constant 0 : index
    %67 = vector.load %arg6[%c0_52, %c0_53, %c0_54] : memref<5x200x80xf32, #tpu.memory_space<vmem>>, vector<1x200x80xf32>
    %68 = vector.shape_cast %67 : vector<1x200x80xf32> to vector<200x80xf32>
    %69 = vector.extract_strided_slice %66 {offsets = [0, 0], sizes = [80, 44], strides = [1, 1]} : vector<80x48xf32> to vector<80x44xf32>
    %cst_55 = arith.constant dense<0.000000e+00> : vector<200x44xf32>
    %70 = tpu.matmul %68, %69, %cst_55 {dimension_numbers = #tpu.dot_dimension_numbers<[1], [0], [0], [1], [0, 0, 1, 1], [], []>} : vector<200x80xf32>, vector<80x44xf32>, vector<200x44xf32> -> vector<200x44xf32>
    %c1_56 = arith.constant 1 : index
    %c0_57 = arith.constant 0 : index
    %c0_58 = arith.constant 0 : index
    %71 = vector.load %arg6[%c1_56, %c0_57, %c0_58] : memref<5x200x80xf32, #tpu.memory_space<vmem>>, vector<1x200x80xf32>
    %72 = vector.shape_cast %71 : vector<1x200x80xf32> to vector<200x80xf32>
    %73 = vector.extract_strided_slice %66 {offsets = [0, 1], sizes = [80, 44], strides = [1, 1]} : vector<80x48xf32> to vector<80x44xf32>
    %cst_59 = arith.constant dense<0.000000e+00> : vector<200x44xf32>
    %74 = tpu.matmul %72, %73, %cst_59 {dimension_numbers = #tpu.dot_dimension_numbers<[1], [0], [0], [1], [0, 0, 1, 1], [], []>} : vector<200x80xf32>, vector<80x44xf32>, vector<200x44xf32> -> vector<200x44xf32>
    %75 = arith.addf %70, %74 : vector<200x44xf32>
    %c2_60 = arith.constant 2 : index
    %c0_61 = arith.constant 0 : index
    %c0_62 = arith.constant 0 : index
    %76 = vector.load %arg6[%c2_60, %c0_61, %c0_62] : memref<5x200x80xf32, #tpu.memory_space<vmem>>, vector<1x200x80xf32>
    %77 = vector.shape_cast %76 : vector<1x200x80xf32> to vector<200x80xf32>
    %78 = vector.extract_strided_slice %66 {offsets = [0, 2], sizes = [80, 44], strides = [1, 1]} : vector<80x48xf32> to vector<80x44xf32>
    %cst_63 = arith.constant dense<0.000000e+00> : vector<200x44xf32>
    %79 = tpu.matmul %77, %78, %cst_63 {dimension_numbers = #tpu.dot_dimension_numbers<[1], [0], [0], [1], [0, 0, 1, 1], [], []>} : vector<200x80xf32>, vector<80x44xf32>, vector<200x44xf32> -> vector<200x44xf32>
    %80 = arith.addf %75, %79 : vector<200x44xf32>
    %c3_64 = arith.constant 3 : index
    %c0_65 = arith.constant 0 : index
    %c0_66 = arith.constant 0 : index
    %81 = vector.load %arg6[%c3_64, %c0_65, %c0_66] : memref<5x200x80xf32, #tpu.memory_space<vmem>>, vector<1x200x80xf32>
    %82 = vector.shape_cast %81 : vector<1x200x80xf32> to vector<200x80xf32>
    %83 = vector.extract_strided_slice %66 {offsets = [0, 3], sizes = [80, 44], strides = [1, 1]} : vector<80x48xf32> to vector<80x44xf32>
    %cst_67 = arith.constant dense<0.000000e+00> : vector<200x44xf32>
    %84 = tpu.matmul %82, %83, %cst_67 {dimension_numbers = #tpu.dot_dimension_numbers<[1], [0], [0], [1], [0, 0, 1, 1], [], []>} : vector<200x80xf32>, vector<80x44xf32>, vector<200x44xf32> -> vector<200x44xf32>
    %85 = arith.addf %80, %84 : vector<200x44xf32>
    %c4_68 = arith.constant 4 : index
    %c0_69 = arith.constant 0 : index
    %c0_70 = arith.constant 0 : index
    %86 = vector.load %arg6[%c4_68, %c0_69, %c0_70] : memref<5x200x80xf32, #tpu.memory_space<vmem>>, vector<1x200x80xf32>
    %87 = vector.shape_cast %86 : vector<1x200x80xf32> to vector<200x80xf32>
    %88 = vector.extract_strided_slice %66 {offsets = [0, 4], sizes = [80, 44], strides = [1, 1]} : vector<80x48xf32> to vector<80x44xf32>
    %cst_71 = arith.constant dense<0.000000e+00> : vector<200x44xf32>
    %89 = tpu.matmul %87, %88, %cst_71 {dimension_numbers = #tpu.dot_dimension_numbers<[1], [0], [0], [1], [0, 0, 1, 1], [], []>} : vector<200x80xf32>, vector<80x44xf32>, vector<200x44xf32> -> vector<200x44xf32>
    %90 = arith.addf %85, %89 : vector<200x44xf32>
    %91 = vector.extract_strided_slice %90 {offsets = [0, 0], sizes = [100, 44], strides = [1, 1]} : vector<200x44xf32> to vector<100x44xf32>
    %92 = vector.extract_strided_slice %90 {offsets = [100, 0], sizes = [100, 44], strides = [1, 1]} : vector<200x44xf32> to vector<100x44xf32>
    %93 = arith.maximumf %91, %92 : vector<100x44xf32>
    %c0_72 = arith.constant 0 : index
    %c0_73 = arith.constant 0 : index
    %c0_74 = arith.constant 0 : index
    %94 = vector.load %arg7[%c0_72, %c0_73, %c0_74] : memref<2x44x20xf32, #tpu.memory_space<vmem>>, vector<1x44x20xf32>
    %95 = vector.shape_cast %94 : vector<1x44x20xf32> to vector<44x20xf32>
    %cst_75 = arith.constant dense<0.000000e+00> : vector<100x20xf32>
    %96 = tpu.matmul %93, %95, %cst_75 {dimension_numbers = #tpu.dot_dimension_numbers<[1], [0], [0], [1], [0, 0, 1, 1], [], []>} : vector<100x44xf32>, vector<44x20xf32>, vector<100x20xf32> -> vector<100x20xf32>
    %c1_76 = arith.constant 1 : index
    %c0_77 = arith.constant 0 : index
    %c0_78 = arith.constant 0 : index
    %97 = vector.load %arg7[%c1_76, %c0_77, %c0_78] : memref<2x44x20xf32, #tpu.memory_space<vmem>>, vector<1x44x20xf32>
    %98 = vector.shape_cast %97 : vector<1x44x20xf32> to vector<44x20xf32>
    %cst_79 = arith.constant dense<0.000000e+00> : vector<100x20xf32>
    %99 = tpu.matmul %93, %98, %cst_79 {dimension_numbers = #tpu.dot_dimension_numbers<[1], [0], [0], [1], [0, 0, 1, 1], [], []>} : vector<100x44xf32>, vector<44x20xf32>, vector<100x20xf32> -> vector<100x20xf32>
    %100 = arith.maximumf %96, %99 : vector<100x20xf32>
    %cst_80 = arith.constant 0.000000e+00 : f32
    %101 = vector.broadcast %cst_80 : f32 to vector<100x20xf32>
    %102 = arith.maximumf %100, %101 : vector<100x20xf32>
    %c0_81 = arith.constant 0 : index
    %c0_82 = arith.constant 0 : index
    %103 = vector.load %arg11[%c0_81, %c0_82] : memref<20x32xf32, #tpu.memory_space<vmem>>, vector<20x32xf32>
    %cst_83 = arith.constant dense<0.000000e+00> : vector<100x32xf32>
    %104 = tpu.matmul %102, %103, %cst_83 {dimension_numbers = #tpu.dot_dimension_numbers<[1], [0], [0], [1], [0, 0, 1, 1], [], []>} : vector<100x20xf32>, vector<20x32xf32>, vector<100x32xf32> -> vector<100x32xf32>
    %c0_84 = arith.constant 0 : index
    %c0_85 = arith.constant 0 : index
    %c0_86 = arith.constant 0 : index
    %105 = vector.load %arg9[%c0_84, %c0_85, %c0_86] : memref<5x240x100xf32, #tpu.memory_space<vmem>>, vector<1x240x100xf32>
    %106 = vector.shape_cast %105 : vector<1x240x100xf32> to vector<240x100xf32>
    %107 = vector.extract_strided_slice %104 {offsets = [0, 0], sizes = [100, 28], strides = [1, 1]} : vector<100x32xf32> to vector<100x28xf32>
    %cst_87 = arith.constant dense<0.000000e+00> : vector<240x28xf32>
    %108 = tpu.matmul %106, %107, %cst_87 {dimension_numbers = #tpu.dot_dimension_numbers<[1], [0], [0], [1], [0, 0, 1, 1], [], []>} : vector<240x100xf32>, vector<100x28xf32>, vector<240x28xf32> -> vector<240x28xf32>
    %c1_88 = arith.constant 1 : index
    %c0_89 = arith.constant 0 : index
    %c0_90 = arith.constant 0 : index
    %109 = vector.load %arg9[%c1_88, %c0_89, %c0_90] : memref<5x240x100xf32, #tpu.memory_space<vmem>>, vector<1x240x100xf32>
    %110 = vector.shape_cast %109 : vector<1x240x100xf32> to vector<240x100xf32>
    %111 = vector.extract_strided_slice %104 {offsets = [0, 1], sizes = [100, 28], strides = [1, 1]} : vector<100x32xf32> to vector<100x28xf32>
    %cst_91 = arith.constant dense<0.000000e+00> : vector<240x28xf32>
    %112 = tpu.matmul %110, %111, %cst_91 {dimension_numbers = #tpu.dot_dimension_numbers<[1], [0], [0], [1], [0, 0, 1, 1], [], []>} : vector<240x100xf32>, vector<100x28xf32>, vector<240x28xf32> -> vector<240x28xf32>
    %113 = arith.addf %108, %112 : vector<240x28xf32>
    %c2_92 = arith.constant 2 : index
    %c0_93 = arith.constant 0 : index
    %c0_94 = arith.constant 0 : index
    %114 = vector.load %arg9[%c2_92, %c0_93, %c0_94] : memref<5x240x100xf32, #tpu.memory_space<vmem>>, vector<1x240x100xf32>
    %115 = vector.shape_cast %114 : vector<1x240x100xf32> to vector<240x100xf32>
    %116 = vector.extract_strided_slice %104 {offsets = [0, 2], sizes = [100, 28], strides = [1, 1]} : vector<100x32xf32> to vector<100x28xf32>
    %cst_95 = arith.constant dense<0.000000e+00> : vector<240x28xf32>
    %117 = tpu.matmul %115, %116, %cst_95 {dimension_numbers = #tpu.dot_dimension_numbers<[1], [0], [0], [1], [0, 0, 1, 1], [], []>} : vector<240x100xf32>, vector<100x28xf32>, vector<240x28xf32> -> vector<240x28xf32>
    %118 = arith.addf %113, %117 : vector<240x28xf32>
    %c3_96 = arith.constant 3 : index
    %c0_97 = arith.constant 0 : index
    %c0_98 = arith.constant 0 : index
    %119 = vector.load %arg9[%c3_96, %c0_97, %c0_98] : memref<5x240x100xf32, #tpu.memory_space<vmem>>, vector<1x240x100xf32>
    %120 = vector.shape_cast %119 : vector<1x240x100xf32> to vector<240x100xf32>
    %121 = vector.extract_strided_slice %104 {offsets = [0, 3], sizes = [100, 28], strides = [1, 1]} : vector<100x32xf32> to vector<100x28xf32>
    %cst_99 = arith.constant dense<0.000000e+00> : vector<240x28xf32>
    %122 = tpu.matmul %120, %121, %cst_99 {dimension_numbers = #tpu.dot_dimension_numbers<[1], [0], [0], [1], [0, 0, 1, 1], [], []>} : vector<240x100xf32>, vector<100x28xf32>, vector<240x28xf32> -> vector<240x28xf32>
    %123 = arith.addf %118, %122 : vector<240x28xf32>
    %c4_100 = arith.constant 4 : index
    %c0_101 = arith.constant 0 : index
    %c0_102 = arith.constant 0 : index
    %124 = vector.load %arg9[%c4_100, %c0_101, %c0_102] : memref<5x240x100xf32, #tpu.memory_space<vmem>>, vector<1x240x100xf32>
    %125 = vector.shape_cast %124 : vector<1x240x100xf32> to vector<240x100xf32>
    %126 = vector.extract_strided_slice %104 {offsets = [0, 4], sizes = [100, 28], strides = [1, 1]} : vector<100x32xf32> to vector<100x28xf32>
    %cst_103 = arith.constant dense<0.000000e+00> : vector<240x28xf32>
    %127 = tpu.matmul %125, %126, %cst_103 {dimension_numbers = #tpu.dot_dimension_numbers<[1], [0], [0], [1], [0, 0, 1, 1], [], []>} : vector<240x100xf32>, vector<100x28xf32>, vector<240x28xf32> -> vector<240x28xf32>
    %128 = arith.addf %123, %127 : vector<240x28xf32>
    %129 = vector.extract_strided_slice %128 {offsets = [0, 0], sizes = [120, 28], strides = [1, 1]} : vector<240x28xf32> to vector<120x28xf32>
    %130 = vector.extract_strided_slice %128 {offsets = [120, 0], sizes = [120, 28], strides = [1, 1]} : vector<240x28xf32> to vector<120x28xf32>
    %131 = arith.maximumf %129, %130 : vector<120x28xf32>
    %c0_104 = arith.constant 0 : index
    %c0_105 = arith.constant 0 : index
    %c0_106 = arith.constant 0 : index
    %132 = vector.load %arg10[%c0_104, %c0_105, %c0_106] : memref<2x28x12xf32, #tpu.memory_space<vmem>>, vector<1x28x12xf32>
    %133 = vector.shape_cast %132 : vector<1x28x12xf32> to vector<28x12xf32>
    %cst_107 = arith.constant dense<0.000000e+00> : vector<120x12xf32>
    %134 = tpu.matmul %131, %133, %cst_107 {dimension_numbers = #tpu.dot_dimension_numbers<[1], [0], [0], [1], [0, 0, 1, 1], [], []>} : vector<120x28xf32>, vector<28x12xf32>, vector<120x12xf32> -> vector<120x12xf32>
    %c1_108 = arith.constant 1 : index
    %c0_109 = arith.constant 0 : index
    %c0_110 = arith.constant 0 : index
    %135 = vector.load %arg10[%c1_108, %c0_109, %c0_110] : memref<2x28x12xf32, #tpu.memory_space<vmem>>, vector<1x28x12xf32>
    %136 = vector.shape_cast %135 : vector<1x28x12xf32> to vector<28x12xf32>
    %cst_111 = arith.constant dense<0.000000e+00> : vector<120x12xf32>
    %137 = tpu.matmul %131, %136, %cst_111 {dimension_numbers = #tpu.dot_dimension_numbers<[1], [0], [0], [1], [0, 0, 1, 1], [], []>} : vector<120x28xf32>, vector<28x12xf32>, vector<120x12xf32> -> vector<120x12xf32>
    %138 = arith.maximumf %134, %137 : vector<120x12xf32>
    %cst_112 = arith.constant 0.000000e+00 : f32
    %139 = vector.broadcast %cst_112 : f32 to vector<120x12xf32>
    %140 = arith.maximumf %138, %139 : vector<120x12xf32>
    %c0_113 = arith.constant 0 : index
    %c0_114 = arith.constant 0 : index
    %141 = vector.load %arg13[%c0_113, %c0_114] : memref<10x1xf32, #tpu.memory_space<vmem>>, vector<10x1xf32>
    %c0_115 = arith.constant 0 : index
    %c0_116 = arith.constant 0 : index
    %142 = vector.load %arg15[%c0_115, %c0_116] : memref<84x1xf32, #tpu.memory_space<vmem>>, vector<84x1xf32>
    %c0_117 = arith.constant 0 : index
    %c0_118 = arith.constant 0 : index
    %143 = vector.load %arg16[%c0_117, %c0_118] : memref<10x84xf32, #tpu.memory_space<vmem>>, vector<10x84xf32>
    %c0_119 = arith.constant 0 : index
    %c0_120 = arith.constant 0 : index
    %144 = vector.load %arg17[%c0_119, %c0_120] : memref<10x1xf32, #tpu.memory_space<vmem>>, vector<10x1xf32>
    %cst_121 = arith.constant 0.000000e+00 : f32
    %145 = vector.broadcast %cst_121 : f32 to vector<10x2xf32>
    %cst_122 = arith.constant 0.000000e+00 : f32
    %146 = vector.broadcast %cst_122 : f32 to vector<10x2xf32>
    %147 = tpu.iota {dimensions = array<i32: 1>} : vector<1x2xi32>
    %148 = vector.extract_strided_slice %64 {offsets = [0, 0], sizes = [80, 8], strides = [1, 1]} : vector<80x16xf32> to vector<80x8xf32>
    %c0_123 = arith.constant 0 : index
    %c0_124 = arith.constant 0 : index
    %c0_125 = arith.constant 0 : index
    %149 = vector.load %arg12[%c0_123, %c0_124, %c0_125] : memref<8x10x80xf32, #tpu.memory_space<vmem>>, vector<1x10x80xf32>
    %150 = vector.shape_cast %149 : vector<1x10x80xf32> to vector<10x80xf32>
    %151 = vector.extract_strided_slice %148 {offsets = [0, 0], sizes = [80, 1], strides = [1, 1]} : vector<80x8xf32> to vector<80x1xf32>
    %cst_126 = arith.constant dense<0.000000e+00> : vector<10x1xf32>
    %152 = tpu.matmul %150, %151, %cst_126 {dimension_numbers = #tpu.dot_dimension_numbers<[1], [0], [0], [1], [0, 0, 1, 1], [], []>} : vector<10x80xf32>, vector<80x1xf32>, vector<10x1xf32> -> vector<10x1xf32>
    %153 = arith.addf %141, %152 : vector<10x1xf32>
    %c1_127 = arith.constant 1 : index
    %c0_128 = arith.constant 0 : index
    %c0_129 = arith.constant 0 : index
    %154 = vector.load %arg12[%c1_127, %c0_128, %c0_129] : memref<8x10x80xf32, #tpu.memory_space<vmem>>, vector<1x10x80xf32>
    %155 = vector.shape_cast %154 : vector<1x10x80xf32> to vector<10x80xf32>
    %156 = vector.extract_strided_slice %148 {offsets = [0, 1], sizes = [80, 1], strides = [1, 1]} : vector<80x8xf32> to vector<80x1xf32>
    %cst_130 = arith.constant dense<0.000000e+00> : vector<10x1xf32>
    %157 = tpu.matmul %155, %156, %cst_130 {dimension_numbers = #tpu.dot_dimension_numbers<[1], [0], [0], [1], [0, 0, 1, 1], [], []>} : vector<10x80xf32>, vector<80x1xf32>, vector<10x1xf32> -> vector<10x1xf32>
    %158 = arith.addf %153, %157 : vector<10x1xf32>
    %c2_131 = arith.constant 2 : index
    %c0_132 = arith.constant 0 : index
    %c0_133 = arith.constant 0 : index
    %159 = vector.load %arg12[%c2_131, %c0_132, %c0_133] : memref<8x10x80xf32, #tpu.memory_space<vmem>>, vector<1x10x80xf32>
    %160 = vector.shape_cast %159 : vector<1x10x80xf32> to vector<10x80xf32>
    %161 = vector.extract_strided_slice %148 {offsets = [0, 2], sizes = [80, 1], strides = [1, 1]} : vector<80x8xf32> to vector<80x1xf32>
    %cst_134 = arith.constant dense<0.000000e+00> : vector<10x1xf32>
    %162 = tpu.matmul %160, %161, %cst_134 {dimension_numbers = #tpu.dot_dimension_numbers<[1], [0], [0], [1], [0, 0, 1, 1], [], []>} : vector<10x80xf32>, vector<80x1xf32>, vector<10x1xf32> -> vector<10x1xf32>
    %163 = arith.addf %158, %162 : vector<10x1xf32>
    %c3_135 = arith.constant 3 : index
    %c0_136 = arith.constant 0 : index
    %c0_137 = arith.constant 0 : index
    %164 = vector.load %arg12[%c3_135, %c0_136, %c0_137] : memref<8x10x80xf32, #tpu.memory_space<vmem>>, vector<1x10x80xf32>
    %165 = vector.shape_cast %164 : vector<1x10x80xf32> to vector<10x80xf32>
    %166 = vector.extract_strided_slice %148 {offsets = [0, 3], sizes = [80, 1], strides = [1, 1]} : vector<80x8xf32> to vector<80x1xf32>
    %cst_138 = arith.constant dense<0.000000e+00> : vector<10x1xf32>
    %167 = tpu.matmul %165, %166, %cst_138 {dimension_numbers = #tpu.dot_dimension_numbers<[1], [0], [0], [1], [0, 0, 1, 1], [], []>} : vector<10x80xf32>, vector<80x1xf32>, vector<10x1xf32> -> vector<10x1xf32>
    %168 = arith.addf %163, %167 : vector<10x1xf32>
    %c4_139 = arith.constant 4 : index
    %c0_140 = arith.constant 0 : index
    %c0_141 = arith.constant 0 : index
    %169 = vector.load %arg12[%c4_139, %c0_140, %c0_141] : memref<8x10x80xf32, #tpu.memory_space<vmem>>, vector<1x10x80xf32>
    %170 = vector.shape_cast %169 : vector<1x10x80xf32> to vector<10x80xf32>
    %171 = vector.extract_strided_slice %148 {offsets = [0, 4], sizes = [80, 1], strides = [1, 1]} : vector<80x8xf32> to vector<80x1xf32>
    %cst_142 = arith.constant dense<0.000000e+00> : vector<10x1xf32>
    %172 = tpu.matmul %170, %171, %cst_142 {dimension_numbers = #tpu.dot_dimension_numbers<[1], [0], [0], [1], [0, 0, 1, 1], [], []>} : vector<10x80xf32>, vector<80x1xf32>, vector<10x1xf32> -> vector<10x1xf32>
    %173 = arith.addf %168, %172 : vector<10x1xf32>
    %c5 = arith.constant 5 : index
    %c0_143 = arith.constant 0 : index
    %c0_144 = arith.constant 0 : index
    %174 = vector.load %arg12[%c5, %c0_143, %c0_144] : memref<8x10x80xf32, #tpu.memory_space<vmem>>, vector<1x10x80xf32>
    %175 = vector.shape_cast %174 : vector<1x10x80xf32> to vector<10x80xf32>
    %176 = vector.extract_strided_slice %148 {offsets = [0, 5], sizes = [80, 1], strides = [1, 1]} : vector<80x8xf32> to vector<80x1xf32>
    %cst_145 = arith.constant dense<0.000000e+00> : vector<10x1xf32>
    %177 = tpu.matmul %175, %176, %cst_145 {dimension_numbers = #tpu.dot_dimension_numbers<[1], [0], [0], [1], [0, 0, 1, 1], [], []>} : vector<10x80xf32>, vector<80x1xf32>, vector<10x1xf32> -> vector<10x1xf32>
    %178 = arith.addf %173, %177 : vector<10x1xf32>
    %c6 = arith.constant 6 : index
    %c0_146 = arith.constant 0 : index
    %c0_147 = arith.constant 0 : index
    %179 = vector.load %arg12[%c6, %c0_146, %c0_147] : memref<8x10x80xf32, #tpu.memory_space<vmem>>, vector<1x10x80xf32>
    %180 = vector.shape_cast %179 : vector<1x10x80xf32> to vector<10x80xf32>
    %181 = vector.extract_strided_slice %148 {offsets = [0, 6], sizes = [80, 1], strides = [1, 1]} : vector<80x8xf32> to vector<80x1xf32>
    %cst_148 = arith.constant dense<0.000000e+00> : vector<10x1xf32>
    %182 = tpu.matmul %180, %181, %cst_148 {dimension_numbers = #tpu.dot_dimension_numbers<[1], [0], [0], [1], [0, 0, 1, 1], [], []>} : vector<10x80xf32>, vector<80x1xf32>, vector<10x1xf32> -> vector<10x1xf32>
    %183 = arith.addf %178, %182 : vector<10x1xf32>
    %c7 = arith.constant 7 : index
    %c0_149 = arith.constant 0 : index
    %c0_150 = arith.constant 0 : index
    %184 = vector.load %arg12[%c7, %c0_149, %c0_150] : memref<8x10x80xf32, #tpu.memory_space<vmem>>, vector<1x10x80xf32>
    %185 = vector.shape_cast %184 : vector<1x10x80xf32> to vector<10x80xf32>
    %186 = vector.extract_strided_slice %148 {offsets = [0, 7], sizes = [80, 1], strides = [1, 1]} : vector<80x8xf32> to vector<80x1xf32>
    %cst_151 = arith.constant dense<0.000000e+00> : vector<10x1xf32>
    %187 = tpu.matmul %185, %186, %cst_151 {dimension_numbers = #tpu.dot_dimension_numbers<[1], [0], [0], [1], [0, 0, 1, 1], [], []>} : vector<10x80xf32>, vector<80x1xf32>, vector<10x1xf32> -> vector<10x1xf32>
    %188 = arith.addf %183, %187 : vector<10x1xf32>
    %189 = vector.extract_strided_slice %140 {offsets = [0, 0], sizes = [120, 6], strides = [1, 1]} : vector<120x12xf32> to vector<120x6xf32>
    %c0_152 = arith.constant 0 : index
    %c0_153 = arith.constant 0 : index
    %c0_154 = arith.constant 0 : index
    %190 = vector.load %arg14[%c0_152, %c0_153, %c0_154] : memref<6x84x120xf32, #tpu.memory_space<vmem>>, vector<1x84x120xf32>
    %191 = vector.shape_cast %190 : vector<1x84x120xf32> to vector<84x120xf32>
    %192 = vector.extract_strided_slice %189 {offsets = [0, 0], sizes = [120, 1], strides = [1, 1]} : vector<120x6xf32> to vector<120x1xf32>
    %cst_155 = arith.constant dense<0.000000e+00> : vector<84x1xf32>
    %193 = tpu.matmul %191, %192, %cst_155 {dimension_numbers = #tpu.dot_dimension_numbers<[1], [0], [0], [1], [0, 0, 1, 1], [], []>} : vector<84x120xf32>, vector<120x1xf32>, vector<84x1xf32> -> vector<84x1xf32>
    %194 = arith.addf %142, %193 : vector<84x1xf32>
    %c1_156 = arith.constant 1 : index
    %c0_157 = arith.constant 0 : index
    %c0_158 = arith.constant 0 : index
    %195 = vector.load %arg14[%c1_156, %c0_157, %c0_158] : memref<6x84x120xf32, #tpu.memory_space<vmem>>, vector<1x84x120xf32>
    %196 = vector.shape_cast %195 : vector<1x84x120xf32> to vector<84x120xf32>
    %197 = vector.extract_strided_slice %189 {offsets = [0, 1], sizes = [120, 1], strides = [1, 1]} : vector<120x6xf32> to vector<120x1xf32>
    %cst_159 = arith.constant dense<0.000000e+00> : vector<84x1xf32>
    %198 = tpu.matmul %196, %197, %cst_159 {dimension_numbers = #tpu.dot_dimension_numbers<[1], [0], [0], [1], [0, 0, 1, 1], [], []>} : vector<84x120xf32>, vector<120x1xf32>, vector<84x1xf32> -> vector<84x1xf32>
    %199 = arith.addf %194, %198 : vector<84x1xf32>
    %c2_160 = arith.constant 2 : index
    %c0_161 = arith.constant 0 : index
    %c0_162 = arith.constant 0 : index
    %200 = vector.load %arg14[%c2_160, %c0_161, %c0_162] : memref<6x84x120xf32, #tpu.memory_space<vmem>>, vector<1x84x120xf32>
    %201 = vector.shape_cast %200 : vector<1x84x120xf32> to vector<84x120xf32>
    %202 = vector.extract_strided_slice %189 {offsets = [0, 2], sizes = [120, 1], strides = [1, 1]} : vector<120x6xf32> to vector<120x1xf32>
    %cst_163 = arith.constant dense<0.000000e+00> : vector<84x1xf32>
    %203 = tpu.matmul %201, %202, %cst_163 {dimension_numbers = #tpu.dot_dimension_numbers<[1], [0], [0], [1], [0, 0, 1, 1], [], []>} : vector<84x120xf32>, vector<120x1xf32>, vector<84x1xf32> -> vector<84x1xf32>
    %204 = arith.addf %199, %203 : vector<84x1xf32>
    %c3_164 = arith.constant 3 : index
    %c0_165 = arith.constant 0 : index
    %c0_166 = arith.constant 0 : index
    %205 = vector.load %arg14[%c3_164, %c0_165, %c0_166] : memref<6x84x120xf32, #tpu.memory_space<vmem>>, vector<1x84x120xf32>
    %206 = vector.shape_cast %205 : vector<1x84x120xf32> to vector<84x120xf32>
    %207 = vector.extract_strided_slice %189 {offsets = [0, 3], sizes = [120, 1], strides = [1, 1]} : vector<120x6xf32> to vector<120x1xf32>
    %cst_167 = arith.constant dense<0.000000e+00> : vector<84x1xf32>
    %208 = tpu.matmul %206, %207, %cst_167 {dimension_numbers = #tpu.dot_dimension_numbers<[1], [0], [0], [1], [0, 0, 1, 1], [], []>} : vector<84x120xf32>, vector<120x1xf32>, vector<84x1xf32> -> vector<84x1xf32>
    %209 = arith.addf %204, %208 : vector<84x1xf32>
    %c4_168 = arith.constant 4 : index
    %c0_169 = arith.constant 0 : index
    %c0_170 = arith.constant 0 : index
    %210 = vector.load %arg14[%c4_168, %c0_169, %c0_170] : memref<6x84x120xf32, #tpu.memory_space<vmem>>, vector<1x84x120xf32>
    %211 = vector.shape_cast %210 : vector<1x84x120xf32> to vector<84x120xf32>
    %212 = vector.extract_strided_slice %189 {offsets = [0, 4], sizes = [120, 1], strides = [1, 1]} : vector<120x6xf32> to vector<120x1xf32>
    %cst_171 = arith.constant dense<0.000000e+00> : vector<84x1xf32>
    %213 = tpu.matmul %211, %212, %cst_171 {dimension_numbers = #tpu.dot_dimension_numbers<[1], [0], [0], [1], [0, 0, 1, 1], [], []>} : vector<84x120xf32>, vector<120x1xf32>, vector<84x1xf32> -> vector<84x1xf32>
    %214 = arith.addf %209, %213 : vector<84x1xf32>
    %c5_172 = arith.constant 5 : index
    %c0_173 = arith.constant 0 : index
    %c0_174 = arith.constant 0 : index
    %215 = vector.load %arg14[%c5_172, %c0_173, %c0_174] : memref<6x84x120xf32, #tpu.memory_space<vmem>>, vector<1x84x120xf32>
    %216 = vector.shape_cast %215 : vector<1x84x120xf32> to vector<84x120xf32>
    %217 = vector.extract_strided_slice %189 {offsets = [0, 5], sizes = [120, 1], strides = [1, 1]} : vector<120x6xf32> to vector<120x1xf32>
    %cst_175 = arith.constant dense<0.000000e+00> : vector<84x1xf32>
    %218 = tpu.matmul %216, %217, %cst_175 {dimension_numbers = #tpu.dot_dimension_numbers<[1], [0], [0], [1], [0, 0, 1, 1], [], []>} : vector<84x120xf32>, vector<120x1xf32>, vector<84x1xf32> -> vector<84x1xf32>
    %219 = arith.addf %214, %218 : vector<84x1xf32>
    %cst_176 = arith.constant dense<0.000000e+00> : vector<10x1xf32>
    %220 = tpu.matmul %143, %219, %cst_176 {dimension_numbers = #tpu.dot_dimension_numbers<[1], [0], [0], [1], [0, 0, 1, 1], [], []>} : vector<10x84xf32>, vector<84x1xf32>, vector<10x1xf32> -> vector<10x1xf32>
    %221 = arith.addf %220, %144 : vector<10x1xf32>
    %c0_i32 = arith.constant 0 : i32
    %222 = vector.broadcast %c0_i32 : i32 to vector<1x2xi32>
    %223 = arith.cmpi eq, %147, %222 : vector<1x2xi32>
    %224 = vector.shape_cast %223 : vector<1x2xi1> to vector<1x2xi1>
    %225 = vector.broadcast %224 : vector<1x2xi1> to vector<10x2xi1>
    %226 = vector.shape_cast %188 : vector<10x1xf32> to vector<10x1xf32>
    %227 = vector.broadcast %226 : vector<10x1xf32> to vector<10x2xf32>
    %228 = arith.select %225, %227, %145 : vector<10x2xi1>, vector<10x2xf32>
    %c0_i32_177 = arith.constant 0 : i32
    %229 = vector.broadcast %c0_i32_177 : i32 to vector<1x2xi32>
    %230 = arith.cmpi eq, %147, %229 : vector<1x2xi32>
    %231 = vector.shape_cast %230 : vector<1x2xi1> to vector<1x2xi1>
    %232 = vector.broadcast %231 : vector<1x2xi1> to vector<10x2xi1>
    %233 = vector.shape_cast %221 : vector<10x1xf32> to vector<10x1xf32>
    %234 = vector.broadcast %233 : vector<10x1xf32> to vector<10x2xf32>
    %235 = arith.select %232, %234, %146 : vector<10x2xi1>, vector<10x2xf32>
    %236 = vector.extract_strided_slice %64 {offsets = [0, 8], sizes = [80, 8], strides = [1, 1]} : vector<80x16xf32> to vector<80x8xf32>
    %c0_178 = arith.constant 0 : index
    %c0_179 = arith.constant 0 : index
    %c0_180 = arith.constant 0 : index
    %237 = vector.load %arg12[%c0_178, %c0_179, %c0_180] : memref<8x10x80xf32, #tpu.memory_space<vmem>>, vector<1x10x80xf32>
    %238 = vector.shape_cast %237 : vector<1x10x80xf32> to vector<10x80xf32>
    %239 = vector.extract_strided_slice %236 {offsets = [0, 0], sizes = [80, 1], strides = [1, 1]} : vector<80x8xf32> to vector<80x1xf32>
    %cst_181 = arith.constant dense<0.000000e+00> : vector<10x1xf32>
    %240 = tpu.matmul %238, %239, %cst_181 {dimension_numbers = #tpu.dot_dimension_numbers<[1], [0], [0], [1], [0, 0, 1, 1], [], []>} : vector<10x80xf32>, vector<80x1xf32>, vector<10x1xf32> -> vector<10x1xf32>
    %241 = arith.addf %141, %240 : vector<10x1xf32>
    %c1_182 = arith.constant 1 : index
    %c0_183 = arith.constant 0 : index
    %c0_184 = arith.constant 0 : index
    %242 = vector.load %arg12[%c1_182, %c0_183, %c0_184] : memref<8x10x80xf32, #tpu.memory_space<vmem>>, vector<1x10x80xf32>
    %243 = vector.shape_cast %242 : vector<1x10x80xf32> to vector<10x80xf32>
    %244 = vector.extract_strided_slice %236 {offsets = [0, 1], sizes = [80, 1], strides = [1, 1]} : vector<80x8xf32> to vector<80x1xf32>
    %cst_185 = arith.constant dense<0.000000e+00> : vector<10x1xf32>
    %245 = tpu.matmul %243, %244, %cst_185 {dimension_numbers = #tpu.dot_dimension_numbers<[1], [0], [0], [1], [0, 0, 1, 1], [], []>} : vector<10x80xf32>, vector<80x1xf32>, vector<10x1xf32> -> vector<10x1xf32>
    %246 = arith.addf %241, %245 : vector<10x1xf32>
    %c2_186 = arith.constant 2 : index
    %c0_187 = arith.constant 0 : index
    %c0_188 = arith.constant 0 : index
    %247 = vector.load %arg12[%c2_186, %c0_187, %c0_188] : memref<8x10x80xf32, #tpu.memory_space<vmem>>, vector<1x10x80xf32>
    %248 = vector.shape_cast %247 : vector<1x10x80xf32> to vector<10x80xf32>
    %249 = vector.extract_strided_slice %236 {offsets = [0, 2], sizes = [80, 1], strides = [1, 1]} : vector<80x8xf32> to vector<80x1xf32>
    %cst_189 = arith.constant dense<0.000000e+00> : vector<10x1xf32>
    %250 = tpu.matmul %248, %249, %cst_189 {dimension_numbers = #tpu.dot_dimension_numbers<[1], [0], [0], [1], [0, 0, 1, 1], [], []>} : vector<10x80xf32>, vector<80x1xf32>, vector<10x1xf32> -> vector<10x1xf32>
    %251 = arith.addf %246, %250 : vector<10x1xf32>
    %c3_190 = arith.constant 3 : index
    %c0_191 = arith.constant 0 : index
    %c0_192 = arith.constant 0 : index
    %252 = vector.load %arg12[%c3_190, %c0_191, %c0_192] : memref<8x10x80xf32, #tpu.memory_space<vmem>>, vector<1x10x80xf32>
    %253 = vector.shape_cast %252 : vector<1x10x80xf32> to vector<10x80xf32>
    %254 = vector.extract_strided_slice %236 {offsets = [0, 3], sizes = [80, 1], strides = [1, 1]} : vector<80x8xf32> to vector<80x1xf32>
    %cst_193 = arith.constant dense<0.000000e+00> : vector<10x1xf32>
    %255 = tpu.matmul %253, %254, %cst_193 {dimension_numbers = #tpu.dot_dimension_numbers<[1], [0], [0], [1], [0, 0, 1, 1], [], []>} : vector<10x80xf32>, vector<80x1xf32>, vector<10x1xf32> -> vector<10x1xf32>
    %256 = arith.addf %251, %255 : vector<10x1xf32>
    %c4_194 = arith.constant 4 : index
    %c0_195 = arith.constant 0 : index
    %c0_196 = arith.constant 0 : index
    %257 = vector.load %arg12[%c4_194, %c0_195, %c0_196] : memref<8x10x80xf32, #tpu.memory_space<vmem>>, vector<1x10x80xf32>
    %258 = vector.shape_cast %257 : vector<1x10x80xf32> to vector<10x80xf32>
    %259 = vector.extract_strided_slice %236 {offsets = [0, 4], sizes = [80, 1], strides = [1, 1]} : vector<80x8xf32> to vector<80x1xf32>
    %cst_197 = arith.constant dense<0.000000e+00> : vector<10x1xf32>
    %260 = tpu.matmul %258, %259, %cst_197 {dimension_numbers = #tpu.dot_dimension_numbers<[1], [0], [0], [1], [0, 0, 1, 1], [], []>} : vector<10x80xf32>, vector<80x1xf32>, vector<10x1xf32> -> vector<10x1xf32>
    %261 = arith.addf %256, %260 : vector<10x1xf32>
    %c5_198 = arith.constant 5 : index
    %c0_199 = arith.constant 0 : index
    %c0_200 = arith.constant 0 : index
    %262 = vector.load %arg12[%c5_198, %c0_199, %c0_200] : memref<8x10x80xf32, #tpu.memory_space<vmem>>, vector<1x10x80xf32>
    %263 = vector.shape_cast %262 : vector<1x10x80xf32> to vector<10x80xf32>
    %264 = vector.extract_strided_slice %236 {offsets = [0, 5], sizes = [80, 1], strides = [1, 1]} : vector<80x8xf32> to vector<80x1xf32>
    %cst_201 = arith.constant dense<0.000000e+00> : vector<10x1xf32>
    %265 = tpu.matmul %263, %264, %cst_201 {dimension_numbers = #tpu.dot_dimension_numbers<[1], [0], [0], [1], [0, 0, 1, 1], [], []>} : vector<10x80xf32>, vector<80x1xf32>, vector<10x1xf32> -> vector<10x1xf32>
    %266 = arith.addf %261, %265 : vector<10x1xf32>
    %c6_202 = arith.constant 6 : index
    %c0_203 = arith.constant 0 : index
    %c0_204 = arith.constant 0 : index
    %267 = vector.load %arg12[%c6_202, %c0_203, %c0_204] : memref<8x10x80xf32, #tpu.memory_space<vmem>>, vector<1x10x80xf32>
    %268 = vector.shape_cast %267 : vector<1x10x80xf32> to vector<10x80xf32>
    %269 = vector.extract_strided_slice %236 {offsets = [0, 6], sizes = [80, 1], strides = [1, 1]} : vector<80x8xf32> to vector<80x1xf32>
    %cst_205 = arith.constant dense<0.000000e+00> : vector<10x1xf32>
    %270 = tpu.matmul %268, %269, %cst_205 {dimension_numbers = #tpu.dot_dimension_numbers<[1], [0], [0], [1], [0, 0, 1, 1], [], []>} : vector<10x80xf32>, vector<80x1xf32>, vector<10x1xf32> -> vector<10x1xf32>
    %271 = arith.addf %266, %270 : vector<10x1xf32>
    %c7_206 = arith.constant 7 : index
    %c0_207 = arith.constant 0 : index
    %c0_208 = arith.constant 0 : index
    %272 = vector.load %arg12[%c7_206, %c0_207, %c0_208] : memref<8x10x80xf32, #tpu.memory_space<vmem>>, vector<1x10x80xf32>
    %273 = vector.shape_cast %272 : vector<1x10x80xf32> to vector<10x80xf32>
    %274 = vector.extract_strided_slice %236 {offsets = [0, 7], sizes = [80, 1], strides = [1, 1]} : vector<80x8xf32> to vector<80x1xf32>
    %cst_209 = arith.constant dense<0.000000e+00> : vector<10x1xf32>
    %275 = tpu.matmul %273, %274, %cst_209 {dimension_numbers = #tpu.dot_dimension_numbers<[1], [0], [0], [1], [0, 0, 1, 1], [], []>} : vector<10x80xf32>, vector<80x1xf32>, vector<10x1xf32> -> vector<10x1xf32>
    %276 = arith.addf %271, %275 : vector<10x1xf32>
    %277 = vector.extract_strided_slice %140 {offsets = [0, 6], sizes = [120, 6], strides = [1, 1]} : vector<120x12xf32> to vector<120x6xf32>
    %c0_210 = arith.constant 0 : index
    %c0_211 = arith.constant 0 : index
    %c0_212 = arith.constant 0 : index
    %278 = vector.load %arg14[%c0_210, %c0_211, %c0_212] : memref<6x84x120xf32, #tpu.memory_space<vmem>>, vector<1x84x120xf32>
    %279 = vector.shape_cast %278 : vector<1x84x120xf32> to vector<84x120xf32>
    %280 = vector.extract_strided_slice %277 {offsets = [0, 0], sizes = [120, 1], strides = [1, 1]} : vector<120x6xf32> to vector<120x1xf32>
    %cst_213 = arith.constant dense<0.000000e+00> : vector<84x1xf32>
    %281 = tpu.matmul %279, %280, %cst_213 {dimension_numbers = #tpu.dot_dimension_numbers<[1], [0], [0], [1], [0, 0, 1, 1], [], []>} : vector<84x120xf32>, vector<120x1xf32>, vector<84x1xf32> -> vector<84x1xf32>
    %282 = arith.addf %142, %281 : vector<84x1xf32>
    %c1_214 = arith.constant 1 : index
    %c0_215 = arith.constant 0 : index
    %c0_216 = arith.constant 0 : index
    %283 = vector.load %arg14[%c1_214, %c0_215, %c0_216] : memref<6x84x120xf32, #tpu.memory_space<vmem>>, vector<1x84x120xf32>
    %284 = vector.shape_cast %283 : vector<1x84x120xf32> to vector<84x120xf32>
    %285 = vector.extract_strided_slice %277 {offsets = [0, 1], sizes = [120, 1], strides = [1, 1]} : vector<120x6xf32> to vector<120x1xf32>
    %cst_217 = arith.constant dense<0.000000e+00> : vector<84x1xf32>
    %286 = tpu.matmul %284, %285, %cst_217 {dimension_numbers = #tpu.dot_dimension_numbers<[1], [0], [0], [1], [0, 0, 1, 1], [], []>} : vector<84x120xf32>, vector<120x1xf32>, vector<84x1xf32> -> vector<84x1xf32>
    %287 = arith.addf %282, %286 : vector<84x1xf32>
    %c2_218 = arith.constant 2 : index
    %c0_219 = arith.constant 0 : index
    %c0_220 = arith.constant 0 : index
    %288 = vector.load %arg14[%c2_218, %c0_219, %c0_220] : memref<6x84x120xf32, #tpu.memory_space<vmem>>, vector<1x84x120xf32>
    %289 = vector.shape_cast %288 : vector<1x84x120xf32> to vector<84x120xf32>
    %290 = vector.extract_strided_slice %277 {offsets = [0, 2], sizes = [120, 1], strides = [1, 1]} : vector<120x6xf32> to vector<120x1xf32>
    %cst_221 = arith.constant dense<0.000000e+00> : vector<84x1xf32>
    %291 = tpu.matmul %289, %290, %cst_221 {dimension_numbers = #tpu.dot_dimension_numbers<[1], [0], [0], [1], [0, 0, 1, 1], [], []>} : vector<84x120xf32>, vector<120x1xf32>, vector<84x1xf32> -> vector<84x1xf32>
    %292 = arith.addf %287, %291 : vector<84x1xf32>
    %c3_222 = arith.constant 3 : index
    %c0_223 = arith.constant 0 : index
    %c0_224 = arith.constant 0 : index
    %293 = vector.load %arg14[%c3_222, %c0_223, %c0_224] : memref<6x84x120xf32, #tpu.memory_space<vmem>>, vector<1x84x120xf32>
    %294 = vector.shape_cast %293 : vector<1x84x120xf32> to vector<84x120xf32>
    %295 = vector.extract_strided_slice %277 {offsets = [0, 3], sizes = [120, 1], strides = [1, 1]} : vector<120x6xf32> to vector<120x1xf32>
    %cst_225 = arith.constant dense<0.000000e+00> : vector<84x1xf32>
    %296 = tpu.matmul %294, %295, %cst_225 {dimension_numbers = #tpu.dot_dimension_numbers<[1], [0], [0], [1], [0, 0, 1, 1], [], []>} : vector<84x120xf32>, vector<120x1xf32>, vector<84x1xf32> -> vector<84x1xf32>
    %297 = arith.addf %292, %296 : vector<84x1xf32>
    %c4_226 = arith.constant 4 : index
    %c0_227 = arith.constant 0 : index
    %c0_228 = arith.constant 0 : index
    %298 = vector.load %arg14[%c4_226, %c0_227, %c0_228] : memref<6x84x120xf32, #tpu.memory_space<vmem>>, vector<1x84x120xf32>
    %299 = vector.shape_cast %298 : vector<1x84x120xf32> to vector<84x120xf32>
    %300 = vector.extract_strided_slice %277 {offsets = [0, 4], sizes = [120, 1], strides = [1, 1]} : vector<120x6xf32> to vector<120x1xf32>
    %cst_229 = arith.constant dense<0.000000e+00> : vector<84x1xf32>
    %301 = tpu.matmul %299, %300, %cst_229 {dimension_numbers = #tpu.dot_dimension_numbers<[1], [0], [0], [1], [0, 0, 1, 1], [], []>} : vector<84x120xf32>, vector<120x1xf32>, vector<84x1xf32> -> vector<84x1xf32>
    %302 = arith.addf %297, %301 : vector<84x1xf32>
    %c5_230 = arith.constant 5 : index
    %c0_231 = arith.constant 0 : index
    %c0_232 = arith.constant 0 : index
    %303 = vector.load %arg14[%c5_230, %c0_231, %c0_232] : memref<6x84x120xf32, #tpu.memory_space<vmem>>, vector<1x84x120xf32>
    %304 = vector.shape_cast %303 : vector<1x84x120xf32> to vector<84x120xf32>
    %305 = vector.extract_strided_slice %277 {offsets = [0, 5], sizes = [120, 1], strides = [1, 1]} : vector<120x6xf32> to vector<120x1xf32>
    %cst_233 = arith.constant dense<0.000000e+00> : vector<84x1xf32>
    %306 = tpu.matmul %304, %305, %cst_233 {dimension_numbers = #tpu.dot_dimension_numbers<[1], [0], [0], [1], [0, 0, 1, 1], [], []>} : vector<84x120xf32>, vector<120x1xf32>, vector<84x1xf32> -> vector<84x1xf32>
    %307 = arith.addf %302, %306 : vector<84x1xf32>
    %cst_234 = arith.constant dense<0.000000e+00> : vector<10x1xf32>
    %308 = tpu.matmul %143, %307, %cst_234 {dimension_numbers = #tpu.dot_dimension_numbers<[1], [0], [0], [1], [0, 0, 1, 1], [], []>} : vector<10x84xf32>, vector<84x1xf32>, vector<10x1xf32> -> vector<10x1xf32>
    %309 = arith.addf %308, %144 : vector<10x1xf32>
    %c1_i32 = arith.constant 1 : i32
    %310 = vector.broadcast %c1_i32 : i32 to vector<1x2xi32>
    %311 = arith.cmpi eq, %147, %310 : vector<1x2xi32>
    %312 = vector.shape_cast %311 : vector<1x2xi1> to vector<1x2xi1>
    %313 = vector.broadcast %312 : vector<1x2xi1> to vector<10x2xi1>
    %314 = vector.shape_cast %276 : vector<10x1xf32> to vector<10x1xf32>
    %315 = vector.broadcast %314 : vector<10x1xf32> to vector<10x2xf32>
    %316 = arith.select %313, %315, %228 : vector<10x2xi1>, vector<10x2xf32>
    %c1_i32_235 = arith.constant 1 : i32
    %317 = vector.broadcast %c1_i32_235 : i32 to vector<1x2xi32>
    %318 = arith.cmpi eq, %147, %317 : vector<1x2xi32>
    %319 = vector.shape_cast %318 : vector<1x2xi1> to vector<1x2xi1>
    %320 = vector.broadcast %319 : vector<1x2xi1> to vector<10x2xi1>
    %321 = vector.shape_cast %309 : vector<10x1xf32> to vector<10x1xf32>
    %322 = vector.broadcast %321 : vector<10x1xf32> to vector<10x2xf32>
    %323 = arith.select %320, %322, %235 : vector<10x2xi1>, vector<10x2xf32>
    %324 = tpu.transpose %316, [1, 0] : vector<10x2xf32> -> vector<2x10xf32>
    %c0_236 = arith.constant 0 : index
    %c0_237 = arith.constant 0 : index
    %325 = vector.load %arg18[%c0_236, %c0_237] : memref<2x10xf32, #tpu.memory_space<vmem>>, vector<2x10xf32>
    tpu.vector_store %arg18[%c0_236, %c0_237], %324 {strides = array<i32>} : memref<2x10xf32, #tpu.memory_space<vmem>>, vector<2x10xf32>,
    %326 = tpu.transpose %323, [1, 0] : vector<10x2xf32> -> vector<2x10xf32>
    %c0_238 = arith.constant 0 : index
    %c0_239 = arith.constant 0 : index
    %327 = vector.load %arg19[%c0_238, %c0_239] : memref<2x10xf32, #tpu.memory_space<vmem>>, vector<2x10xf32>
    tpu.vector_store %arg19[%c0_238, %c0_239], %326 {strides = array<i32>} : memref<2x10xf32, #tpu.memory_space<vmem>>, vector<2x10xf32>,
    return
  }
}

</mosaic_0001>

<bundles_post_ra>
// kernel: _forward_impl.1
= control target key start
LH: loop header
LB: loop body
LE: loop exit
PB: predicated region body
PF: predicated region fallthrough
CT: control target
= control target key end

     0   :  { %s25163_s0 = inlined_call_operand.vmem [shape: f32[36,72], index: 0, kind: input, shape index: {}]   ;;  %s25164_s1 = inlined_call_operand.vmem [shape: f32[5,160,36], index: 1, kind: input, shape index: {}]   ;;  %s25165_s2 = inlined_call_operand.vmem [shape: f32[2,68,32], index: 2, kind: input, shape index: {}]   ;;  %s25166_s3 = inlined_call_operand.vmem [shape: f32[3,160,80], index: 3, kind: input, shape index: {}]   ;;  %s25167_s4 = inlined_call_operand.vmem [shape: f32[2,34,16], index: 4, kind: input, shape index: {}]   ;;  %s25168_s5 = inlined_call_operand.vmem [shape: f32[32,36], index: 5, kind: input, shape index: {}]   ;;  %s25169_s6 = inlined_call_operand.vmem [shape: f32[5,200,80], index: 6, kind: input, shape index: {}]   ;;  %s25170_s7 = inlined_call_operand.vmem [shape: f32[2,44,20], index: 7, kind: input, shape index: {}]   ;;  %s25171_s8 = inlined_call_operand.vmem [shape: f32[32,48], index: 8, kind: input, shape index: {}]   ;;  %s25172_s9 = inlined_call_operand.vmem [shape: f32[5,240,100], index: 9, kind: input, shape index: {}]   ;;  %s25173_s10 = inlined_call_operand.vmem [shape: f32[2,28,12], index: 10, kind: input, shape index: {}]   ;;  %s25174_s11 = inlined_call_operand.vmem [shape: f32[20,32], index: 11, kind: input, shape index: {}]   ;;  %s25175_s12 = inlined_call_operand.vmem [shape: f32[8,10,80], index: 12, kind: input, shape index: {}]   ;;  %s25176_s13 = inlined_call_operand.vmem [shape: f32[10,1], index: 13, kind: input, shape index: {}]   ;;  %s25177_s14 = inlined_call_operand.vmem [shape: f32[6,84,120], index: 14, kind: input, shape index: {}]   ;;  %s25178_s15 = inlined_call_operand.vmem [shape: f32[84,1], index: 15, kind: input, shape index: {}]   ;;  %s25179_s16 = inlined_call_operand.vmem [shape: f32[10,84], index: 16, kind: input, shape index: {}]   ;;  %s25180_s17 = inlined_call_operand.vmem [shape: f32[10,1], index: 17, kind: input, shape index: {}]   ;;  %s25181_s18 = inlined_call_operand.hbm [shape: f32[2,10], index: 18, kind: output, shape index: {0}]   ;;  %s25182_s19 = inlined_call_operand.hbm [shape: f32[2,10], index: 19, kind: output, shape index: {1}]  }
   0x1   :  { %25189 = sst [smem:[#allocation8_spill]] %s25163_s0 }
   0x2   :  { %25190 = sst [smem:[#allocation9_spill]] %s25164_s1 }
   0x3   :  { %25191 = sst [smem:[#allocation10_spill]] %s25165_s2 }
   0x4   :  { %25192 = sst [smem:[#allocation11_spill]] %s25166_s3 }
   0x5   :  { %25 = vsyncpa [#allocation3], 0  ;;  %s25193_s20 = sld [smem:[#allocation8_spill]] }
   0xb   :  { %v63_v0 = vld [vmem:[%s25193_s20] sm:$0xff]  ;;  %v64_v1 = vld [vmem:[%s25193_s20 + $0x8] sm:$0xff]  ;;  %v65_v2 = vld [vmem:[%s25193_s20 + $0x10] sm:$0xff] }
   0xc   :  { %v19170_v3 = vpack.i.bf16 %v64_v1, %v63_v0  ;;  %v66_v4 = vld [vmem:[%s25193_s20 + $0x18] sm:$0xff]  ;;  %v67_v5 = vld [vmem:[%s25193_s20 + $0x20] sm:$0xf] }
   0xd   :  { %26 = vsyncpa [#allocation5], 0  ;;  %s20373_s26 = smov 127   ;;  %s25194_s29 = sld [smem:[#allocation9_spill]]  ;;  %vm128_vm0 = vcmask 293888   ;;  %v19175_v7 = vpack.i.bf16 %v66_v4, %v65_v2  ;;  %v17459_v8 = vpack.c.bf16 %v64_v1, %v63_v0  ;;  %v17463_v9 = vpack.c.bf16 %v66_v4, %v65_v2 }
   0xe   :  { %122 = vrot.lane.b32.xlu1 %v67_v5, %s20373_s26  ;;  %19171 = vrot.lane.b32.xlu0 %v19170_v3, %s20373_s26  ;;  %s20374_s0 = smov 126   ;;  %s20375_s30 = smov 125   ;;  %vm189_vm1 = vcmask 1043456   ;;  %vm1449_vm2 = vcmask 556032   ;;  %vm1750_vm3 = vcmask 261120   ;;  %vm1977_vm4 = vcmask 654336  }
   0xf   :  { %s20376_s20 = smov 124   ;;  %s25195_s21 = sld [smem:[#allocation10_spill]]  ;;  %vm2770_vm5 = vcmask 1041408   ;;  %vm2739_vm6 = vcmask 277504   ;;  %vm20378_vm7 = vmmov 0   ;;  %vm20380_vm8 = vmmov 1  }
  0x10   :  { %s25196_s2 = sld [smem:[#allocation11_spill]]  ;;  %vm22286_vm9 = vmpackc.low %vm189_vm1, %vm20380_vm8  ;;  %vm4881_vm10 = vcmask 359424   ;;  %vm5223_vm11 = vcmask 162816   ;;  %vm5508_vm12 = vcmask 818176   ;;  %vm7360_vm13 = vcmask 228352   ;;  %s20383_s3 = smov 121  }
  0x11   :  { %vm8664_vm14 = vcmask 982016   ;;  %s20384_s27 = smov 120   ;;  %s20385_s28 = smov 119   ;;  %vm9949_vm15 = vcmask 687104  }
  0x12   :  { %19181 = vrot.lane.b32.xlu1 %v19170_v3, %s20374_s0  ;;  %19176 = vrot.lane.b32.xlu0 %v19175_v7, %s20373_s26  ;;  %s20387_s23 = smov 117  }
  0x13   :  { %v12173_v6 = vld [vmem:[%s25194_s29 + $0xa0] sm:$0xff]  ;;  %v12174_v19 = vld [vmem:[%s25194_s29 + $0xa8] sm:$0xff]  ;;  %v12175_v20 = vld [vmem:[%s25194_s29 + $0xb0] sm:$0xff] }
  0x14   :  { %14692 = vmatprep.mubr.msk.f32.mxu0 %vm128_vm0, %v12173_v6  ;;  %v12176_v22 = vld [vmem:[%s25194_s29 + $0xb8] sm:$0xff]  ;;  %v12177_v23 = vld [vmem:[%s25194_s29 + $0xc0] sm:$0xff]  ;;  %v12178_v26 = vld [vmem:[%s25194_s29 + $0xc8] sm:$0xff] }
  0x15   :  { %v12179_v27 = vld [vmem:[%s25194_s29 + $0xd0] sm:$0xff]  ;;  %v12180_v29 = vld [vmem:[%s25194_s29 + $0xd8] sm:$0xff]  ;;  %v12181_v30 = vld [vmem:[%s25194_s29 + $0xe0] sm:$0xff] }
  0x16   :  { %613 = vrot.lane.b32.xlu1 %v67_v5, %s20374_s0  ;;  %19186 = vrot.lane.b32.xlu0 %v19175_v7, %s20374_s0  ;;  %v12182_v31 = vld [vmem:[%s25194_s29 + $0xe8] sm:$0xff]  ;;  %v12183_v32 = vld [vmem:[%s25194_s29 + $0xf0] sm:$0xff] }
  0x17   :  { %v12184_v33 = vld [vmem:[%s25194_s29 + $0xf8] sm:$0xff]  ;;  %v12185_v34 = vld [vmem:[%s25194_s29 + $0x100] sm:$0xff]  ;;  %v12186_v35 = vld [vmem:[%s25194_s29 + $0x108] sm:$0xff] }
  0x18   :  { %v12187_v36 = vld [vmem:[%s25194_s29 + $0x110] sm:$0xff]  ;;  %v12188_v37 = vld [vmem:[%s25194_s29 + $0x118] sm:$0xff]  ;;  %v12189_v38 = vld [vmem:[%s25194_s29 + $0x120] sm:$0xff] }
  0x19   :  { %v12190_v39 = vld [vmem:[%s25194_s29 + $0x128] sm:$0xff]  ;;  %v12191_v40 = vld [vmem:[%s25194_s29 + $0x130] sm:$0xff]  ;;  %v12192_v42 = vld [vmem:[%s25194_s29 + $0x138] sm:$0xff] }
  0x1a   :  { %19196 = vrot.lane.b32.xlu1 %v19175_v7, %s20375_s30  ;;  %19191 = vrot.lane.b32.xlu0 %v19170_v3, %s20375_s30  ;;  %v68_v43 = vld [vmem:[%s25194_s29] sm:$0xff]  ;;  %v69_v46 = vld [vmem:[%s25194_s29 + $0x8] sm:$0xff] }
  0x1b   :  { %v70_v47 = vld [vmem:[%s25194_s29 + $0x10] sm:$0xff]  ;;  %v71_v50 = vld [vmem:[%s25194_s29 + $0x18] sm:$0xff]  ;;  %v72_v51 = vld [vmem:[%s25194_s29 + $0x20] sm:$0xff] }
  0x1c   :  { %v73_v55 = vld [vmem:[%s25194_s29 + $0x28] sm:$0xff]  ;;  %v74_v56 = vld [vmem:[%s25194_s29 + $0x30] sm:$0xff]  ;;  %v75_v58 = vld [vmem:[%s25194_s29 + $0x38] sm:$0xff] }
  0x1d   :  { %v76_v59 = vld [vmem:[%s25194_s29 + $0x40] sm:$0xff]  ;;  %v77_v60 = vld [vmem:[%s25194_s29 + $0x48] sm:$0xff]  ;;  %v78_v61 = vld [vmem:[%s25194_s29 + $0x50] sm:$0xff] }
  0x1e   :  { %895 = vrot.lane.b32.xlu0 %v67_v5, %s20375_s30  ;;  %19201 = vrot.lane.b32.xlu1 %v19170_v3, %s20376_s20  ;;  %v79_v62 = vld [vmem:[%s25194_s29 + $0x58] sm:$0xff]  ;;  %v80_v63 = vld [vmem:[%s25194_s29 + $0x60] sm:$0xff] }
  0x1f   :  { %v81_v0 = vld [vmem:[%s25194_s29 + $0x68] sm:$0xff]  ;;  %v82_v1 = vld [vmem:[%s25194_s29 + $0x70] sm:$0xff]  ;;  %v83_v2 = vld [vmem:[%s25194_s29 + $0x78] sm:$0xff] }
  0x20   :  { %v84_v3 = vld [vmem:[%s25194_s29 + $0x80] sm:$0xff]  ;;  %v85_v4 = vld [vmem:[%s25194_s29 + $0x88] sm:$0xff] }
  0x22   :  { %19206 = vrot.lane.b32.xlu0 %v19175_v7, %s20376_s20  ;;  %1177 = vrot.lane.b32.xlu1 %v67_v5, %s20376_s20  ;;  %v87_v7 = vld [vmem:[%s25194_s29 + $0x98] sm:$0xff] }
  0x80   :  { %v19172_v10 = vpop.permute.xlu0 %19171  ;;  %v123_v18 = vpop.permute.xlu1 %122 }
  0x81   :  { %v19174_v11 = vunpack.i.h.bf16 %v19172_v10  ;;  %v19173_v12 = vunpack.i.l.bf16 %v19172_v10 }
  0x83   :  { %v17451_v13 = vpack.c.bf16 %v19174_v11, %v19173_v12  ;;  %v12236_v11 = vld [vmem:[%s25194_s29 + $0x148] sm:$0xff]  ;;  %v12237_v12 = vld [vmem:[%s25194_s29 + $0x150] sm:$0xff] }
  0x84   :  { %v19177_v14 = vpop.permute.xlu0 %19176  ;;  %v19182_v21 = vpop.permute.xlu1 %19181 }
  0x85   :  { %v19179_v15 = vunpack.i.h.bf16 %v19177_v14  ;;  %v19178_v16 = vunpack.i.l.bf16 %v19177_v14  ;;  %17452 = vmatprep.subr.bf16.mxu0 %v17451_v13  ;;  %v19184_v24 = vunpack.i.h.bf16 %v19182_v21  ;;  %v19183_v25 = vunpack.i.l.bf16 %v19182_v21  ;;  %v12241_v21 = vld [vmem:[%s25194_s29 + $0x170] sm:$0xff] }
  0x86   :  { %17454 = vmatpush3.bf16.msra.mxu0 %v17451_v13 }
  0x87   :  { %v17455_v17 = vpack.c.bf16 %v19179_v15, %v19178_v16  ;;  %v17467_v28 = vpack.c.bf16 %v19184_v24, %v19183_v25  ;;  %v12238_v15 = vld [vmem:[%s25194_s29 + $0x158] sm:$0xff]  ;;  %v12239_v16 = vld [vmem:[%s25194_s29 + $0x160] sm:$0xff]  ;;  %v12244_v25 = vld [vmem:[%s25194_s29 + $0x188] sm:$0xff] }
  0x88   :  { %v19187_v41 = vpop.permute.xlu0 %19186  ;;  %v614_v54 = vpop.permute.xlu1 %613  ;;  %v12243_v24 = vld [vmem:[%s25194_s29 + $0x180] sm:$0xff] }
  0x89   :  { %17456 = vmatprep.subr.bf16.mxu0 %v17455_v17  ;;  %v19189_v44 = vunpack.i.h.bf16 %v19187_v41  ;;  %v19188_v45 = vunpack.i.l.bf16 %v19187_v41  ;;  %v12278_v41 = vld [vmem:[%s25194_s29 + $0x1f0] sm:$0xff] }
  0x8a   :  { %17458 = vmatpush3.bf16.msra.mxu0 %v17455_v17 }
  0x8b   :  { %14690 = vmatprep.subr.msk.mxu0 %vm189_vm1, %v123_v18  ;;  %v17471_v48 = vpack.c.bf16 %v19189_v44, %v19188_v45  ;;  %v12280_v44 = vld [vmem:[%s25194_s29 + $0x200] sm:$0xff] }
  0x8c   :  { %v19192_v49 = vpop.permute.xlu0 %19191  ;;  %v19197_v6 = vpop.permute.xlu1 %19196 }
  0x8d   :  { %v19194_v52 = vunpack.i.h.bf16 %v19192_v49  ;;  %v19193_v53 = vunpack.i.l.bf16 %v19192_v49  ;;  %v19198_v10 = vunpack.i.l.bf16 %v19197_v6  ;;  %v12284_v49 = vld [vmem:[%s25194_s29 + $0x220] sm:$0xff] }
  0x8e   :  { %14691 = vmatpush3.msk.msra.mxu0 %vm189_vm1, %v123_v18 }
  0x8f   :  { %14693 = vmatmul.mubr.msk.f32.vlgmr.msra.gmra.mrb[0].mxu0 %vm128_vm0, %v12174_v19  ;;  %17460 = vmatprep.subr.bf16.mxu0 %v17459_v8  ;;  %v17475_v57 = vpack.c.bf16 %v19194_v52, %v19193_v53  ;;  %v12287_v52 = vld [vmem:[%s25194_s29 + $0x238] sm:$0xff]  ;;  %v12288_v53 = vld [vmem:[%s25194_s29 + $0x240] sm:$0xff] }
  0x90   :  { %14695 = vmatprep.mubr.msk.f32.mxu0 %vm128_vm0, %v12175_v20  ;;  %17462 = vmatpush3.bf16.msra.mxu0 %v17459_v8  ;;  %v12235_v8 = vld [vmem:[%s25194_s29 + $0x140] sm:$0xff]  ;;  %v19202_v14 = vpop.permute.xlu1 %19201  ;;  %v896_v19 = vpop.permute.xlu0 %895  ;;  %v12240_v20 = vld [vmem:[%s25194_s29 + $0x168] sm:$0xff] }
  0x91   :  { %17464 = vmatprep.subr.bf16.mxu0 %v17463_v9  ;;  %v19204_v17 = vunpack.i.h.bf16 %v19202_v14  ;;  %v19203_v18 = vunpack.i.l.bf16 %v19202_v14  ;;  %v12334_v14 = vld [vmem:[%s25194_s29 + $0x308] sm:$0xff] }
  0x93   :  { %14696 = vmatmul.mubr.msk.f32.gmra.mrb[2].mxu0 %vm128_vm0, %v12176_v22  ;;  %v17483_v22 = vpack.c.bf16 %v19204_v17, %v19203_v18  ;;  %v1440_v17 = vld [vmem:[%s25195_s21] sm:$0xff]  ;;  %v1441_v18 = vld [vmem:[%s25195_s21 + $0x8] sm:$0xff] }
  0x94   :  { %14698 = vmatprep.mubr.msk.f32.mxu0 %vm128_vm0, %v12177_v23  ;;  %17466 = vmatpush3.bf16.msra.mxu0 %v17463_v9  ;;  %v19199_v9 = vunpack.i.h.bf16 %v19197_v6  ;;  %v12242_v23 = vld [vmem:[%s25194_s29 + $0x178] sm:$0xff]  ;;  %v1178_v45 = vpop.permute.xlu1 %1177  ;;  %v12326_v6 = vld [vmem:[%s25194_s29 + $0x2c8] sm:$0xff] }
  0x95   :  { %14730 = vmatprep.subr.msk.mxu0 %vm189_vm1, %v67_v5 }
  0x96   :  { %v17479_v13 = vpack.c.bf16 %v19199_v9, %v19198_v10  ;;  %v12329_v9 = vld [vmem:[%s25194_s29 + $0x2e0] sm:$0xff]  ;;  %v12330_v10 = vld [vmem:[%s25194_s29 + $0x2e8] sm:$0xff] }
  0x97   :  { %14699 = vmatmul.mubr.msk.f32.gmra.mrb[4].mxu0 %vm128_vm0, %v12178_v26  ;;  %v12245_v26 = vld [vmem:[%s25194_s29 + $0x190] sm:$0xff] }
  0x98   :  { %14701 = vmatprep.mubr.msk.f32.mxu0 %vm128_vm0, %v12179_v27  ;;  %14731 = vmatpush3.msk.msra.mxu0 %vm189_vm1, %v67_v5  ;;  %v86_v5 = vld [vmem:[%s25194_s29 + $0x90] sm:$0xff]  ;;  %v12246_v27 = vld [vmem:[%s25194_s29 + $0x198] sm:$0xff] }
  0x99   :  { %17468 = vmatprep.subr.bf16.mxu0 %v17467_v28 }
  0x9b   :  { %14702 = vmatmul.mubr.msk.f32.gmra.mrb[6].mxu0 %vm128_vm0, %v12180_v29  ;;  %v12248_v29 = vld [vmem:[%s25194_s29 + $0x1a8] sm:$0xff] }
  0x9c   :  { %14704 = vmatprep.mubr.msk.f32.mxu0 %vm128_vm0, %v12181_v30  ;;  %v12249_v30 = vld [vmem:[%s25194_s29 + $0x1b0] sm:$0xff] }
  0x9f   :  { %14705 = vmatmul.mubr.msk.f32.gmra.mrb[8].mxu0 %vm128_vm0, %v12182_v31  ;;  %v12250_v31 = vld [vmem:[%s25194_s29 + $0x1b8] sm:$0xff] }
  0xa0   :  { %14707 = vmatprep.mubr.msk.f32.mxu0 %vm128_vm0, %v12183_v32  ;;  %v12251_v32 = vld [vmem:[%s25194_s29 + $0x1c0] sm:$0xff] }
  0xa3   :  { %14708 = vmatmul.mubr.msk.f32.gmra.mrb[10].mxu0 %vm128_vm0, %v12184_v33  ;;  %v12252_v33 = vld [vmem:[%s25194_s29 + $0x1c8] sm:$0xff] }
  0xa4   :  { %14710 = vmatprep.mubr.msk.f32.mxu0 %vm128_vm0, %v12185_v34  ;;  %v12253_v34 = vld [vmem:[%s25194_s29 + $0x1d0] sm:$0xff] }
  0xa7   :  { %14711 = vmatmul.mubr.msk.f32.gmra.mrb[12].mxu0 %vm128_vm0, %v12186_v35  ;;  %v19207_v35 = vpop.permute.xlu0 %19206 }
  0xa8   :  { %14713 = vmatprep.mubr.msk.f32.mxu0 %vm128_vm0, %v12187_v36  ;;  %v12254_v36 = vld [vmem:[%s25194_s29 + $0x1d8] sm:$0xff] }
  0xab   :  { %14714 = vmatmul.mubr.msk.f32.gmra.mrb[14].mxu0 %vm128_vm0, %v12188_v37  ;;  %v12276_v37 = vld [vmem:[%s25194_s29 + $0x1e0] sm:$0xff] }
  0xac   :  { %14716 = vmatprep.mubr.msk.f32.mxu0 %vm128_vm0, %v12189_v38  ;;  %v19209_v38 = vunpack.i.h.bf16 %v19207_v35 }
  0xaf   :  { %14717 = vmatmul.mubr.msk.f32.gmra.mrb[16].mxu0 %vm128_vm0, %v12190_v39  ;;  %v19208_v39 = vunpack.i.l.bf16 %v19207_v35 }
  0xb0   :  { %14719 = vmatprep.mubr.msk.f32.mxu0 %vm128_vm0, %v12191_v40  ;;  %v12277_v40 = vld [vmem:[%s25194_s29 + $0x1e8] sm:$0xff] }
  0xb3   :  { %14720 = vmatmul.mubr.msk.f32.gmra.mrb[18].mxu0 %vm128_vm0, %v12192_v42  ;;  %v17487_v42 = vpack.c.bf16 %v19209_v38, %v19208_v39 }
  0xb4   :  { %14732 = vmatprep.mubr.msk.f32.mxu0 %vm128_vm0, %v68_v43  ;;  %v12279_v43 = vld [vmem:[%s25194_s29 + $0x1f8] sm:$0xff] }
  0xb7   :  { %14733 = vmatmul.mubr.msk.f32.vlgmr.msra.gmra.mrb[0].mxu0 %vm128_vm0, %v69_v46  ;;  %v12281_v46 = vld [vmem:[%s25194_s29 + $0x208] sm:$0xff] }
  0xb8   :  { %14735 = vmatprep.mubr.msk.f32.mxu0 %vm128_vm0, %v70_v47  ;;  %17470 = vmatpush3.bf16.msra.mxu0 %v17467_v28  ;;  %v12247_v28 = vld [vmem:[%s25194_s29 + $0x1a0] sm:$0xff]  ;;  %v12282_v47 = vld [vmem:[%s25194_s29 + $0x210] sm:$0xff] }
  0xb9   :  { %17472 = vmatprep.subr.bf16.mxu0 %v17471_v48 }
  0xbb   :  { %14736 = vmatmul.mubr.msk.f32.gmra.mrb[2].mxu0 %vm128_vm0, %v71_v50  ;;  %v12285_v50 = vld [vmem:[%s25194_s29 + $0x228] sm:$0xff] }
  0xbc   :  { %14738 = vmatprep.mubr.msk.f32.mxu0 %vm128_vm0, %v72_v51  ;;  %17474 = vmatpush3.bf16.msra.mxu0 %v17471_v48  ;;  %v12283_v48 = vld [vmem:[%s25194_s29 + $0x218] sm:$0xff]  ;;  %v12286_v51 = vld [vmem:[%s25194_s29 + $0x230] sm:$0xff] }
  0xbd   :  { %14770 = vmatprep.subr.msk.mxu0 %vm189_vm1, %v614_v54 }
  0xbf   :  { %14739 = vmatmul.mubr.msk.f32.gmra.mrb[4].mxu0 %vm128_vm0, %v73_v55  ;;  %v12290_v55 = vld [vmem:[%s25194_s29 + $0x250] sm:$0xff] }
  0xc0   :  { %14741 = vmatprep.mubr.msk.f32.mxu0 %vm128_vm0, %v74_v56  ;;  %14771 = vmatpush3.msk.msra.mxu0 %vm189_vm1, %v614_v54  ;;  %v12289_v54 = vld [vmem:[%s25194_s29 + $0x248] sm:$0xff]  ;;  %v12291_v56 = vld [vmem:[%s25194_s29 + $0x258] sm:$0xff] }
  0xc1   :  { %17476 = vmatprep.subr.bf16.mxu0 %v17475_v57 }
  0xc3   :  { %14742 = vmatmul.mubr.msk.f32.gmra.mrb[6].mxu0 %vm128_vm0, %v75_v58  ;;  %v12293_v58 = vld [vmem:[%s25194_s29 + $0x268] sm:$0xff] }
  0xc4   :  { %14744 = vmatprep.mubr.msk.f32.mxu0 %vm128_vm0, %v76_v59  ;;  %v12294_v59 = vld [vmem:[%s25194_s29 + $0x270] sm:$0xff] }
  0xc7   :  { %14745 = vmatmul.mubr.msk.f32.gmra.mrb[8].mxu0 %vm128_vm0, %v77_v60  ;;  %v12295_v60 = vld [vmem:[%s25194_s29 + $0x278] sm:$0xff] }
  0xc8   :  { %14747 = vmatprep.mubr.msk.f32.mxu0 %vm128_vm0, %v78_v61  ;;  %v12317_v61 = vld [vmem:[%s25194_s29 + $0x280] sm:$0xff] }
  0xcb   :  { %14748 = vmatmul.mubr.msk.f32.gmra.mrb[10].mxu0 %vm128_vm0, %v79_v62  ;;  %v12318_v62 = vld [vmem:[%s25194_s29 + $0x288] sm:$0xff] }
  0xcc   :  { %14750 = vmatprep.mubr.msk.f32.mxu0 %vm128_vm0, %v80_v63  ;;  %v12319_v63 = vld [vmem:[%s25194_s29 + $0x290] sm:$0xff] }
  0xcf   :  { %14751 = vmatmul.mubr.msk.f32.gmra.mrb[12].mxu0 %vm128_vm0, %v81_v0  ;;  %v12320_v0 = vld [vmem:[%s25194_s29 + $0x298] sm:$0xff] }
  0xd0   :  { %14753 = vmatprep.mubr.msk.f32.mxu0 %vm128_vm0, %v82_v1  ;;  %v12321_v1 = vld [vmem:[%s25194_s29 + $0x2a0] sm:$0xff] }
  0xd3   :  { %14754 = vmatmul.mubr.msk.f32.gmra.mrb[14].mxu0 %vm128_vm0, %v83_v2  ;;  %v12322_v2 = vld [vmem:[%s25194_s29 + $0x2a8] sm:$0xff] }
  0xd4   :  { %14756 = vmatprep.mubr.msk.f32.mxu0 %vm128_vm0, %v84_v3  ;;  %v12323_v3 = vld [vmem:[%s25194_s29 + $0x2b0] sm:$0xff] }
  0xd7   :  { %14757 = vmatmul.mubr.msk.f32.gmra.mrb[16].mxu0 %vm128_vm0, %v85_v4  ;;  %v12324_v4 = vld [vmem:[%s25194_s29 + $0x2b8] sm:$0xff] }
  0xd8   :  { %14759 = vmatprep.mubr.msk.f32.mxu0 %vm128_vm0, %v86_v5  ;;  %v12325_v5 = vld [vmem:[%s25194_s29 + $0x2c0] sm:$0xff] }
  0xdb   :  { %14760 = vmatmul.mubr.msk.f32.gmra.mrb[18].mxu0 %vm128_vm0, %v87_v7  ;;  %v12327_v7 = vld [vmem:[%s25194_s29 + $0x2d0] sm:$0xff] }
  0xdc   :  { %14772 = vmatprep.mubr.msk.f32.mxu0 %vm128_vm0, %v12235_v8  ;;  %v12328_v8 = vld [vmem:[%s25194_s29 + $0x2d8] sm:$0xff] }
  0xdf   :  { %14773 = vmatmul.mubr.msk.f32.vlgmr.msra.gmra.mrb[0].mxu0 %vm128_vm0, %v12236_v11  ;;  %v12331_v11 = vld [vmem:[%s25194_s29 + $0x2f0] sm:$0xff] }
  0xe0   :  { %14775 = vmatprep.mubr.msk.f32.mxu0 %vm128_vm0, %v12237_v12  ;;  %17478 = vmatpush3.bf16.msra.mxu0 %v17475_v57  ;;  %v12292_v57 = vld [vmem:[%s25194_s29 + $0x260] sm:$0xff]  ;;  %v12332_v12 = vld [vmem:[%s25194_s29 + $0x2f8] sm:$0xff] }
  0xe1   :  { %17480 = vmatprep.subr.bf16.mxu0 %v17479_v13 }
  0xe3   :  { %14776 = vmatmul.mubr.msk.f32.gmra.mrb[2].mxu0 %vm128_vm0, %v12238_v15  ;;  %v12335_v15 = vld [vmem:[%s25194_s29 + $0x310] sm:$0xff] }
  0xe4   :  { %14778 = vmatprep.mubr.msk.f32.mxu0 %vm128_vm0, %v12239_v16  ;;  %17482 = vmatpush3.bf16.msra.mxu0 %v17479_v13  ;;  %v12333_v13 = vld [vmem:[%s25194_s29 + $0x300] sm:$0xff]  ;;  %v12336_v16 = vld [vmem:[%s25194_s29 + $0x318] sm:$0xff] }
  0xe5   :  { %14810 = vmatprep.subr.msk.mxu0 %vm189_vm1, %v896_v19 }
  0xe7   :  { %14779 = vmatmul.mubr.msk.f32.gmra.mrb[4].mxu0 %vm128_vm0, %v12240_v20  ;;  %v1442_v20 = vld [vmem:[%s25195_s21 + $0x10] sm:$0xff] }
  0xe8   :  { %14781 = vmatprep.mubr.msk.f32.mxu0 %vm128_vm0, %v12241_v21  ;;  %14811 = vmatpush3.msk.msra.mxu0 %vm189_vm1, %v896_v19  ;;  %v17491_v19 = vpack.c.bf16 %v1441_v18, %v1440_v17  ;;  %v1443_v21 = vld [vmem:[%s25195_s21 + $0x18] sm:$0xff] }
  0xe9   :  { %17484 = vmatprep.subr.bf16.mxu0 %v17483_v22 }
  0xea   :  { %17492 = vmatprep.subr.bf16.mxu1 %v17491_v19 }
  0xeb   :  { %14782 = vmatmul.mubr.msk.f32.gmra.mrb[6].mxu0 %vm128_vm0, %v12242_v23  ;;  %17494 = vmatpush3.bf16.msra.mxu1 %v17491_v19  ;;  %v1444_v23 = vld [vmem:[%s25195_s21 + $0x20] sm:$0xff] }
  0xec   :  { %14784 = vmatprep.mubr.msk.f32.mxu0 %vm128_vm0, %v12243_v24  ;;  %v1445_v24 = vld [vmem:[%s25195_s21 + $0x28] sm:$0xff] }
  0xef   :  { %14785 = vmatmul.mubr.msk.f32.gmra.mrb[8].mxu0 %vm128_vm0, %v12244_v25  ;;  %v17499_v25 = vpack.c.bf16 %v1445_v24, %v1444_v23 }
  0xf0   :  { %14787 = vmatprep.mubr.msk.f32.mxu0 %vm128_vm0, %v12245_v26  ;;  %v1446_v26 = vld [vmem:[%s25195_s21 + $0x30] sm:$0xff] }
  0xf3   :  { %14788 = vmatmul.mubr.msk.f32.gmra.mrb[10].mxu0 %vm128_vm0, %v12246_v27  ;;  %v1447_v27 = vld [vmem:[%s25195_s21 + $0x38] sm:$0xff] }
  0xf4   :  { %14790 = vmatprep.mubr.msk.f32.mxu0 %vm128_vm0, %v12247_v28  ;;  %v17503_v28 = vpack.c.bf16 %v1447_v27, %v1446_v26 }
  0xf7   :  { %14791 = vmatmul.mubr.msk.f32.gmra.mrb[12].mxu0 %vm128_vm0, %v12248_v29  ;;  %v1448_v29 = vld [vmem:[%s25195_s21 + $0x40] sm:$0xf] }
  0xf8   :  { %14793 = vmatprep.mubr.msk.f32.mxu0 %vm128_vm0, %v12249_v30  ;;  %v12369_v30 = vld [vmem:[%s25195_s21 + $0x48] sm:$0xff] }
  0xfb   :  { %14794 = vmatmul.mubr.msk.f32.gmra.mrb[14].mxu0 %vm128_vm0, %v12250_v31  ;;  %v12370_v31 = vld [vmem:[%s25195_s21 + $0x50] sm:$0xff] }
  0xfc   :  { %14796 = vmatprep.mubr.msk.f32.mxu0 %vm128_vm0, %v12251_v32  ;;  %v17507_v32 = vpack.c.bf16 %v12370_v31, %v12369_v30 }
  0xff   :  { %14797 = vmatmul.mubr.msk.f32.gmra.mrb[16].mxu0 %vm128_vm0, %v12252_v33 }
 0x100   :  { %14799 = vmatprep.mubr.msk.f32.mxu0 %vm128_vm0, %v12253_v34 }
 0x103   :  { %14800 = vmatmul.mubr.msk.f32.gmra.mrb[18].mxu0 %vm128_vm0, %v12254_v36 }
 0x104   :  { %14812 = vmatprep.mubr.msk.f32.mxu0 %vm128_vm0, %v12276_v37 }
 0x107   :  { %14813 = vmatmul.mubr.msk.f32.vlgmr.msra.gmra.mrb[0].mxu0 %vm128_vm0, %v12277_v40 }
 0x108   :  { %14815 = vmatprep.mubr.msk.f32.mxu0 %vm128_vm0, %v12278_v41  ;;  %17486 = vmatpush3.bf16.msra.mxu0 %v17483_v22  ;;  %v17495_v22 = vpack.c.bf16 %v1443_v21, %v1442_v20 }
 0x109   :  { %17488 = vmatprep.subr.bf16.mxu0 %v17487_v42 }
 0x10a   :  { %17496 = vmatprep.subr.bf16.mxu1 %v17495_v22 }
 0x10b   :  { %14816 = vmatmul.mubr.msk.f32.gmra.mrb[2].mxu0 %vm128_vm0, %v12279_v43  ;;  %17498 = vmatpush3.bf16.msra.mxu1 %v17495_v22 }
 0x10c   :  { %14818 = vmatprep.mubr.msk.f32.mxu0 %vm128_vm0, %v12280_v44  ;;  %17490 = vmatpush3.bf16.msra.mxu0 %v17487_v42  ;;  %v12371_v44 = vld [vmem:[%s25195_s21 + $0x58] sm:$0xff] }
 0x10d   :  { %14850 = vmatprep.subr.msk.mxu0 %vm189_vm1, %v1178_v45  ;;  %17500 = vmatprep.subr.bf16.mxu1 %v17499_v25 }
 0x10f   :  { %14819 = vmatmul.mubr.msk.f32.gmra.mrb[4].mxu0 %vm128_vm0, %v12281_v46  ;;  %17502 = vmatpush3.bf16.msra.mxu1 %v17499_v25 }
 0x110   :  { %14821 = vmatprep.mubr.msk.f32.mxu0 %vm128_vm0, %v12282_v47  ;;  %14851 = vmatpush3.msk.msra.mxu0 %vm189_vm1, %v1178_v45  ;;  %v12372_v45 = vld [vmem:[%s25195_s21 + $0x60] sm:$0xff] }
 0x111   :  { %17504 = vmatprep.subr.bf16.mxu1 %v17503_v28 }
 0x113   :  { %14822 = vmatmul.mubr.msk.f32.gmra.mrb[6].mxu0 %vm128_vm0, %v12283_v48  ;;  %17506 = vmatpush3.bf16.msra.mxu1 %v17503_v28 }
 0x114   :  { %14824 = vmatprep.mubr.msk.f32.mxu0 %vm128_vm0, %v12284_v49  ;;  %14898 = vmatprep.subr.msk.mxu1 %vm189_vm1, %v1448_v29  ;;  %v17511_v49 = vpack.c.bf16 %v12372_v45, %v12371_v44 }
 0x117   :  { %14825 = vmatmul.mubr.msk.f32.gmra.mrb[8].mxu0 %vm128_vm0, %v12285_v50  ;;  %14899 = vmatpush3.msk.msra.mxu1 %vm189_vm1, %v1448_v29 }
 0x118   :  { %14827 = vmatprep.mubr.msk.f32.mxu0 %vm128_vm0, %v12286_v51  ;;  %17508 = vmatprep.subr.bf16.mxu1 %v17507_v32  ;;  %v12373_v51 = vld [vmem:[%s25195_s21 + $0x68] sm:$0xff] }
 0x11b   :  { %14828 = vmatmul.mubr.msk.f32.gmra.mrb[10].mxu0 %vm128_vm0, %v12287_v52  ;;  %v12374_v52 = vld [vmem:[%s25195_s21 + $0x70] sm:$0xff] }
 0x11c   :  { %14830 = vmatprep.mubr.msk.f32.mxu0 %vm128_vm0, %v12288_v53 }
 0x11f   :  { %14831 = vmatmul.mubr.msk.f32.gmra.mrb[12].mxu0 %vm128_vm0, %v12289_v54 }
 0x120   :  { %14833 = vmatprep.mubr.msk.f32.mxu0 %vm128_vm0, %v12290_v55 }
 0x123   :  { %14834 = vmatmul.mubr.msk.f32.gmra.mrb[14].mxu0 %vm128_vm0, %v12291_v56  ;;  %v17515_v56 = vpack.c.bf16 %v12374_v52, %v12373_v51 }
 0x124   :  { %14836 = vmatprep.mubr.msk.f32.mxu0 %vm128_vm0, %v12292_v57 }
 0x127   :  { %14837 = vmatmul.mubr.msk.f32.gmra.mrb[16].mxu0 %vm128_vm0, %v12293_v58  ;;  %v12375_v58 = vld [vmem:[%s25195_s21 + $0x78] sm:$0xff] }
 0x128   :  { %14839 = vmatprep.mubr.msk.f32.mxu0 %vm128_vm0, %v12294_v59  ;;  %v12376_v59 = vld [vmem:[%s25195_s21 + $0x80] sm:$0xff] }
 0x12b   :  { %14840 = vmatmul.mubr.msk.f32.gmra.mrb[18].mxu0 %vm128_vm0, %v12295_v60 }
 0x12c   :  { %14852 = vmatprep.mubr.msk.f32.mxu0 %vm128_vm0, %v12317_v61 }
 0x12f   :  { %14853 = vmatmul.mubr.msk.f32.vlgmr.msra.gmra.mrb[0].mxu0 %vm128_vm0, %v12318_v62 }
 0x130   :  { %14855 = vmatprep.mubr.msk.f32.mxu0 %vm128_vm0, %v12319_v63  ;;  %v17519_v63 = vpack.c.bf16 %v12376_v59, %v12375_v58 }
 0x133   :  { %14856 = vmatmul.mubr.msk.f32.gmra.mrb[2].mxu0 %vm128_vm0, %v12320_v0 }
 0x134   :  { %14858 = vmatprep.mubr.msk.f32.mxu0 %vm128_vm0, %v12321_v1 }
 0x137   :  { %14859 = vmatmul.mubr.msk.f32.gmra.mrb[4].mxu0 %vm128_vm0, %v12322_v2 }
 0x138   :  { %14861 = vmatprep.mubr.msk.f32.mxu0 %vm128_vm0, %v12323_v3 }
 0x13b   :  { %14862 = vmatmul.mubr.msk.f32.gmra.mrb[6].mxu0 %vm128_vm0, %v12324_v4 }
 0x13c   :  { %14864 = vmatprep.mubr.msk.f32.mxu0 %vm128_vm0, %v12325_v5  ;;  %v12377_v5 = vld [vmem:[%s25195_s21 + $0x88] sm:$0xf] }
 0x13f   :  { %14865 = vmatmul.mubr.msk.f32.gmra.mrb[8].mxu0 %vm128_vm0, %v12326_v6 }
 0x140   :  { %14867 = vmatprep.mubr.msk.f32.mxu0 %vm128_vm0, %v12327_v7 }
 0x143   :  { %14868 = vmatmul.mubr.msk.f32.gmra.mrb[10].mxu0 %vm128_vm0, %v12328_v8 }
 0x144   :  { %14870 = vmatprep.mubr.msk.f32.mxu0 %vm128_vm0, %v12329_v9  ;;  %v1746_v9 = vld [vmem:[%s25168_s5] sm:$0xff] }
 0x147   :  { %14871 = vmatmul.mubr.msk.f32.gmra.mrb[12].mxu0 %vm128_vm0, %v12330_v10  ;;  %v1747_v10 = vld [vmem:[%s25168_s5 + $0x8] sm:$0xff] }
 0x148   :  { %14873 = vmatprep.mubr.msk.f32.mxu0 %vm128_vm0, %v12331_v11  ;;  %v17523_v11 = vpack.c.bf16 %v1747_v10, %v1746_v9 }
 0x14b   :  { %14874 = vmatmul.mubr.msk.f32.gmra.mrb[14].mxu0 %vm128_vm0, %v12332_v12  ;;  %v1748_v12 = vld [vmem:[%s25168_s5 + $0x10] sm:$0xff] }
 0x14c   :  { %14876 = vmatprep.mubr.msk.f32.mxu0 %vm128_vm0, %v12333_v13  ;;  %v1749_v13 = vld [vmem:[%s25168_s5 + $0x18] sm:$0xff] }
 0x14f   :  { %14877 = vmatmul.mubr.msk.f32.gmra.mrb[16].mxu0 %vm128_vm0, %v12334_v14  ;;  %v17527_v14 = vpack.c.bf16 %v1749_v13, %v1748_v12 }
 0x150   :  { %14879 = vmatprep.mubr.msk.f32.mxu0 %vm128_vm0, %v12335_v15 }
 0x153   :  { %14880 = vmatmul.mubr.msk.f32.gmra.mrb[18].mxu0 %vm128_vm0, %v12336_v16 }
 0x202   :  { %v14854_v33 = vpop.f32.mrb[0].mxu0 }
 0x203   :  { %v1311_v34 = vpop.f32.mrb[1].mxu0 }
 0x206   :  { %v14857_v35 = vpop.f32.mrb[2].mxu0 }
 0x207   :  { %v1321_v36 = vpop.f32.mrb[3].mxu0 }
 0x20a   :  { %v14860_v37 = vpop.f32.mrb[4].mxu0 }
 0x20b   :  { %v1331_v38 = vpop.f32.mrb[5].mxu0 }
 0x20e   :  { %v14863_v39 = vpop.f32.mrb[6].mxu0 }
 0x20f   :  { %v1341_v40 = vpop.f32.mrb[7].mxu0 }
 0x212   :  { %v14866_v41 = vpop.f32.mrb[8].mxu0 }
 0x213   :  { %v1351_v42 = vpop.f32.mrb[9].mxu0 }
 0x216   :  { %v14869_v43 = vpop.f32.mrb[10].mxu0 }
 0x217   :  { %v1431_v46 = vmax.f32 %v14854_v33, %v14869_v43  ;;  %v1361_v47 = vpop.f32.mrb[11].mxu0 }
 0x218   :  { %v1430_v48 = vmax.f32 %v1311_v34, %v1361_v47 }
 0x21a   :  { %v14872_v50 = vpop.f32.mrb[12].mxu0  ;;  %14900 = vmatprep.mubr.msk.f32.mxu1 %vm1449_vm2, %v1430_v48 }
 0x21b   :  { %v1433_v53 = vmax.f32 %v14857_v35, %v14872_v50  ;;  %v1371_v54 = vpop.f32.mrb[13].mxu0  ;;  %14901 = vmatmul.mubr.msk.f32.vlgmr.msra.gmra.mrb[0].mxu1 %vm1449_vm2, %v1431_v46 }
 0x21c   :  { %v1432_v55 = vmax.f32 %v1321_v36, %v1371_v54  ;;  %17510 = vmatpush3.bf16.msra.mxu1 %v17507_v32 }
 0x21d   :  { %17512 = vmatprep.subr.bf16.mxu1 %v17511_v49 }
 0x21e   :  { %v14875_v57 = vpop.f32.mrb[14].mxu0  ;;  %14903 = vmatprep.mubr.msk.f32.mxu1 %vm1449_vm2, %v1432_v55 }
 0x21f   :  { %v1435_v60 = vmax.f32 %v14860_v37, %v14875_v57  ;;  %v1381_v61 = vpop.f32.mrb[15].mxu0  ;;  %14904 = vmatmul.mubr.msk.f32.gmra.mrb[2].mxu1 %vm1449_vm2, %v1433_v53 }
 0x220   :  { %v1434_v62 = vmax.f32 %v1331_v38, %v1381_v61  ;;  %17514 = vmatpush3.bf16.msra.mxu1 %v17511_v49 }
 0x221   :  { %17516 = vmatprep.subr.bf16.mxu1 %v17515_v56 }
 0x222   :  { %v14878_v0 = vpop.f32.mrb[16].mxu0  ;;  %14906 = vmatprep.mubr.msk.f32.mxu1 %vm1449_vm2, %v1434_v62 }
 0x223   :  { %v1437_v1 = vmax.f32 %v14863_v39, %v14878_v0  ;;  %v1391_v2 = vpop.f32.mrb[17].mxu0  ;;  %14907 = vmatmul.mubr.msk.f32.gmra.mrb[4].mxu1 %vm1449_vm2, %v1435_v60 }
 0x224   :  { %v1436_v3 = vmax.f32 %v1341_v40, %v1391_v2  ;;  %17518 = vmatpush3.bf16.msra.mxu1 %v17515_v56 }
 0x225   :  { %17520 = vmatprep.subr.bf16.mxu1 %v17519_v63 }
 0x226   :  { %v14881_v4 = vpop.f32.mrb[18].mxu0  ;;  %14909 = vmatprep.mubr.msk.f32.mxu1 %vm1449_vm2, %v1436_v3 }
 0x227   :  { %v1439_v6 = vmax.f32 %v14866_v41, %v14881_v4  ;;  %v1401_v7 = vpop.f32.mrb[19].mxu0  ;;  %14910 = vmatmul.mubr.msk.f32.gmra.mrb[6].mxu1 %vm1449_vm2, %v1437_v1 }
 0x228   :  { %v1438_v8 = vmax.f32 %v1351_v42, %v1401_v7  ;;  %17522 = vmatpush3.bf16.msra.mxu1 %v17519_v63 }
 0x229   :  { %14931 = vmatprep.subr.msk.mxu1 %vm189_vm1, %v12377_v5 }
 0x22a   :  { %14912 = vmatprep.mubr.msk.f32.mxu1 %vm1449_vm2, %v1438_v8 }
 0x22b   :  { %14913 = vmatmul.mubr.msk.f32.gmra.mrb[8].mxu1 %vm1449_vm2, %v1439_v6 }
 0x22c   :  { %14933 = vmatprep.mubr.msk.f32.mxu1 %vm1449_vm2, %v1430_v48  ;;  %14932 = vmatpush3.msk.msra.mxu1 %vm189_vm1, %v12377_v5  ;;  %v12399_v5 = vld [vmem:[%s25196_s2 + $0xa0] sm:$0xff] }
 0x22d   :  { %17524 = vmatprep.subr.bf16.mxu1 %v17523_v11 }
 0x22f   :  { %14934 = vmatmul.mubr.msk.f32.vlgmr.msra.gmra.mrb[10].mxu1 %vm1449_vm2, %v1431_v46 }
 0x230   :  { %14936 = vmatprep.mubr.msk.f32.mxu1 %vm1449_vm2, %v1432_v55  ;;  %17526 = vmatpush3.bf16.msra.mxu1 %v17523_v11 }
 0x231   :  { %17528 = vmatprep.subr.bf16.mxu1 %v17527_v14 }
 0x233   :  { %14937 = vmatmul.mubr.msk.f32.gmra.mrb[12].mxu1 %vm1449_vm2, %v1433_v53 }
 0x234   :  { %14939 = vmatprep.mubr.msk.f32.mxu1 %vm1449_vm2, %v1434_v62  ;;  %17530 = vmatpush3.bf16.msra.mxu1 %v17527_v14 }
 0x237   :  { %14940 = vmatmul.mubr.msk.f32.gmra.mrb[14].mxu1 %vm1449_vm2, %v1435_v60 }
 0x238   :  { %14942 = vmatprep.mubr.msk.f32.mxu1 %vm1449_vm2, %v1436_v3 }
 0x23b   :  { %14943 = vmatmul.mubr.msk.f32.gmra.mrb[16].mxu1 %vm1449_vm2, %v1437_v1 }
 0x23c   :  { %14945 = vmatprep.mubr.msk.f32.mxu1 %vm1449_vm2, %v1438_v8 }
 0x23f   :  { %14946 = vmatmul.mubr.msk.f32.gmra.mrb[18].mxu1 %vm1449_vm2, %v1439_v6  ;;  %vm12110_vm2 = vcmask 74752  }
 0x2ee   :  { %v14902_v15 = vpop.f32.mrb[0].mxu1 }
 0x2ef   :  { %v1549_v16 = vpop.f32.mrb[1].mxu1 }
 0x2f2   :  { %v14905_v17 = vpop.f32.mrb[2].mxu1 }
 0x2f3   :  { %v1559_v18 = vpop.f32.mrb[3].mxu1 }
 0x2f6   :  { %v14908_v19 = vpop.f32.mrb[4].mxu1 }
 0x2f7   :  { %v1569_v20 = vpop.f32.mrb[5].mxu1 }
 0x2fa   :  { %v14911_v21 = vpop.f32.mrb[6].mxu1 }
 0x2fb   :  { %v1579_v22 = vpop.f32.mrb[7].mxu1 }
 0x2fe   :  { %v14914_v23 = vpop.f32.mrb[8].mxu1 }
 0x2ff   :  { %v1589_v24 = vpop.f32.mrb[9].mxu1 }
 0x302   :  { %v14935_v25 = vpop.f32.mrb[10].mxu1 }
 0x303   :  { %v1727_v26 = vmax.f32 %v14902_v15, %v14935_v25  ;;  %v1677_v27 = vpop.f32.mrb[11].mxu1 }
 0x304   :  { %v1726_v28 = vmax.f32 %v1549_v16, %v1677_v27 }
 0x305   :  { %v21024_v31 = vmax.f32 %v1727_v26, 0.0 }
 0x306   :  { %v21022_v29 = vmax.f32 %v1726_v28, 0.0  ;;  %v14938_v30 = vpop.f32.mrb[12].mxu1 }
 0x307   :  { %v1729_v32 = vmax.f32 %v14905_v17, %v14938_v30  ;;  %v1687_v33 = vpop.f32.mrb[13].mxu1 }
 0x308   :  { %v1728_v34 = vmax.f32 %v1559_v18, %v1687_v33  ;;  %14956 = vmatprep.mubr.msk.f32.mxu1 %vm1750_vm3, %v21022_v29 }
 0x309   :  { %14957 = vmatmul.mubr.msk.f32.vlgmr.msra.gmra.mrb[20].mxu1 %vm1750_vm3, %v21024_v31  ;;  %v21032_v37 = vmax.f32 %v1729_v32, 0.0 }
 0x30a   :  { %v21030_v35 = vmax.f32 %v1728_v34, 0.0  ;;  %v14941_v36 = vpop.f32.mrb[14].mxu1  ;;  %v12400_v34 = vld [vmem:[%s25196_s2 + $0xa8] sm:$0xff] }
 0x30b   :  { %v1731_v38 = vmax.f32 %v14908_v19, %v14941_v36  ;;  %v1697_v39 = vpop.f32.mrb[15].mxu1  ;;  %v12401_v36 = vld [vmem:[%s25196_s2 + $0xb0] sm:$0xff] }
 0x30c   :  { %v1730_v40 = vmax.f32 %v1569_v20, %v1697_v39  ;;  %14959 = vmatprep.mubr.msk.f32.mxu1 %vm1750_vm3, %v21030_v35  ;;  %v12403_v39 = vld [vmem:[%s25196_s2 + $0xc0] sm:$0xff] }
 0x30d   :  { %14960 = vmatmul.mubr.msk.f32.gmra.mrb[22].mxu1 %vm1750_vm3, %v21032_v37  ;;  %v21040_v43 = vmax.f32 %v1731_v38, 0.0  ;;  %v12402_v38 = vld [vmem:[%s25196_s2 + $0xb8] sm:$0xff] }
 0x30e   :  { %v21038_v41 = vmax.f32 %v1730_v40, 0.0  ;;  %v14944_v42 = vpop.f32.mrb[16].mxu1  ;;  %v12404_v40 = vld [vmem:[%s25196_s2 + $0xc8] sm:$0xff] }
 0x30f   :  { %v1733_v44 = vmax.f32 %v14911_v21, %v14944_v42  ;;  %v1707_v45 = vpop.f32.mrb[17].mxu1  ;;  %v12405_v42 = vld [vmem:[%s25196_s2 + $0xd0] sm:$0xff] }
 0x310   :  { %v1732_v46 = vmax.f32 %v1579_v22, %v1707_v45  ;;  %14962 = vmatprep.mubr.msk.f32.mxu1 %vm1750_vm3, %v21038_v41  ;;  %v12406_v45 = vld [vmem:[%s25196_s2 + $0xd8] sm:$0xff] }
 0x311   :  { %14963 = vmatmul.mubr.msk.f32.gmra.mrb[24].mxu1 %vm1750_vm3, %v21040_v43  ;;  %v21048_v49 = vmax.f32 %v1733_v44, 0.0 }
 0x312   :  { %v21046_v47 = vmax.f32 %v1732_v46, 0.0  ;;  %v14947_v48 = vpop.f32.mrb[18].mxu1  ;;  %v12407_v46 = vld [vmem:[%s25196_s2 + $0xe0] sm:$0xff] }
 0x313   :  { %v1735_v50 = vmax.f32 %v14914_v23, %v14947_v48  ;;  %v1717_v51 = vpop.f32.mrb[19].mxu1 }
 0x314   :  { %v1734_v52 = vmax.f32 %v1589_v24, %v1717_v51  ;;  %14965 = vmatprep.mubr.msk.f32.mxu1 %vm1750_vm3, %v21046_v47  ;;  %v12408_v51 = vld [vmem:[%s25196_s2 + $0xe8] sm:$0xff] }
 0x315   :  { %14966 = vmatmul.mubr.msk.f32.gmra.mrb[26].mxu1 %vm1750_vm3, %v21048_v49  ;;  %v21056_v54 = vmax.f32 %v1735_v50, 0.0 }
 0x316   :  { %v21054_v53 = vmax.f32 %v1734_v52, 0.0  ;;  %v12409_v52 = vld [vmem:[%s25196_s2 + $0xf0] sm:$0xff] }
 0x318   :  { %14968 = vmatprep.mubr.msk.f32.mxu1 %vm1750_vm3, %v21054_v53 }
 0x319   :  { %14969 = vmatmul.mubr.msk.f32.gmra.mrb[28].mxu1 %vm1750_vm3, %v21056_v54 }
 0x31a   :  { %14991 = vmatprep.mubr.msk.f32.mxu1 %vm1977_vm4, %v12399_v5 }
 0x3dc   :  { %v14958_v55 = vpop.f32.mrb[20].mxu1 }
 0x3dd   :  { %v1847_v56 = vpop.f32.mrb[21].mxu1 }
 0x3de   :  { %v19235_v57 = vpack.i.bf16 %v14958_v55, %v1847_v56  ;;  %v21062_v58 = vpack.c.bf16 %v14958_v55, %v1847_v56  ;;  %v12410_v56 = vld [vmem:[%s25196_s2 + $0xf8] sm:$0xff] }
 0x3e0   :  { %19211 = vrot.lane.b32.xlu0 %v19235_v57, %s20373_s26  ;;  %v14961_v59 = vpop.f32.mrb[22].mxu1 }
 0x3e1   :  { %v1857_v60 = vpop.f32.mrb[23].mxu1 }
 0x3e2   :  { %v19240_v61 = vpack.i.bf16 %v14961_v59, %v1857_v60  ;;  %v21065_v62 = vpack.c.bf16 %v14961_v59, %v1857_v60  ;;  %v12413_v59 = vld [vmem:[%s25196_s2 + $0x110] sm:$0xff]  ;;  %v12414_v60 = vld [vmem:[%s25196_s2 + $0x118] sm:$0xff] }
 0x3e4   :  { %19216 = vrot.lane.b32.xlu1 %v19240_v61, %s20373_s26  ;;  %v14964_v63 = vpop.f32.mrb[24].mxu1 }
 0x3e5   :  { %v1867_v0 = vpop.f32.mrb[25].mxu1 }
 0x3e6   :  { %v19245_v1 = vpack.i.bf16 %v14964_v63, %v1867_v0  ;;  %v21068_v2 = vpack.c.bf16 %v14964_v63, %v1867_v0  ;;  %v12417_v63 = vld [vmem:[%s25196_s2 + $0x130] sm:$0xff] }
 0x3e8   :  { %19221 = vrot.lane.b32.xlu0 %v19245_v1, %s20373_s26  ;;  %v14967_v3 = vpop.f32.mrb[26].mxu1 }
 0x3e9   :  { %v1877_v4 = vpop.f32.mrb[27].mxu1 }
 0x3ea   :  { %v19250_v6 = vpack.i.bf16 %v14967_v3, %v1877_v4  ;;  %v21074_v7 = vpack.c.bf16 %v14967_v3, %v1877_v4 }
 0x3ec   :  { %19226 = vrot.lane.b32.xlu1 %v19250_v6, %s20373_s26  ;;  %v14970_v8 = vpop.f32.mrb[28].mxu1 }
 0x3ed   :  { %v1887_v9 = vpop.f32.mrb[29].mxu1 }
 0x3ee   :  { %v19255_v10 = vpack.i.bf16 %v14970_v8, %v1887_v9  ;;  %v21078_v11 = vpack.c.bf16 %v14970_v8, %v1887_v9 }
 0x3f0   :  { %19236 = vrot.lane.b32.xlu1 %v19235_v57, %s20374_s0  ;;  %19231 = vrot.lane.b32.xlu0 %v19255_v10, %s20373_s26  ;;  %v12411_v57 = vld [vmem:[%s25196_s2 + $0x100] sm:$0xff] }
 0x3f4   :  { %19246 = vrot.lane.b32.xlu1 %v19245_v1, %s20374_s0  ;;  %19241 = vrot.lane.b32.xlu0 %v19240_v61, %s20374_s0  ;;  %v12415_v61 = vld [vmem:[%s25196_s2 + $0x120] sm:$0xff]  ;;  %v12418_v1 = vld [vmem:[%s25196_s2 + $0x138] sm:$0xff] }
 0x3f8   :  { %19256 = vrot.lane.b32.xlu1 %v19255_v10, %s20374_s0  ;;  %19251 = vrot.lane.b32.xlu0 %v19250_v6, %s20374_s0  ;;  %v1897_v6 = vld [vmem:[%s25196_s2 + $0x8] sm:$0xff] }
 0x452   :  { %v19212_v12 = vpop.permute.xlu0 %19211 }
 0x453   :  { %v19214_v13 = vunpack.i.h.bf16 %v19212_v12  ;;  %v19213_v14 = vunpack.i.l.bf16 %v19212_v12  ;;  %v1899_v12 = vld [vmem:[%s25196_s2 + $0x18] sm:$0xff] }
 0x455   :  { %v17531_v15 = vpack.c.bf16 %v19214_v13, %v19213_v14  ;;  %v1900_v13 = vld [vmem:[%s25196_s2 + $0x20] sm:$0xff] }
 0x456   :  { %v19217_v16 = vpop.permute.xlu1 %19216 }
 0x457   :  { %v19219_v17 = vunpack.i.h.bf16 %v19217_v16  ;;  %v19218_v18 = vunpack.i.l.bf16 %v19217_v16  ;;  %17532 = vmatprep.subr.bf16.mxu1 %v17531_v15 }
 0x458   :  { %17534 = vmatpush3.bf16.msra.mxu1 %v17531_v15 }
 0x459   :  { %v17535_v19 = vpack.c.bf16 %v19219_v17, %v19218_v18  ;;  %v1901_v18 = vld [vmem:[%s25196_s2 + $0x28] sm:$0xff] }
 0x45a   :  { %v19222_v20 = vpop.permute.xlu0 %19221 }
 0x45b   :  { %v19224_v21 = vunpack.i.h.bf16 %v19222_v20  ;;  %v19223_v22 = vunpack.i.l.bf16 %v19222_v20  ;;  %17536 = vmatprep.subr.bf16.mxu1 %v17535_v19 }
 0x45c   :  { %17538 = vmatpush3.bf16.msra.mxu1 %v17535_v19  ;;  %v1902_v19 = vld [vmem:[%s25196_s2 + $0x30] sm:$0xff] }
 0x45d   :  { %v17539_v23 = vpack.c.bf16 %v19224_v21, %v19223_v22 }
 0x45e   :  { %v19227_v24 = vpop.permute.xlu1 %19226 }
 0x45f   :  { %v19229_v25 = vunpack.i.h.bf16 %v19227_v24  ;;  %v19228_v26 = vunpack.i.l.bf16 %v19227_v24  ;;  %17540 = vmatprep.subr.bf16.mxu1 %v17539_v23  ;;  %v1904_v24 = vld [vmem:[%s25196_s2 + $0x40] sm:$0xff] }
 0x460   :  { %17542 = vmatpush3.bf16.msra.mxu1 %v17539_v23  ;;  %v1903_v23 = vld [vmem:[%s25196_s2 + $0x38] sm:$0xff] }
 0x461   :  { %v17543_v27 = vpack.c.bf16 %v19229_v25, %v19228_v26  ;;  %v1905_v26 = vld [vmem:[%s25196_s2 + $0x48] sm:$0xff] }
 0x462   :  { %v19232_v28 = vpop.permute.xlu0 %19231  ;;  %v19237_v44 = vpop.permute.xlu1 %19236 }
 0x463   :  { %v19234_v30 = vunpack.i.h.bf16 %v19232_v28  ;;  %v19233_v32 = vunpack.i.l.bf16 %v19232_v28  ;;  %17544 = vmatprep.subr.bf16.mxu1 %v17543_v27  ;;  %v19239_v48 = vunpack.i.h.bf16 %v19237_v44  ;;  %v19238_v50 = vunpack.i.l.bf16 %v19237_v44  ;;  %v1907_v28 = vld [vmem:[%s25196_s2 + $0x58] sm:$0xff]  ;;  %v12460_v44 = vld [vmem:[%s25196_s2 + $0x148] sm:$0xff] }
 0x464   :  { %17546 = vmatpush3.bf16.msra.mxu1 %v17543_v27  ;;  %v1906_v27 = vld [vmem:[%s25196_s2 + $0x50] sm:$0xff] }
 0x465   :  { %v17547_v33 = vpack.c.bf16 %v19234_v30, %v19233_v32  ;;  %v17571_v55 = vpack.c.bf16 %v19239_v48, %v19238_v50  ;;  %v1908_v30 = vld [vmem:[%s25196_s2 + $0x60] sm:$0xff]  ;;  %v1909_v32 = vld [vmem:[%s25196_s2 + $0x68] sm:$0xff] }
 0x466   :  { %v19242_v0 = vpop.permute.xlu0 %19241  ;;  %v19247_v5 = vpop.permute.xlu1 %19246  ;;  %v12463_v48 = vld [vmem:[%s25196_s2 + $0x160] sm:$0xff]  ;;  %v12464_v50 = vld [vmem:[%s25196_s2 + $0x168] sm:$0xff] }
 0x467   :  { %17548 = vmatprep.subr.bf16.mxu1 %v17547_v33  ;;  %v19244_v3 = vunpack.i.h.bf16 %v19242_v0  ;;  %v19243_v4 = vunpack.i.l.bf16 %v19242_v0  ;;  %v19249_v8 = vunpack.i.h.bf16 %v19247_v5  ;;  %v19248_v9 = vunpack.i.l.bf16 %v19247_v5  ;;  %v12476_v0 = vld [vmem:[%s25196_s2 + $0x1c8] sm:$0xff] }
 0x468   :  { %17550 = vmatpush3.bf16.msra.mxu1 %v17547_v33  ;;  %v1910_v33 = vld [vmem:[%s25196_s2 + $0x70] sm:$0xff]  ;;  %v12510_v5 = vld [vmem:[%s25167_s4 + $0x28] sm:$0xff] }
 0x469   :  { %17552 = vmatprep.subr.bf16.mxu1 %v21062_v58  ;;  %v17575_v10 = vpack.c.bf16 %v19244_v3, %v19243_v4  ;;  %v17579_v16 = vpack.c.bf16 %v19249_v8, %v19248_v9  ;;  %v2734_v3 = vld [vmem:[%s25167_s4] sm:$0xff]  ;;  %v2735_v4 = vld [vmem:[%s25167_s4 + $0x8] sm:$0xff]  ;;  %v2736_v9 = vld [vmem:[%s25167_s4 + $0x10] sm:$0xff] }
 0x46a   :  { %v19257_v17 = vpop.permute.xlu1 %19256 }
 0x46b   :  { %14992 = vmatmul.mubr.msk.f32.vlgmr.msra.gmra.mrb[30].mxu1 %vm1977_vm4, %v12400_v34  ;;  %v19259_v20 = vunpack.i.h.bf16 %v19257_v17  ;;  %v19258_v21 = vunpack.i.l.bf16 %v19257_v17  ;;  %v1911_v34 = vld [vmem:[%s25196_s2 + $0x78] sm:$0xff]  ;;  %v3033_v17 = vld [vmem:[%s25171_s8] sm:$0xff] }
 0x46c   :  { %17554 = vmatpush3.bf16.msra.mxu1 %v21062_v58  ;;  %14994 = vmatprep.mubr.msk.f32.mxu1 %vm1977_vm4, %v12401_v36  ;;  %v12412_v58 = vld [vmem:[%s25196_s2 + $0x108] sm:$0xff]  ;;  %v1912_v36 = vld [vmem:[%s25196_s2 + $0x80] sm:$0xff] }
 0x46d   :  { %17556 = vmatprep.subr.bf16.mxu1 %v21065_v62  ;;  %v17587_v25 = vpack.c.bf16 %v19259_v20, %v19258_v21 }
 0x46f   :  { %14995 = vmatmul.mubr.msk.f32.gmra.mrb[32].mxu1 %vm1977_vm4, %v12402_v38  ;;  %v1913_v38 = vld [vmem:[%s25196_s2 + $0x88] sm:$0xff] }
 0x470   :  { %17558 = vmatpush3.bf16.msra.mxu1 %v21065_v62  ;;  %14997 = vmatprep.mubr.msk.f32.mxu1 %vm1977_vm4, %v12403_v39  ;;  %v12416_v62 = vld [vmem:[%s25196_s2 + $0x128] sm:$0xff]  ;;  %v1914_v39 = vld [vmem:[%s25196_s2 + $0x90] sm:$0xff] }
 0x471   :  { %17560 = vmatprep.subr.bf16.mxu1 %v21068_v2 }
 0x473   :  { %14998 = vmatmul.mubr.msk.f32.gmra.mrb[34].mxu1 %vm1977_vm4, %v12404_v40  ;;  %v1915_v40 = vld [vmem:[%s25196_s2 + $0x98] sm:$0xff] }
 0x474   :  { %17562 = vmatpush3.bf16.msra.mxu1 %v21068_v2  ;;  %15000 = vmatprep.mubr.msk.f32.mxu1 %vm1977_vm4, %v12405_v42  ;;  %v1896_v2 = vld [vmem:[%s25196_s2] sm:$0xff] }
 0x475   :  { %17564 = vmatprep.subr.bf16.mxu1 %v21074_v7  ;;  %v12459_v42 = vld [vmem:[%s25196_s2 + $0x140] sm:$0xff] }
 0x477   :  { %15001 = vmatmul.mubr.msk.f32.gmra.mrb[36].mxu1 %vm1977_vm4, %v12406_v45  ;;  %v12461_v45 = vld [vmem:[%s25196_s2 + $0x150] sm:$0xff] }
 0x478   :  { %17566 = vmatpush3.bf16.msra.mxu1 %v21074_v7  ;;  %15003 = vmatprep.mubr.msk.f32.mxu1 %vm1977_vm4, %v12407_v46  ;;  %v1898_v7 = vld [vmem:[%s25196_s2 + $0x10] sm:$0xff]  ;;  %v12462_v46 = vld [vmem:[%s25196_s2 + $0x158] sm:$0xff] }
 0x479   :  { %17568 = vmatprep.subr.bf16.mxu1 %v21078_v11 }
 0x47b   :  { %15004 = vmatmul.mubr.msk.f32.gmra.mrb[38].mxu1 %vm1977_vm4, %v12408_v51  ;;  %v12465_v51 = vld [vmem:[%s25196_s2 + $0x170] sm:$0xff] }
 0x47c   :  { %17570 = vmatpush3.bf16.msra.mxu1 %v21078_v11  ;;  %15006 = vmatprep.mubr.msk.f32.mxu1 %vm1977_vm4, %v12409_v52  ;;  %v19252_v11 = vpop.permute.xlu0 %19251  ;;  %v12466_v52 = vld [vmem:[%s25196_s2 + $0x178] sm:$0xff] }
 0x47d   :  { %17572 = vmatprep.subr.bf16.mxu1 %v17571_v55  ;;  %v19254_v14 = vunpack.i.h.bf16 %v19252_v11  ;;  %v19253_v15 = vunpack.i.l.bf16 %v19252_v11  ;;  %v12512_v11 = vld [vmem:[%s25167_s4 + $0x38] sm:$0xff] }
 0x47f   :  { %15007 = vmatmul.mubr.msk.f32.gmra.mrb[40].mxu1 %vm1977_vm4, %v12410_v56  ;;  %v17583_v22 = vpack.c.bf16 %v19254_v14, %v19253_v15  ;;  %v12468_v56 = vld [vmem:[%s25196_s2 + $0x188] sm:$0xff]  ;;  %v2738_v15 = vld [vmem:[%s25167_s4 + $0x20] sm:$0x3] }
 0x480   :  { %15009 = vmatprep.mubr.msk.f32.mxu1 %vm1977_vm4, %v12411_v57  ;;  %v12469_v57 = vld [vmem:[%s25196_s2 + $0x190] sm:$0xff] }
 0x483   :  { %15010 = vmatmul.mubr.msk.f32.gmra.mrb[42].mxu1 %vm1977_vm4, %v12412_v58  ;;  %v12470_v58 = vld [vmem:[%s25196_s2 + $0x198] sm:$0xff] }
 0x484   :  { %15012 = vmatprep.mubr.msk.f32.mxu1 %vm1977_vm4, %v12413_v59  ;;  %v12471_v59 = vld [vmem:[%s25196_s2 + $0x1a0] sm:$0xff] }
 0x487   :  { %15013 = vmatmul.mubr.msk.f32.gmra.mrb[44].mxu1 %vm1977_vm4, %v12414_v60  ;;  %v12472_v60 = vld [vmem:[%s25196_s2 + $0x1a8] sm:$0xff] }
 0x488   :  { %15015 = vmatprep.mubr.msk.f32.mxu1 %vm1977_vm4, %v12415_v61  ;;  %v12473_v61 = vld [vmem:[%s25196_s2 + $0x1b0] sm:$0xff] }
 0x48b   :  { %15016 = vmatmul.mubr.msk.f32.gmra.mrb[46].mxu1 %vm1977_vm4, %v12416_v62  ;;  %v12474_v62 = vld [vmem:[%s25196_s2 + $0x1b8] sm:$0xff] }
 0x48c   :  { %15018 = vmatprep.mubr.msk.f32.mxu1 %vm1977_vm4, %v12417_v63  ;;  %v12475_v63 = vld [vmem:[%s25196_s2 + $0x1c0] sm:$0xff] }
 0x48f   :  { %15019 = vmatmul.mubr.msk.f32.gmra.mrb[48].mxu1 %vm1977_vm4, %v12418_v1  ;;  %v12477_v1 = vld [vmem:[%s25196_s2 + $0x1d0] sm:$0xff] }
 0x490   :  { %15041 = vmatprep.mubr.msk.f32.mxu1 %vm1977_vm4, %v1896_v2  ;;  %v12478_v2 = vld [vmem:[%s25196_s2 + $0x1d8] sm:$0xff] }
 0x493   :  { %15042 = vmatmul.mubr.msk.f32.vlgmr.msra.gmra.mrb[30].mxu1 %vm1977_vm4, %v1897_v6  ;;  %v17591_v6 = vpack.c.bf16 %v2735_v4, %v2734_v3 }
 0x494   :  { %17574 = vmatpush3.bf16.msra.mxu1 %v17571_v55  ;;  %15044 = vmatprep.mubr.msk.f32.mxu1 %vm1977_vm4, %v1898_v7  ;;  %v12467_v55 = vld [vmem:[%s25196_s2 + $0x180] sm:$0xff]  ;;  %v12511_v7 = vld [vmem:[%s25167_s4 + $0x30] sm:$0xff]  ;;  %s20382_s2 = smov 122  }
 0x495   :  { %17576 = vmatprep.subr.bf16.mxu1 %v17575_v10  ;;  %v17599_v8 = vpack.c.bf16 %v12511_v7, %v12510_v5 }
 0x497   :  { %15045 = vmatmul.mubr.msk.f32.gmra.mrb[32].mxu1 %vm1977_vm4, %v1899_v12  ;;  %17600 = vmatprep.subr.bf16.mxu0 %v17599_v8 }
 0x498   :  { %17578 = vmatpush3.bf16.msra.mxu1 %v17575_v10  ;;  %15047 = vmatprep.mubr.msk.f32.mxu1 %vm1977_vm4, %v1900_v13  ;;  %v2737_v10 = vld [vmem:[%s25167_s4 + $0x18] sm:$0xff]  ;;  %v12513_v13 = vld [vmem:[%s25167_s4 + $0x40] sm:$0xff] }
 0x499   :  { %17580 = vmatprep.subr.bf16.mxu1 %v17579_v16  ;;  %17602 = vmatpush3.bf16.msra.mxu0 %v17599_v8  ;;  %v17595_v12 = vpack.c.bf16 %v2737_v10, %v2736_v9  ;;  %v17603_v14 = vpack.c.bf16 %v12513_v13, %v12512_v11 }
 0x49b   :  { %15048 = vmatmul.mubr.msk.f32.gmra.mrb[34].mxu1 %vm1977_vm4, %v1901_v18  ;;  %17604 = vmatprep.subr.bf16.mxu0 %v17603_v14  ;;  %v3034_v18 = vld [vmem:[%s25171_s8 + $0x8] sm:$0xff] }
 0x49c   :  { %17582 = vmatpush3.bf16.msra.mxu1 %v17579_v16  ;;  %15050 = vmatprep.mubr.msk.f32.mxu1 %vm1977_vm4, %v1902_v19  ;;  %v12514_v16 = vld [vmem:[%s25167_s4 + $0x48] sm:$0x3]  ;;  %v17607_v19 = vpack.c.bf16 %v3034_v18, %v3033_v17  ;;  %s20386_s4 = smov 118  }
 0x49d   :  { %17584 = vmatprep.subr.bf16.mxu1 %v17583_v22  ;;  %17606 = vmatpush3.bf16.msra.mxu0 %v17603_v14 }
 0x49e   :  { %15154 = vmatprep.subr.msk.mxu0 %vm2770_vm5, %v12514_v16 }
 0x49f   :  { %15051 = vmatmul.mubr.msk.f32.gmra.mrb[36].mxu1 %vm1977_vm4, %v1903_v23 }
 0x4a0   :  { %17586 = vmatpush3.bf16.msra.mxu1 %v17583_v22  ;;  %15053 = vmatprep.mubr.msk.f32.mxu1 %vm1977_vm4, %v1904_v24 }
 0x4a1   :  { %17588 = vmatprep.subr.bf16.mxu1 %v17587_v25  ;;  %15155 = vmatpush3.msk.msra.mxu0 %vm2770_vm5, %v12514_v16 }
 0x4a3   :  { %15054 = vmatmul.mubr.msk.f32.gmra.mrb[38].mxu1 %vm1977_vm4, %v1905_v26 }
 0x4a4   :  { %17590 = vmatpush3.bf16.msra.mxu1 %v17587_v25  ;;  %15056 = vmatprep.mubr.msk.f32.mxu1 %vm1977_vm4, %v1906_v27 }
 0x4a5   :  { %17592 = vmatprep.subr.bf16.mxu1 %v17591_v6 }
 0x4a7   :  { %15057 = vmatmul.mubr.msk.f32.gmra.mrb[40].mxu1 %vm1977_vm4, %v1907_v28 }
 0x4a8   :  { %15059 = vmatprep.mubr.msk.f32.mxu1 %vm1977_vm4, %v1908_v30 }
 0x4ab   :  { %15060 = vmatmul.mubr.msk.f32.gmra.mrb[42].mxu1 %vm1977_vm4, %v1909_v32 }
 0x4ac   :  { %15062 = vmatprep.mubr.msk.f32.mxu1 %vm1977_vm4, %v1910_v33  ;;  %v3035_v33 = vld [vmem:[%s25171_s8 + $0x10] sm:$0xff] }
 0x4af   :  { %15063 = vmatmul.mubr.msk.f32.gmra.mrb[44].mxu1 %vm1977_vm4, %v1911_v34  ;;  %v3036_v34 = vld [vmem:[%s25171_s8 + $0x18] sm:$0xff] }
 0x4b0   :  { %15065 = vmatprep.mubr.msk.f32.mxu1 %vm1977_vm4, %v1912_v36 }
 0x4b3   :  { %15066 = vmatmul.mubr.msk.f32.gmra.mrb[46].mxu1 %vm1977_vm4, %v1913_v38 }
 0x4b4   :  { %15068 = vmatprep.mubr.msk.f32.mxu1 %vm1977_vm4, %v1914_v39 }
 0x4b7   :  { %15069 = vmatmul.mubr.msk.f32.gmra.mrb[48].mxu1 %vm1977_vm4, %v1915_v40  ;;  %v17611_v40 = vpack.c.bf16 %v3036_v34, %v3035_v33 }
 0x4b8   :  { %15091 = vmatprep.mubr.msk.f32.mxu1 %vm1977_vm4, %v12459_v42 }
 0x4bb   :  { %15092 = vmatmul.mubr.msk.f32.vlgmr.msra.gmra.mrb[30].mxu1 %vm1977_vm4, %v12460_v44 }
 0x4bc   :  { %15094 = vmatprep.mubr.msk.f32.mxu1 %vm1977_vm4, %v12461_v45  ;;  %17594 = vmatpush3.bf16.msra.mxu1 %v17591_v6 }
 0x4bd   :  { %17596 = vmatprep.subr.bf16.mxu1 %v17595_v12 }
 0x4bf   :  { %15095 = vmatmul.mubr.msk.f32.gmra.mrb[32].mxu1 %vm1977_vm4, %v12462_v46 }
 0x4c0   :  { %15097 = vmatprep.mubr.msk.f32.mxu1 %vm1977_vm4, %v12463_v48  ;;  %17598 = vmatpush3.bf16.msra.mxu1 %v17595_v12 }
 0x4c1   :  { %15129 = vmatprep.subr.msk.mxu1 %vm2770_vm5, %v2738_v15 }
 0x4c3   :  { %15098 = vmatmul.mubr.msk.f32.gmra.mrb[34].mxu1 %vm1977_vm4, %v12464_v50 }
 0x4c4   :  { %15100 = vmatprep.mubr.msk.f32.mxu1 %vm1977_vm4, %v12465_v51  ;;  %15130 = vmatpush3.msk.msra.mxu1 %vm2770_vm5, %v2738_v15 }
 0x4c5   :  { %17608 = vmatprep.subr.bf16.mxu1 %v17607_v19 }
 0x4c7   :  { %15101 = vmatmul.mubr.msk.f32.gmra.mrb[36].mxu1 %vm1977_vm4, %v12466_v52 }
 0x4c8   :  { %15103 = vmatprep.mubr.msk.f32.mxu1 %vm1977_vm4, %v12467_v55 }
 0x4cb   :  { %15104 = vmatmul.mubr.msk.f32.gmra.mrb[38].mxu1 %vm1977_vm4, %v12468_v56 }
 0x4cc   :  { %15106 = vmatprep.mubr.msk.f32.mxu1 %vm1977_vm4, %v12469_v57 }
 0x4cf   :  { %15107 = vmatmul.mubr.msk.f32.gmra.mrb[40].mxu1 %vm1977_vm4, %v12470_v58 }
 0x4d0   :  { %15109 = vmatprep.mubr.msk.f32.mxu1 %vm1977_vm4, %v12471_v59 }
 0x4d3   :  { %15110 = vmatmul.mubr.msk.f32.gmra.mrb[42].mxu1 %vm1977_vm4, %v12472_v60 }
 0x4d4   :  { %15112 = vmatprep.mubr.msk.f32.mxu1 %vm1977_vm4, %v12473_v61 }
 0x4d7   :  { %15113 = vmatmul.mubr.msk.f32.gmra.mrb[44].mxu1 %vm1977_vm4, %v12474_v62 }
 0x4d8   :  { %15115 = vmatprep.mubr.msk.f32.mxu1 %vm1977_vm4, %v12475_v63 }
 0x4db   :  { %15116 = vmatmul.mubr.msk.f32.gmra.mrb[46].mxu1 %vm1977_vm4, %v12476_v0 }
 0x4dc   :  { %15118 = vmatprep.mubr.msk.f32.mxu1 %vm1977_vm4, %v12477_v1 }
 0x4df   :  { %15119 = vmatmul.mubr.msk.f32.gmra.mrb[48].mxu1 %vm1977_vm4, %v12478_v2 }
 0x58e   :  { %v15093_v20 = vpop.f32.mrb[30].mxu1 }
 0x58f   :  { %v2605_v21 = vpop.f32.mrb[31].mxu1 }
 0x592   :  { %v15096_v22 = vpop.f32.mrb[32].mxu1 }
 0x593   :  { %v2615_v23 = vpop.f32.mrb[33].mxu1 }
 0x596   :  { %v15099_v24 = vpop.f32.mrb[34].mxu1 }
 0x597   :  { %v2625_v25 = vpop.f32.mrb[35].mxu1 }
 0x59a   :  { %v15102_v26 = vpop.f32.mrb[36].mxu1 }
 0x59b   :  { %v2635_v27 = vpop.f32.mrb[37].mxu1 }
 0x59e   :  { %v15105_v28 = vpop.f32.mrb[38].mxu1 }
 0x59f   :  { %v2645_v30 = vpop.f32.mrb[39].mxu1 }
 0x5a2   :  { %v15108_v32 = vpop.f32.mrb[40].mxu1 }
 0x5a3   :  { %v2725_v36 = vmax.f32 %v15093_v20, %v15108_v32  ;;  %v2655_v38 = vpop.f32.mrb[41].mxu1 }
 0x5a4   :  { %v2724_v39 = vmax.f32 %v2605_v21, %v2655_v38 }
 0x5a6   :  { %v15111_v42 = vpop.f32.mrb[42].mxu1  ;;  %15131 = vmatprep.mubr.msk.f32.mxu1 %vm2739_vm6, %v2724_v39  ;;  %15156 = vmatprep.mubr.msk.f32.mxu0 %vm2739_vm6, %v2724_v39 }
 0x5a7   :  { %v2727_v44 = vmax.f32 %v15096_v22, %v15111_v42  ;;  %v2665_v45 = vpop.f32.mrb[43].mxu1  ;;  %15132 = vmatmul.mubr.msk.f32.vlgmr.msra.gmra.mrb[50].mxu1 %vm2739_vm6, %v2725_v36  ;;  %15157 = vmatmul.mubr.msk.f32.vlgmr.msra.gmra.mrb[20].mxu0 %vm2739_vm6, %v2725_v36 }
 0x5a8   :  { %v2726_v46 = vmax.f32 %v2615_v23, %v2665_v45  ;;  %17610 = vmatpush3.bf16.msra.mxu1 %v17607_v19 }
 0x5a9   :  { %17612 = vmatprep.subr.bf16.mxu1 %v17611_v40 }
 0x5aa   :  { %v15114_v48 = vpop.f32.mrb[44].mxu1  ;;  %15134 = vmatprep.mubr.msk.f32.mxu1 %vm2739_vm6, %v2726_v46  ;;  %15159 = vmatprep.mubr.msk.f32.mxu0 %vm2739_vm6, %v2726_v46 }
 0x5ab   :  { %v2729_v50 = vmax.f32 %v15099_v24, %v15114_v48  ;;  %v2675_v51 = vpop.f32.mrb[45].mxu1  ;;  %15135 = vmatmul.mubr.msk.f32.gmra.mrb[52].mxu1 %vm2739_vm6, %v2727_v44  ;;  %15160 = vmatmul.mubr.msk.f32.gmra.mrb[22].mxu0 %vm2739_vm6, %v2727_v44 }
 0x5ac   :  { %v2728_v52 = vmax.f32 %v2625_v25, %v2675_v51  ;;  %17614 = vmatpush3.bf16.msra.mxu1 %v17611_v40 }
 0x5ae   :  { %v15117_v55 = vpop.f32.mrb[46].mxu1  ;;  %15137 = vmatprep.mubr.msk.f32.mxu1 %vm2739_vm6, %v2728_v52  ;;  %15162 = vmatprep.mubr.msk.f32.mxu0 %vm2739_vm6, %v2728_v52 }
 0x5af   :  { %v2731_v56 = vmax.f32 %v15102_v26, %v15117_v55  ;;  %v2685_v57 = vpop.f32.mrb[47].mxu1  ;;  %15138 = vmatmul.mubr.msk.f32.gmra.mrb[54].mxu1 %vm2739_vm6, %v2729_v50  ;;  %15163 = vmatmul.mubr.msk.f32.gmra.mrb[24].mxu0 %vm2739_vm6, %v2729_v50 }
 0x5b0   :  { %v2730_v58 = vmax.f32 %v2635_v27, %v2685_v57 }
 0x5b2   :  { %v15120_v59 = vpop.f32.mrb[48].mxu1  ;;  %15140 = vmatprep.mubr.msk.f32.mxu1 %vm2739_vm6, %v2730_v58  ;;  %15165 = vmatprep.mubr.msk.f32.mxu0 %vm2739_vm6, %v2730_v58 }
 0x5b3   :  { %v2733_v60 = vmax.f32 %v15105_v28, %v15120_v59  ;;  %v2695_v61 = vpop.f32.mrb[49].mxu1  ;;  %15141 = vmatmul.mubr.msk.f32.gmra.mrb[56].mxu1 %vm2739_vm6, %v2731_v56  ;;  %15166 = vmatmul.mubr.msk.f32.gmra.mrb[26].mxu0 %vm2739_vm6, %v2731_v56 }
 0x5b4   :  { %v2732_v62 = vmax.f32 %v2645_v30, %v2695_v61 }
 0x5b6   :  { %15143 = vmatprep.mubr.msk.f32.mxu1 %vm2739_vm6, %v2732_v62  ;;  %15168 = vmatprep.mubr.msk.f32.mxu0 %vm2739_vm6, %v2732_v62 }
 0x5b7   :  { %15144 = vmatmul.mubr.msk.f32.gmra.mrb[58].mxu1 %vm2739_vm6, %v2733_v60  ;;  %15169 = vmatmul.mubr.msk.f32.gmra.mrb[28].mxu0 %vm2739_vm6, %v2733_v60 }
 0x5b8   :  { %15179 = vmatprep.mubr.msk.f32.mxu1 %vm1750_vm3, %v21022_v29  ;;  %v25187_v29 = vmov 0.0|0.0  }
 0x5b9   :  { %17630 = vmatprep.subr.bf16.mxu0 %v25187_v29  ;;  %17615 = vmatprep.subr.bf16.mxu1 %v25187_v29 }
 0x5bb   :  { %15180 = vmatmul.mubr.msk.f32.vlgmr.msra.gmra.mrb[60].mxu1 %vm1750_vm3, %v21024_v31  ;;  %v20379_v31 = vmov 0.0  }
 0x5bc   :  { %15182 = vmatprep.mubr.msk.f32.mxu1 %vm1750_vm3, %v21030_v35  ;;  %15309 = vmatprep.mubr.msk.f32.mxu0 %vm20378_vm7, %v20379_v31 }
 0x5bf   :  { %15183 = vmatmul.mubr.msk.f32.gmra.mrb[62].mxu1 %vm1750_vm3, %v21032_v37 }
 0x5c0   :  { %15185 = vmatprep.mubr.msk.f32.mxu1 %vm1750_vm3, %v21038_v41 }
 0x5c3   :  { %15186 = vmatmul.mubr.msk.f32.gmra.mrb[64].mxu1 %vm1750_vm3, %v21040_v43 }
 0x5c4   :  { %15188 = vmatprep.mubr.msk.f32.mxu1 %vm1750_vm3, %v21046_v47 }
 0x5c7   :  { %15189 = vmatmul.mubr.msk.f32.gmra.mrb[66].mxu1 %vm1750_vm3, %v21048_v49 }
 0x5c8   :  { %15191 = vmatprep.mubr.msk.f32.mxu1 %vm1750_vm3, %v21054_v53 }
 0x5cb   :  { %15192 = vmatmul.mubr.msk.f32.gmra.mrb[68].mxu1 %vm1750_vm3, %v21056_v54 }
 0x5cc   :  { %15214 = vmatprep.mubr.msk.f32.mxu1 %vm20378_vm7, %v20379_v31 }
 0x67a   :  { %v15133_v35 = vpop.f32.mrb[50].mxu1  ;;  %v15158_v37 = vpop.f32.mrb[20].mxu0 }
 0x67b   :  { %v3014_v41 = vmax.f32 %v15133_v35, %v15158_v37  ;;  %v2840_v43 = vpop.f32.mrb[51].mxu1  ;;  %v2964_v47 = vpop.f32.mrb[21].mxu0 }
 0x67c   :  { %v3013_v49 = vmax.f32 %v2840_v43, %v2964_v47 }
 0x67d   :  { %v3024_v53 = vmax.f32 %v3014_v41, 0.0 }
 0x67e   :  { %v3023_v54 = vmax.f32 %v3013_v49, 0.0  ;;  %v15136_v63 = vpop.f32.mrb[52].mxu1  ;;  %v15161_v0 = vpop.f32.mrb[22].mxu0 }
 0x67f   :  { %v3016_v1 = vmax.f32 %v15136_v63, %v15161_v0  ;;  %v2850_v2 = vpop.f32.mrb[53].mxu1  ;;  %v2974_v3 = vpop.f32.mrb[23].mxu0  ;;  %v3152_v63 = vld [vmem:[%s25169_s6] sm:$0xff]  ;;  %v3153_v0 = vld [vmem:[%s25169_s6 + $0x8] sm:$0xff] }
 0x680   :  { %v3015_v4 = vmax.f32 %v2850_v2, %v2974_v3  ;;  %v21420_v5 = vpack.c.bf16 %v3024_v53, %v3023_v54  ;;  %v21422_v6 = vpack.i.bf16 %v3024_v53, %v3023_v54  ;;  %v3155_v2 = vld [vmem:[%s25169_s6 + $0x18] sm:$0xff]  ;;  %v3156_v3 = vld [vmem:[%s25169_s6 + $0x20] sm:$0xff] }
 0x681   :  { %v3026_v7 = vmax.f32 %v3016_v1, 0.0  ;;  %v3154_v1 = vld [vmem:[%s25169_s6 + $0x10] sm:$0xff] }
 0x682   :  { %v3025_v8 = vmax.f32 %v3015_v4, 0.0  ;;  %v15139_v9 = vpop.f32.mrb[54].mxu1  ;;  %v15164_v10 = vpop.f32.mrb[24].mxu0  ;;  %v3157_v4 = vld [vmem:[%s25169_s6 + $0x28] sm:$0xff] }
 0x683   :  { %v3018_v11 = vmax.f32 %v15139_v9, %v15164_v10  ;;  %v2860_v12 = vpop.f32.mrb[55].mxu1  ;;  %v2984_v13 = vpop.f32.mrb[25].mxu0  ;;  %v3160_v9 = vld [vmem:[%s25169_s6 + $0x40] sm:$0xff]  ;;  %v3161_v10 = vld [vmem:[%s25169_s6 + $0x48] sm:$0xff] }
 0x684   :  { %v3017_v14 = vmax.f32 %v2860_v12, %v2984_v13  ;;  %v21424_v15 = vpack.c.bf16 %v3026_v7, %v3025_v8  ;;  %v21426_v16 = vpack.i.bf16 %v3026_v7, %v3025_v8  ;;  %v3158_v7 = vld [vmem:[%s25169_s6 + $0x30] sm:$0xff]  ;;  %v3159_v8 = vld [vmem:[%s25169_s6 + $0x38] sm:$0xff]  ;;  %v3164_v13 = vld [vmem:[%s25169_s6 + $0x60] sm:$0xff] }
 0x685   :  { %v3028_v17 = vmax.f32 %v3018_v11, 0.0  ;;  %v3162_v11 = vld [vmem:[%s25169_s6 + $0x50] sm:$0xff]  ;;  %v3163_v12 = vld [vmem:[%s25169_s6 + $0x58] sm:$0xff] }
 0x686   :  { %v3027_v18 = vmax.f32 %v3017_v14, 0.0  ;;  %v15142_v19 = vpop.f32.mrb[56].mxu1  ;;  %v15167_v20 = vpop.f32.mrb[26].mxu0  ;;  %v3165_v14 = vld [vmem:[%s25169_s6 + $0x68] sm:$0xff] }
 0x687   :  { %v3020_v21 = vmax.f32 %v15142_v19, %v15167_v20  ;;  %v2870_v22 = vpop.f32.mrb[57].mxu1  ;;  %v2994_v23 = vpop.f32.mrb[27].mxu0  ;;  %v3168_v19 = vld [vmem:[%s25169_s6 + $0x80] sm:$0xff]  ;;  %v3169_v20 = vld [vmem:[%s25169_s6 + $0x88] sm:$0xff] }
 0x688   :  { %v3019_v24 = vmax.f32 %v2870_v22, %v2994_v23  ;;  %v21428_v25 = vpack.c.bf16 %v3028_v17, %v3027_v18  ;;  %v21430_v26 = vpack.i.bf16 %v3028_v17, %v3027_v18  ;;  %v3166_v17 = vld [vmem:[%s25169_s6 + $0x70] sm:$0xff]  ;;  %v3167_v18 = vld [vmem:[%s25169_s6 + $0x78] sm:$0xff]  ;;  %v3172_v23 = vld [vmem:[%s25169_s6 + $0xa0] sm:$0xff] }
 0x689   :  { %v3030_v27 = vmax.f32 %v3020_v21, 0.0  ;;  %v3170_v21 = vld [vmem:[%s25169_s6 + $0x90] sm:$0xff]  ;;  %v3171_v22 = vld [vmem:[%s25169_s6 + $0x98] sm:$0xff] }
 0x68a   :  { %v3029_v28 = vmax.f32 %v3019_v24, 0.0  ;;  %v15145_v30 = vpop.f32.mrb[58].mxu1  ;;  %v15170_v32 = vpop.f32.mrb[28].mxu0  ;;  %v3173_v24 = vld [vmem:[%s25169_s6 + $0xa8] sm:$0xff] }
 0x68b   :  { %v3022_v33 = vmax.f32 %v15145_v30, %v15170_v32  ;;  %v2880_v34 = vpop.f32.mrb[59].mxu1  ;;  %v3004_v36 = vpop.f32.mrb[29].mxu0  ;;  %v3176_v32 = vld [vmem:[%s25169_s6 + $0xc0] sm:$0xff] }
 0x68c   :  { %v3021_v38 = vmax.f32 %v2880_v34, %v3004_v36  ;;  %v21432_v39 = vpack.c.bf16 %v3030_v27, %v3029_v28  ;;  %v21434_v40 = vpack.i.bf16 %v3030_v27, %v3029_v28  ;;  %v3174_v27 = vld [vmem:[%s25169_s6 + $0xb0] sm:$0xff]  ;;  %v3175_v28 = vld [vmem:[%s25169_s6 + $0xb8] sm:$0xff] }
 0x68d   :  { %v3032_v42 = vmax.f32 %v3022_v33, 0.0 }
 0x68e   :  { %v3031_v44 = vmax.f32 %v3021_v38, 0.0  ;;  %v15181_v45 = vpop.f32.mrb[60].mxu1 }
 0x68f   :  { %v3103_v46 = vpop.f32.mrb[61].mxu1 }
 0x690   :  { %v19260_v48 = vpack.i.bf16 %v15181_v45, %v3103_v46  ;;  %v17631_v50 = vpack.c.bf16 %v15181_v45, %v3103_v46  ;;  %v21436_v51 = vpack.c.bf16 %v3032_v42, %v3031_v44  ;;  %v21438_v52 = vpack.i.bf16 %v3032_v42, %v3031_v44 }
 0x692   :  { %19261 = vrot.lane.b32.xlu0 %v19260_v48, %s20374_s0  ;;  %v15184_v55 = vpop.f32.mrb[62].mxu1  ;;  %17632 = vmatpush3.bf16.msra.mxu0 %v17631_v50 }
 0x693   :  { %v3113_v56 = vpop.f32.mrb[63].mxu1  ;;  %17633 = vmatprep.subr.bf16.mxu0 %v25187_v29 }
 0x694   :  { %v19265_v57 = vpack.i.bf16 %v15184_v55, %v3113_v56  ;;  %v17634_v58 = vpack.c.bf16 %v15184_v55, %v3113_v56 }
 0x696   :  { %19266 = vrot.lane.b32.xlu1 %v19265_v57, %s20374_s0  ;;  %v15187_v59 = vpop.f32.mrb[64].mxu1  ;;  %17635 = vmatpush3.bf16.msra.mxu0 %v17634_v58 }
 0x697   :  { %v3123_v60 = vpop.f32.mrb[65].mxu1  ;;  %17636 = vmatprep.subr.bf16.mxu0 %v25187_v29 }
 0x698   :  { %v19270_v61 = vpack.i.bf16 %v15187_v59, %v3123_v60  ;;  %v17637_v62 = vpack.c.bf16 %v15187_v59, %v3123_v60 }
 0x69a   :  { %19271 = vrot.lane.b32.xlu0 %v19270_v61, %s20374_s0  ;;  %v15190_v35 = vpop.f32.mrb[66].mxu1  ;;  %17638 = vmatpush3.bf16.msra.mxu0 %v17637_v62 }
 0x69b   :  { %v3133_v37 = vpop.f32.mrb[67].mxu1  ;;  %17639 = vmatprep.subr.bf16.mxu0 %v25187_v29 }
 0x69c   :  { %v19275_v41 = vpack.i.bf16 %v15190_v35, %v3133_v37  ;;  %v17640_v43 = vpack.c.bf16 %v15190_v35, %v3133_v37 }
 0x69e   :  { %19276 = vrot.lane.b32.xlu1 %v19275_v41, %s20374_s0  ;;  %v15193_v47 = vpop.f32.mrb[68].mxu1  ;;  %17641 = vmatpush3.bf16.msra.mxu0 %v17640_v43 }
 0x69f   :  { %v3143_v49 = vpop.f32.mrb[69].mxu1  ;;  %17642 = vmatprep.subr.bf16.mxu0 %v25187_v29 }
 0x6a0   :  { %v19280_v53 = vpack.i.bf16 %v15193_v47, %v3143_v49  ;;  %v17643_v54 = vpack.c.bf16 %v15193_v47, %v3143_v49  ;;  %v12611_v49 = vld [vmem:[%s25169_s6 + $0x190] sm:$0xff] }
 0x6a2   :  { %19286 = vrot.lane.b32.xlu1 %v19260_v48, %s20375_s30  ;;  %19281 = vrot.lane.b32.xlu0 %v19280_v53, %s20374_s0 }
 0x6a3   :  { %17644 = vmatpush3.bf16.msra.mxu0 %v17643_v54 }
 0x6a4   :  { %17645 = vmatprep.subr.bf16.mxu0 %v25187_v29 }
 0x6a6   :  { %19296 = vrot.lane.b32.xlu1 %v19270_v61, %s20375_s30  ;;  %19291 = vrot.lane.b32.xlu0 %v19265_v57, %s20375_s30 }
 0x6a7   :  { %15310 = vmatmul.mubr.msk.f32.vlgmr.msra.gmra.mrb[30].mxu0 %vm1977_vm4, %v3152_v63 }
 0x6a8   :  { %15312 = vmatprep.mubr.msk.f32.mxu0 %vm20378_vm7, %v20379_v31 }
 0x6aa   :  { %19306 = vrot.lane.b32.xlu1 %v19280_v53, %s20375_s30  ;;  %19301 = vrot.lane.b32.xlu0 %v19275_v41, %s20375_s30 }
 0x6ab   :  { %15313 = vmatmul.mubr.msk.f32.gmra.mrb[32].mxu0 %vm1977_vm4, %v3153_v0 }
 0x6ac   :  { %15315 = vmatprep.mubr.msk.f32.mxu0 %vm20378_vm7, %v20379_v31 }
 0x6ae   :  { %19316 = vrot.lane.b32.xlu1 %v19260_v48, %s20376_s20  ;;  %19311 = vrot.lane.b32.xlu0 %v19260_v48, %s20373_s26 }
 0x6af   :  { %15316 = vmatmul.mubr.msk.f32.gmra.mrb[34].mxu0 %vm1977_vm4, %v3154_v1 }
 0x6b0   :  { %15318 = vmatprep.mubr.msk.f32.mxu0 %vm20378_vm7, %v20379_v31 }
 0x6b2   :  { %19326 = vrot.lane.b32.xlu1 %v19265_v57, %s20376_s20  ;;  %19321 = vrot.lane.b32.xlu0 %v19265_v57, %s20373_s26 }
 0x6b3   :  { %15319 = vmatmul.mubr.msk.f32.gmra.mrb[36].mxu0 %vm1977_vm4, %v3155_v2  ;;  %v12612_v2 = vld [vmem:[%s25169_s6 + $0x198] sm:$0xff] }
 0x6b4   :  { %15321 = vmatprep.mubr.msk.f32.mxu0 %vm20378_vm7, %v20379_v31 }
 0x6b6   :  { %19336 = vrot.lane.b32.xlu1 %v19270_v61, %s20376_s20  ;;  %19331 = vrot.lane.b32.xlu0 %v19270_v61, %s20373_s26 }
 0x6b7   :  { %15322 = vmatmul.mubr.msk.f32.gmra.mrb[38].mxu0 %vm1977_vm4, %v3156_v3 }
 0x6b8   :  { %15324 = vmatprep.mubr.msk.f32.mxu0 %vm20378_vm7, %v20379_v31 }
 0x6ba   :  { %19346 = vrot.lane.b32.xlu1 %v19275_v41, %s20376_s20  ;;  %19341 = vrot.lane.b32.xlu0 %v19275_v41, %s20373_s26 }
 0x6bb   :  { %15325 = vmatmul.mubr.msk.f32.gmra.mrb[40].mxu0 %vm1977_vm4, %v3157_v4 }
 0x6bc   :  { %15327 = vmatprep.mubr.msk.f32.mxu0 %vm20378_vm7, %v20379_v31 }
 0x6be   :  { %19356 = vrot.lane.b32.xlu1 %v19280_v53, %s20376_s20  ;;  %19351 = vrot.lane.b32.xlu0 %v19280_v53, %s20373_s26 }
 0x6bf   :  { %15328 = vmatmul.mubr.msk.f32.gmra.mrb[42].mxu0 %vm1977_vm4, %v3158_v7 }
 0x6c0   :  { %15330 = vmatprep.mubr.msk.f32.mxu0 %vm20378_vm7, %v20379_v31 }
 0x6c3   :  { %15331 = vmatmul.mubr.msk.f32.gmra.mrb[44].mxu0 %vm1977_vm4, %v3159_v8 }
 0x6c4   :  { %15333 = vmatprep.mubr.msk.f32.mxu0 %vm20378_vm7, %v20379_v31 }
 0x6c7   :  { %15334 = vmatmul.mubr.msk.f32.gmra.mrb[46].mxu0 %vm1977_vm4, %v3160_v9 }
 0x6c8   :  { %15336 = vmatprep.mubr.msk.f32.mxu0 %vm20378_vm7, %v20379_v31 }
 0x6cb   :  { %15337 = vmatmul.mubr.msk.f32.gmra.mrb[48].mxu0 %vm1977_vm4, %v3161_v10 }
 0x6cc   :  { %15339 = vmatprep.mubr.msk.f32.mxu0 %vm20378_vm7, %v20379_v31 }
 0x6cf   :  { %15340 = vmatmul.mubr.msk.f32.gmra.mrb[50].mxu0 %vm1977_vm4, %v3162_v11  ;;  %v12613_v11 = vld [vmem:[%s25169_s6 + $0x1a0] sm:$0xff] }
 0x6d0   :  { %15342 = vmatprep.mubr.msk.f32.mxu0 %vm20378_vm7, %v20379_v31 }
 0x6d3   :  { %15343 = vmatmul.mubr.msk.f32.gmra.mrb[52].mxu0 %vm1977_vm4, %v3163_v12 }
 0x6d4   :  { %15345 = vmatprep.mubr.msk.f32.mxu0 %vm20378_vm7, %v20379_v31 }
 0x6d7   :  { %15346 = vmatmul.mubr.msk.f32.gmra.mrb[54].mxu0 %vm1977_vm4, %v3164_v13 }
 0x6d8   :  { %15348 = vmatprep.mubr.msk.f32.mxu0 %vm20378_vm7, %v20379_v31 }
 0x6db   :  { %15349 = vmatmul.mubr.msk.f32.gmra.mrb[56].mxu0 %vm1977_vm4, %v3165_v14 }
 0x6dc   :  { %15351 = vmatprep.mubr.msk.f32.mxu0 %vm20378_vm7, %v20379_v31 }
 0x6df   :  { %15352 = vmatmul.mubr.msk.f32.gmra.mrb[58].mxu0 %vm1977_vm4, %v3166_v17 }
 0x6e0   :  { %15354 = vmatprep.mubr.msk.f32.mxu0 %vm20378_vm7, %v20379_v31 }
 0x6e3   :  { %15355 = vmatmul.mubr.msk.f32.gmra.mrb[60].mxu0 %vm1977_vm4, %v3167_v18 }
 0x6e4   :  { %15357 = vmatprep.mubr.msk.f32.mxu0 %vm20378_vm7, %v20379_v31 }
 0x6e7   :  { %15358 = vmatmul.mubr.msk.f32.gmra.mrb[62].mxu0 %vm1977_vm4, %v3168_v19 }
 0x6e8   :  { %15360 = vmatprep.mubr.msk.f32.mxu0 %vm20378_vm7, %v20379_v31 }
 0x6eb   :  { %15361 = vmatmul.mubr.msk.f32.gmra.mrb[64].mxu0 %vm1977_vm4, %v3169_v20 }
 0x6ec   :  { %15363 = vmatprep.mubr.msk.f32.mxu0 %vm20378_vm7, %v20379_v31 }
 0x6ef   :  { %15364 = vmatmul.mubr.msk.f32.gmra.mrb[66].mxu0 %vm1977_vm4, %v3170_v21 }
 0x6f0   :  { %15366 = vmatprep.mubr.msk.f32.mxu0 %vm20378_vm7, %v20379_v31 }
 0x6f3   :  { %15367 = vmatmul.mubr.msk.f32.gmra.mrb[68].mxu0 %vm1977_vm4, %v3171_v22  ;;  %v12614_v22 = vld [vmem:[%s25169_s6 + $0x1a8] sm:$0xff] }
 0x6f4   :  { %15369 = vmatprep.mubr.msk.f32.mxu0 %vm20378_vm7, %v20379_v31 }
 0x6f7   :  { %15370 = vmatmul.mubr.msk.f32.gmra.mrb[70].mxu0 %vm1977_vm4, %v3172_v23 }
 0x6f8   :  { %15372 = vmatprep.mubr.msk.f32.mxu0 %vm20378_vm7, %v20379_v31 }
 0x6fb   :  { %15373 = vmatmul.mubr.msk.f32.gmra.mrb[72].mxu0 %vm1977_vm4, %v3173_v24 }
 0x6fc   :  { %15375 = vmatprep.mubr.msk.f32.mxu0 %vm20378_vm7, %v20379_v31 }
 0x6ff   :  { %15376 = vmatmul.mubr.msk.f32.gmra.mrb[74].mxu0 %vm1977_vm4, %v3174_v27 }
 0x700   :  { %15378 = vmatprep.mubr.msk.f32.mxu0 %vm20378_vm7, %v20379_v31 }
 0x703   :  { %15379 = vmatmul.mubr.msk.f32.gmra.mrb[76].mxu0 %vm1977_vm4, %v3175_v28 }
 0x704   :  { %v19262_v30 = vpop.permute.xlu0 %19261  ;;  %15381 = vmatprep.mubr.msk.f32.mxu0 %vm20378_vm7, %v20379_v31 }
 0x705   :  { %v19264_v33 = vunpack.i.h.bf16 %v19262_v30  ;;  %v19263_v34 = vunpack.i.l.bf16 %v19262_v30 }
 0x707   :  { %v17646_v36 = vpack.c.bf16 %v19264_v33, %v19263_v34  ;;  %15382 = vmatmul.mubr.msk.f32.gmra.mrb[78].mxu0 %vm1977_vm4, %v3176_v32  ;;  %v12615_v34 = vld [vmem:[%s25169_s6 + $0x1b0] sm:$0xff] }
 0x708   :  { %v19267_v38 = vpop.permute.xlu1 %19266  ;;  %15404 = vmatprep.mubr.msk.f32.mxu0 %vm20378_vm7, %v20379_v31 }
 0x709   :  { %v19269_v42 = vunpack.i.h.bf16 %v19267_v38  ;;  %v19268_v44 = vunpack.i.l.bf16 %v19267_v38  ;;  %17647 = vmatpush3.bf16.msra.mxu0 %v17646_v36 }
 0x70a   :  { %17648 = vmatprep.subr.bf16.mxu0 %v25187_v29 }
 0x70b   :  { %v17649_v45 = vpack.c.bf16 %v19269_v42, %v19268_v44 }
 0x70c   :  { %v19272_v46 = vpop.permute.xlu0 %19271 }
 0x70d   :  { %v19274_v48 = vunpack.i.h.bf16 %v19272_v46  ;;  %v19273_v50 = vunpack.i.l.bf16 %v19272_v46  ;;  %17650 = vmatpush3.bf16.msra.mxu0 %v17649_v45  ;;  %v12616_v46 = vld [vmem:[%s25169_s6 + $0x1b8] sm:$0xff] }
 0x70e   :  { %17651 = vmatprep.subr.bf16.mxu0 %v25187_v29 }
 0x70f   :  { %v17652_v55 = vpack.c.bf16 %v19274_v48, %v19273_v50 }
 0x710   :  { %v19277_v56 = vpop.permute.xlu1 %19276 }
 0x711   :  { %v19279_v57 = vunpack.i.h.bf16 %v19277_v56  ;;  %v19278_v58 = vunpack.i.l.bf16 %v19277_v56  ;;  %17653 = vmatpush3.bf16.msra.mxu0 %v17652_v55 }
 0x712   :  { %17654 = vmatprep.subr.bf16.mxu0 %v25187_v29 }
 0x713   :  { %v17655_v59 = vpack.c.bf16 %v19279_v57, %v19278_v58  ;;  %v12617_v57 = vld [vmem:[%s25169_s6 + $0x1c0] sm:$0xff] }
 0x714   :  { %v19287_v60 = vpop.permute.xlu1 %19286  ;;  %v19282_v61 = vpop.permute.xlu0 %19281 }
 0x715   :  { %v19284_v62 = vunpack.i.h.bf16 %v19282_v61  ;;  %v19283_v35 = vunpack.i.l.bf16 %v19282_v61  ;;  %17656 = vmatpush3.bf16.msra.mxu0 %v17655_v59  ;;  %v19289_v37 = vunpack.i.h.bf16 %v19287_v60  ;;  %v19288_v41 = vunpack.i.l.bf16 %v19287_v60  ;;  %v12618_v59 = vld [vmem:[%s25169_s6 + $0x1c8] sm:$0xff]  ;;  %v12619_v60 = vld [vmem:[%s25169_s6 + $0x1d0] sm:$0xff]  ;;  %v12620_v61 = vld [vmem:[%s25169_s6 + $0x1d8] sm:$0xff] }
 0x716   :  { %17657 = vmatprep.subr.bf16.mxu0 %v25187_v29 }
 0x717   :  { %v17658_v43 = vpack.c.bf16 %v19284_v62, %v19283_v35  ;;  %v17661_v53 = vpack.c.bf16 %v19289_v37, %v19288_v41  ;;  %v12621_v62 = vld [vmem:[%s25169_s6 + $0x1e0] sm:$0xff]  ;;  %v12622_v35 = vld [vmem:[%s25169_s6 + $0x1e8] sm:$0xff]  ;;  %v12623_v37 = vld [vmem:[%s25169_s6 + $0x1f0] sm:$0xff] }
 0x718   :  { %v19292_v47 = vpop.permute.xlu0 %19291  ;;  %v19297_v0 = vpop.permute.xlu1 %19296  ;;  %v12624_v41 = vld [vmem:[%s25169_s6 + $0x1f8] sm:$0xff] }
 0x719   :  { %17659 = vmatpush3.bf16.msra.mxu0 %v17658_v43  ;;  %v19294_v54 = vunpack.i.h.bf16 %v19292_v47  ;;  %v19293_v63 = vunpack.i.l.bf16 %v19292_v47  ;;  %v19299_v3 = vunpack.i.h.bf16 %v19297_v0  ;;  %v19298_v4 = vunpack.i.l.bf16 %v19297_v0  ;;  %v12625_v43 = vld [vmem:[%s25169_s6 + $0x200] sm:$0xff]  ;;  %v12626_v47 = vld [vmem:[%s25169_s6 + $0x208] sm:$0xff] }
 0x71a   :  { %17660 = vmatprep.subr.bf16.mxu0 %v25187_v29  ;;  %v12630_v0 = vld [vmem:[%s25169_s6 + $0x228] sm:$0xff] }
 0x71b   :  { %v17664_v7 = vpack.c.bf16 %v19294_v54, %v19293_v63  ;;  %v17667_v12 = vpack.c.bf16 %v19299_v3, %v19298_v4  ;;  %v12629_v54 = vld [vmem:[%s25169_s6 + $0x220] sm:$0xff]  ;;  %v12536_v63 = vld [vmem:[%s25169_s6 + $0xc8] sm:$0xff]  ;;  %v12538_v3 = vld [vmem:[%s25169_s6 + $0xd8] sm:$0xff] }
 0x71c   :  { %v19302_v1 = vpop.permute.xlu0 %19301  ;;  %15405 = vmatmul.mubr.msk.f32.vlgmr.msra.gmra.mrb[30].mxu0 %vm1977_vm4, %v12611_v49  ;;  %v19307_v18 = vpop.permute.xlu1 %19306  ;;  %v12627_v49 = vld [vmem:[%s25169_s6 + $0x210] sm:$0xff]  ;;  %v12632_v4 = vld [vmem:[%s25169_s6 + $0x238] sm:$0xff] }
 0x71d   :  { %17662 = vmatpush3.bf16.msra.mxu0 %v17661_v53  ;;  %15407 = vmatprep.mubr.msk.f32.mxu0 %vm20378_vm7, %v20379_v31  ;;  %v19304_v13 = vunpack.i.h.bf16 %v19302_v1  ;;  %v19303_v14 = vunpack.i.l.bf16 %v19302_v1  ;;  %v19309_v23 = vunpack.i.h.bf16 %v19307_v18  ;;  %v19308_v24 = vunpack.i.l.bf16 %v19307_v18  ;;  %v12628_v53 = vld [vmem:[%s25169_s6 + $0x218] sm:$0xff]  ;;  %v12537_v1 = vld [vmem:[%s25169_s6 + $0xd0] sm:$0xff] }
 0x71e   :  { %17663 = vmatprep.subr.bf16.mxu0 %v25187_v29 }
 0x71f   :  { %v17670_v27 = vpack.c.bf16 %v19304_v13, %v19303_v14  ;;  %v17673_v36 = vpack.c.bf16 %v19309_v23, %v19308_v24  ;;  %v12635_v14 = vld [vmem:[%s25169_s6 + $0x250] sm:$0xff] }
 0x720   :  { %v19312_v8 = vpop.permute.xlu0 %19311  ;;  %15408 = vmatmul.mubr.msk.f32.gmra.mrb[32].mxu0 %vm1977_vm4, %v12612_v2  ;;  %v12631_v2 = vld [vmem:[%s25169_s6 + $0x230] sm:$0xff] }
 0x721   :  { %v19314_v9 = vunpack.i.h.bf16 %v19312_v8  ;;  %v19313_v10 = vunpack.i.l.bf16 %v19312_v8  ;;  %17665 = vmatpush3.bf16.msra.mxu0 %v17664_v7  ;;  %15410 = vmatprep.mubr.msk.f32.mxu0 %vm20378_vm7, %v20379_v31  ;;  %v12539_v7 = vld [vmem:[%s25169_s6 + $0xe0] sm:$0xff]  ;;  %v19317_v8 = vpop.permute.xlu1 %19316 }
 0x722   :  { %17666 = vmatprep.subr.bf16.mxu0 %v25187_v29  ;;  %v19319_v18 = vunpack.i.h.bf16 %v19317_v8 }
 0x723   :  { %v17616_v17 = vpack.c.bf16 %v19314_v9, %v19313_v10  ;;  %v12633_v9 = vld [vmem:[%s25169_s6 + $0x240] sm:$0xff]  ;;  %v12540_v10 = vld [vmem:[%s25169_s6 + $0xe8] sm:$0xff] }
 0x724   :  { %v19322_v19 = vpop.permute.xlu0 %19321  ;;  %15411 = vmatmul.mubr.msk.f32.gmra.mrb[34].mxu0 %vm1977_vm4, %v12613_v11  ;;  %v12634_v11 = vld [vmem:[%s25169_s6 + $0x248] sm:$0xff] }
 0x725   :  { %v19324_v20 = vunpack.i.h.bf16 %v19322_v19  ;;  %v19323_v21 = vunpack.i.l.bf16 %v19322_v19  ;;  %17617 = vmatpush3.bf16.msra.mxu1 %v17616_v17  ;;  %17668 = vmatpush3.bf16.msra.mxu0 %v17667_v12  ;;  %v12541_v12 = vld [vmem:[%s25169_s6 + $0xf0] sm:$0xff]  ;;  %v19327_v13 = vpop.permute.xlu1 %19326  ;;  %v12542_v17 = vld [vmem:[%s25169_s6 + $0xf8] sm:$0xff]  ;;  %v19318_v19 = vunpack.i.l.bf16 %v19317_v8  ;;  %v12674_v8 = vld [vmem:[%s25169_s6 + $0x2c0] sm:$0xff] }
 0x726   :  { %15413 = vmatprep.mubr.msk.f32.mxu0 %vm20378_vm7, %v20379_v31  ;;  %17618 = vmatprep.subr.bf16.mxu1 %v25187_v29  ;;  %v19329_v24 = vunpack.i.h.bf16 %v19327_v13 }
 0x727   :  { %v17619_v28 = vpack.c.bf16 %v19324_v20, %v19323_v21  ;;  %17669 = vmatprep.subr.bf16.mxu0 %v25187_v29  ;;  %v12661_v21 = vld [vmem:[%s25169_s6 + $0x258] sm:$0xff]  ;;  %v17676_v23 = vpack.c.bf16 %v19319_v18, %v19318_v19  ;;  %v12678_v18 = vld [vmem:[%s25169_s6 + $0x2e0] sm:$0xff]  ;;  %v12560_v19 = vld [vmem:[%s25169_s6 + $0x188] sm:$0xff] }
 0x728   :  { %v19332_v30 = vpop.permute.xlu0 %19331  ;;  %15414 = vmatmul.mubr.msk.f32.gmra.mrb[36].mxu0 %vm1977_vm4, %v12614_v22  ;;  %v12543_v22 = vld [vmem:[%s25169_s6 + $0x100] sm:$0xff] }
 0x729   :  { %v19334_v32 = vunpack.i.h.bf16 %v19332_v30  ;;  %v19333_v33 = vunpack.i.l.bf16 %v19332_v30  ;;  %17620 = vmatpush3.bf16.msra.mxu1 %v17619_v28  ;;  %17671 = vmatpush3.bf16.msra.mxu0 %v17670_v27  ;;  %v19337_v20 = vpop.permute.xlu1 %19336  ;;  %v19328_v27 = vunpack.i.l.bf16 %v19327_v13  ;;  %v12662_v28 = vld [vmem:[%s25169_s6 + $0x260] sm:$0xff]  ;;  %v12544_v30 = vld [vmem:[%s25169_s6 + $0x108] sm:$0xff]  ;;  %v12558_v13 = vld [vmem:[%s25169_s6 + $0x178] sm:$0xff] }
 0x72a   :  { %15416 = vmatprep.mubr.msk.f32.mxu0 %vm20378_vm7, %v20379_v31  ;;  %17621 = vmatprep.subr.bf16.mxu1 %v25187_v29 }
 0x72b   :  { %v17622_v38 = vpack.c.bf16 %v19334_v32, %v19333_v33  ;;  %17672 = vmatprep.subr.bf16.mxu0 %v25187_v29  ;;  %v17679_v33 = vpack.c.bf16 %v19329_v24, %v19328_v27  ;;  %v12683_v24 = vld [vmem:[%s25169_s6 + $0x308] sm:$0xff]  ;;  %v12684_v27 = vld [vmem:[%s25169_s6 + $0x310] sm:$0xff] }
 0x72c   :  { %v19342_v42 = vpop.permute.xlu0 %19341  ;;  %15417 = vmatmul.mubr.msk.f32.gmra.mrb[38].mxu0 %vm1977_vm4, %v12615_v34  ;;  %v19339_v34 = vunpack.i.h.bf16 %v19337_v20 }
 0x72d   :  { %v19344_v44 = vunpack.i.h.bf16 %v19342_v42  ;;  %v19343_v45 = vunpack.i.l.bf16 %v19342_v42  ;;  %17623 = vmatpush3.bf16.msra.mxu1 %v17622_v38  ;;  %17674 = vmatpush3.bf16.msra.mxu0 %v17673_v36  ;;  %v19347_v32 = vpop.permute.xlu1 %19346  ;;  %v19338_v36 = vunpack.i.l.bf16 %v19337_v20  ;;  %v12663_v38 = vld [vmem:[%s25169_s6 + $0x268] sm:$0xff]  ;;  %v12545_v42 = vld [vmem:[%s25169_s6 + $0x110] sm:$0xff] }
 0x72e   :  { %15419 = vmatprep.mubr.msk.f32.mxu0 %vm20378_vm7, %v20379_v31  ;;  %17624 = vmatprep.subr.bf16.mxu1 %v25187_v29  ;;  %v12679_v20 = vld [vmem:[%s25169_s6 + $0x2e8] sm:$0xff] }
 0x72f   :  { %v17625_v48 = vpack.c.bf16 %v19344_v44, %v19343_v45  ;;  %17675 = vmatprep.subr.bf16.mxu0 %v25187_v29  ;;  %v17682_v44 = vpack.c.bf16 %v19339_v34, %v19338_v36  ;;  %v19349_v45 = vunpack.i.h.bf16 %v19347_v32  ;;  %v12714_v34 = vld [vmem:[%s25169_s6 + $0x338] sm:$0xff]  ;;  %v12715_v36 = vld [vmem:[%s25169_s6 + $0x340] sm:$0xff] }
 0x730   :  { %v19352_v50 = vpop.permute.xlu0 %19351  ;;  %15420 = vmatmul.mubr.msk.f32.gmra.mrb[40].mxu0 %vm1977_vm4, %v12616_v46  ;;  %v19348_v46 = vunpack.i.l.bf16 %v19347_v32  ;;  %v12712_v32 = vld [vmem:[%s25169_s6 + $0x328] sm:$0xff] }
 0x731   :  { %v19354_v55 = vunpack.i.h.bf16 %v19352_v50  ;;  %v19353_v56 = vunpack.i.l.bf16 %v19352_v50  ;;  %17626 = vmatpush3.bf16.msra.mxu1 %v17625_v48  ;;  %15422 = vmatprep.mubr.msk.f32.mxu0 %vm20378_vm7, %v20379_v31  ;;  %v19357_v48 = vpop.permute.xlu1 %19356  ;;  %v12664_v50 = vld [vmem:[%s25169_s6 + $0x270] sm:$0xff] }
 0x732   :  { %17627 = vmatprep.subr.bf16.mxu1 %v25187_v29 }
 0x733   :  { %v17628_v58 = vpack.c.bf16 %v19354_v55, %v19353_v56  ;;  %v12546_v55 = vld [vmem:[%s25169_s6 + $0x118] sm:$0xff]  ;;  %v17685_v56 = vpack.c.bf16 %v19349_v45, %v19348_v46  ;;  %v12719_v45 = vld [vmem:[%s25169_s6 + $0x360] sm:$0xff]  ;;  %v12720_v46 = vld [vmem:[%s25169_s6 + $0x368] sm:$0xff] }
 0x734   :  { %15423 = vmatmul.mubr.msk.f32.gmra.mrb[42].mxu0 %vm1977_vm4, %v12617_v57  ;;  %v19359_v57 = vunpack.i.h.bf16 %v19357_v48 }
 0x735   :  { %17629 = vmatpush3.bf16.msra.mxu1 %v17628_v58  ;;  %15425 = vmatprep.mubr.msk.f32.mxu0 %vm20378_vm7, %v20379_v31  ;;  %v19358_v58 = vunpack.i.l.bf16 %v19357_v48  ;;  %v12721_v48 = vld [vmem:[%s25169_s6 + $0x370] sm:$0xff] }
 0x736   :  { %17690 = vmatprep.subr.bf16.mxu1 %v25187_v29 }
 0x738   :  { %15426 = vmatmul.mubr.msk.f32.gmra.mrb[44].mxu0 %vm1977_vm4, %v12618_v59  ;;  %15215 = vmatmul.mubr.msk.f32.vlgmr.msra.gmra.mrb[70].mxu1 %vm1977_vm4, %v12536_v63  ;;  %v12665_v59 = vld [vmem:[%s25169_s6 + $0x278] sm:$0xff]  ;;  %v12552_v63 = vld [vmem:[%s25169_s6 + $0x148] sm:$0xff] }
 0x739   :  { %15428 = vmatprep.mubr.msk.f32.mxu0 %vm20378_vm7, %v20379_v31  ;;  %15217 = vmatprep.mubr.msk.f32.mxu1 %vm20378_vm7, %v20379_v31 }
 0x73c   :  { %15429 = vmatmul.mubr.msk.f32.gmra.mrb[46].mxu0 %vm1977_vm4, %v12619_v60  ;;  %15218 = vmatmul.mubr.msk.f32.gmra.mrb[72].mxu1 %vm1977_vm4, %v12537_v1  ;;  %v12547_v60 = vld [vmem:[%s25169_s6 + $0x120] sm:$0xff]  ;;  %v12553_v1 = vld [vmem:[%s25169_s6 + $0x150] sm:$0xff] }
 0x73d   :  { %15431 = vmatprep.mubr.msk.f32.mxu0 %vm20378_vm7, %v20379_v31  ;;  %15220 = vmatprep.mubr.msk.f32.mxu1 %vm20378_vm7, %v20379_v31 }
 0x740   :  { %15432 = vmatmul.mubr.msk.f32.gmra.mrb[48].mxu0 %vm1977_vm4, %v12620_v61  ;;  %15221 = vmatmul.mubr.msk.f32.gmra.mrb[74].mxu1 %vm1977_vm4, %v12538_v3  ;;  %v17688_v61 = vpack.c.bf16 %v19359_v57, %v19358_v58  ;;  %v12554_v3 = vld [vmem:[%s25169_s6 + $0x158] sm:$0xff]  ;;  %v12725_v57 = vld [vmem:[%s25169_s6 + $0x390] sm:$0xff] }
 0x741   :  { %15434 = vmatprep.mubr.msk.f32.mxu0 %vm20378_vm7, %v20379_v31  ;;  %15223 = vmatprep.mubr.msk.f32.mxu1 %vm20378_vm7, %v20379_v31  ;;  %v12726_v58 = vld [vmem:[%s25169_s6 + $0x398] sm:$0xff] }
 0x744   :  { %15435 = vmatmul.mubr.msk.f32.gmra.mrb[50].mxu0 %vm1977_vm4, %v12621_v62  ;;  %15224 = vmatmul.mubr.msk.f32.gmra.mrb[76].mxu1 %vm1977_vm4, %v12539_v7  ;;  %v12666_v62 = vld [vmem:[%s25169_s6 + $0x280] sm:$0xff] }
 0x745   :  { %15437 = vmatprep.mubr.msk.f32.mxu0 %vm20378_vm7, %v20379_v31  ;;  %15226 = vmatprep.mubr.msk.f32.mxu1 %vm20378_vm7, %v20379_v31  ;;  %v12555_v7 = vld [vmem:[%s25169_s6 + $0x160] sm:$0xff] }
 0x748   :  { %15438 = vmatmul.mubr.msk.f32.gmra.mrb[52].mxu0 %vm1977_vm4, %v12622_v35  ;;  %15227 = vmatmul.mubr.msk.f32.gmra.mrb[78].mxu1 %vm1977_vm4, %v12540_v10  ;;  %v12548_v35 = vld [vmem:[%s25169_s6 + $0x128] sm:$0xff] }
 0x749   :  { %15440 = vmatprep.mubr.msk.f32.mxu0 %vm20378_vm7, %v20379_v31  ;;  %15229 = vmatprep.mubr.msk.f32.mxu1 %vm20378_vm7, %v20379_v31  ;;  %v12675_v10 = vld [vmem:[%s25169_s6 + $0x2c8] sm:$0xff] }
 0x74c   :  { %15441 = vmatmul.mubr.msk.f32.gmra.mrb[54].mxu0 %vm1977_vm4, %v12623_v37  ;;  %15230 = vmatmul.mubr.msk.f32.gmra.mrb[80].mxu1 %vm1977_vm4, %v12541_v12  ;;  %v12667_v37 = vld [vmem:[%s25169_s6 + $0x288] sm:$0xff]  ;;  %v12676_v12 = vld [vmem:[%s25169_s6 + $0x2d0] sm:$0xff] }
 0x74d   :  { %15443 = vmatprep.mubr.msk.f32.mxu0 %vm20378_vm7, %v20379_v31  ;;  %15232 = vmatprep.mubr.msk.f32.mxu1 %vm20378_vm7, %v20379_v31 }
 0x750   :  { %15444 = vmatmul.mubr.msk.f32.gmra.mrb[56].mxu0 %vm1977_vm4, %v12624_v41  ;;  %15233 = vmatmul.mubr.msk.f32.gmra.mrb[82].mxu1 %vm1977_vm4, %v12542_v17  ;;  %v12549_v41 = vld [vmem:[%s25169_s6 + $0x130] sm:$0xff]  ;;  %v12559_v17 = vld [vmem:[%s25169_s6 + $0x180] sm:$0xff] }
 0x751   :  { %15446 = vmatprep.mubr.msk.f32.mxu0 %vm20378_vm7, %v20379_v31  ;;  %15235 = vmatprep.mubr.msk.f32.mxu1 %vm20378_vm7, %v20379_v31 }
 0x754   :  { %15447 = vmatmul.mubr.msk.f32.gmra.mrb[58].mxu0 %vm1977_vm4, %v12625_v43  ;;  %15236 = vmatmul.mubr.msk.f32.gmra.mrb[84].mxu1 %vm1977_vm4, %v12543_v22  ;;  %v12668_v43 = vld [vmem:[%s25169_s6 + $0x290] sm:$0xff]  ;;  %v12681_v22 = vld [vmem:[%s25169_s6 + $0x2f8] sm:$0xff] }
 0x755   :  { %15449 = vmatprep.mubr.msk.f32.mxu0 %vm20378_vm7, %v20379_v31  ;;  %15238 = vmatprep.mubr.msk.f32.mxu1 %vm20378_vm7, %v20379_v31 }
 0x758   :  { %15450 = vmatmul.mubr.msk.f32.gmra.mrb[60].mxu0 %vm1977_vm4, %v12626_v47  ;;  %15239 = vmatmul.mubr.msk.f32.gmra.mrb[86].mxu1 %vm1977_vm4, %v12544_v30  ;;  %v12550_v47 = vld [vmem:[%s25169_s6 + $0x138] sm:$0xff]  ;;  %v12711_v30 = vld [vmem:[%s25169_s6 + $0x320] sm:$0xff] }
 0x759   :  { %15452 = vmatprep.mubr.msk.f32.mxu0 %vm20378_vm7, %v20379_v31  ;;  %15241 = vmatprep.mubr.msk.f32.mxu1 %vm20378_vm7, %v20379_v31 }
 0x75c   :  { %15453 = vmatmul.mubr.msk.f32.gmra.mrb[62].mxu0 %vm1977_vm4, %v12627_v49  ;;  %15242 = vmatmul.mubr.msk.f32.gmra.mrb[88].mxu1 %vm1977_vm4, %v12545_v42  ;;  %v12669_v49 = vld [vmem:[%s25169_s6 + $0x298] sm:$0xff]  ;;  %v12717_v42 = vld [vmem:[%s25169_s6 + $0x350] sm:$0xff] }
 0x75d   :  { %15455 = vmatprep.mubr.msk.f32.mxu0 %vm20378_vm7, %v20379_v31  ;;  %15244 = vmatprep.mubr.msk.f32.mxu1 %vm20378_vm7, %v20379_v31 }
 0x760   :  { %15456 = vmatmul.mubr.msk.f32.gmra.mrb[64].mxu0 %vm1977_vm4, %v12628_v53  ;;  %15245 = vmatmul.mubr.msk.f32.gmra.mrb[90].mxu1 %vm1977_vm4, %v12546_v55  ;;  %v12551_v53 = vld [vmem:[%s25169_s6 + $0x140] sm:$0xff] }
 0x761   :  { %15458 = vmatprep.mubr.msk.f32.mxu0 %vm20378_vm7, %v20379_v31  ;;  %15247 = vmatprep.mubr.msk.f32.mxu1 %vm20378_vm7, %v20379_v31  ;;  %v12723_v55 = vld [vmem:[%s25169_s6 + $0x380] sm:$0xff] }
 0x764   :  { %15459 = vmatmul.mubr.msk.f32.gmra.mrb[66].mxu0 %vm1977_vm4, %v12629_v54  ;;  %15248 = vmatmul.mubr.msk.f32.gmra.mrb[92].mxu1 %vm1977_vm4, %v12547_v60  ;;  %v12670_v54 = vld [vmem:[%s25169_s6 + $0x2a0] sm:$0xff]  ;;  %v12728_v60 = vld [vmem:[%s25169_s6 + $0x3a8] sm:$0xff] }
 0x765   :  { %15461 = vmatprep.mubr.msk.f32.mxu0 %vm20378_vm7, %v20379_v31  ;;  %15250 = vmatprep.mubr.msk.f32.mxu1 %vm20378_vm7, %v20379_v31 }
 0x768   :  { %15462 = vmatmul.mubr.msk.f32.gmra.mrb[68].mxu0 %vm1977_vm4, %v12630_v0  ;;  %15251 = vmatmul.mubr.msk.f32.gmra.mrb[94].mxu1 %vm1977_vm4, %v12548_v35  ;;  %v12671_v0 = vld [vmem:[%s25169_s6 + $0x2a8] sm:$0xff]  ;;  %v12731_v35 = vld [vmem:[%s25169_s6 + $0x3c0] sm:$0xff] }
 0x769   :  { %15464 = vmatprep.mubr.msk.f32.mxu0 %vm20378_vm7, %v20379_v31  ;;  %15253 = vmatprep.mubr.msk.f32.mxu1 %vm20378_vm7, %v20379_v31 }
 0x76c   :  { %15465 = vmatmul.mubr.msk.f32.gmra.mrb[70].mxu0 %vm1977_vm4, %v12631_v2  ;;  %15254 = vmatmul.mubr.msk.f32.gmra.mrb[96].mxu1 %vm1977_vm4, %v12549_v41  ;;  %v12672_v2 = vld [vmem:[%s25169_s6 + $0x2b0] sm:$0xff] }
 0x76d   :  { %15467 = vmatprep.mubr.msk.f32.mxu0 %vm20378_vm7, %v20379_v31  ;;  %15256 = vmatprep.mubr.msk.f32.mxu1 %vm20378_vm7, %v20379_v31 }
 0x770   :  { %15468 = vmatmul.mubr.msk.f32.gmra.mrb[72].mxu0 %vm1977_vm4, %v12632_v4  ;;  %15257 = vmatmul.mubr.msk.f32.gmra.mrb[98].mxu1 %vm1977_vm4, %v12550_v47  ;;  %v12673_v4 = vld [vmem:[%s25169_s6 + $0x2b8] sm:$0xff]  ;;  %v12733_v47 = vld [vmem:[%s25169_s6 + $0x3d0] sm:$0xff] }
 0x771   :  { %15470 = vmatprep.mubr.msk.f32.mxu0 %vm20378_vm7, %v20379_v31  ;;  %15259 = vmatprep.mubr.msk.f32.mxu1 %vm20378_vm7, %v20379_v31 }
 0x774   :  { %15471 = vmatmul.mubr.msk.f32.gmra.mrb[74].mxu0 %vm1977_vm4, %v12633_v9  ;;  %15260 = vmatmul.mubr.msk.f32.gmra.mrb[100].mxu1 %vm1977_vm4, %v12551_v53  ;;  %v12556_v9 = vld [vmem:[%s25169_s6 + $0x168] sm:$0xff] }
 0x775   :  { %15473 = vmatprep.mubr.msk.f32.mxu0 %vm20378_vm7, %v20379_v31  ;;  %15262 = vmatprep.mubr.msk.f32.mxu1 %vm20378_vm7, %v20379_v31 }
 0x778   :  { %15474 = vmatmul.mubr.msk.f32.gmra.mrb[76].mxu0 %vm1977_vm4, %v12634_v11  ;;  %15263 = vmatmul.mubr.msk.f32.gmra.mrb[102].mxu1 %vm1977_vm4, %v12552_v63  ;;  %v12557_v11 = vld [vmem:[%s25169_s6 + $0x170] sm:$0xff] }
 0x779   :  { %15476 = vmatprep.mubr.msk.f32.mxu0 %vm20378_vm7, %v20379_v31  ;;  %15265 = vmatprep.mubr.msk.f32.mxu1 %vm20378_vm7, %v20379_v31 }
 0x77c   :  { %15477 = vmatmul.mubr.msk.f32.gmra.mrb[78].mxu0 %vm1977_vm4, %v12635_v14  ;;  %15266 = vmatmul.mubr.msk.f32.gmra.mrb[104].mxu1 %vm1977_vm4, %v12553_v1  ;;  %v12677_v14 = vld [vmem:[%s25169_s6 + $0x2d8] sm:$0xff]  ;;  %v12735_v1 = vld [vmem:[%s25169_s6 + $0x3e0] sm:$0xff] }
 0x77d   :  { %15499 = vmatprep.mubr.msk.f32.mxu0 %vm20378_vm7, %v20379_v31  ;;  %15268 = vmatprep.mubr.msk.f32.mxu1 %vm20378_vm7, %v20379_v31 }
 0x780   :  { %15500 = vmatmul.mubr.msk.f32.vlgmr.msra.gmra.mrb[30].mxu0 %vm1977_vm4, %v12661_v21  ;;  %15269 = vmatmul.mubr.msk.f32.gmra.mrb[106].mxu1 %vm1977_vm4, %v12554_v3  ;;  %v12680_v21 = vld [vmem:[%s25169_s6 + $0x2f0] sm:$0xff] }
 0x781   :  { %17677 = vmatpush3.bf16.msra.mxu0 %v17676_v23  ;;  %15502 = vmatprep.mubr.msk.f32.mxu0 %vm20378_vm7, %v20379_v31  ;;  %v12682_v23 = vld [vmem:[%s25169_s6 + $0x300] sm:$0xff] }
 0x782   :  { %17678 = vmatprep.subr.bf16.mxu0 %v25187_v29  ;;  %15271 = vmatprep.mubr.msk.f32.mxu1 %vm20378_vm7, %v20379_v31 }
 0x784   :  { %15503 = vmatmul.mubr.msk.f32.gmra.mrb[32].mxu0 %vm1977_vm4, %v12662_v28  ;;  %15272 = vmatmul.mubr.msk.f32.gmra.mrb[108].mxu1 %vm1977_vm4, %v12555_v7  ;;  %v12685_v28 = vld [vmem:[%s25169_s6 + $0x318] sm:$0xff] }
 0x785   :  { %17680 = vmatpush3.bf16.msra.mxu0 %v17679_v33  ;;  %15505 = vmatprep.mubr.msk.f32.mxu0 %vm20378_vm7, %v20379_v31  ;;  %v12713_v33 = vld [vmem:[%s25169_s6 + $0x330] sm:$0xff] }
 0x786   :  { %17681 = vmatprep.subr.bf16.mxu0 %v25187_v29  ;;  %15274 = vmatprep.mubr.msk.f32.mxu1 %vm20378_vm7, %v20379_v31 }
 0x788   :  { %15506 = vmatmul.mubr.msk.f32.gmra.mrb[34].mxu0 %vm1977_vm4, %v12663_v38  ;;  %15275 = vmatmul.mubr.msk.f32.gmra.mrb[110].mxu1 %vm1977_vm4, %v12556_v9  ;;  %v12716_v38 = vld [vmem:[%s25169_s6 + $0x348] sm:$0xff] }
 0x789   :  { %17683 = vmatpush3.bf16.msra.mxu0 %v17682_v44  ;;  %15508 = vmatprep.mubr.msk.f32.mxu0 %vm20378_vm7, %v20379_v31  ;;  %v12718_v44 = vld [vmem:[%s25169_s6 + $0x358] sm:$0xff] }
 0x78a   :  { %17684 = vmatprep.subr.bf16.mxu0 %v25187_v29  ;;  %15277 = vmatprep.mubr.msk.f32.mxu1 %vm20378_vm7, %v20379_v31 }
 0x78c   :  { %15509 = vmatmul.mubr.msk.f32.gmra.mrb[36].mxu0 %vm1977_vm4, %v12664_v50  ;;  %15278 = vmatmul.mubr.msk.f32.gmra.mrb[112].mxu1 %vm1977_vm4, %v12557_v11  ;;  %v12722_v50 = vld [vmem:[%s25169_s6 + $0x378] sm:$0xff] }
 0x78d   :  { %17686 = vmatpush3.bf16.msra.mxu0 %v17685_v56  ;;  %15511 = vmatprep.mubr.msk.f32.mxu0 %vm20378_vm7, %v20379_v31  ;;  %v12724_v56 = vld [vmem:[%s25169_s6 + $0x388] sm:$0xff] }
 0x78e   :  { %17687 = vmatprep.subr.bf16.mxu0 %v25187_v29  ;;  %15280 = vmatprep.mubr.msk.f32.mxu1 %vm20378_vm7, %v20379_v31 }
 0x790   :  { %15512 = vmatmul.mubr.msk.f32.gmra.mrb[38].mxu0 %vm1977_vm4, %v12665_v59  ;;  %15281 = vmatmul.mubr.msk.f32.gmra.mrb[114].mxu1 %vm1977_vm4, %v12558_v13  ;;  %v12727_v59 = vld [vmem:[%s25169_s6 + $0x3a0] sm:$0xff] }
 0x791   :  { %17689 = vmatpush3.bf16.msra.mxu0 %v17688_v61  ;;  %15514 = vmatprep.mubr.msk.f32.mxu0 %vm20378_vm7, %v20379_v31  ;;  %v12729_v61 = vld [vmem:[%s25169_s6 + $0x3b0] sm:$0xff] }
 0x792   :  { %17840 = vmatprep.subr.bf16.mxu0 %v25187_v29  ;;  %15283 = vmatprep.mubr.msk.f32.mxu1 %vm20378_vm7, %v20379_v31 }
 0x794   :  { %15515 = vmatmul.mubr.msk.f32.gmra.mrb[40].mxu0 %vm1977_vm4, %v12666_v62  ;;  %15284 = vmatmul.mubr.msk.f32.gmra.mrb[116].mxu1 %vm1977_vm4, %v12559_v17  ;;  %v12730_v62 = vld [vmem:[%s25169_s6 + $0x3b8] sm:$0xff] }
 0x795   :  { %15517 = vmatprep.mubr.msk.f32.mxu0 %vm20378_vm7, %v20379_v31  ;;  %15286 = vmatprep.mubr.msk.f32.mxu1 %vm20378_vm7, %v20379_v31 }
 0x798   :  { %15518 = vmatmul.mubr.msk.f32.gmra.mrb[42].mxu0 %vm1977_vm4, %v12667_v37  ;;  %15287 = vmatmul.mubr.msk.f32.gmra.mrb[118].mxu1 %vm1977_vm4, %v12560_v19  ;;  %v12732_v37 = vld [vmem:[%s25169_s6 + $0x3c8] sm:$0xff] }
 0x799   :  { %15520 = vmatprep.mubr.msk.f32.mxu0 %vm20378_vm7, %v20379_v31  ;;  %15681 = vmatprep.mubr.msk.f32.mxu1 %vm20378_vm7, %v20379_v31 }
 0x79c   :  { %15521 = vmatmul.mubr.msk.f32.gmra.mrb[44].mxu0 %vm1977_vm4, %v12668_v43 }
 0x79d   :  { %15523 = vmatprep.mubr.msk.f32.mxu0 %vm20378_vm7, %v20379_v31 }
 0x7a0   :  { %15524 = vmatmul.mubr.msk.f32.gmra.mrb[46].mxu0 %vm1977_vm4, %v12669_v49 }
 0x7a1   :  { %15526 = vmatprep.mubr.msk.f32.mxu0 %vm20378_vm7, %v20379_v31 }
 0x7a4   :  { %15527 = vmatmul.mubr.msk.f32.gmra.mrb[48].mxu0 %vm1977_vm4, %v12670_v54  ;;  %v12734_v54 = vld [vmem:[%s25169_s6 + $0x3d8] sm:$0xff] }
 0x7a5   :  { %15529 = vmatprep.mubr.msk.f32.mxu0 %vm20378_vm7, %v20379_v31 }
 0x7a8   :  { %15530 = vmatmul.mubr.msk.f32.gmra.mrb[50].mxu0 %vm1977_vm4, %v12671_v0 }
 0x7a9   :  { %15532 = vmatprep.mubr.msk.f32.mxu0 %vm20378_vm7, %v20379_v31 }
 0x7ac   :  { %15533 = vmatmul.mubr.msk.f32.gmra.mrb[52].mxu0 %vm1977_vm4, %v12672_v2 }
 0x7ad   :  { %15535 = vmatprep.mubr.msk.f32.mxu0 %vm20378_vm7, %v20379_v31 }
 0x7b0   :  { %15536 = vmatmul.mubr.msk.f32.gmra.mrb[54].mxu0 %vm1977_vm4, %v12673_v4 }
 0x7b1   :  { %15538 = vmatprep.mubr.msk.f32.mxu0 %vm20378_vm7, %v20379_v31 }
 0x7b4   :  { %15539 = vmatmul.mubr.msk.f32.gmra.mrb[56].mxu0 %vm1977_vm4, %v12674_v8 }
 0x7b5   :  { %15541 = vmatprep.mubr.msk.f32.mxu0 %vm20378_vm7, %v20379_v31 }
 0x7b8   :  { %15542 = vmatmul.mubr.msk.f32.gmra.mrb[58].mxu0 %vm1977_vm4, %v12675_v10 }
 0x7b9   :  { %15544 = vmatprep.mubr.msk.f32.mxu0 %vm20378_vm7, %v20379_v31 }
 0x7bc   :  { %15545 = vmatmul.mubr.msk.f32.gmra.mrb[60].mxu0 %vm1977_vm4, %v12676_v12 }
 0x7bd   :  { %15547 = vmatprep.mubr.msk.f32.mxu0 %vm20378_vm7, %v20379_v31 }
 0x7c0   :  { %15548 = vmatmul.mubr.msk.f32.gmra.mrb[62].mxu0 %vm1977_vm4, %v12677_v14 }
 0x7c1   :  { %15550 = vmatprep.mubr.msk.f32.mxu0 %vm20378_vm7, %v20379_v31 }
 0x7c4   :  { %15551 = vmatmul.mubr.msk.f32.gmra.mrb[64].mxu0 %vm1977_vm4, %v12678_v18 }
 0x7c5   :  { %15553 = vmatprep.mubr.msk.f32.mxu0 %vm20378_vm7, %v20379_v31 }
 0x7c8   :  { %15554 = vmatmul.mubr.msk.f32.gmra.mrb[66].mxu0 %vm1977_vm4, %v12679_v20 }
 0x7c9   :  { %15556 = vmatprep.mubr.msk.f32.mxu0 %vm20378_vm7, %v20379_v31 }
 0x7cc   :  { %15557 = vmatmul.mubr.msk.f32.gmra.mrb[68].mxu0 %vm1977_vm4, %v12680_v21 }
 0x7cd   :  { %15559 = vmatprep.mubr.msk.f32.mxu0 %vm20378_vm7, %v20379_v31 }
 0x7d0   :  { %15560 = vmatmul.mubr.msk.f32.gmra.mrb[70].mxu0 %vm1977_vm4, %v12681_v22  ;;  %v4875_v22 = vld [vmem:[%s25170_s7] sm:$0xff] }
 0x7d1   :  { %15562 = vmatprep.mubr.msk.f32.mxu0 %vm20378_vm7, %v20379_v31 }
 0x7d4   :  { %15563 = vmatmul.mubr.msk.f32.gmra.mrb[72].mxu0 %vm1977_vm4, %v12682_v23  ;;  %v4876_v23 = vld [vmem:[%s25170_s7 + $0x8] sm:$0xff] }
 0x7d5   :  { %15565 = vmatprep.mubr.msk.f32.mxu0 %vm20378_vm7, %v20379_v31 }
 0x7d8   :  { %15566 = vmatmul.mubr.msk.f32.gmra.mrb[74].mxu0 %vm1977_vm4, %v12683_v24  ;;  %v17691_v24 = vpack.c.bf16 %v4876_v23, %v4875_v22 }
 0x7d9   :  { %15568 = vmatprep.mubr.msk.f32.mxu0 %vm20378_vm7, %v20379_v31 }
 0x7da   :  { %17692 = vmatpush3.bf16.msra.mxu1 %v17691_v24 }
 0x7db   :  { %17693 = vmatprep.subr.bf16.mxu1 %v25187_v29 }
 0x7dc   :  { %15569 = vmatmul.mubr.msk.f32.gmra.mrb[76].mxu0 %vm1977_vm4, %v12684_v27 }
 0x7dd   :  { %15571 = vmatprep.mubr.msk.f32.mxu0 %vm20378_vm7, %v20379_v31 }
 0x7e0   :  { %15572 = vmatmul.mubr.msk.f32.gmra.mrb[78].mxu0 %vm1977_vm4, %v12685_v28 }
 0x7e1   :  { %15594 = vmatprep.mubr.msk.f32.mxu0 %vm20378_vm7, %v20379_v31 }
 0x7e4   :  { %15595 = vmatmul.mubr.msk.f32.vlgmr.msra.gmra.mrb[30].mxu0 %vm1977_vm4, %v12711_v30 }
 0x7e5   :  { %15597 = vmatprep.mubr.msk.f32.mxu0 %vm20378_vm7, %v20379_v31 }
 0x7e8   :  { %15598 = vmatmul.mubr.msk.f32.gmra.mrb[32].mxu0 %vm1977_vm4, %v12712_v32 }
 0x7e9   :  { %15600 = vmatprep.mubr.msk.f32.mxu0 %vm20378_vm7, %v20379_v31 }
 0x7ec   :  { %15601 = vmatmul.mubr.msk.f32.gmra.mrb[34].mxu0 %vm1977_vm4, %v12713_v33 }
 0x7ed   :  { %15603 = vmatprep.mubr.msk.f32.mxu0 %vm20378_vm7, %v20379_v31 }
 0x7f0   :  { %15604 = vmatmul.mubr.msk.f32.gmra.mrb[36].mxu0 %vm1977_vm4, %v12714_v34  ;;  %v4877_v34 = vld [vmem:[%s25170_s7 + $0x10] sm:$0xff] }
 0x7f1   :  { %15606 = vmatprep.mubr.msk.f32.mxu0 %vm20378_vm7, %v20379_v31 }
 0x7f4   :  { %15607 = vmatmul.mubr.msk.f32.gmra.mrb[38].mxu0 %vm1977_vm4, %v12715_v36  ;;  %v4878_v36 = vld [vmem:[%s25170_s7 + $0x18] sm:$0xff] }
 0x7f5   :  { %15609 = vmatprep.mubr.msk.f32.mxu0 %vm20378_vm7, %v20379_v31 }
 0x7f8   :  { %15610 = vmatmul.mubr.msk.f32.gmra.mrb[40].mxu0 %vm1977_vm4, %v12716_v38  ;;  %v17694_v38 = vpack.c.bf16 %v4878_v36, %v4877_v34 }
 0x7f9   :  { %15612 = vmatprep.mubr.msk.f32.mxu0 %vm20378_vm7, %v20379_v31 }
 0x7fa   :  { %17695 = vmatpush3.bf16.msra.mxu1 %v17694_v38 }
 0x7fb   :  { %17696 = vmatprep.subr.bf16.mxu1 %v25187_v29 }
 0x7fc   :  { %15613 = vmatmul.mubr.msk.f32.gmra.mrb[42].mxu0 %vm1977_vm4, %v12717_v42 }
 0x7fd   :  { %15615 = vmatprep.mubr.msk.f32.mxu0 %vm20378_vm7, %v20379_v31 }
 0x800   :  { %15616 = vmatmul.mubr.msk.f32.gmra.mrb[44].mxu0 %vm1977_vm4, %v12718_v44  ;;  %v4879_v44 = vld [vmem:[%s25170_s7 + $0x20] sm:$0xff] }
 0x801   :  { %15618 = vmatprep.mubr.msk.f32.mxu0 %vm20378_vm7, %v20379_v31 }
 0x804   :  { %15619 = vmatmul.mubr.msk.f32.gmra.mrb[46].mxu0 %vm1977_vm4, %v12719_v45  ;;  %v4880_v45 = vld [vmem:[%s25170_s7 + $0x28] sm:$0xf] }
 0x805   :  { %15621 = vmatprep.mubr.msk.f32.mxu0 %vm20378_vm7, %v20379_v31 }
 0x808   :  { %15622 = vmatmul.mubr.msk.f32.gmra.mrb[48].mxu0 %vm1977_vm4, %v12720_v46 }
 0x809   :  { %15624 = vmatprep.mubr.msk.f32.mxu0 %vm20378_vm7, %v20379_v31 }
 0x80b   :  { %v22214_v41 = vpop.f32.mrb[70].mxu1 }
 0x80c   :  { %15625 = vmatmul.mubr.msk.f32.gmra.mrb[50].mxu0 %vm1977_vm4, %v12721_v48  ;;  %v15216_v43 = vpop.f32.mrb[71].mxu1  ;;  %v17697_v48 = vpack.c.bf16 %v4880_v45, %v4879_v44 }
 0x80d   :  { %15627 = vmatprep.mubr.msk.f32.mxu0 %vm20378_vm7, %v20379_v31 }
 0x80e   :  { %17699 = vmatpush3.bf16.msk.msra.mxu1 %vm22286_vm9, %v17697_v48 }
 0x80f   :  { %v22222_v49 = vpop.f32.mrb[72].mxu1  ;;  %17700 = vmatprep.subr.bf16.mxu1 %v25187_v29 }
 0x810   :  { %15628 = vmatmul.mubr.msk.f32.gmra.mrb[52].mxu0 %vm1977_vm4, %v12722_v50  ;;  %v15219_v53 = vpop.f32.mrb[73].mxu1 }
 0x811   :  { %15630 = vmatprep.mubr.msk.f32.mxu0 %vm20378_vm7, %v20379_v31 }
 0x813   :  { %v22230_v63 = vpop.f32.mrb[74].mxu1 }
 0x814   :  { %15631 = vmatmul.mubr.msk.f32.gmra.mrb[54].mxu0 %vm1977_vm4, %v12723_v55  ;;  %v15222_v0 = vpop.f32.mrb[75].mxu1 }
 0x815   :  { %15633 = vmatprep.mubr.msk.f32.mxu0 %vm20378_vm7, %v20379_v31 }
 0x817   :  { %v22238_v2 = vpop.f32.mrb[76].mxu1 }
 0x818   :  { %15634 = vmatmul.mubr.msk.f32.gmra.mrb[56].mxu0 %vm1977_vm4, %v12724_v56  ;;  %v15225_v3 = vpop.f32.mrb[77].mxu1 }
 0x819   :  { %15636 = vmatprep.mubr.msk.f32.mxu0 %vm20378_vm7, %v20379_v31 }
 0x81b   :  { %v22241_v4 = vpop.f32.mrb[78].mxu1 }
 0x81c   :  { %15637 = vmatmul.mubr.msk.f32.gmra.mrb[58].mxu0 %vm1977_vm4, %v12725_v57  ;;  %v15228_v7 = vpop.f32.mrb[79].mxu1 }
 0x81d   :  { %15639 = vmatprep.mubr.msk.f32.mxu0 %vm20378_vm7, %v20379_v31 }
 0x81f   :  { %v22245_v8 = vpop.f32.mrb[80].mxu1 }
 0x820   :  { %15640 = vmatmul.mubr.msk.f32.gmra.mrb[60].mxu0 %vm1977_vm4, %v12726_v58  ;;  %v15231_v9 = vpop.f32.mrb[81].mxu1 }
 0x821   :  { %15642 = vmatprep.mubr.msk.f32.mxu0 %vm20378_vm7, %v20379_v31 }
 0x823   :  { %v22247_v10 = vpop.f32.mrb[82].mxu1 }
 0x824   :  { %15643 = vmatmul.mubr.msk.f32.gmra.mrb[62].mxu0 %vm1977_vm4, %v12727_v59  ;;  %v15234_v11 = vpop.f32.mrb[83].mxu1 }
 0x825   :  { %15645 = vmatprep.mubr.msk.f32.mxu0 %vm20378_vm7, %v20379_v31 }
 0x827   :  { %v22249_v12 = vpop.f32.mrb[84].mxu1 }
 0x828   :  { %15646 = vmatmul.mubr.msk.f32.gmra.mrb[64].mxu0 %vm1977_vm4, %v12728_v60  ;;  %v15237_v13 = vpop.f32.mrb[85].mxu1 }
 0x829   :  { %15648 = vmatprep.mubr.msk.f32.mxu0 %vm20378_vm7, %v20379_v31 }
 0x82b   :  { %v22251_v14 = vpop.f32.mrb[86].mxu1 }
 0x82c   :  { %15649 = vmatmul.mubr.msk.f32.gmra.mrb[66].mxu0 %vm1977_vm4, %v12729_v61  ;;  %v15240_v17 = vpop.f32.mrb[87].mxu1 }
 0x82d   :  { %15651 = vmatprep.mubr.msk.f32.mxu0 %vm20378_vm7, %v20379_v31 }
 0x82f   :  { %v22253_v18 = vpop.f32.mrb[88].mxu1 }
 0x830   :  { %15652 = vmatmul.mubr.msk.f32.gmra.mrb[68].mxu0 %vm1977_vm4, %v12730_v62  ;;  %v15243_v19 = vpop.f32.mrb[89].mxu1 }
 0x831   :  { %15654 = vmatprep.mubr.msk.f32.mxu0 %vm20378_vm7, %v20379_v31 }
 0x833   :  { %v22255_v20 = vpop.f32.mrb[90].mxu1 }
 0x834   :  { %15655 = vmatmul.mubr.msk.f32.gmra.mrb[70].mxu0 %vm1977_vm4, %v12731_v35  ;;  %v15246_v21 = vpop.f32.mrb[91].mxu1 }
 0x835   :  { %15657 = vmatprep.mubr.msk.f32.mxu0 %vm20378_vm7, %v20379_v31 }
 0x837   :  { %v22263_v27 = vpop.f32.mrb[92].mxu1 }
 0x838   :  { %15658 = vmatmul.mubr.msk.f32.gmra.mrb[72].mxu0 %vm1977_vm4, %v12732_v37  ;;  %v15249_v28 = vpop.f32.mrb[93].mxu1 }
 0x839   :  { %15660 = vmatprep.mubr.msk.f32.mxu0 %vm20378_vm7, %v20379_v31 }
 0x83b   :  { %v22266_v30 = vpop.f32.mrb[94].mxu1 }
 0x83c   :  { %15661 = vmatmul.mubr.msk.f32.gmra.mrb[74].mxu0 %vm1977_vm4, %v12733_v47  ;;  %v15252_v32 = vpop.f32.mrb[95].mxu1 }
 0x83d   :  { %15663 = vmatprep.mubr.msk.f32.mxu0 %vm20378_vm7, %v20379_v31 }
 0x83f   :  { %v22268_v33 = vpop.f32.mrb[96].mxu1 }
 0x840   :  { %15664 = vmatmul.mubr.msk.f32.gmra.mrb[76].mxu0 %vm1977_vm4, %v12734_v54  ;;  %v15255_v42 = vpop.f32.mrb[97].mxu1 }
 0x841   :  { %15666 = vmatprep.mubr.msk.f32.mxu0 %vm20378_vm7, %v20379_v31 }
 0x843   :  { %v22283_v46 = vpop.f32.mrb[98].mxu1 }
 0x844   :  { %15667 = vmatmul.mubr.msk.f32.gmra.mrb[78].mxu0 %vm1977_vm4, %v12735_v1  ;;  %v15258_v55 = vpop.f32.mrb[99].mxu1 }
 0x845   :  { %16232 = vmatprep.mubr.msk.f32.mxu0 %vm20378_vm7, %v20379_v31 }
 0x847   :  { %v22293_v56 = vpop.f32.mrb[100].mxu1 }
 0x848   :  { %v15261_v57 = vpop.f32.mrb[101].mxu1 }
 0x84b   :  { %v22295_v58 = vpop.f32.mrb[102].mxu1 }
 0x84c   :  { %v15264_v59 = vpop.f32.mrb[103].mxu1 }
 0x84f   :  { %v22297_v60 = vpop.f32.mrb[104].mxu1 }
 0x850   :  { %v15267_v61 = vpop.f32.mrb[105].mxu1 }
 0x853   :  { %v22299_v62 = vpop.f32.mrb[106].mxu1 }
 0x854   :  { %v15270_v35 = vpop.f32.mrb[107].mxu1 }
 0x857   :  { %v22301_v37 = vpop.f32.mrb[108].mxu1 }
 0x858   :  { %v15273_v43 = vpop.f32.mrb[109].mxu1 }
 0x85b   :  { %v22303_v47 = vpop.f32.mrb[110].mxu1 }
 0x85c   :  { %v15276_v53 = vpop.f32.mrb[111].mxu1 }
 0x85f   :  { %v22305_v54 = vpop.f32.mrb[112].mxu1 }
 0x860   :  { %v15279_v0 = vpop.f32.mrb[113].mxu1 }
 0x863   :  { %v22307_v1 = vpop.f32.mrb[114].mxu1 }
 0x864   :  { %v15282_v3 = vpop.f32.mrb[115].mxu1 }
 0x867   :  { %v22309_v7 = vpop.f32.mrb[116].mxu1 }
 0x868   :  { %v15285_v9 = vpop.f32.mrb[117].mxu1 }
 0x86b   :  { %v22311_v11 = vpop.f32.mrb[118].mxu1 }
 0x86c   :  { %v15288_v13 = vpop.f32.mrb[119].mxu1 }
 0x8b7   :  { %v4662_v17 = vpop.f32.mrb[30].mxu0 }
 0x8b8   :  { %v18459_v19 = vadd.f32 %v4662_v17, %v22214_v41  ;;  %v15596_v21 = vpop.f32.mrb[31].mxu0 }
 0x8bb   :  { %v4667_v22 = vpop.f32.mrb[32].mxu0 }
 0x8bc   :  { %v18460_v23 = vadd.f32 %v4667_v22, %v22222_v49  ;;  %v15599_v24 = vpop.f32.mrb[33].mxu0 }
 0x8bf   :  { %v4672_v28 = vpop.f32.mrb[34].mxu0 }
 0x8c0   :  { %v22316_v32 = vadd.f32 %v4672_v28, %v22230_v63  ;;  %v15602_v34 = vpop.f32.mrb[35].mxu0 }
 0x8c3   :  { %v4677_v36 = vpop.f32.mrb[36].mxu0 }
 0x8c4   :  { %v22319_v38 = vadd.f32 %v4677_v36, %v22238_v2  ;;  %v15605_v42 = vpop.f32.mrb[37].mxu0  ;;  %v12776_v36 = vld [vmem:[%s25170_s7 + $0x38] sm:$0xff] }
 0x8c7   :  { %v4682_v44 = vpop.f32.mrb[38].mxu0 }
 0x8c8   :  { %v22322_v45 = vadd.f32 %v4682_v44, %v22241_v4  ;;  %v15608_v41 = vpop.f32.mrb[39].mxu0 }
 0x8cb   :  { %v4687_v48 = vpop.f32.mrb[40].mxu0 }
 0x8cc   :  { %v22325_v55 = vadd.f32 %v4687_v48, %v22245_v8  ;;  %v15611_v49 = vpop.f32.mrb[41].mxu0 }
 0x8cf   :  { %v4692_v57 = vpop.f32.mrb[42].mxu0 }
 0x8d0   :  { %v22328_v63 = vadd.f32 %v4692_v57, %v22247_v10  ;;  %v15614_v59 = vpop.f32.mrb[43].mxu0  ;;  %v12777_v57 = vld [vmem:[%s25170_s7 + $0x40] sm:$0xff] }
 0x8d1   :  { %v12778_v59 = vld [vmem:[%s25170_s7 + $0x48] sm:$0xff] }
 0x8d3   :  { %v4697_v61 = vpop.f32.mrb[44].mxu0 }
 0x8d4   :  { %v22331_v2 = vadd.f32 %v4697_v61, %v22249_v12  ;;  %v15617_v35 = vpop.f32.mrb[45].mxu0 }
 0x8d7   :  { %v4702_v43 = vpop.f32.mrb[46].mxu0 }
 0x8d8   :  { %v22334_v4 = vadd.f32 %v4702_v43, %v22251_v14  ;;  %v15620_v53 = vpop.f32.mrb[47].mxu0 }
 0x8db   :  { %v4707_v0 = vpop.f32.mrb[48].mxu0 }
 0x8dc   :  { %v22337_v8 = vadd.f32 %v4707_v0, %v22253_v18  ;;  %v15623_v3 = vpop.f32.mrb[49].mxu0 }
 0x8dd   :  { %v12779_v3 = vld [vmem:[%s25170_s7 + $0x50] sm:$0xff] }
 0x8df   :  { %v4712_v9 = vpop.f32.mrb[50].mxu0 }
 0x8e0   :  { %v22340_v10 = vadd.f32 %v4712_v9, %v22255_v20  ;;  %v15626_v13 = vpop.f32.mrb[51].mxu0  ;;  %v12775_v20 = vld [vmem:[%s25170_s7 + $0x30] sm:$0xff]  ;;  %v12780_v9 = vld [vmem:[%s25170_s7 + $0x58] sm:$0xf]  ;;  %s20381_s7 = smov 123  }
 0x8e3   :  { %v4717_v17 = vpop.f32.mrb[52].mxu0 }
 0x8e4   :  { %v22343_v12 = vadd.f32 %v4717_v17, %v22263_v27  ;;  %v15629_v21 = vpop.f32.mrb[53].mxu0 }
 0x8e7   :  { %v4722_v22 = vpop.f32.mrb[54].mxu0 }
 0x8e8   :  { %v22346_v14 = vadd.f32 %v4722_v22, %v22266_v30  ;;  %v15632_v24 = vpop.f32.mrb[55].mxu0  ;;  %v17707_v22 = vpack.c.bf16 %v12780_v9, %v12779_v3 }
 0x8ea   :  { %v4824_v27 = vrot.slane %v22346_v14, 4 }
 0x8eb   :  { %v4727_v28 = vpop.f32.mrb[56].mxu0 }
 0x8ec   :  { %v18472_v18 = vadd.f32 %v4727_v28, %v22268_v33  ;;  %v15635_v34 = vpop.f32.mrb[57].mxu0  ;;  %v17701_v33 = vpack.c.bf16 %v12776_v36, %v12775_v20 }
 0x8ee   :  { %v4825_v42 = vrot.slane %v18472_v18, 4 }
 0x8ef   :  { %v4732_v44 = vpop.f32.mrb[58].mxu0 }
 0x8f0   :  { %v4826_v30 = vsel %vm189_vm1, %v4824_v27, %v4825_v42  ;;  %v18473_v41 = vadd.f32 %v4732_v44, %v22283_v46  ;;  %v15638_v48 = vpop.f32.mrb[59].mxu0 }
 0x8f1   :  { %v22358_v49 = vmax.f32 %v18459_v19, %v4826_v30  ;;  %v17704_v19 = vpack.c.bf16 %v12778_v59, %v12777_v57 }
 0x8f2   :  { %v4827_v61 = vrot.slane %v18473_v41, 4 }
 0x8f3   :  { %v4737_v35 = vpop.f32.mrb[60].mxu0  ;;  %15682 = vmatmul.mubr.msk.f32.vlgmr.msra.gmra.mrb[120].mxu1 %vm4881_vm10, %v22358_v49 }
 0x8f4   :  { %v4828_v46 = vsel %vm189_vm1, %v4825_v42, %v4827_v61  ;;  %v18474_v43 = vadd.f32 %v4737_v35, %v22293_v56  ;;  %v15641_v53 = vpop.f32.mrb[61].mxu0  ;;  %15684 = vmatprep.mubr.msk.f32.mxu1 %vm20378_vm7, %v20379_v31  ;;  %17702 = vmatpush3.bf16.msra.mxu1 %v17701_v33 }
 0x8f5   :  { %v22372_v0 = vmax.f32 %v18460_v23, %v4828_v46  ;;  %17703 = vmatprep.subr.bf16.mxu1 %v25187_v29 }
 0x8f6   :  { %v4829_v13 = vrot.slane %v18474_v43, 4 }
 0x8f7   :  { %v4742_v56 = vpop.f32.mrb[62].mxu0  ;;  %15685 = vmatmul.mubr.msk.f32.gmra.mrb[122].mxu1 %vm4881_vm10, %v22372_v0 }
 0x8f8   :  { %v4830_v17 = vsel %vm189_vm1, %v4827_v61, %v4829_v13  ;;  %v18475_v23 = vadd.f32 %v4742_v56, %v22295_v58  ;;  %v15644_v21 = vpop.f32.mrb[63].mxu0  ;;  %15687 = vmatprep.mubr.msk.f32.mxu1 %vm20378_vm7, %v20379_v31  ;;  %17705 = vmatpush3.bf16.msra.mxu1 %v17704_v19 }
 0x8f9   :  { %v22388_v24 = vmax.f32 %v22316_v32, %v4830_v17  ;;  %17706 = vmatprep.subr.bf16.mxu1 %v25187_v29 }
 0x8fa   :  { %v4831_v28 = vrot.slane %v18475_v23, 4 }
 0x8fb   :  { %v4747_v18 = vpop.f32.mrb[64].mxu0  ;;  %15688 = vmatmul.mubr.msk.f32.gmra.mrb[124].mxu1 %vm4881_vm10, %v22388_v24 }
 0x8fc   :  { %v4832_v34 = vsel %vm189_vm1, %v4829_v13, %v4831_v28  ;;  %v18476_v58 = vadd.f32 %v4747_v18, %v22297_v60  ;;  %v15647_v20 = vpop.f32.mrb[65].mxu0  ;;  %15690 = vmatprep.mubr.msk.f32.mxu1 %vm20378_vm7, %v20379_v31  ;;  %17709 = vmatpush3.bf16.msk.msra.mxu1 %vm22286_vm9, %v17707_v22 }
 0x8fd   :  { %v22400_v32 = vmax.f32 %v22319_v38, %v4832_v34  ;;  %17710 = vmatprep.subr.bf16.mxu1 %v25187_v29 }
 0x8fe   :  { %v4833_v36 = vrot.slane %v18476_v58, 4 }
 0x8ff   :  { %v4752_v27 = vpop.f32.mrb[66].mxu0  ;;  %15691 = vmatmul.mubr.msk.f32.gmra.mrb[126].mxu1 %vm4881_vm10, %v22400_v32 }
 0x900   :  { %v4834_v42 = vsel %vm189_vm1, %v4831_v28, %v4833_v36  ;;  %v18477_v60 = vadd.f32 %v4752_v27, %v22299_v62  ;;  %v15650_v44 = vpop.f32.mrb[67].mxu0  ;;  %15693 = vmatprep.mubr.msk.f32.mxu1 %vm20378_vm7, %v20379_v31 }
 0x901   :  { %v22410_v30 = vmax.f32 %v22322_v45, %v4834_v42 }
 0x902   :  { %v4835_v38 = vrot.slane %v18477_v60, 4 }
 0x903   :  { %v4757_v41 = vpop.f32.mrb[68].mxu0  ;;  %15694 = vmatmul.mubr.msk.f32.gmra.mrb[128].mxu1 %vm4881_vm10, %v22410_v30 }
 0x904   :  { %v4836_v48 = vsel %vm189_vm1, %v4833_v36, %v4835_v38  ;;  %v18478_v33 = vadd.f32 %v4757_v41, %v22301_v37  ;;  %v15653_v57 = vpop.f32.mrb[69].mxu0  ;;  %15696 = vmatprep.mubr.msk.f32.mxu1 %vm20378_vm7, %v20379_v31 }
 0x905   :  { %v4867_v62 = vmax.f32 %v22325_v55, %v4836_v48 }
 0x906   :  { %v4837_v59 = vrot.slane %v18478_v33, 4 }
 0x907   :  { %v4762_v61 = vpop.f32.mrb[70].mxu0  ;;  %15697 = vmatmul.mubr.msk.f32.gmra.mrb[130].mxu1 %vm4881_vm10, %v4867_v62 }
 0x908   :  { %v4838_v45 = vsel %vm189_vm1, %v4835_v38, %v4837_v59  ;;  %v18479_v35 = vadd.f32 %v4762_v61, %v22303_v47  ;;  %v15656_v46 = vpop.f32.mrb[71].mxu0  ;;  %15699 = vmatprep.mubr.msk.f32.mxu1 %vm20378_vm7, %v20379_v31 }
 0x909   :  { %v4868_v37 = vmax.f32 %v22328_v63, %v4838_v45 }
 0x90a   :  { %v4839_v43 = vrot.slane %v18479_v35, 4 }
 0x90b   :  { %v4767_v53 = vpop.f32.mrb[72].mxu0  ;;  %15700 = vmatmul.mubr.msk.f32.gmra.mrb[132].mxu1 %vm4881_vm10, %v4868_v37 }
 0x90c   :  { %v4840_v55 = vsel %vm189_vm1, %v4837_v59, %v4839_v43  ;;  %v18480_v19 = vadd.f32 %v4767_v53, %v22305_v54  ;;  %v15659_v3 = vpop.f32.mrb[73].mxu0  ;;  %15702 = vmatprep.mubr.msk.f32.mxu1 %vm20378_vm7, %v20379_v31 }
 0x90d   :  { %v4869_v47 = vmax.f32 %v22331_v2, %v4840_v55 }
 0x90e   :  { %v4841_v9 = vrot.slane %v18480_v19, 4 }
 0x90f   :  { %v4772_v13 = vpop.f32.mrb[74].mxu0  ;;  %15703 = vmatmul.mubr.msk.f32.gmra.mrb[134].mxu1 %vm4881_vm10, %v4869_v47 }
 0x910   :  { %v4842_v63 = vsel %vm189_vm1, %v4839_v43, %v4841_v9  ;;  %v18481_v56 = vadd.f32 %v4772_v13, %v22307_v1  ;;  %v15662_v17 = vpop.f32.mrb[75].mxu0  ;;  %15705 = vmatprep.mubr.msk.f32.mxu1 %vm20378_vm7, %v20379_v31 }
 0x911   :  { %v4870_v54 = vmax.f32 %v22334_v4, %v4842_v63 }
 0x912   :  { %v4843_v23 = vrot.slane %v18481_v56, 4 }
 0x913   :  { %v4777_v21 = vpop.f32.mrb[76].mxu0  ;;  %15706 = vmatmul.mubr.msk.f32.gmra.mrb[136].mxu1 %vm4881_vm10, %v4870_v54 }
 0x914   :  { %v4844_v2 = vsel %vm189_vm1, %v4841_v9, %v4843_v23  ;;  %v18482_v22 = vadd.f32 %v4777_v21, %v22309_v7  ;;  %v15665_v28 = vpop.f32.mrb[77].mxu0  ;;  %15708 = vmatprep.mubr.msk.f32.mxu1 %vm20378_vm7, %v20379_v31 }
 0x915   :  { %v4871_v1 = vmax.f32 %v22337_v8, %v4844_v2 }
 0x916   :  { %v4845_v18 = vrot.slane %v18482_v22, 4 }
 0x917   :  { %v4782_v34 = vpop.f32.mrb[78].mxu0  ;;  %15709 = vmatmul.mubr.msk.f32.gmra.mrb[138].mxu1 %vm4881_vm10, %v4871_v1 }
 0x918   :  { %v4846_v4 = vsel %vm189_vm1, %v4843_v23, %v4845_v18  ;;  %v18483_v58 = vadd.f32 %v4782_v34, %v22311_v11  ;;  %v15668_v20 = vpop.f32.mrb[79].mxu0  ;;  %15711 = vmatprep.mubr.msk.f32.mxu1 %vm20378_vm7, %v20379_v31  ;;  %v5220_v11 = vld [vmem:[%s25174_s11] sm:$0xff] }
 0x919   :  { %v4872_v7 = vmax.f32 %v22340_v10, %v4846_v4  ;;  %v5221_v10 = vld [vmem:[%s25174_s11 + $0x8] sm:$0xff] }
 0x91a   :  { %v4847_v36 = vrot.slane %v18483_v58, 4 }
 0x91b   :  { %15712 = vmatmul.mubr.msk.f32.gmra.mrb[140].mxu1 %vm4881_vm10, %v4872_v7 }
 0x91c   :  { %v4848_v27 = vsel %vm189_vm1, %v4845_v18, %v4847_v36  ;;  %v4874_v8 = vmax.f32 %v22346_v14, %v4847_v36  ;;  %15714 = vmatprep.mubr.msk.f32.mxu1 %vm20378_vm7, %v20379_v31  ;;  %v5222_v14 = vld [vmem:[%s25174_s11 + $0x10] sm:$0xf] }
 0x91d   :  { %v4873_v42 = vmax.f32 %v22343_v12, %v4848_v27  ;;  %v17711_v12 = vpack.c.bf16 %v5221_v10, %v5220_v11 }
 0x91f   :  { %15715 = vmatmul.mubr.msk.f32.gmra.mrb[142].mxu1 %vm4881_vm10, %v4873_v42 }
 0x920   :  { %15717 = vmatprep.mubr.msk.f32.mxu1 %vm20378_vm7, %v20379_v31 }
 0x923   :  { %15718 = vmatmul.mubr.msk.f32.gmra.mrb[144].mxu1 %vm4881_vm10, %v4874_v8 }
 0x924   :  { %15732 = vmatprep.mubr.msk.f32.mxu1 %vm20378_vm7, %v20379_v31 }
 0x927   :  { %15733 = vmatmul.mubr.msk.f32.vlgmr.msra.gmra.mrb[146].mxu1 %vm4881_vm10, %v22358_v49 }
 0x928   :  { %15735 = vmatprep.mubr.msk.f32.mxu1 %vm20378_vm7, %v20379_v31  ;;  %17712 = vmatpush3.bf16.msra.mxu1 %v17711_v12 }
 0x929   :  { %15775 = vmatprep.subr.mxu1 %v20379_v31 }
 0x92b   :  { %15736 = vmatmul.mubr.msk.f32.gmra.mrb[148].mxu1 %vm4881_vm10, %v22372_v0 }
 0x92c   :  { %15738 = vmatprep.mubr.msk.f32.mxu1 %vm20378_vm7, %v20379_v31  ;;  %15776 = vmatpush3.msk.msra.mxu1 %vm189_vm1, %v5222_v14 }
 0x92f   :  { %15739 = vmatmul.mubr.msk.f32.gmra.mrb[150].mxu1 %vm4881_vm10, %v22388_v24 }
 0x930   :  { %15741 = vmatprep.mubr.msk.f32.mxu1 %vm20378_vm7, %v20379_v31 }
 0x933   :  { %15742 = vmatmul.mubr.msk.f32.gmra.mrb[152].mxu1 %vm4881_vm10, %v22400_v32 }
 0x934   :  { %15744 = vmatprep.mubr.msk.f32.mxu1 %vm20378_vm7, %v20379_v31 }
 0x937   :  { %15745 = vmatmul.mubr.msk.f32.gmra.mrb[154].mxu1 %vm4881_vm10, %v22410_v30 }
 0x938   :  { %15747 = vmatprep.mubr.msk.f32.mxu1 %vm20378_vm7, %v20379_v31 }
 0x93b   :  { %15748 = vmatmul.mubr.msk.f32.gmra.mrb[156].mxu1 %vm4881_vm10, %v4867_v62 }
 0x93c   :  { %15750 = vmatprep.mubr.msk.f32.mxu1 %vm20378_vm7, %v20379_v31 }
 0x93f   :  { %15751 = vmatmul.mubr.msk.f32.gmra.mrb[158].mxu1 %vm4881_vm10, %v4868_v37 }
 0x940   :  { %15753 = vmatprep.mubr.msk.f32.mxu1 %vm20378_vm7, %v20379_v31 }
 0x943   :  { %15754 = vmatmul.mubr.msk.f32.gmra.mrb[160].mxu1 %vm4881_vm10, %v4869_v47 }
 0x944   :  { %15756 = vmatprep.mubr.msk.f32.mxu1 %vm20378_vm7, %v20379_v31 }
 0x947   :  { %15757 = vmatmul.mubr.msk.f32.gmra.mrb[162].mxu1 %vm4881_vm10, %v4870_v54 }
 0x948   :  { %15759 = vmatprep.mubr.msk.f32.mxu1 %vm20378_vm7, %v20379_v31 }
 0x94b   :  { %15760 = vmatmul.mubr.msk.f32.gmra.mrb[164].mxu1 %vm4881_vm10, %v4871_v1 }
 0x94c   :  { %15762 = vmatprep.mubr.msk.f32.mxu1 %vm20378_vm7, %v20379_v31 }
 0x94f   :  { %15763 = vmatmul.mubr.msk.f32.gmra.mrb[166].mxu1 %vm4881_vm10, %v4872_v7 }
 0x950   :  { %15765 = vmatprep.mubr.msk.f32.mxu1 %vm20378_vm7, %v20379_v31 }
 0x953   :  { %15766 = vmatmul.mubr.msk.f32.gmra.mrb[168].mxu1 %vm4881_vm10, %v4873_v42 }
 0x954   :  { %15768 = vmatprep.mubr.msk.f32.mxu1 %vm20378_vm7, %v20379_v31 }
 0x957   :  { %15769 = vmatmul.mubr.msk.f32.gmra.mrb[170].mxu1 %vm4881_vm10, %v4874_v8 }
 0x958   :  { %15777 = vmatprep.mubr.msk.f32.mxu1 %vm20378_vm7, %v20379_v31 }
 0x9c6   :  { %v4990_v49 = vpop.f32.mrb[120].mxu1 }
 0x9c7   :  { %v15683_v0 = vpop.f32.mrb[121].mxu1 }
 0x9ca   :  { %v4995_v24 = vpop.f32.mrb[122].mxu1 }
 0x9cb   :  { %v15686_v32 = vpop.f32.mrb[123].mxu1 }
 0x9ce   :  { %v5000_v60 = vpop.f32.mrb[124].mxu1 }
 0x9cf   :  { %v15689_v44 = vpop.f32.mrb[125].mxu1 }
 0x9d2   :  { %v5005_v30 = vpop.f32.mrb[126].mxu1 }
 0x9d3   :  { %v15692_v38 = vpop.f32.mrb[127].mxu1 }
 0x9d6   :  { %v5010_v41 = vpop.f32.mrb[128].mxu1 }
 0x9d7   :  { %v15695_v48 = vpop.f32.mrb[129].mxu1 }
 0x9da   :  { %v5015_v33 = vpop.f32.mrb[130].mxu1 }
 0x9db   :  { %v15698_v57 = vpop.f32.mrb[131].mxu1 }
 0x9de   :  { %v5020_v62 = vpop.f32.mrb[132].mxu1 }
 0x9df   :  { %v15701_v59 = vpop.f32.mrb[133].mxu1 }
 0x9e2   :  { %v5025_v61 = vpop.f32.mrb[134].mxu1 }
 0x9e3   :  { %v15704_v45 = vpop.f32.mrb[135].mxu1 }
 0x9e6   :  { %v5030_v35 = vpop.f32.mrb[136].mxu1 }
 0x9e7   :  { %v15707_v46 = vpop.f32.mrb[137].mxu1 }
 0x9ea   :  { %v22516_v37 = vpop.f32.mrb[138].mxu1 }
 0x9eb   :  { %v15710_v43 = vpop.f32.mrb[139].mxu1 }
 0x9ee   :  { %v22518_v53 = vpop.f32.mrb[140].mxu1 }
 0x9ef   :  { %v15713_v55 = vpop.f32.mrb[141].mxu1 }
 0x9f2   :  { %v22520_v19 = vpop.f32.mrb[142].mxu1 }
 0x9f3   :  { %v15716_v3 = vpop.f32.mrb[143].mxu1 }
 0x9f6   :  { %v22522_v47 = vpop.f32.mrb[144].mxu1 }
 0x9f7   :  { %v15719_v9 = vpop.f32.mrb[145].mxu1 }
 0x9fa   :  { %v5130_v13 = vpop.f32.mrb[146].mxu1 }
 0x9fb   :  { %v5194_v63 = vmax.f32 %v4990_v49, %v5130_v13  ;;  %v15734_v56 = vpop.f32.mrb[147].mxu1 }
 0x9fd   :  { %v5207_v17 = vmax.f32 %v5194_v63, 0.0 }
 0x9fe   :  { %v5135_v54 = vpop.f32.mrb[148].mxu1 }
 0x9ff   :  { %v5195_v23 = vmax.f32 %v4995_v24, %v5135_v54  ;;  %v15737_v21 = vpop.f32.mrb[149].mxu1  ;;  %15778 = vmatmul.mubr.msk.f32.vlgmr.msra.gmra.mrb[172].mxu1 %vm5223_vm11, %v5207_v17 }
 0xa00   :  { %15780 = vmatprep.mubr.msk.f32.mxu1 %vm20378_vm7, %v20379_v31 }
 0xa01   :  { %v5208_v2 = vmax.f32 %v5195_v23, 0.0 }
 0xa02   :  { %v5140_v22 = vpop.f32.mrb[150].mxu1 }
 0xa03   :  { %v5196_v28 = vmax.f32 %v5000_v60, %v5140_v22  ;;  %v15740_v1 = vpop.f32.mrb[151].mxu1  ;;  %15781 = vmatmul.mubr.msk.f32.gmra.mrb[174].mxu1 %vm5223_vm11, %v5208_v2 }
 0xa04   :  { %15783 = vmatprep.mubr.msk.f32.mxu1 %vm20378_vm7, %v20379_v31 }
 0xa05   :  { %v5209_v18 = vmax.f32 %v5196_v28, 0.0 }
 0xa06   :  { %v5145_v34 = vpop.f32.mrb[152].mxu1 }
 0xa07   :  { %v5197_v4 = vmax.f32 %v5005_v30, %v5145_v34  ;;  %v15743_v58 = vpop.f32.mrb[153].mxu1  ;;  %15784 = vmatmul.mubr.msk.f32.gmra.mrb[176].mxu1 %vm5223_vm11, %v5209_v18 }
 0xa08   :  { %15786 = vmatprep.mubr.msk.f32.mxu1 %vm20378_vm7, %v20379_v31 }
 0xa09   :  { %v5210_v20 = vmax.f32 %v5197_v4, 0.0 }
 0xa0a   :  { %v5150_v7 = vpop.f32.mrb[154].mxu1 }
 0xa0b   :  { %v5198_v36 = vmax.f32 %v5010_v41, %v5150_v7  ;;  %v15746_v27 = vpop.f32.mrb[155].mxu1  ;;  %15787 = vmatmul.mubr.msk.f32.gmra.mrb[178].mxu1 %vm5223_vm11, %v5210_v20 }
 0xa0c   :  { %15789 = vmatprep.mubr.msk.f32.mxu1 %vm20378_vm7, %v20379_v31 }
 0xa0d   :  { %v5211_v8 = vmax.f32 %v5198_v36, 0.0 }
 0xa0e   :  { %v5155_v42 = vpop.f32.mrb[156].mxu1 }
 0xa0f   :  { %v5199_v11 = vmax.f32 %v5015_v33, %v5155_v42  ;;  %v15749_v10 = vpop.f32.mrb[157].mxu1  ;;  %15790 = vmatmul.mubr.msk.f32.gmra.mrb[180].mxu1 %vm5223_vm11, %v5211_v8 }
 0xa10   :  { %15792 = vmatprep.mubr.msk.f32.mxu1 %vm20378_vm7, %v20379_v31 }
 0xa11   :  { %v5212_v12 = vmax.f32 %v5199_v11, 0.0 }
 0xa12   :  { %v5160_v14 = vpop.f32.mrb[158].mxu1 }
 0xa13   :  { %v5200_v49 = vmax.f32 %v5020_v62, %v5160_v14  ;;  %v15752_v0 = vpop.f32.mrb[159].mxu1  ;;  %15793 = vmatmul.mubr.msk.f32.gmra.mrb[182].mxu1 %vm5223_vm11, %v5212_v12 }
 0xa14   :  { %15795 = vmatprep.mubr.msk.f32.mxu1 %vm20378_vm7, %v20379_v31 }
 0xa15   :  { %v5213_v24 = vmax.f32 %v5200_v49, 0.0 }
 0xa16   :  { %v5165_v32 = vpop.f32.mrb[160].mxu1 }
 0xa17   :  { %v5201_v60 = vmax.f32 %v5025_v61, %v5165_v32  ;;  %v15755_v44 = vpop.f32.mrb[161].mxu1  ;;  %15796 = vmatmul.mubr.msk.f32.gmra.mrb[184].mxu1 %vm5223_vm11, %v5213_v24 }
 0xa18   :  { %15798 = vmatprep.mubr.msk.f32.mxu1 %vm20378_vm7, %v20379_v31 }
 0xa19   :  { %v5214_v30 = vmax.f32 %v5201_v60, 0.0 }
 0xa1a   :  { %v5170_v38 = vpop.f32.mrb[162].mxu1 }
 0xa1b   :  { %v5202_v41 = vmax.f32 %v5030_v35, %v5170_v38  ;;  %v15758_v48 = vpop.f32.mrb[163].mxu1  ;;  %15799 = vmatmul.mubr.msk.f32.gmra.mrb[186].mxu1 %vm5223_vm11, %v5214_v30 }
 0xa1c   :  { %15801 = vmatprep.mubr.msk.f32.mxu1 %vm20378_vm7, %v20379_v31 }
 0xa1d   :  { %v5215_v33 = vmax.f32 %v5202_v41, 0.0  ;;  %v12809_v41 = vld [vmem:[%s25172_s9 + $0xf0] sm:$0xff] }
 0xa1e   :  { %v5175_v57 = vpop.f32.mrb[164].mxu1 }
 0xa1f   :  { %v5203_v62 = vmax.f32 %v22516_v37, %v5175_v57  ;;  %v15761_v59 = vpop.f32.mrb[165].mxu1  ;;  %15802 = vmatmul.mubr.msk.f32.gmra.mrb[188].mxu1 %vm5223_vm11, %v5215_v33 }
 0xa20   :  { %15804 = vmatprep.mubr.msk.f32.mxu1 %vm20378_vm7, %v20379_v31 }
 0xa21   :  { %v5216_v61 = vmax.f32 %v5203_v62, 0.0 }
 0xa22   :  { %v5180_v45 = vpop.f32.mrb[166].mxu1 }
 0xa23   :  { %v5204_v35 = vmax.f32 %v22518_v53, %v5180_v45  ;;  %v15764_v46 = vpop.f32.mrb[167].mxu1  ;;  %15805 = vmatmul.mubr.msk.f32.gmra.mrb[190].mxu1 %vm5223_vm11, %v5216_v61 }
 0xa24   :  { %15807 = vmatprep.mubr.msk.f32.mxu1 %vm20378_vm7, %v20379_v31 }
 0xa25   :  { %v5217_v43 = vmax.f32 %v5204_v35, 0.0 }
 0xa26   :  { %v5185_v55 = vpop.f32.mrb[168].mxu1 }
 0xa27   :  { %v5205_v37 = vmax.f32 %v22520_v19, %v5185_v55  ;;  %v15767_v3 = vpop.f32.mrb[169].mxu1  ;;  %15808 = vmatmul.mubr.msk.f32.gmra.mrb[192].mxu1 %vm5223_vm11, %v5217_v43 }
 0xa28   :  { %15810 = vmatprep.mubr.msk.f32.mxu1 %vm20378_vm7, %v20379_v31 }
 0xa29   :  { %v5218_v9 = vmax.f32 %v5205_v37, 0.0 }
 0xa2a   :  { %v5190_v13 = vpop.f32.mrb[170].mxu1 }
 0xa2b   :  { %v5206_v53 = vmax.f32 %v22522_v47, %v5190_v13  ;;  %v15770_v63 = vpop.f32.mrb[171].mxu1  ;;  %15811 = vmatmul.mubr.msk.f32.gmra.mrb[194].mxu1 %vm5223_vm11, %v5218_v9 }
 0xa2c   :  { %15813 = vmatprep.mubr.msk.f32.mxu1 %vm20378_vm7, %v20379_v31 }
 0xa2d   :  { %v5219_v56 = vmax.f32 %v5206_v53, 0.0 }
 0xa2f   :  { %15814 = vmatmul.mubr.msk.f32.gmra.mrb[196].mxu1 %vm5223_vm11, %v5219_v56 }
 0xa30   :  { %15842 = vmatprep.mubr.msk.f32.mxu1 %vm5508_vm12, %v12809_v41  ;;  %v12825_v41 = vld [vmem:[%s25172_s9 + $0x170] sm:$0xff] }
 0xad2   :  { %v5332_v19 = vpop.f32.mrb[172].mxu1 }
 0xad3   :  { %v15779_v17 = vpop.f32.mrb[173].mxu1 }
 0xad6   :  { %v5337_v54 = vpop.f32.mrb[174].mxu1 }
 0xad7   :  { %v15782_v23 = vpop.f32.mrb[175].mxu1  ;;  %v19360_v21 = vpack.i.bf16 %v5337_v54, %v5332_v19  ;;  %v22565_v2 = vpack.c.bf16 %v5337_v54, %v5332_v19 }
 0xad9   :  { %19361 = vrot.lane.b32.xlu0 %v19360_v21, %s20373_s26 }
 0xada   :  { %v5342_v22 = vpop.f32.mrb[176].mxu1 }
 0xadb   :  { %v15785_v47 = vpop.f32.mrb[177].mxu1 }
 0xade   :  { %v5347_v28 = vpop.f32.mrb[178].mxu1 }
 0xadf   :  { %v15788_v1 = vpop.f32.mrb[179].mxu1  ;;  %v19365_v18 = vpack.i.bf16 %v5347_v28, %v5342_v22  ;;  %v22568_v34 = vpack.c.bf16 %v5347_v28, %v5342_v22 }
 0xae1   :  { %19366 = vrot.lane.b32.xlu1 %v19365_v18, %s20373_s26 }
 0xae2   :  { %v5352_v4 = vpop.f32.mrb[180].mxu1 }
 0xae3   :  { %v15791_v58 = vpop.f32.mrb[181].mxu1 }
 0xae6   :  { %v5357_v20 = vpop.f32.mrb[182].mxu1 }
 0xae7   :  { %v15794_v7 = vpop.f32.mrb[183].mxu1  ;;  %v19370_v36 = vpack.i.bf16 %v5357_v20, %v5352_v4  ;;  %v22571_v27 = vpack.c.bf16 %v5357_v20, %v5352_v4 }
 0xae8   :  { %v12810_v7 = vld [vmem:[%s25172_s9 + $0xf8] sm:$0xff] }
 0xae9   :  { %19371 = vrot.lane.b32.xlu0 %v19370_v36, %s20373_s26 }
 0xaea   :  { %v5362_v8 = vpop.f32.mrb[184].mxu1 }
 0xaeb   :  { %v15797_v42 = vpop.f32.mrb[185].mxu1 }
 0xaec   :  { %v12813_v42 = vld [vmem:[%s25172_s9 + $0x110] sm:$0xff] }
 0xaee   :  { %v5367_v11 = vpop.f32.mrb[186].mxu1 }
 0xaef   :  { %v15800_v10 = vpop.f32.mrb[187].mxu1  ;;  %v19375_v12 = vpack.i.bf16 %v5367_v11, %v5362_v8  ;;  %v22574_v14 = vpack.c.bf16 %v5367_v11, %v5362_v8  ;;  %v12812_v8 = vld [vmem:[%s25172_s9 + $0x108] sm:$0xff]  ;;  %v12815_v11 = vld [vmem:[%s25172_s9 + $0x120] sm:$0xff] }
 0xaf0   :  { %v12817_v10 = vld [vmem:[%s25172_s9 + $0x130] sm:$0xff] }
 0xaf1   :  { %19376 = vrot.lane.b32.xlu1 %v19375_v12, %s20373_s26 }
 0xaf2   :  { %v5372_v49 = vpop.f32.mrb[188].mxu1 }
 0xaf3   :  { %v15803_v0 = vpop.f32.mrb[189].mxu1 }
 0xaf4   :  { %v12821_v0 = vld [vmem:[%s25172_s9 + $0x150] sm:$0xff] }
 0xaf6   :  { %v5377_v24 = vpop.f32.mrb[190].mxu1 }
 0xaf7   :  { %v15806_v32 = vpop.f32.mrb[191].mxu1  ;;  %v19380_v60 = vpack.i.bf16 %v5377_v24, %v5372_v49  ;;  %v22577_v44 = vpack.c.bf16 %v5377_v24, %v5372_v49 }
 0xaf9   :  { %19381 = vrot.lane.b32.xlu0 %v19380_v60, %s20373_s26 }
 0xafa   :  { %v5382_v30 = vpop.f32.mrb[192].mxu1 }
 0xafb   :  { %v15809_v38 = vpop.f32.mrb[193].mxu1 }
 0xafc   :  { %v12824_v38 = vld [vmem:[%s25172_s9 + $0x168] sm:$0xff] }
 0xafe   :  { %v5387_v48 = vpop.f32.mrb[194].mxu1 }
 0xaff   :  { %v15812_v33 = vpop.f32.mrb[195].mxu1  ;;  %v19385_v57 = vpack.i.bf16 %v5387_v48, %v5382_v30  ;;  %v22584_v62 = vpack.c.bf16 %v5387_v48, %v5382_v30  ;;  %v12826_v48 = vld [vmem:[%s25172_s9 + $0x178] sm:$0xff] }
 0xb00   :  { %v12827_v33 = vld [vmem:[%s25172_s9 + $0x180] sm:$0xff] }
 0xb01   :  { %19386 = vrot.lane.b32.xlu1 %v19385_v57, %s20373_s26 }
 0xb02   :  { %v22587_v59 = vpop.f32.mrb[196].mxu1 }
 0xb03   :  { %5494 = vrot.lane.b32.xlu0 %v22587_v59, %s20373_s26  ;;  %v15815_v61 = vpop.f32.mrb[197].mxu1 }
 0xb04   :  { %v12831_v61 = vld [vmem:[%s25172_s9 + $0x1a0] sm:$0xff] }
 0xb05   :  { %19391 = vrot.lane.b32.xlu1 %v19360_v21, %s20374_s0 }
 0xb07   :  { %19396 = vrot.lane.b32.xlu0 %v19365_v18, %s20374_s0 }
 0xb09   :  { %19401 = vrot.lane.b32.xlu1 %v19370_v36, %s20374_s0 }
 0xb0b   :  { %19406 = vrot.lane.b32.xlu0 %v19375_v12, %s20374_s0 }
 0xb0d   :  { %19411 = vrot.lane.b32.xlu1 %v19380_v60, %s20374_s0 }
 0xb0f   :  { %19416 = vrot.lane.b32.xlu0 %v19385_v57, %s20374_s0 }
 0xb11   :  { %6178 = vrot.lane.b32.xlu1 %v22587_v59, %s20374_s0 }
 0xb13   :  { %19421 = vrot.lane.b32.xlu0 %v19360_v21, %s20375_s30 }
 0xb15   :  { %19426 = vrot.lane.b32.xlu1 %v19365_v18, %s20375_s30 }
 0xb17   :  { %19431 = vrot.lane.b32.xlu0 %v19370_v36, %s20375_s30 }
 0xb19   :  { %19436 = vrot.lane.b32.xlu1 %v19375_v12, %s20375_s30 }
 0xb1b   :  { %19441 = vrot.lane.b32.xlu0 %v19380_v60, %s20375_s30 }
 0xb1d   :  { %19446 = vrot.lane.b32.xlu1 %v19385_v57, %s20375_s30 }
 0xb1f   :  { %6584 = vrot.lane.b32.xlu0 %v22587_v59, %s20375_s30 }
 0xb21   :  { %19451 = vrot.lane.b32.xlu1 %v19360_v21, %s20376_s20 }
 0xb23   :  { %19456 = vrot.lane.b32.xlu0 %v19365_v18, %s20376_s20 }
 0xb25   :  { %19461 = vrot.lane.b32.xlu1 %v19370_v36, %s20376_s20  ;;  %v12811_v36 = vld [vmem:[%s25172_s9 + $0x100] sm:$0xff] }
 0xb27   :  { %19466 = vrot.lane.b32.xlu0 %v19375_v12, %s20376_s20  ;;  %v12819_v12 = vld [vmem:[%s25172_s9 + $0x140] sm:$0xff] }
 0xb29   :  { %19471 = vrot.lane.b32.xlu1 %v19380_v60, %s20376_s20  ;;  %v12822_v60 = vld [vmem:[%s25172_s9 + $0x158] sm:$0xff] }
 0xb2b   :  { %19476 = vrot.lane.b32.xlu0 %v19385_v57, %s20376_s20  ;;  %v12828_v57 = vld [vmem:[%s25172_s9 + $0x188] sm:$0xff] }
 0xb2d   :  { %6990 = vrot.lane.b32.xlu1 %v22587_v59, %s20376_s20 }
 0xb4b   :  { %v19362_v45 = vpop.permute.xlu0 %19361 }
 0xb4c   :  { %v19364_v35 = vunpack.i.h.bf16 %v19362_v45  ;;  %v19363_v46 = vunpack.i.l.bf16 %v19362_v45  ;;  %v12832_v45 = vld [vmem:[%s25172_s9 + $0x1a8] sm:$0xff] }
 0xb4e   :  { %v17713_v43 = vpack.c.bf16 %v19364_v35, %v19363_v46  ;;  %v12833_v35 = vld [vmem:[%s25172_s9 + $0x1b0] sm:$0xff]  ;;  %v12834_v46 = vld [vmem:[%s25172_s9 + $0x1b8] sm:$0xff] }
 0xb50   :  { %17714 = vmatprep.subr.bf16.mxu1 %v17713_v43 }
 0xb51   :  { %17716 = vmatpush3.bf16.msra.mxu1 %v17713_v43  ;;  %v12835_v43 = vld [vmem:[%s25172_s9 + $0x1c0] sm:$0xff] }
 0xb53   :  { %v19367_v55 = vpop.permute.xlu1 %19366 }
 0xb54   :  { %v19369_v37 = vunpack.i.h.bf16 %v19367_v55  ;;  %v19368_v3 = vunpack.i.l.bf16 %v19367_v55  ;;  %v12836_v55 = vld [vmem:[%s25172_s9 + $0x1c8] sm:$0xff] }
 0xb56   :  { %v17717_v9 = vpack.c.bf16 %v19369_v37, %v19368_v3  ;;  %v12837_v37 = vld [vmem:[%s25172_s9 + $0x1d0] sm:$0xff] }
 0xb58   :  { %17718 = vmatprep.subr.bf16.mxu1 %v17717_v9 }
 0xb59   :  { %17720 = vmatpush3.bf16.msra.mxu1 %v17717_v9  ;;  %v12838_v9 = vld [vmem:[%s25172_s9 + $0x1d8] sm:$0xff] }
 0xb5b   :  { %v19372_v13 = vpop.permute.xlu0 %19371 }
 0xb5c   :  { %v19374_v53 = vunpack.i.h.bf16 %v19372_v13  ;;  %v19373_v63 = vunpack.i.l.bf16 %v19372_v13  ;;  %v5396_v13 = vld [vmem:[%s25172_s9] sm:$0xff] }
 0xb5e   :  { %v17721_v56 = vpack.c.bf16 %v19374_v53, %v19373_v63 }
 0xb60   :  { %17722 = vmatprep.subr.bf16.mxu1 %v17721_v56 }
 0xb61   :  { %17724 = vmatpush3.bf16.msra.mxu1 %v17721_v56 }
 0xb63   :  { %v19377_v19 = vpop.permute.xlu1 %19376 }
 0xb64   :  { %v19379_v17 = vunpack.i.h.bf16 %v19377_v19  ;;  %v19378_v54 = vunpack.i.l.bf16 %v19377_v19  ;;  %v5397_v19 = vld [vmem:[%s25172_s9 + $0x8] sm:$0xff] }
 0xb66   :  { %v17725_v23 = vpack.c.bf16 %v19379_v17, %v19378_v54  ;;  %v5398_v17 = vld [vmem:[%s25172_s9 + $0x10] sm:$0xff] }
 0xb68   :  { %17726 = vmatprep.subr.bf16.mxu1 %v17725_v23 }
 0xb69   :  { %17728 = vmatpush3.bf16.msra.mxu1 %v17725_v23 }
 0xb6b   :  { %v19382_v21 = vpop.permute.xlu0 %19381 }
 0xb6c   :  { %v19384_v22 = vunpack.i.h.bf16 %v19382_v21  ;;  %v19383_v47 = vunpack.i.l.bf16 %v19382_v21 }
 0xb6e   :  { %v17729_v28 = vpack.c.bf16 %v19384_v22, %v19383_v47  ;;  %v5399_v47 = vld [vmem:[%s25172_s9 + $0x18] sm:$0xff] }
 0xb70   :  { %17730 = vmatprep.subr.bf16.mxu1 %v17729_v28 }
 0xb71   :  { %17732 = vmatpush3.bf16.msra.mxu1 %v17729_v28  ;;  %v5400_v28 = vld [vmem:[%s25172_s9 + $0x20] sm:$0xff] }
 0xb73   :  { %v19387_v1 = vpop.permute.xlu1 %19386 }
 0xb74   :  { %v19389_v18 = vunpack.i.h.bf16 %v19387_v1  ;;  %v19388_v4 = vunpack.i.l.bf16 %v19387_v1 }
 0xb75   :  { %v5495_v20 = vpop.permute.xlu0 %5494 }
 0xb76   :  { %v17733_v58 = vpack.c.bf16 %v19389_v18, %v19388_v4 }
 0xb77   :  { %v19392_v49 = vpop.permute.xlu1 %19391 }
 0xb78   :  { %17734 = vmatprep.subr.bf16.mxu1 %v17733_v58  ;;  %v19394_v24 = vunpack.i.h.bf16 %v19392_v49  ;;  %v19393_v32 = vunpack.i.l.bf16 %v19392_v49  ;;  %v5405_v49 = vld [vmem:[%s25172_s9 + $0x48] sm:$0xff] }
 0xb79   :  { %17736 = vmatpush3.bf16.msra.mxu1 %v17733_v58  ;;  %v19397_v3 = vpop.permute.xlu0 %19396 }
 0xb7a   :  { %15840 = vmatprep.subr.msk.mxu1 %vm189_vm1, %v5495_v20  ;;  %v17761_v30 = vpack.c.bf16 %v19394_v24, %v19393_v32  ;;  %v19399_v53 = vunpack.i.h.bf16 %v19397_v3  ;;  %v19398_v63 = vunpack.i.l.bf16 %v19397_v3  ;;  %v5407_v32 = vld [vmem:[%s25172_s9 + $0x58] sm:$0xff]  ;;  %v5421_v3 = vld [vmem:[%s25172_s9 + $0xc8] sm:$0xff] }
 0xb7b   :  { %v19402_v56 = vpop.permute.xlu1 %19401 }
 0xb7c   :  { %v19404_v54 = vunpack.i.h.bf16 %v19402_v56  ;;  %v19403_v23 = vunpack.i.l.bf16 %v19402_v56  ;;  %v17765_v21 = vpack.c.bf16 %v19399_v53, %v19398_v63  ;;  %v5424_v53 = vld [vmem:[%s25172_s9 + $0xe0] sm:$0xff]  ;;  %v5425_v56 = vld [vmem:[%s25172_s9 + $0xe8] sm:$0xff] }
 0xb7d   :  { %15841 = vmatpush3.msk.msra.mxu1 %vm189_vm1, %v5495_v20  ;;  %v19407_v22 = vpop.permute.xlu0 %19406  ;;  %v5401_v20 = vld [vmem:[%s25172_s9 + $0x28] sm:$0xff] }
 0xb7e   :  { %15843 = vmatmul.mubr.msk.f32.vlgmr.msra.gmra.mrb[198].mxu1 %vm5508_vm12, %v12810_v7  ;;  %17738 = vmatprep.subr.bf16.mxu1 %v22565_v2  ;;  %v19409_v1 = vunpack.i.h.bf16 %v19407_v22  ;;  %v19408_v18 = vunpack.i.l.bf16 %v19407_v22  ;;  %v17769_v4 = vpack.c.bf16 %v19404_v54, %v19403_v23  ;;  %v5402_v7 = vld [vmem:[%s25172_s9 + $0x30] sm:$0xff] }
 0xb7f   :  { %17740 = vmatpush3.bf16.msra.mxu1 %v22565_v2  ;;  %15845 = vmatprep.mubr.msk.f32.mxu1 %vm5508_vm12, %v12811_v36  ;;  %v12814_v2 = vld [vmem:[%s25172_s9 + $0x118] sm:$0xff]  ;;  %v19412_v58 = vpop.permute.xlu1 %19411  ;;  %v12903_v22 = vld [vmem:[%s25172_s9 + $0x1f0] sm:$0xff] }
 0xb80   :  { %17742 = vmatprep.subr.bf16.mxu1 %v22568_v34  ;;  %v19414_v36 = vunpack.i.h.bf16 %v19412_v58 }
 0xb82   :  { %15846 = vmatmul.mubr.msk.f32.gmra.mrb[200].mxu1 %vm5508_vm12, %v12812_v8  ;;  %v19413_v8 = vunpack.i.l.bf16 %v19412_v58  ;;  %v12905_v58 = vld [vmem:[%s25172_s9 + $0x200] sm:$0xff] }
 0xb83   :  { %17744 = vmatpush3.bf16.msra.mxu1 %v22568_v34  ;;  %15848 = vmatprep.mubr.msk.f32.mxu1 %vm5508_vm12, %v12813_v42  ;;  %v12816_v34 = vld [vmem:[%s25172_s9 + $0x128] sm:$0xff]  ;;  %v17773_v42 = vpack.c.bf16 %v19409_v1, %v19408_v18 }
 0xb84   :  { %17746 = vmatprep.subr.bf16.mxu1 %v22571_v27 }
 0xb86   :  { %15849 = vmatmul.mubr.msk.f32.gmra.mrb[202].mxu1 %vm5508_vm12, %v12814_v2  ;;  %v19417_v2 = vpop.permute.xlu0 %19416 }
 0xb87   :  { %17748 = vmatpush3.bf16.msra.mxu1 %v22571_v27  ;;  %15851 = vmatprep.mubr.msk.f32.mxu1 %vm5508_vm12, %v12815_v11  ;;  %v12818_v27 = vld [vmem:[%s25172_s9 + $0x138] sm:$0xff] }
 0xb88   :  { %17750 = vmatprep.subr.bf16.mxu1 %v22574_v14  ;;  %v5403_v11 = vld [vmem:[%s25172_s9 + $0x38] sm:$0xff] }
 0xb8a   :  { %15852 = vmatmul.mubr.msk.f32.gmra.mrb[204].mxu1 %vm5508_vm12, %v12816_v34  ;;  %v5404_v34 = vld [vmem:[%s25172_s9 + $0x40] sm:$0xff]  ;;  %v19422_v24 = vpop.permute.xlu0 %19421 }
 0xb8b   :  { %17752 = vmatpush3.bf16.msra.mxu1 %v22574_v14  ;;  %15854 = vmatprep.mubr.msk.f32.mxu1 %vm5508_vm12, %v12817_v10  ;;  %v12820_v14 = vld [vmem:[%s25172_s9 + $0x148] sm:$0xff]  ;;  %v19419_v10 = vunpack.i.h.bf16 %v19417_v2 }
 0xb8c   :  { %17754 = vmatprep.subr.bf16.mxu1 %v22577_v44 }
 0xb8e   :  { %15855 = vmatmul.mubr.msk.f32.gmra.mrb[206].mxu1 %vm5508_vm12, %v12818_v27  ;;  %v19418_v27 = vunpack.i.l.bf16 %v19417_v2  ;;  %v19432_v23 = vpop.permute.xlu0 %19431  ;;  %v12907_v2 = vld [vmem:[%s25172_s9 + $0x210] sm:$0xff] }
 0xb8f   :  { %17756 = vmatpush3.bf16.msra.mxu1 %v22577_v44  ;;  %15857 = vmatprep.mubr.msk.f32.mxu1 %vm5508_vm12, %v12819_v12  ;;  %v12823_v44 = vld [vmem:[%s25172_s9 + $0x160] sm:$0xff]  ;;  %v17777_v12 = vpack.c.bf16 %v19414_v36, %v19413_v8 }
 0xb90   :  { %17758 = vmatprep.subr.bf16.mxu1 %v22584_v62 }
 0xb92   :  { %15858 = vmatmul.mubr.msk.f32.gmra.mrb[208].mxu1 %vm5508_vm12, %v12820_v14  ;;  %v5406_v14 = vld [vmem:[%s25172_s9 + $0x50] sm:$0xff]  ;;  %v19442_v8 = vpop.permute.xlu0 %19441 }
 0xb93   :  { %17760 = vmatpush3.bf16.msra.mxu1 %v22584_v62  ;;  %15860 = vmatprep.mubr.msk.f32.mxu1 %vm5508_vm12, %v12821_v0  ;;  %v12829_v62 = vld [vmem:[%s25172_s9 + $0x190] sm:$0xff]  ;;  %v17781_v0 = vpack.c.bf16 %v19419_v10, %v19418_v27 }
 0xb94   :  { %15911 = vmatprep.subr.msk.mxu1 %vm189_vm1, %v22587_v59 }
 0xb96   :  { %15861 = vmatmul.mubr.msk.f32.gmra.mrb[210].mxu1 %vm5508_vm12, %v12822_v60  ;;  %v5408_v60 = vld [vmem:[%s25172_s9 + $0x60] sm:$0xff] }
 0xb97   :  { %15912 = vmatpush3.msk.msra.mxu1 %vm189_vm1, %v22587_v59  ;;  %15863 = vmatprep.mubr.msk.f32.mxu1 %vm5508_vm12, %v12823_v44  ;;  %v12830_v59 = vld [vmem:[%s25172_s9 + $0x198] sm:$0xff]  ;;  %v19424_v44 = vunpack.i.h.bf16 %v19422_v24 }
 0xb98   :  { %17762 = vmatprep.subr.bf16.mxu1 %v17761_v30 }
 0xb9a   :  { %15864 = vmatmul.mubr.msk.f32.gmra.mrb[212].mxu1 %vm5508_vm12, %v12824_v38  ;;  %v6179_v38 = vpop.permute.xlu1 %6178 }
 0xb9b   :  { %15866 = vmatprep.mubr.msk.f32.mxu1 %vm5508_vm12, %v12825_v41  ;;  %v5409_v41 = vld [vmem:[%s25172_s9 + $0x68] sm:$0xff] }
 0xb9e   :  { %15867 = vmatmul.mubr.msk.f32.gmra.mrb[214].mxu1 %vm5508_vm12, %v12826_v48  ;;  %v5410_v48 = vld [vmem:[%s25172_s9 + $0x70] sm:$0xff]  ;;  %v19427_v63 = vpop.permute.xlu1 %19426 }
 0xb9f   :  { %15869 = vmatprep.mubr.msk.f32.mxu1 %vm5508_vm12, %v12827_v33  ;;  %v19428_v54 = vunpack.i.l.bf16 %v19427_v63 }
 0xba2   :  { %15870 = vmatmul.mubr.msk.f32.gmra.mrb[216].mxu1 %vm5508_vm12, %v12828_v57  ;;  %v5411_v57 = vld [vmem:[%s25172_s9 + $0x78] sm:$0xff]  ;;  %v19437_v18 = vpop.permute.xlu1 %19436 }
 0xba3   :  { %15872 = vmatprep.mubr.msk.f32.mxu1 %vm5508_vm12, %v12829_v62  ;;  %v5412_v62 = vld [vmem:[%s25172_s9 + $0x80] sm:$0xff] }
 0xba6   :  { %15873 = vmatmul.mubr.msk.f32.gmra.mrb[218].mxu1 %vm5508_vm12, %v12830_v59  ;;  %v5413_v59 = vld [vmem:[%s25172_s9 + $0x88] sm:$0xff]  ;;  %v19447_v27 = vpop.permute.xlu1 %19446 }
 0xba7   :  { %15875 = vmatprep.mubr.msk.f32.mxu1 %vm5508_vm12, %v12831_v61  ;;  %v5414_v61 = vld [vmem:[%s25172_s9 + $0x90] sm:$0xff] }
 0xbaa   :  { %15876 = vmatmul.mubr.msk.f32.gmra.mrb[220].mxu1 %vm5508_vm12, %v12832_v45  ;;  %v5415_v45 = vld [vmem:[%s25172_s9 + $0x98] sm:$0xff] }
 0xbab   :  { %15878 = vmatprep.mubr.msk.f32.mxu1 %vm5508_vm12, %v12833_v35  ;;  %v5416_v35 = vld [vmem:[%s25172_s9 + $0xa0] sm:$0xff] }
 0xbae   :  { %15879 = vmatmul.mubr.msk.f32.gmra.mrb[222].mxu1 %vm5508_vm12, %v12834_v46  ;;  %v5417_v46 = vld [vmem:[%s25172_s9 + $0xa8] sm:$0xff] }
 0xbaf   :  { %15881 = vmatprep.mubr.msk.f32.mxu1 %vm5508_vm12, %v12835_v43  ;;  %v5418_v43 = vld [vmem:[%s25172_s9 + $0xb0] sm:$0xff] }
 0xbb2   :  { %15882 = vmatmul.mubr.msk.f32.gmra.mrb[224].mxu1 %vm5508_vm12, %v12836_v55  ;;  %v5419_v55 = vld [vmem:[%s25172_s9 + $0xb8] sm:$0xff] }
 0xbb3   :  { %15884 = vmatprep.mubr.msk.f32.mxu1 %vm5508_vm12, %v12837_v37  ;;  %v5420_v37 = vld [vmem:[%s25172_s9 + $0xc0] sm:$0xff] }
 0xbb6   :  { %15885 = vmatmul.mubr.msk.f32.gmra.mrb[226].mxu1 %vm5508_vm12, %v12838_v9  ;;  %v5422_v9 = vld [vmem:[%s25172_s9 + $0xd0] sm:$0xff] }
 0xbb7   :  { %15913 = vmatprep.mubr.msk.f32.mxu1 %vm5508_vm12, %v5396_v13  ;;  %v5423_v13 = vld [vmem:[%s25172_s9 + $0xd8] sm:$0xff] }
 0xbba   :  { %15914 = vmatmul.mubr.msk.f32.vlgmr.msra.gmra.mrb[198].mxu1 %vm5508_vm12, %v5397_v19  ;;  %v12901_v19 = vld [vmem:[%s25172_s9 + $0x1e0] sm:$0xff] }
 0xbbb   :  { %17764 = vmatpush3.bf16.msra.mxu1 %v17761_v30  ;;  %15916 = vmatprep.mubr.msk.f32.mxu1 %vm5508_vm12, %v5398_v17  ;;  %v19423_v30 = vunpack.i.l.bf16 %v19422_v24  ;;  %v19429_v17 = vunpack.i.h.bf16 %v19427_v63  ;;  %v12926_v63 = vld [vmem:[%s25172_s9 + $0x2a8] sm:$0xff] }
 0xbbc   :  { %17766 = vmatprep.subr.bf16.mxu1 %v17765_v21 }
 0xbbd   :  { %v17785_v33 = vpack.c.bf16 %v19424_v44, %v19423_v30  ;;  %v17789_v1 = vpack.c.bf16 %v19429_v17, %v19428_v54  ;;  %v19452_v30 = vpop.permute.xlu1 %19451  ;;  %v12929_v17 = vld [vmem:[%s25172_s9 + $0x2c0] sm:$0xff] }
 0xbbe   :  { %15917 = vmatmul.mubr.msk.f32.gmra.mrb[200].mxu1 %vm5508_vm12, %v5399_v47  ;;  %v19434_v47 = vunpack.i.h.bf16 %v19432_v23 }
 0xbbf   :  { %17768 = vmatpush3.bf16.msra.mxu1 %v17765_v21  ;;  %15919 = vmatprep.mubr.msk.f32.mxu1 %vm5508_vm12, %v5400_v28  ;;  %v12902_v21 = vld [vmem:[%s25172_s9 + $0x1e8] sm:$0xff]  ;;  %v19433_v28 = vunpack.i.l.bf16 %v19432_v23 }
 0xbc0   :  { %17770 = vmatprep.subr.bf16.mxu1 %v17769_v4  ;;  %v12930_v23 = vld [vmem:[%s25172_s9 + $0x2c8] sm:$0xff] }
 0xbc1   :  { %v17793_v36 = vpack.c.bf16 %v19434_v47, %v19433_v28  ;;  %v19462_v28 = vpop.permute.xlu1 %19461 }
 0xbc2   :  { %15920 = vmatmul.mubr.msk.f32.gmra.mrb[202].mxu1 %vm5508_vm12, %v5401_v20  ;;  %v19439_v20 = vunpack.i.h.bf16 %v19437_v18 }
 0xbc3   :  { %17772 = vmatpush3.bf16.msra.mxu1 %v17769_v4  ;;  %15922 = vmatprep.mubr.msk.f32.mxu1 %vm5508_vm12, %v5402_v7  ;;  %v12904_v4 = vld [vmem:[%s25172_s9 + $0x1f8] sm:$0xff]  ;;  %v19438_v7 = vunpack.i.l.bf16 %v19437_v18  ;;  %v12964_v18 = vld [vmem:[%s25172_s9 + $0x2e0] sm:$0xff] }
 0xbc4   :  { %17774 = vmatprep.subr.bf16.mxu1 %v17773_v42 }
 0xbc5   :  { %v17797_v10 = vpack.c.bf16 %v19439_v20, %v19438_v7 }
 0xbc6   :  { %15923 = vmatmul.mubr.msk.f32.gmra.mrb[204].mxu1 %vm5508_vm12, %v5403_v11  ;;  %v19444_v11 = vunpack.i.h.bf16 %v19442_v8 }
 0xbc7   :  { %17776 = vmatpush3.bf16.msra.mxu1 %v17773_v42  ;;  %15925 = vmatprep.mubr.msk.f32.mxu1 %vm5508_vm12, %v5404_v34  ;;  %v12906_v42 = vld [vmem:[%s25172_s9 + $0x208] sm:$0xff]  ;;  %v19443_v34 = vunpack.i.l.bf16 %v19442_v8  ;;  %v12966_v8 = vld [vmem:[%s25172_s9 + $0x2f0] sm:$0xff] }
 0xbc8   :  { %17778 = vmatprep.subr.bf16.mxu1 %v17777_v12 }
 0xbc9   :  { %v17801_v24 = vpack.c.bf16 %v19444_v11, %v19443_v34  ;;  %v19472_v34 = vpop.permute.xlu1 %19471 }
 0xbca   :  { %15926 = vmatmul.mubr.msk.f32.gmra.mrb[206].mxu1 %vm5508_vm12, %v5405_v49  ;;  %v12909_v49 = vld [vmem:[%s25172_s9 + $0x220] sm:$0xff] }
 0xbcb   :  { %17780 = vmatpush3.bf16.msra.mxu1 %v17777_v12  ;;  %15928 = vmatprep.mubr.msk.f32.mxu1 %vm5508_vm12, %v5406_v14  ;;  %v12908_v12 = vld [vmem:[%s25172_s9 + $0x218] sm:$0xff]  ;;  %v19449_v14 = vunpack.i.h.bf16 %v19447_v27 }
 0xbcc   :  { %17782 = vmatprep.subr.bf16.mxu1 %v17781_v0 }
 0xbce   :  { %15929 = vmatmul.mubr.msk.f32.gmra.mrb[208].mxu1 %vm5508_vm12, %v5407_v32  ;;  %v12910_v32 = vld [vmem:[%s25172_s9 + $0x228] sm:$0xff] }
 0xbcf   :  { %17784 = vmatpush3.bf16.msra.mxu1 %v17781_v0  ;;  %15931 = vmatprep.mubr.msk.f32.mxu1 %vm5508_vm12, %v5408_v60  ;;  %v19448_v0 = vunpack.i.l.bf16 %v19447_v27  ;;  %v12911_v60 = vld [vmem:[%s25172_s9 + $0x230] sm:$0xff]  ;;  %v12968_v27 = vld [vmem:[%s25172_s9 + $0x300] sm:$0xff] }
 0xbd0   :  { %15982 = vmatprep.subr.msk.mxu1 %vm189_vm1, %v6179_v38 }
 0xbd1   :  { %v17805_v44 = vpack.c.bf16 %v19449_v14, %v19448_v0 }
 0xbd2   :  { %15932 = vmatmul.mubr.msk.f32.gmra.mrb[210].mxu1 %vm5508_vm12, %v5409_v41  ;;  %v12913_v41 = vld [vmem:[%s25172_s9 + $0x240] sm:$0xff] }
 0xbd3   :  { %15983 = vmatpush3.msk.msra.mxu1 %vm189_vm1, %v6179_v38  ;;  %15934 = vmatprep.mubr.msk.f32.mxu1 %vm5508_vm12, %v5410_v48  ;;  %v12912_v38 = vld [vmem:[%s25172_s9 + $0x238] sm:$0xff]  ;;  %v19454_v48 = vunpack.i.h.bf16 %v19452_v30 }
 0xbd4   :  { %17786 = vmatprep.subr.bf16.mxu1 %v17785_v33 }
 0xbd6   :  { %15935 = vmatmul.mubr.msk.f32.gmra.mrb[212].mxu1 %vm5508_vm12, %v5411_v57  ;;  %v6585_v57 = vpop.permute.xlu0 %6584 }
 0xbd7   :  { %15937 = vmatprep.mubr.msk.f32.mxu1 %vm5508_vm12, %v5412_v62  ;;  %v12914_v62 = vld [vmem:[%s25172_s9 + $0x248] sm:$0xff] }
 0xbda   :  { %15938 = vmatmul.mubr.msk.f32.gmra.mrb[214].mxu1 %vm5508_vm12, %v5413_v59  ;;  %v12915_v59 = vld [vmem:[%s25172_s9 + $0x250] sm:$0xff]  ;;  %v19457_v54 = vpop.permute.xlu0 %19456 }
 0xbdb   :  { %15940 = vmatprep.mubr.msk.f32.mxu1 %vm5508_vm12, %v5414_v61  ;;  %v19458_v47 = vunpack.i.l.bf16 %v19457_v54 }
 0xbde   :  { %15941 = vmatmul.mubr.msk.f32.gmra.mrb[216].mxu1 %vm5508_vm12, %v5415_v45  ;;  %v12916_v45 = vld [vmem:[%s25172_s9 + $0x258] sm:$0xff]  ;;  %v19467_v7 = vpop.permute.xlu0 %19466 }
 0xbdf   :  { %15943 = vmatprep.mubr.msk.f32.mxu1 %vm5508_vm12, %v5416_v35  ;;  %v12917_v35 = vld [vmem:[%s25172_s9 + $0x260] sm:$0xff] }
 0xbe2   :  { %15944 = vmatmul.mubr.msk.f32.gmra.mrb[218].mxu1 %vm5508_vm12, %v5417_v46  ;;  %v12918_v46 = vld [vmem:[%s25172_s9 + $0x268] sm:$0xff]  ;;  %v19477_v0 = vpop.permute.xlu0 %19476 }
 0xbe3   :  { %15946 = vmatprep.mubr.msk.f32.mxu1 %vm5508_vm12, %v5418_v43  ;;  %v12919_v43 = vld [vmem:[%s25172_s9 + $0x270] sm:$0xff] }
 0xbe6   :  { %15947 = vmatmul.mubr.msk.f32.gmra.mrb[220].mxu1 %vm5508_vm12, %v5419_v55  ;;  %v12920_v55 = vld [vmem:[%s25172_s9 + $0x278] sm:$0xff] }
 0xbe7   :  { %15949 = vmatprep.mubr.msk.f32.mxu1 %vm5508_vm12, %v5420_v37  ;;  %v12921_v37 = vld [vmem:[%s25172_s9 + $0x280] sm:$0xff] }
 0xbea   :  { %15950 = vmatmul.mubr.msk.f32.gmra.mrb[222].mxu1 %vm5508_vm12, %v5421_v3  ;;  %v12922_v3 = vld [vmem:[%s25172_s9 + $0x288] sm:$0xff] }
 0xbeb   :  { %15952 = vmatprep.mubr.msk.f32.mxu1 %vm5508_vm12, %v5422_v9  ;;  %v12923_v9 = vld [vmem:[%s25172_s9 + $0x290] sm:$0xff] }
 0xbee   :  { %15953 = vmatmul.mubr.msk.f32.gmra.mrb[224].mxu1 %vm5508_vm12, %v5423_v13  ;;  %v12924_v13 = vld [vmem:[%s25172_s9 + $0x298] sm:$0xff] }
 0xbef   :  { %15955 = vmatprep.mubr.msk.f32.mxu1 %vm5508_vm12, %v5424_v53  ;;  %v12925_v53 = vld [vmem:[%s25172_s9 + $0x2a0] sm:$0xff] }
 0xbf2   :  { %15956 = vmatmul.mubr.msk.f32.gmra.mrb[226].mxu1 %vm5508_vm12, %v5425_v56  ;;  %v12927_v56 = vld [vmem:[%s25172_s9 + $0x2b0] sm:$0xff] }
 0xbf3   :  { %15984 = vmatprep.mubr.msk.f32.mxu1 %vm5508_vm12, %v12901_v19  ;;  %v12928_v19 = vld [vmem:[%s25172_s9 + $0x2b8] sm:$0xff] }
 0xbf6   :  { %15985 = vmatmul.mubr.msk.f32.vlgmr.msra.gmra.mrb[198].mxu1 %vm5508_vm12, %v12902_v21  ;;  %v12962_v21 = vld [vmem:[%s25172_s9 + $0x2d0] sm:$0xff] }
 0xbf7   :  { %17788 = vmatpush3.bf16.msra.mxu1 %v17785_v33  ;;  %15987 = vmatprep.mubr.msk.f32.mxu1 %vm5508_vm12, %v12903_v22  ;;  %v19453_v33 = vunpack.i.l.bf16 %v19452_v30  ;;  %v19459_v22 = vunpack.i.h.bf16 %v19457_v54  ;;  %v12991_v54 = vld [vmem:[%s25172_s9 + $0x3b8] sm:$0xff] }
 0xbf8   :  { %17790 = vmatprep.subr.bf16.mxu1 %v17789_v1 }
 0xbf9   :  { %v17809_v61 = vpack.c.bf16 %v19454_v48, %v19453_v33  ;;  %v17813_v20 = vpack.c.bf16 %v19459_v22, %v19458_v47  ;;  %v12973_v33 = vld [vmem:[%s25172_s9 + $0x328] sm:$0xff] }
 0xbfa   :  { %15988 = vmatmul.mubr.msk.f32.gmra.mrb[200].mxu1 %vm5508_vm12, %v12904_v4  ;;  %v19464_v4 = vunpack.i.h.bf16 %v19462_v28  ;;  %v7357_v22 = vld [vmem:[%s25173_s10 + $0x8] sm:$0xff] }
 0xbfb   :  { %17792 = vmatpush3.bf16.msra.mxu1 %v17789_v1  ;;  %15990 = vmatprep.mubr.msk.f32.mxu1 %vm5508_vm12, %v12905_v58  ;;  %v12963_v1 = vld [vmem:[%s25172_s9 + $0x2d8] sm:$0xff]  ;;  %v19463_v58 = vunpack.i.l.bf16 %v19462_v28  ;;  %v13024_v47 = vld [vmem:[%s25172_s9 + $0x3c8] sm:$0xff] }
 0xbfc   :  { %17794 = vmatprep.subr.bf16.mxu1 %v17793_v36 }
 0xbfd   :  { %v17817_v11 = vpack.c.bf16 %v19464_v4, %v19463_v58  ;;  %v7359_v4 = vld [vmem:[%s25173_s10 + $0x18] sm:$0xf] }
 0xbfe   :  { %15991 = vmatmul.mubr.msk.f32.gmra.mrb[202].mxu1 %vm5508_vm12, %v12906_v42  ;;  %v19469_v42 = vunpack.i.h.bf16 %v19467_v7  ;;  %v13026_v58 = vld [vmem:[%s25172_s9 + $0x3d8] sm:$0xff] }
 0xbff   :  { %17796 = vmatpush3.bf16.msra.mxu1 %v17793_v36  ;;  %15993 = vmatprep.mubr.msk.f32.mxu1 %vm5508_vm12, %v12907_v2  ;;  %v12965_v36 = vld [vmem:[%s25172_s9 + $0x2e8] sm:$0xff]  ;;  %v19468_v2 = vunpack.i.l.bf16 %v19467_v7  ;;  %v13027_v7 = vld [vmem:[%s25172_s9 + $0x3e0] sm:$0xff] }
 0xc00   :  { %17798 = vmatprep.subr.bf16.mxu1 %v17797_v10 }
 0xc01   :  { %v17821_v14 = vpack.c.bf16 %v19469_v42, %v19468_v2  ;;  %v13030_v42 = vld [vmem:[%s25172_s9 + $0x3f8] sm:$0xff]  ;;  %v13031_v2 = vld [vmem:[%s25172_s9 + $0x400] sm:$0xff] }
 0xc02   :  { %15994 = vmatmul.mubr.msk.f32.gmra.mrb[204].mxu1 %vm5508_vm12, %v12908_v12  ;;  %v19474_v12 = vunpack.i.h.bf16 %v19472_v34 }
 0xc03   :  { %17800 = vmatpush3.bf16.msra.mxu1 %v17797_v10  ;;  %15996 = vmatprep.mubr.msk.f32.mxu1 %vm5508_vm12, %v12909_v49  ;;  %v12967_v10 = vld [vmem:[%s25172_s9 + $0x2f8] sm:$0xff]  ;;  %v19473_v49 = vunpack.i.l.bf16 %v19472_v34  ;;  %v13033_v34 = vld [vmem:[%s25172_s9 + $0x410] sm:$0xff] }
 0xc04   :  { %17802 = vmatprep.subr.bf16.mxu1 %v17801_v24 }
 0xc05   :  { %v17825_v30 = vpack.c.bf16 %v19474_v12, %v19473_v49  ;;  %v13036_v12 = vld [vmem:[%s25172_s9 + $0x428] sm:$0xff]  ;;  %v13037_v49 = vld [vmem:[%s25172_s9 + $0x430] sm:$0xff] }
 0xc06   :  { %15997 = vmatmul.mubr.msk.f32.gmra.mrb[206].mxu1 %vm5508_vm12, %v12910_v32  ;;  %v12970_v32 = vld [vmem:[%s25172_s9 + $0x310] sm:$0xff] }
 0xc07   :  { %17804 = vmatpush3.bf16.msra.mxu1 %v17801_v24  ;;  %15999 = vmatprep.mubr.msk.f32.mxu1 %vm5508_vm12, %v12911_v60  ;;  %v12969_v24 = vld [vmem:[%s25172_s9 + $0x308] sm:$0xff]  ;;  %v19479_v60 = vunpack.i.h.bf16 %v19477_v0 }
 0xc08   :  { %17806 = vmatprep.subr.bf16.mxu1 %v17805_v44 }
 0xc0a   :  { %16000 = vmatmul.mubr.msk.f32.gmra.mrb[208].mxu1 %vm5508_vm12, %v12912_v38  ;;  %v12971_v38 = vld [vmem:[%s25172_s9 + $0x318] sm:$0xff] }
 0xc0b   :  { %17808 = vmatpush3.bf16.msra.mxu1 %v17805_v44  ;;  %16002 = vmatprep.mubr.msk.f32.mxu1 %vm5508_vm12, %v12913_v41  ;;  %v19478_v44 = vunpack.i.l.bf16 %v19477_v0  ;;  %v12972_v41 = vld [vmem:[%s25172_s9 + $0x320] sm:$0xff] }
 0xc0c   :  { %16053 = vmatprep.subr.msk.mxu1 %vm189_vm1, %v6585_v57  ;;  %v13039_v0 = vld [vmem:[%s25172_s9 + $0x440] sm:$0xff] }
 0xc0d   :  { %v17829_v48 = vpack.c.bf16 %v19479_v60, %v19478_v44  ;;  %v13042_v60 = vld [vmem:[%s25172_s9 + $0x458] sm:$0xff]  ;;  %v13043_v44 = vld [vmem:[%s25172_s9 + $0x460] sm:$0xff] }
 0xc0e   :  { %16003 = vmatmul.mubr.msk.f32.gmra.mrb[210].mxu1 %vm5508_vm12, %v12914_v62  ;;  %v6991_v62 = vpop.permute.xlu1 %6990 }
 0xc0f   :  { %16054 = vmatpush3.msk.msra.mxu1 %vm189_vm1, %v6585_v57  ;;  %16005 = vmatprep.mubr.msk.f32.mxu1 %vm5508_vm12, %v12915_v59  ;;  %v12974_v57 = vld [vmem:[%s25172_s9 + $0x330] sm:$0xff]  ;;  %v12975_v59 = vld [vmem:[%s25172_s9 + $0x338] sm:$0xff] }
 0xc10   :  { %17810 = vmatprep.subr.bf16.mxu1 %v17809_v61 }
 0xc12   :  { %16006 = vmatmul.mubr.msk.f32.gmra.mrb[212].mxu1 %vm5508_vm12, %v12916_v45  ;;  %v12977_v45 = vld [vmem:[%s25172_s9 + $0x348] sm:$0xff] }
 0xc13   :  { %16008 = vmatprep.mubr.msk.f32.mxu1 %vm5508_vm12, %v12917_v35  ;;  %v12978_v35 = vld [vmem:[%s25172_s9 + $0x350] sm:$0xff] }
 0xc16   :  { %16009 = vmatmul.mubr.msk.f32.gmra.mrb[214].mxu1 %vm5508_vm12, %v12918_v46  ;;  %v12979_v46 = vld [vmem:[%s25172_s9 + $0x358] sm:$0xff] }
 0xc17   :  { %16011 = vmatprep.mubr.msk.f32.mxu1 %vm5508_vm12, %v12919_v43  ;;  %v12980_v43 = vld [vmem:[%s25172_s9 + $0x360] sm:$0xff] }
 0xc1a   :  { %16012 = vmatmul.mubr.msk.f32.gmra.mrb[216].mxu1 %vm5508_vm12, %v12920_v55  ;;  %v12981_v55 = vld [vmem:[%s25172_s9 + $0x368] sm:$0xff] }
 0xc1b   :  { %16014 = vmatprep.mubr.msk.f32.mxu1 %vm5508_vm12, %v12921_v37  ;;  %v12982_v37 = vld [vmem:[%s25172_s9 + $0x370] sm:$0xff] }
 0xc1e   :  { %16015 = vmatmul.mubr.msk.f32.gmra.mrb[218].mxu1 %vm5508_vm12, %v12922_v3  ;;  %v12983_v3 = vld [vmem:[%s25172_s9 + $0x378] sm:$0xff] }
 0xc1f   :  { %16017 = vmatprep.mubr.msk.f32.mxu1 %vm5508_vm12, %v12923_v9  ;;  %v12984_v9 = vld [vmem:[%s25172_s9 + $0x380] sm:$0xff] }
 0xc22   :  { %16018 = vmatmul.mubr.msk.f32.gmra.mrb[220].mxu1 %vm5508_vm12, %v12924_v13  ;;  %v12985_v13 = vld [vmem:[%s25172_s9 + $0x388] sm:$0xff] }
 0xc23   :  { %16020 = vmatprep.mubr.msk.f32.mxu1 %vm5508_vm12, %v12925_v53  ;;  %v12986_v53 = vld [vmem:[%s25172_s9 + $0x390] sm:$0xff] }
 0xc26   :  { %16021 = vmatmul.mubr.msk.f32.gmra.mrb[222].mxu1 %vm5508_vm12, %v12926_v63  ;;  %v12987_v63 = vld [vmem:[%s25172_s9 + $0x398] sm:$0xff] }
 0xc27   :  { %16023 = vmatprep.mubr.msk.f32.mxu1 %vm5508_vm12, %v12927_v56  ;;  %v12988_v56 = vld [vmem:[%s25172_s9 + $0x3a0] sm:$0xff] }
 0xc2a   :  { %16024 = vmatmul.mubr.msk.f32.gmra.mrb[224].mxu1 %vm5508_vm12, %v12928_v19  ;;  %v12989_v19 = vld [vmem:[%s25172_s9 + $0x3a8] sm:$0xff] }
 0xc2b   :  { %16026 = vmatprep.mubr.msk.f32.mxu1 %vm5508_vm12, %v12929_v17  ;;  %v12990_v17 = vld [vmem:[%s25172_s9 + $0x3b0] sm:$0xff] }
 0xc2e   :  { %16027 = vmatmul.mubr.msk.f32.gmra.mrb[226].mxu1 %vm5508_vm12, %v12930_v23  ;;  %v13023_v23 = vld [vmem:[%s25172_s9 + $0x3c0] sm:$0xff] }
 0xc2f   :  { %16055 = vmatprep.mubr.msk.f32.mxu1 %vm5508_vm12, %v12962_v21  ;;  %v7356_v21 = vld [vmem:[%s25173_s10] sm:$0xff] }
 0xc30   :  { %v17834_v28 = vpack.c.bf16 %v7357_v22, %v7356_v21 }
 0xc32   :  { %16056 = vmatmul.mubr.msk.f32.vlgmr.msra.gmra.mrb[198].mxu1 %vm5508_vm12, %v12963_v1  ;;  %v13025_v1 = vld [vmem:[%s25172_s9 + $0x3d0] sm:$0xff] }
 0xc33   :  { %17812 = vmatpush3.bf16.msra.mxu1 %v17809_v61  ;;  %16058 = vmatprep.mubr.msk.f32.mxu1 %vm5508_vm12, %v12964_v18  ;;  %v12976_v61 = vld [vmem:[%s25172_s9 + $0x340] sm:$0xff]  ;;  %v7358_v18 = vld [vmem:[%s25173_s10 + $0x10] sm:$0xff] }
 0xc34   :  { %17814 = vmatprep.subr.bf16.mxu1 %v17813_v20 }
 0xc36   :  { %16059 = vmatmul.mubr.msk.f32.gmra.mrb[200].mxu1 %vm5508_vm12, %v12965_v36  ;;  %v13028_v36 = vld [vmem:[%s25172_s9 + $0x3e8] sm:$0xff] }
 0xc37   :  { %17816 = vmatpush3.bf16.msra.mxu1 %v17813_v20  ;;  %16061 = vmatprep.mubr.msk.f32.mxu1 %vm5508_vm12, %v12966_v8  ;;  %v17837_v20 = vpack.c.bf16 %v7359_v4, %v7358_v18  ;;  %v13029_v8 = vld [vmem:[%s25172_s9 + $0x3f0] sm:$0xff] }
 0xc38   :  { %17818 = vmatprep.subr.bf16.mxu1 %v17817_v11 }
 0xc3a   :  { %16062 = vmatmul.mubr.msk.f32.gmra.mrb[202].mxu1 %vm5508_vm12, %v12967_v10  ;;  %v13034_v10 = vld [vmem:[%s25172_s9 + $0x418] sm:$0xff] }
 0xc3b   :  { %17820 = vmatpush3.bf16.msra.mxu1 %v17817_v11  ;;  %16064 = vmatprep.mubr.msk.f32.mxu1 %vm5508_vm12, %v12968_v27  ;;  %v13032_v11 = vld [vmem:[%s25172_s9 + $0x408] sm:$0xff]  ;;  %v13035_v27 = vld [vmem:[%s25172_s9 + $0x420] sm:$0xff] }
 0xc3c   :  { %17822 = vmatprep.subr.bf16.mxu1 %v17821_v14 }
 0xc3e   :  { %16065 = vmatmul.mubr.msk.f32.gmra.mrb[204].mxu1 %vm5508_vm12, %v12969_v24  ;;  %v13040_v24 = vld [vmem:[%s25172_s9 + $0x448] sm:$0xff] }
 0xc3f   :  { %17824 = vmatpush3.bf16.msra.mxu1 %v17821_v14  ;;  %16067 = vmatprep.mubr.msk.f32.mxu1 %vm5508_vm12, %v12970_v32  ;;  %v13038_v14 = vld [vmem:[%s25172_s9 + $0x438] sm:$0xff]  ;;  %v13041_v32 = vld [vmem:[%s25172_s9 + $0x450] sm:$0xff] }
 0xc40   :  { %17826 = vmatprep.subr.bf16.mxu1 %v17825_v30 }
 0xc42   :  { %16068 = vmatmul.mubr.msk.f32.gmra.mrb[206].mxu1 %vm5508_vm12, %v12971_v38  ;;  %v13045_v38 = vld [vmem:[%s25172_s9 + $0x470] sm:$0xff] }
 0xc43   :  { %17828 = vmatpush3.bf16.msra.mxu1 %v17825_v30  ;;  %16070 = vmatprep.mubr.msk.f32.mxu1 %vm5508_vm12, %v12972_v41  ;;  %v13044_v30 = vld [vmem:[%s25172_s9 + $0x468] sm:$0xff]  ;;  %v13046_v41 = vld [vmem:[%s25172_s9 + $0x478] sm:$0xff] }
 0xc44   :  { %17830 = vmatprep.subr.bf16.mxu1 %v17829_v48 }
 0xc46   :  { %16071 = vmatmul.mubr.msk.f32.gmra.mrb[208].mxu1 %vm5508_vm12, %v12973_v33  ;;  %v13048_v33 = vld [vmem:[%s25172_s9 + $0x488] sm:$0xff] }
 0xc47   :  { %17832 = vmatpush3.bf16.msra.mxu1 %v17829_v48  ;;  %16073 = vmatprep.mubr.msk.f32.mxu1 %vm5508_vm12, %v12974_v57  ;;  %v13047_v48 = vld [vmem:[%s25172_s9 + $0x480] sm:$0xff]  ;;  %v13049_v57 = vld [vmem:[%s25172_s9 + $0x490] sm:$0xff] }
 0xc48   :  { %16124 = vmatprep.subr.msk.mxu1 %vm189_vm1, %v6991_v62 }
 0xc4a   :  { %16074 = vmatmul.mubr.msk.f32.gmra.mrb[210].mxu1 %vm5508_vm12, %v12975_v59  ;;  %v13051_v59 = vld [vmem:[%s25172_s9 + $0x4a0] sm:$0xff] }
 0xc4b   :  { %16125 = vmatpush3.msk.msra.mxu1 %vm189_vm1, %v6991_v62  ;;  %16076 = vmatprep.mubr.msk.f32.mxu1 %vm5508_vm12, %v12976_v61  ;;  %v13050_v62 = vld [vmem:[%s25172_s9 + $0x498] sm:$0xff]  ;;  %v13052_v61 = vld [vmem:[%s25172_s9 + $0x4a8] sm:$0xff] }
 0xc4c   :  { %17833 = vmatprep.subr.bf16.mxu1 %v25187_v29 }
 0xc4e   :  { %16077 = vmatmul.mubr.msk.f32.gmra.mrb[212].mxu1 %vm5508_vm12, %v12977_v45  ;;  %v13100_v45 = vld [vmem:[%s25173_s10 + $0x20] sm:$0xff] }
 0xc4f   :  { %16079 = vmatprep.mubr.msk.f32.mxu1 %vm5508_vm12, %v12978_v35  ;;  %v13101_v35 = vld [vmem:[%s25173_s10 + $0x28] sm:$0xff] }
 0xc52   :  { %16080 = vmatmul.mubr.msk.f32.gmra.mrb[214].mxu1 %vm5508_vm12, %v12979_v46  ;;  %v17841_v46 = vpack.c.bf16 %v13101_v35, %v13100_v45 }
 0xc53   :  { %16082 = vmatprep.mubr.msk.f32.mxu1 %vm5508_vm12, %v12980_v43  ;;  %v13102_v43 = vld [vmem:[%s25173_s10 + $0x30] sm:$0xff] }
 0xc54   :  { %17842 = vmatpush3.bf16.msra.mxu0 %v17841_v46 }
 0xc55   :  { %17843 = vmatprep.subr.bf16.mxu0 %v25187_v29 }
 0xc56   :  { %16083 = vmatmul.mubr.msk.f32.gmra.mrb[216].mxu1 %vm5508_vm12, %v12981_v55  ;;  %v13103_v55 = vld [vmem:[%s25173_s10 + $0x38] sm:$0xf] }
 0xc57   :  { %16085 = vmatprep.mubr.msk.f32.mxu1 %vm5508_vm12, %v12982_v37  ;;  %v17844_v37 = vpack.c.bf16 %v13103_v55, %v13102_v43 }
 0xc59   :  { %17846 = vmatpush3.bf16.msk.msra.mxu0 %vm22286_vm9, %v17844_v37 }
 0xc5a   :  { %16086 = vmatmul.mubr.msk.f32.gmra.mrb[218].mxu1 %vm5508_vm12, %v12983_v3  ;;  %18007 = vmatprep.subr.bf16.mxu0 %v25187_v29 }
 0xc5b   :  { %16088 = vmatprep.mubr.msk.f32.mxu1 %vm5508_vm12, %v12984_v9 }
 0xc5e   :  { %16089 = vmatmul.mubr.msk.f32.gmra.mrb[220].mxu1 %vm5508_vm12, %v12985_v13 }
 0xc5f   :  { %16091 = vmatprep.mubr.msk.f32.mxu1 %vm5508_vm12, %v12986_v53 }
 0xc62   :  { %16092 = vmatmul.mubr.msk.f32.gmra.mrb[222].mxu1 %vm5508_vm12, %v12987_v63 }
 0xc63   :  { %16094 = vmatprep.mubr.msk.f32.mxu1 %vm5508_vm12, %v12988_v56 }
 0xc66   :  { %16095 = vmatmul.mubr.msk.f32.gmra.mrb[224].mxu1 %vm5508_vm12, %v12989_v19 }
 0xc67   :  { %16097 = vmatprep.mubr.msk.f32.mxu1 %vm5508_vm12, %v12990_v17 }
 0xc6a   :  { %16098 = vmatmul.mubr.msk.f32.gmra.mrb[226].mxu1 %vm5508_vm12, %v12991_v54 }
 0xc6b   :  { %16126 = vmatprep.mubr.msk.f32.mxu1 %vm5508_vm12, %v13023_v23 }
 0xc6e   :  { %16127 = vmatmul.mubr.msk.f32.vlgmr.msra.gmra.mrb[198].mxu1 %vm5508_vm12, %v13024_v47 }
 0xc6f   :  { %17835 = vmatpush3.bf16.msra.mxu1 %v17834_v28  ;;  %16129 = vmatprep.mubr.msk.f32.mxu1 %vm5508_vm12, %v13025_v1 }
 0xc70   :  { %17836 = vmatprep.subr.bf16.mxu1 %v25187_v29 }
 0xc72   :  { %16130 = vmatmul.mubr.msk.f32.gmra.mrb[200].mxu1 %vm5508_vm12, %v13026_v58 }
 0xc73   :  { %17839 = vmatpush3.bf16.msk.msra.mxu1 %vm22286_vm9, %v17837_v20  ;;  %16132 = vmatprep.mubr.msk.f32.mxu1 %vm5508_vm12, %v13027_v7 }
 0xc74   :  { %17848 = vmatprep.subr.bf16.mxu1 %v21420_v5 }
 0xc76   :  { %16133 = vmatmul.mubr.msk.f32.gmra.mrb[202].mxu1 %vm5508_vm12, %v13028_v36 }
 0xc77   :  { %16135 = vmatprep.mubr.msk.f32.mxu1 %vm5508_vm12, %v13029_v8 }
 0xc7a   :  { %16136 = vmatmul.mubr.msk.f32.gmra.mrb[204].mxu1 %vm5508_vm12, %v13030_v42 }
 0xc7b   :  { %16138 = vmatprep.mubr.msk.f32.mxu1 %vm5508_vm12, %v13031_v2 }
 0xc7e   :  { %16139 = vmatmul.mubr.msk.f32.gmra.mrb[206].mxu1 %vm5508_vm12, %v13032_v11 }
 0xc7f   :  { %16141 = vmatprep.mubr.msk.f32.mxu1 %vm5508_vm12, %v13033_v34 }
 0xc82   :  { %16142 = vmatmul.mubr.msk.f32.gmra.mrb[208].mxu1 %vm5508_vm12, %v13034_v10 }
 0xc83   :  { %16144 = vmatprep.mubr.msk.f32.mxu1 %vm5508_vm12, %v13035_v27 }
 0xc86   :  { %16145 = vmatmul.mubr.msk.f32.gmra.mrb[210].mxu1 %vm5508_vm12, %v13036_v12 }
 0xc87   :  { %16147 = vmatprep.mubr.msk.f32.mxu1 %vm5508_vm12, %v13037_v49 }
 0xc8a   :  { %16148 = vmatmul.mubr.msk.f32.gmra.mrb[212].mxu1 %vm5508_vm12, %v13038_v14 }
 0xc8b   :  { %16150 = vmatprep.mubr.msk.f32.mxu1 %vm5508_vm12, %v13039_v0 }
 0xc8e   :  { %16151 = vmatmul.mubr.msk.f32.gmra.mrb[214].mxu1 %vm5508_vm12, %v13040_v24 }
 0xc8f   :  { %16153 = vmatprep.mubr.msk.f32.mxu1 %vm5508_vm12, %v13041_v32 }
 0xc92   :  { %16154 = vmatmul.mubr.msk.f32.gmra.mrb[216].mxu1 %vm5508_vm12, %v13042_v60 }
 0xc93   :  { %16156 = vmatprep.mubr.msk.f32.mxu1 %vm5508_vm12, %v13043_v44 }
 0xc96   :  { %16157 = vmatmul.mubr.msk.f32.gmra.mrb[218].mxu1 %vm5508_vm12, %v13044_v30 }
 0xc97   :  { %16159 = vmatprep.mubr.msk.f32.mxu1 %vm5508_vm12, %v13045_v38 }
 0xc9a   :  { %16160 = vmatmul.mubr.msk.f32.gmra.mrb[220].mxu1 %vm5508_vm12, %v13046_v41 }
 0xc9b   :  { %16162 = vmatprep.mubr.msk.f32.mxu1 %vm5508_vm12, %v13047_v48 }
 0xc9e   :  { %16163 = vmatmul.mubr.msk.f32.gmra.mrb[222].mxu1 %vm5508_vm12, %v13048_v33 }
 0xc9f   :  { %16165 = vmatprep.mubr.msk.f32.mxu1 %vm5508_vm12, %v13049_v57 }
 0xca2   :  { %16166 = vmatmul.mubr.msk.f32.gmra.mrb[224].mxu1 %vm5508_vm12, %v13050_v62 }
 0xca3   :  { %16168 = vmatprep.mubr.msk.f32.mxu1 %vm5508_vm12, %v13051_v59 }
 0xca6   :  { %16169 = vmatmul.mubr.msk.f32.gmra.mrb[226].mxu1 %vm5508_vm12, %v13052_v61 }
 0xca7   :  { %16179 = vmatprep.mubr.msk.f32.mxu1 %vm20378_vm7, %v20379_v31 }
 0xd41   :  { %v16128_v3 = vpop.f32.mrb[198].mxu1 }
 0xd42   :  { %v7162_v9 = vpop.f32.mrb[199].mxu1 }
 0xd45   :  { %v16131_v13 = vpop.f32.mrb[200].mxu1 }
 0xd46   :  { %v7172_v53 = vpop.f32.mrb[201].mxu1 }
 0xd49   :  { %v16134_v63 = vpop.f32.mrb[202].mxu1 }
 0xd4a   :  { %v7182_v56 = vpop.f32.mrb[203].mxu1 }
 0xd4d   :  { %v16137_v19 = vpop.f32.mrb[204].mxu1 }
 0xd4e   :  { %v7192_v17 = vpop.f32.mrb[205].mxu1 }
 0xd51   :  { %v16140_v54 = vpop.f32.mrb[206].mxu1 }
 0xd52   :  { %v7202_v23 = vpop.f32.mrb[207].mxu1 }
 0xd55   :  { %v23270_v21 = vpop.f32.mrb[208].mxu1 }
 0xd56   :  { %v7212_v22 = vpop.f32.mrb[209].mxu1 }
 0xd59   :  { %v23272_v47 = vpop.f32.mrb[210].mxu1 }
 0xd5a   :  { %v7222_v28 = vpop.f32.mrb[211].mxu1 }
 0xd5d   :  { %v16149_v50 = vpop.f32.mrb[212].mxu1 }
 0xd5e   :  { %v7341_v1 = vmax.f32 %v7162_v9, %v16149_v50  ;;  %v7232_v18 = vpop.f32.mrb[213].mxu1 }
 0xd60   :  { %16180 = vmatmul.mubr.msk.f32.vlgmr.msra.gmra.mrb[228].mxu1 %vm7360_vm13, %v7341_v1  ;;  %16233 = vmatmul.mubr.msk.f32.vlgmr.msra.gmra.mrb[80].mxu0 %vm7360_vm13, %v7341_v1 }
 0xd61   :  { %17850 = vmatpush3.bf16.msra.mxu1 %v21420_v5  ;;  %v16152_v4 = vpop.f32.mrb[214].mxu1  ;;  %16182 = vmatprep.mubr.msk.f32.mxu1 %vm20378_vm7, %v20379_v31 }
 0xd62   :  { %v7343_v58 = vmax.f32 %v7172_v53, %v16152_v4  ;;  %17852 = vmatprep.subr.bf16.mxu1 %v21424_v15  ;;  %v7242_v20 = vpop.f32.mrb[215].mxu1  ;;  %16235 = vmatprep.mubr.msk.f32.mxu0 %vm20378_vm7, %v20379_v31 }
 0xd63   :  { %v7342_v7 = vmax.f32 %v16128_v3, %v7242_v20 }
 0xd65   :  { %17854 = vmatpush3.bf16.msra.mxu1 %v21424_v15  ;;  %v16155_v36 = vpop.f32.mrb[216].mxu1  ;;  %16236 = vmatmul.mubr.msk.f32.gmra.mrb[82].mxu0 %vm7360_vm13, %v7342_v7 }
 0xd66   :  { %v7345_v8 = vmax.f32 %v7182_v56, %v16155_v36  ;;  %16183 = vmatmul.mubr.msk.f32.gmra.mrb[230].mxu1 %vm7360_vm13, %v7342_v7  ;;  %17856 = vmatprep.subr.bf16.mxu1 %v21428_v25  ;;  %v7252_v5 = vpop.f32.mrb[217].mxu1 }
 0xd67   :  { %v7344_v42 = vmax.f32 %v16131_v13, %v7252_v5  ;;  %16185 = vmatprep.mubr.msk.f32.mxu1 %vm20378_vm7, %v20379_v31  ;;  %16238 = vmatprep.mubr.msk.f32.mxu0 %vm20378_vm7, %v20379_v31 }
 0xd69   :  { %17858 = vmatpush3.bf16.msra.mxu1 %v21428_v25  ;;  %v16158_v2 = vpop.f32.mrb[218].mxu1  ;;  %16239 = vmatmul.mubr.msk.f32.gmra.mrb[84].mxu0 %vm7360_vm13, %v7343_v58 }
 0xd6a   :  { %v7347_v15 = vmax.f32 %v7192_v17, %v16158_v2  ;;  %16186 = vmatmul.mubr.msk.f32.gmra.mrb[232].mxu1 %vm7360_vm13, %v7343_v58  ;;  %17860 = vmatprep.subr.bf16.mxu1 %v21432_v39  ;;  %v7262_v11 = vpop.f32.mrb[219].mxu1 }
 0xd6b   :  { %v7346_v34 = vmax.f32 %v16134_v63, %v7262_v11  ;;  %16188 = vmatprep.mubr.msk.f32.mxu1 %vm20378_vm7, %v20379_v31  ;;  %16241 = vmatprep.mubr.msk.f32.mxu0 %vm20378_vm7, %v20379_v31 }
 0xd6d   :  { %17862 = vmatpush3.bf16.msra.mxu1 %v21432_v39  ;;  %v16161_v10 = vpop.f32.mrb[220].mxu1  ;;  %16242 = vmatmul.mubr.msk.f32.gmra.mrb[86].mxu0 %vm7360_vm13, %v7344_v42 }
 0xd6e   :  { %v7349_v25 = vmax.f32 %v7202_v23, %v16161_v10  ;;  %16189 = vmatmul.mubr.msk.f32.gmra.mrb[234].mxu1 %vm7360_vm13, %v7344_v42  ;;  %17864 = vmatprep.subr.bf16.mxu1 %v21436_v51  ;;  %v7272_v27 = vpop.f32.mrb[221].mxu1 }
 0xd6f   :  { %v7348_v12 = vmax.f32 %v16137_v19, %v7272_v27  ;;  %16191 = vmatprep.mubr.msk.f32.mxu1 %vm20378_vm7, %v20379_v31  ;;  %16244 = vmatprep.mubr.msk.f32.mxu0 %vm20378_vm7, %v20379_v31 }
 0xd71   :  { %17866 = vmatpush3.bf16.msra.mxu1 %v21436_v51  ;;  %v16164_v49 = vpop.f32.mrb[222].mxu1  ;;  %16245 = vmatmul.mubr.msk.f32.gmra.mrb[88].mxu0 %vm7360_vm13, %v7345_v8 }
 0xd72   :  { %v7351_v39 = vmax.f32 %v7212_v22, %v16164_v49  ;;  %16192 = vmatmul.mubr.msk.f32.gmra.mrb[236].mxu1 %vm7360_vm13, %v7345_v8  ;;  %v7282_v14 = vpop.f32.mrb[223].mxu1  ;;  %16247 = vmatprep.mubr.msk.f32.mxu0 %vm20378_vm7, %v20379_v31 }
 0xd73   :  { %v7350_v0 = vmax.f32 %v16140_v54, %v7282_v14  ;;  %16194 = vmatprep.mubr.msk.f32.mxu1 %vm20378_vm7, %v20379_v31 }
 0xd75   :  { %v16167_v24 = vpop.f32.mrb[224].mxu1  ;;  %16248 = vmatmul.mubr.msk.f32.gmra.mrb[90].mxu0 %vm7360_vm13, %v7346_v34 }
 0xd76   :  { %v7353_v32 = vmax.f32 %v7222_v28, %v16167_v24  ;;  %16195 = vmatmul.mubr.msk.f32.gmra.mrb[238].mxu1 %vm7360_vm13, %v7346_v34  ;;  %v7292_v51 = vpop.f32.mrb[225].mxu1  ;;  %16250 = vmatprep.mubr.msk.f32.mxu0 %vm20378_vm7, %v20379_v31 }
 0xd77   :  { %v7352_v60 = vmax.f32 %v23270_v21, %v7292_v51  ;;  %16197 = vmatprep.mubr.msk.f32.mxu1 %vm20378_vm7, %v20379_v31 }
 0xd79   :  { %v16170_v44 = vpop.f32.mrb[226].mxu1  ;;  %16251 = vmatmul.mubr.msk.f32.gmra.mrb[92].mxu0 %vm7360_vm13, %v7347_v15 }
 0xd7a   :  { %v7355_v30 = vmax.f32 %v7232_v18, %v16170_v44  ;;  %16198 = vmatmul.mubr.msk.f32.gmra.mrb[240].mxu1 %vm7360_vm13, %v7347_v15  ;;  %v7302_v38 = vpop.f32.mrb[227].mxu1  ;;  %16253 = vmatprep.mubr.msk.f32.mxu0 %vm20378_vm7, %v20379_v31 }
 0xd7b   :  { %v7354_v41 = vmax.f32 %v23272_v47, %v7302_v38  ;;  %16200 = vmatprep.mubr.msk.f32.mxu1 %vm20378_vm7, %v20379_v31 }
 0xd7d   :  { %16254 = vmatmul.mubr.msk.f32.gmra.mrb[94].mxu0 %vm7360_vm13, %v7348_v12 }
 0xd7e   :  { %16201 = vmatmul.mubr.msk.f32.gmra.mrb[242].mxu1 %vm7360_vm13, %v7348_v12  ;;  %16256 = vmatprep.mubr.msk.f32.mxu0 %vm20378_vm7, %v20379_v31 }
 0xd7f   :  { %16203 = vmatprep.mubr.msk.f32.mxu1 %vm20378_vm7, %v20379_v31 }
 0xd81   :  { %16257 = vmatmul.mubr.msk.f32.gmra.mrb[96].mxu0 %vm7360_vm13, %v7349_v25 }
 0xd82   :  { %16204 = vmatmul.mubr.msk.f32.gmra.mrb[244].mxu1 %vm7360_vm13, %v7349_v25  ;;  %16259 = vmatprep.mubr.msk.f32.mxu0 %vm20378_vm7, %v20379_v31 }
 0xd83   :  { %16206 = vmatprep.mubr.msk.f32.mxu1 %vm20378_vm7, %v20379_v31 }
 0xd85   :  { %16260 = vmatmul.mubr.msk.f32.gmra.mrb[98].mxu0 %vm7360_vm13, %v7350_v0 }
 0xd86   :  { %16207 = vmatmul.mubr.msk.f32.gmra.mrb[246].mxu1 %vm7360_vm13, %v7350_v0  ;;  %16262 = vmatprep.mubr.msk.f32.mxu0 %vm20378_vm7, %v20379_v31 }
 0xd87   :  { %16209 = vmatprep.mubr.msk.f32.mxu1 %vm20378_vm7, %v20379_v31 }
 0xd89   :  { %16263 = vmatmul.mubr.msk.f32.gmra.mrb[100].mxu0 %vm7360_vm13, %v7351_v39 }
 0xd8a   :  { %16210 = vmatmul.mubr.msk.f32.gmra.mrb[248].mxu1 %vm7360_vm13, %v7351_v39  ;;  %16265 = vmatprep.mubr.msk.f32.mxu0 %vm20378_vm7, %v20379_v31 }
 0xd8b   :  { %16212 = vmatprep.mubr.msk.f32.mxu1 %vm20378_vm7, %v20379_v31 }
 0xd8d   :  { %16266 = vmatmul.mubr.msk.f32.gmra.mrb[102].mxu0 %vm7360_vm13, %v7352_v60 }
 0xd8e   :  { %16213 = vmatmul.mubr.msk.f32.gmra.mrb[250].mxu1 %vm7360_vm13, %v7352_v60  ;;  %16268 = vmatprep.mubr.msk.f32.mxu0 %vm20378_vm7, %v20379_v31 }
 0xd8f   :  { %16215 = vmatprep.mubr.msk.f32.mxu1 %vm20378_vm7, %v20379_v31 }
 0xd91   :  { %16269 = vmatmul.mubr.msk.f32.gmra.mrb[104].mxu0 %vm7360_vm13, %v7353_v32 }
 0xd92   :  { %16216 = vmatmul.mubr.msk.f32.gmra.mrb[252].mxu1 %vm7360_vm13, %v7353_v32  ;;  %16271 = vmatprep.mubr.msk.f32.mxu0 %vm20378_vm7, %v20379_v31 }
 0xd93   :  { %16218 = vmatprep.mubr.msk.f32.mxu1 %vm20378_vm7, %v20379_v31 }
 0xd95   :  { %16272 = vmatmul.mubr.msk.f32.gmra.mrb[106].mxu0 %vm7360_vm13, %v7354_v41 }
 0xd96   :  { %16219 = vmatmul.mubr.msk.f32.gmra.mrb[254].mxu1 %vm7360_vm13, %v7354_v41  ;;  %16274 = vmatprep.mubr.msk.f32.mxu0 %vm20378_vm7, %v20379_v31 }
 0xd97   :  { %16221 = vmatprep.mubr.msk.f32.mxu1 %vm20378_vm7, %v20379_v31 }
 0xd99   :  { %16275 = vmatmul.mubr.msk.f32.gmra.mrb[108].mxu0 %vm7360_vm13, %v7355_v30 }
 0xd9a   :  { %16222 = vmatmul.mubr.msk.f32.gmra.mrb[0].mxu1 %vm7360_vm13, %v7355_v30  ;;  %16491 = vmatprep.mubr.msk.f32.mxu0 %vm20378_vm7, %v20379_v31 }
 0xe33   :  { %v7475_v48 = vpop.f32.mrb[228].mxu1  ;;  %v7623_v33 = vpop.f32.mrb[80].mxu0 }
 0xe34   :  { %v7697_v57 = vmax.f32 %v7475_v48, %v7623_v33  ;;  %v16181_v62 = vpop.f32.mrb[229].mxu1  ;;  %v16234_v59 = vpop.f32.mrb[81].mxu0 }
 0xe36   :  { %v7712_v55 = vmax.f32 %v7697_v57, 0.0 }
 0xe38   :  { %v7628_v61 = vpop.f32.mrb[82].mxu0 }
 0xe39   :  { %v7480_v45 = vpop.f32.mrb[230].mxu1  ;;  %v16237_v35 = vpop.f32.mrb[83].mxu0 }
 0xe3a   :  { %v7698_v46 = vmax.f32 %v7480_v45, %v7628_v61  ;;  %v16184_v43 = vpop.f32.mrb[231].mxu1 }
 0xe3c   :  { %v7713_v37 = vmax.f32 %v7698_v46, 0.0  ;;  %v7633_v3 = vpop.f32.mrb[84].mxu0 }
 0xe3d   :  { %v7485_v9 = vpop.f32.mrb[232].mxu1  ;;  %v16240_v13 = vpop.f32.mrb[85].mxu0 }
 0xe3e   :  { %v7699_v53 = vmax.f32 %v7485_v9, %v7633_v3  ;;  %v16187_v63 = vpop.f32.mrb[233].mxu1  ;;  %v23373_v56 = vpack.i.bf16 %v7713_v37, %v7712_v55  ;;  %v18008_v19 = vpack.c.bf16 %v7713_v37, %v7712_v55 }
 0xe40   :  { %19481 = vrot.lane.b32.xlu0 %v23373_v56, %s20373_s26  ;;  %18009 = vmatpush3.bf16.msra.mxu0 %v18008_v19  ;;  %v7638_v17 = vpop.f32.mrb[86].mxu0  ;;  %v7714_v47 = vmax.f32 %v7699_v53, 0.0 }
 0xe41   :  { %v7490_v54 = vpop.f32.mrb[234].mxu1  ;;  %v16243_v23 = vpop.f32.mrb[87].mxu0  ;;  %18010 = vmatprep.subr.bf16.mxu0 %v25187_v29 }
 0xe42   :  { %v7700_v21 = vmax.f32 %v7490_v54, %v7638_v17  ;;  %v16190_v22 = vpop.f32.mrb[235].mxu1 }
 0xe44   :  { %v7715_v28 = vmax.f32 %v7700_v21, 0.0  ;;  %v7643_v50 = vpop.f32.mrb[88].mxu0 }
 0xe45   :  { %v7495_v1 = vpop.f32.mrb[236].mxu1  ;;  %v16246_v18 = vpop.f32.mrb[89].mxu0 }
 0xe46   :  { %v7701_v4 = vmax.f32 %v7495_v1, %v7643_v50  ;;  %v16193_v58 = vpop.f32.mrb[237].mxu1  ;;  %v23378_v20 = vpack.i.bf16 %v7715_v28, %v7714_v47  ;;  %v18011_v7 = vpack.c.bf16 %v7715_v28, %v7714_v47 }
 0xe48   :  { %19486 = vrot.lane.b32.xlu1 %v23378_v20, %s20373_s26  ;;  %18012 = vmatpush3.bf16.msra.mxu0 %v18011_v7  ;;  %v7648_v36 = vpop.f32.mrb[90].mxu0  ;;  %v7716_v15 = vmax.f32 %v7701_v4, 0.0 }
 0xe49   :  { %v7500_v8 = vpop.f32.mrb[238].mxu1  ;;  %v16249_v5 = vpop.f32.mrb[91].mxu0  ;;  %18013 = vmatprep.subr.bf16.mxu0 %v25187_v29 }
 0xe4a   :  { %v7702_v42 = vmax.f32 %v7500_v8, %v7648_v36  ;;  %v16196_v2 = vpop.f32.mrb[239].mxu1 }
 0xe4c   :  { %v7717_v11 = vmax.f32 %v7702_v42, 0.0  ;;  %v7653_v34 = vpop.f32.mrb[92].mxu0 }
 0xe4d   :  { %v7505_v10 = vpop.f32.mrb[240].mxu1  ;;  %v16252_v25 = vpop.f32.mrb[93].mxu0 }
 0xe4e   :  { %v7703_v27 = vmax.f32 %v7505_v10, %v7653_v34  ;;  %v16199_v12 = vpop.f32.mrb[241].mxu1  ;;  %v23383_v49 = vpack.i.bf16 %v7717_v11, %v7716_v15  ;;  %v18014_v39 = vpack.c.bf16 %v7717_v11, %v7716_v15 }
 0xe50   :  { %19491 = vrot.lane.b32.xlu0 %v23383_v49, %s20373_s26  ;;  %18015 = vmatpush3.bf16.msra.mxu0 %v18014_v39  ;;  %v7658_v14 = vpop.f32.mrb[94].mxu0  ;;  %v7718_v60 = vmax.f32 %v7703_v27, 0.0 }
 0xe51   :  { %v7510_v0 = vpop.f32.mrb[242].mxu1  ;;  %v16255_v24 = vpop.f32.mrb[95].mxu0  ;;  %18016 = vmatprep.subr.bf16.mxu0 %v25187_v29 }
 0xe52   :  { %v7704_v32 = vmax.f32 %v7510_v0, %v7658_v14  ;;  %v16202_v51 = vpop.f32.mrb[243].mxu1 }
 0xe53   :  { %v8654_v51 = vld [vmem:[%s25177_s14 + $0x8] sm:$0xff] }
 0xe54   :  { %v7719_v44 = vmax.f32 %v7704_v32, 0.0  ;;  %v7663_v30 = vpop.f32.mrb[96].mxu0  ;;  %v8653_v32 = vld [vmem:[%s25177_s14] sm:$0xff] }
 0xe55   :  { %v7515_v38 = vpop.f32.mrb[244].mxu1  ;;  %v16258_v41 = vpop.f32.mrb[97].mxu0 }
 0xe56   :  { %v7705_v48 = vmax.f32 %v7515_v38, %v7663_v30  ;;  %v16205_v33 = vpop.f32.mrb[245].mxu1  ;;  %v23388_v57 = vpack.i.bf16 %v7719_v44, %v7718_v60  ;;  %v18017_v62 = vpack.c.bf16 %v7719_v44, %v7718_v60  ;;  %v8655_v60 = vld [vmem:[%s25177_s14 + $0x10] sm:$0xff]  ;;  %v8656_v44 = vld [vmem:[%s25177_s14 + $0x18] sm:$0xff]  ;;  %v8657_v30 = vld [vmem:[%s25177_s14 + $0x20] sm:$0xff] }
 0xe57   :  { %v8658_v38 = vld [vmem:[%s25177_s14 + $0x28] sm:$0xff]  ;;  %v8659_v41 = vld [vmem:[%s25177_s14 + $0x30] sm:$0xff]  ;;  %v8661_v33 = vld [vmem:[%s25177_s14 + $0x40] sm:$0xff] }
 0xe58   :  { %19496 = vrot.lane.b32.xlu1 %v23388_v57, %s20373_s26  ;;  %18018 = vmatpush3.bf16.msra.mxu0 %v18017_v62  ;;  %v7668_v59 = vpop.f32.mrb[98].mxu0  ;;  %v7720_v43 = vmax.f32 %v7705_v48, 0.0  ;;  %v8660_v48 = vld [vmem:[%s25177_s14 + $0x38] sm:$0xff]  ;;  %v8662_v62 = vld [vmem:[%s25177_s14 + $0x48] sm:$0xff] }
 0xe59   :  { %v7520_v61 = vpop.f32.mrb[246].mxu1  ;;  %v16261_v45 = vpop.f32.mrb[99].mxu0  ;;  %18019 = vmatprep.subr.bf16.mxu0 %v25187_v29 }
 0xe5a   :  { %v7706_v35 = vmax.f32 %v7520_v61, %v7668_v59  ;;  %v16208_v46 = vpop.f32.mrb[247].mxu1  ;;  %v8663_v59 = vld [vmem:[%s25177_s14 + $0x50] sm:$0xf] }
 0xe5c   :  { %v7721_v55 = vmax.f32 %v7706_v35, 0.0  ;;  %v7673_v37 = vpop.f32.mrb[100].mxu0 }
 0xe5d   :  { %v7525_v3 = vpop.f32.mrb[248].mxu1  ;;  %v16264_v9 = vpop.f32.mrb[101].mxu0 }
 0xe5e   :  { %v7707_v13 = vmax.f32 %v7525_v3, %v7673_v37  ;;  %v16211_v53 = vpop.f32.mrb[249].mxu1  ;;  %v23393_v63 = vpack.i.bf16 %v7721_v55, %v7720_v43  ;;  %v18020_v19 = vpack.c.bf16 %v7721_v55, %v7720_v43 }
 0xe60   :  { %19501 = vrot.lane.b32.xlu0 %v23393_v63, %s20373_s26  ;;  %18021 = vmatpush3.bf16.msra.mxu0 %v18020_v19  ;;  %v7678_v17 = vpop.f32.mrb[102].mxu0  ;;  %v7722_v47 = vmax.f32 %v7707_v13, 0.0 }
 0xe61   :  { %v7530_v54 = vpop.f32.mrb[250].mxu1  ;;  %v16267_v23 = vpop.f32.mrb[103].mxu0  ;;  %18022 = vmatprep.subr.bf16.mxu0 %v25187_v29 }
 0xe62   :  { %v7708_v21 = vmax.f32 %v7530_v54, %v7678_v17  ;;  %v16214_v22 = vpop.f32.mrb[251].mxu1 }
 0xe64   :  { %v7723_v28 = vmax.f32 %v7708_v21, 0.0  ;;  %v7683_v50 = vpop.f32.mrb[104].mxu0 }
 0xe65   :  { %v7535_v1 = vpop.f32.mrb[252].mxu1  ;;  %v16270_v18 = vpop.f32.mrb[105].mxu0 }
 0xe66   :  { %v7709_v4 = vmax.f32 %v7535_v1, %v7683_v50  ;;  %v16217_v58 = vpop.f32.mrb[253].mxu1  ;;  %v23398_v7 = vpack.i.bf16 %v7723_v28, %v7722_v47  ;;  %v18023_v36 = vpack.c.bf16 %v7723_v28, %v7722_v47 }
 0xe68   :  { %19506 = vrot.lane.b32.xlu1 %v23398_v7, %s20373_s26  ;;  %18024 = vmatpush3.bf16.msra.mxu0 %v18023_v36  ;;  %v7688_v8 = vpop.f32.mrb[106].mxu0  ;;  %v7724_v11 = vmax.f32 %v7709_v4, 0.0 }
 0xe69   :  { %v7540_v5 = vpop.f32.mrb[254].mxu1  ;;  %v16273_v42 = vpop.f32.mrb[107].mxu0  ;;  %18025 = vmatprep.subr.bf16.mxu0 %v25187_v29 }
 0xe6a   :  { %v7710_v2 = vmax.f32 %v7540_v5, %v7688_v8  ;;  %v16220_v15 = vpop.f32.mrb[255].mxu1 }
 0xe6c   :  { %v7725_v34 = vmax.f32 %v7710_v2, 0.0  ;;  %v7693_v10 = vpop.f32.mrb[108].mxu0 }
 0xe6d   :  { %v7545_v25 = vpop.f32.mrb[0].mxu1  ;;  %v16276_v27 = vpop.f32.mrb[109].mxu0 }
 0xe6e   :  { %v7711_v12 = vmax.f32 %v7545_v25, %v7693_v10  ;;  %v16223_v39 = vpop.f32.mrb[1].mxu1  ;;  %v23403_v14 = vpack.i.bf16 %v7725_v34, %v7724_v11  ;;  %v18026_v0 = vpack.c.bf16 %v7725_v34, %v7724_v11  ;;  %v13161_v25 = vld [vmem:[%s25177_s14 + $0x58] sm:$0xff] }
 0xe70   :  { %v23405_v24 = vmax.f32 %v7711_v12, 0.0  ;;  %19511 = vrot.lane.b32.xlu0 %v23403_v14, %s20373_s26  ;;  %18027 = vmatpush3.bf16.msra.mxu0 %v18026_v0 }
 0xe71   :  { %16489 = vmatprep.subr.mxu0 %v20379_v31 }
 0xe72   :  { %8884 = vrot.lane.b32.xlu1 %v23405_v24, %s20373_s26 }
 0xe74   :  { %19516 = vrot.lane.b32.xlu0 %v23373_v56, %s20374_s0  ;;  %16490 = vmatpush3.msra.mxu0 %v23405_v24 }
 0xe75   :  { %18028 = vmatprep.subr.bf16.mxu0 %v25187_v29  ;;  %16492 = vmatmul.mubr.msk.f32.vlgmr.msra.gmra.mrb[110].mxu0 %vm8664_vm14, %v8653_v32 }
 0xe76   :  { %19521 = vrot.lane.b32.xlu1 %v23378_v20, %s20374_s0  ;;  %16494 = vmatprep.mubr.msk.f32.mxu0 %vm20378_vm7, %v20379_v31 }
 0xe78   :  { %19526 = vrot.lane.b32.xlu0 %v23383_v49, %s20374_s0 }
 0xe79   :  { %16495 = vmatmul.mubr.msk.f32.gmra.mrb[112].mxu0 %vm8664_vm14, %v8654_v51  ;;  %v13162_v51 = vld [vmem:[%s25177_s14 + $0x60] sm:$0xff] }
 0xe7a   :  { %19531 = vrot.lane.b32.xlu1 %v23388_v57, %s20374_s0  ;;  %16497 = vmatprep.mubr.msk.f32.mxu0 %vm20378_vm7, %v20379_v31 }
 0xe7c   :  { %19536 = vrot.lane.b32.xlu0 %v23393_v63, %s20374_s0 }
 0xe7d   :  { %16498 = vmatmul.mubr.msk.f32.gmra.mrb[114].mxu0 %vm8664_vm14, %v8655_v60  ;;  %v7746_v60 = vld [vmem:[%s25175_s12] sm:$0xff] }
 0xe7e   :  { %19541 = vrot.lane.b32.xlu1 %v23398_v7, %s20374_s0  ;;  %16500 = vmatprep.mubr.msk.f32.mxu0 %vm20378_vm7, %v20379_v31 }
 0xe7f   :  { %16297 = vmatprep.mubr.msk.f32.mxu1 %vm1977_vm4, %v7746_v60 }
 0xe80   :  { %19546 = vrot.lane.b32.xlu0 %v23403_v14, %s20374_s0 }
 0xe81   :  { %16501 = vmatmul.mubr.msk.f32.gmra.mrb[116].mxu0 %vm8664_vm14, %v8656_v44 }
 0xe82   :  { %9105 = vrot.lane.b32.xlu1 %v23405_v24, %s20374_s0  ;;  %16503 = vmatprep.mubr.msk.f32.mxu0 %vm20378_vm7, %v20379_v31 }
 0xe84   :  { %19551 = vrot.lane.b32.xlu0 %v23373_v56, %s20375_s30 }
 0xe85   :  { %16504 = vmatmul.mubr.msk.f32.gmra.mrb[118].mxu0 %vm8664_vm14, %v8657_v30  ;;  %v7747_v30 = vld [vmem:[%s25175_s12 + $0x8] sm:$0x3] }
 0xe86   :  { %19556 = vrot.lane.b32.xlu1 %v23378_v20, %s20375_s30  ;;  %16506 = vmatprep.mubr.msk.f32.mxu0 %vm20378_vm7, %v20379_v31 }
 0xe87   :  { %16298 = vmatmul.mubr.msk.f32.vlgmr.msra.gmra.mrb[2].mxu1 %vm1977_vm4, %v7747_v30 }
 0xe88   :  { %19561 = vrot.lane.b32.xlu0 %v23383_v49, %s20375_s30 }
 0xe89   :  { %16507 = vmatmul.mubr.msk.f32.gmra.mrb[120].mxu0 %vm8664_vm14, %v8658_v38 }
 0xe8a   :  { %19566 = vrot.lane.b32.xlu1 %v23388_v57, %s20375_s30  ;;  %16509 = vmatprep.mubr.msk.f32.mxu0 %vm20378_vm7, %v20379_v31 }
 0xe8c   :  { %19571 = vrot.lane.b32.xlu0 %v23393_v63, %s20375_s30 }
 0xe8d   :  { %16510 = vmatmul.mubr.msk.f32.gmra.mrb[122].mxu0 %vm8664_vm14, %v8659_v41 }
 0xe8e   :  { %19576 = vrot.lane.b32.xlu1 %v23398_v7, %s20375_s30  ;;  %16512 = vmatprep.mubr.msk.f32.mxu0 %vm20378_vm7, %v20379_v31 }
 0xe90   :  { %19581 = vrot.lane.b32.xlu0 %v23403_v14, %s20375_s30 }
 0xe91   :  { %16513 = vmatmul.mubr.msk.f32.gmra.mrb[124].mxu0 %vm8664_vm14, %v8660_v48 }
 0xe92   :  { %9326 = vrot.lane.b32.xlu1 %v23405_v24, %s20375_s30  ;;  %16515 = vmatprep.mubr.msk.f32.mxu0 %vm20378_vm7, %v20379_v31 }
 0xe94   :  { %19586 = vrot.lane.b32.xlu0 %v23373_v56, %s20376_s20 }
 0xe95   :  { %16516 = vmatmul.mubr.msk.f32.gmra.mrb[126].mxu0 %vm8664_vm14, %v8661_v33 }
 0xe96   :  { %19591 = vrot.lane.b32.xlu1 %v23378_v20, %s20376_s20  ;;  %16518 = vmatprep.mubr.msk.f32.mxu0 %vm20378_vm7, %v20379_v31 }
 0xe98   :  { %19596 = vrot.lane.b32.xlu0 %v23383_v49, %s20376_s20 }
 0xe99   :  { %16519 = vmatmul.mubr.msk.f32.gmra.mrb[128].mxu0 %vm8664_vm14, %v8662_v62  ;;  %v13163_v62 = vld [vmem:[%s25177_s14 + $0x68] sm:$0xff] }
 0xe9a   :  { %19601 = vrot.lane.b32.xlu1 %v23388_v57, %s20376_s20  ;;  %16521 = vmatprep.mubr.msk.f32.mxu0 %vm20378_vm7, %v20379_v31 }
 0xe9c   :  { %19606 = vrot.lane.b32.xlu0 %v23393_v63, %s20376_s20 }
 0xe9d   :  { %16522 = vmatmul.mubr.msk.f32.gmra.mrb[130].mxu0 %vm8664_vm14, %v8663_v59 }
 0xe9e   :  { %19611 = vrot.lane.b32.xlu1 %v23398_v7, %s20376_s20  ;;  %16554 = vmatprep.mubr.msk.f32.mxu0 %vm20378_vm7, %v20379_v31 }
 0xea0   :  { %19616 = vrot.lane.b32.xlu0 %v23403_v14, %s20376_s20 }
 0xea2   :  { %9547 = vrot.lane.b32.xlu1 %v23405_v24, %s20376_s20 }
 0xea4   :  { %19621 = vrot.lane.b32.xlu0 %v23373_v56, %s20381_s7 }
 0xea6   :  { %19626 = vrot.lane.b32.xlu1 %v23378_v20, %s20381_s7 }
 0xea8   :  { %19631 = vrot.lane.b32.xlu0 %v23383_v49, %s20381_s7 }
 0xeaa   :  { %19636 = vrot.lane.b32.xlu1 %v23388_v57, %s20381_s7 }
 0xeac   :  { %19641 = vrot.lane.b32.xlu0 %v23393_v63, %s20381_s7 }
 0xeae   :  { %19646 = vrot.lane.b32.xlu1 %v23398_v7, %s20381_s7 }
 0xeb0   :  { %19651 = vrot.lane.b32.xlu0 %v23403_v14, %s20381_s7 }
 0xeb2   :  { %v19482_v61 = vpop.permute.xlu0 %19481  ;;  %9768 = vrot.lane.b32.xlu1 %v23405_v24, %s20381_s7 }
 0xeb3   :  { %v19484_v45 = vunpack.i.h.bf16 %v19482_v61  ;;  %v19483_v35 = vunpack.i.l.bf16 %v19482_v61 }
 0xeb4   :  { %19656 = vrot.lane.b32.xlu0 %v23373_v56, %s20382_s2 }
 0xeb5   :  { %v18029_v46 = vpack.c.bf16 %v19484_v45, %v19483_v35 }
 0xeb6   :  { %19661 = vrot.lane.b32.xlu1 %v23378_v20, %s20382_s2 }
 0xeb7   :  { %18030 = vmatpush3.bf16.msra.mxu0 %v18029_v46 }
 0xeb8   :  { %19666 = vrot.lane.b32.xlu0 %v23383_v49, %s20382_s2  ;;  %18031 = vmatprep.subr.bf16.mxu0 %v25187_v29 }
 0xeba   :  { %v19487_v43 = vpop.permute.xlu1 %19486  ;;  %19671 = vrot.lane.b32.xlu1 %v23388_v57, %s20382_s2 }
 0xebb   :  { %v19489_v55 = vunpack.i.h.bf16 %v19487_v43  ;;  %v19488_v37 = vunpack.i.l.bf16 %v19487_v43  ;;  %v13164_v43 = vld [vmem:[%s25177_s14 + $0x70] sm:$0xff] }
 0xebc   :  { %19676 = vrot.lane.b32.xlu0 %v23393_v63, %s20382_s2 }
 0xebd   :  { %v18032_v3 = vpack.c.bf16 %v19489_v55, %v19488_v37 }
 0xebe   :  { %19681 = vrot.lane.b32.xlu1 %v23398_v7, %s20382_s2 }
 0xebf   :  { %18033 = vmatpush3.bf16.msra.mxu0 %v18032_v3 }
 0xec0   :  { %19686 = vrot.lane.b32.xlu0 %v23403_v14, %s20382_s2  ;;  %18034 = vmatprep.subr.bf16.mxu0 %v25187_v29 }
 0xec2   :  { %v19492_v9 = vpop.permute.xlu0 %19491  ;;  %10945 = vrot.lane.b32.xlu1 %v23405_v24, %s20382_s2 }
 0xec3   :  { %v19494_v13 = vunpack.i.h.bf16 %v19492_v9  ;;  %v19493_v53 = vunpack.i.l.bf16 %v19492_v9 }
 0xec4   :  { %19691 = vrot.lane.b32.xlu0 %v23373_v56, %s20383_s3 }
 0xec5   :  { %v18035_v19 = vpack.c.bf16 %v19494_v13, %v19493_v53  ;;  %v13165_v53 = vld [vmem:[%s25177_s14 + $0x78] sm:$0xff] }
 0xec6   :  { %19696 = vrot.lane.b32.xlu1 %v23378_v20, %s20383_s3 }
 0xec7   :  { %18036 = vmatpush3.bf16.msra.mxu0 %v18035_v19 }
 0xec8   :  { %19701 = vrot.lane.b32.xlu0 %v23383_v49, %s20383_s3  ;;  %18037 = vmatprep.subr.bf16.mxu0 %v25187_v29 }
 0xeca   :  { %v19497_v17 = vpop.permute.xlu1 %19496  ;;  %19706 = vrot.lane.b32.xlu1 %v23388_v57, %s20383_s3 }
 0xecb   :  { %v19499_v54 = vunpack.i.h.bf16 %v19497_v17  ;;  %v19498_v23 = vunpack.i.l.bf16 %v19497_v17 }
 0xecc   :  { %19711 = vrot.lane.b32.xlu0 %v23393_v63, %s20383_s3 }
 0xecd   :  { %v18038_v21 = vpack.c.bf16 %v19499_v54, %v19498_v23 }
 0xece   :  { %19716 = vrot.lane.b32.xlu1 %v23398_v7, %s20383_s3 }
 0xecf   :  { %18039 = vmatpush3.bf16.msra.mxu0 %v18038_v21 }
 0xed0   :  { %19721 = vrot.lane.b32.xlu0 %v23403_v14, %s20383_s3  ;;  %18040 = vmatprep.subr.bf16.mxu0 %v25187_v29 }
 0xed2   :  { %v19502_v22 = vpop.permute.xlu0 %19501  ;;  %11121 = vrot.lane.b32.xlu1 %v23405_v24, %s20383_s3 }
 0xed3   :  { %v19504_v47 = vunpack.i.h.bf16 %v19502_v22  ;;  %v19503_v28 = vunpack.i.l.bf16 %v19502_v22  ;;  %v13166_v22 = vld [vmem:[%s25177_s14 + $0x80] sm:$0xff] }
 0xed4   :  { %19726 = vrot.lane.b32.xlu0 %v23373_v56, %s20384_s27 }
 0xed5   :  { %v18041_v50 = vpack.c.bf16 %v19504_v47, %v19503_v28 }
 0xed6   :  { %19731 = vrot.lane.b32.xlu1 %v23378_v20, %s20384_s27 }
 0xed7   :  { %18042 = vmatpush3.bf16.msra.mxu0 %v18041_v50 }
 0xed8   :  { %19736 = vrot.lane.b32.xlu0 %v23383_v49, %s20384_s27  ;;  %18043 = vmatprep.subr.bf16.mxu0 %v25187_v29 }
 0xeda   :  { %v19507_v1 = vpop.permute.xlu1 %19506  ;;  %19741 = vrot.lane.b32.xlu1 %v23388_v57, %s20384_s27 }
 0xedb   :  { %v19509_v18 = vunpack.i.h.bf16 %v19507_v1  ;;  %v19508_v4 = vunpack.i.l.bf16 %v19507_v1 }
 0xedc   :  { %19746 = vrot.lane.b32.xlu0 %v23393_v63, %s20384_s27 }
 0xedd   :  { %v18044_v58 = vpack.c.bf16 %v19509_v18, %v19508_v4  ;;  %v13167_v4 = vld [vmem:[%s25177_s14 + $0x88] sm:$0xff] }
 0xede   :  { %19751 = vrot.lane.b32.xlu1 %v23398_v7, %s20384_s27 }
 0xedf   :  { %18045 = vmatpush3.bf16.msra.mxu0 %v18044_v58  ;;  %v13122_v58 = vld [vmem:[%s25175_s12 + $0x10] sm:$0xff] }
 0xee0   :  { %19756 = vrot.lane.b32.xlu0 %v23403_v14, %s20384_s27  ;;  %18046 = vmatprep.subr.bf16.mxu0 %v25187_v29 }
 0xee1   :  { %16320 = vmatprep.mubr.msk.f32.mxu1 %vm1977_vm4, %v13122_v58 }
 0xee2   :  { %v19512_v36 = vpop.permute.xlu0 %19511  ;;  %11297 = vrot.lane.b32.xlu1 %v23405_v24, %s20384_s27 }
 0xee3   :  { %v19514_v8 = vunpack.i.h.bf16 %v19512_v36  ;;  %v19513_v5 = vunpack.i.l.bf16 %v19512_v36 }
 0xee4   :  { %19761 = vrot.lane.b32.xlu0 %v23373_v56, %s20385_s28  ;;  %v8885_v42 = vpop.permute.xlu1 %8884 }
 0xee5   :  { %v18047_v2 = vpack.c.bf16 %v19514_v8, %v19513_v5 }
 0xee6   :  { %v19517_v15 = vpop.permute.xlu0 %19516  ;;  %19766 = vrot.lane.b32.xlu1 %v23378_v20, %s20385_s28 }
 0xee7   :  { %18048 = vmatpush3.bf16.msra.mxu0 %v18047_v2  ;;  %v19519_v11 = vunpack.i.h.bf16 %v19517_v15  ;;  %v19518_v34 = vunpack.i.l.bf16 %v19517_v15 }
 0xee8   :  { %19771 = vrot.lane.b32.xlu0 %v23383_v49, %s20385_s28  ;;  %v19522_v10 = vpop.permute.xlu1 %19521  ;;  %16552 = vmatprep.subr.mxu0 %v20379_v31 }
 0xee9   :  { %v18050_v12 = vpack.c.bf16 %v19519_v11, %v19518_v34  ;;  %v19524_v39 = vunpack.i.h.bf16 %v19522_v10  ;;  %v19523_v0 = vunpack.i.l.bf16 %v19522_v10  ;;  %v13169_v11 = vld [vmem:[%s25177_s14 + $0x98] sm:$0xff] }
 0xeea   :  { %v19527_v27 = vpop.permute.xlu0 %19526  ;;  %19776 = vrot.lane.b32.xlu1 %v23388_v57, %s20385_s28 }
 0xeeb   :  { %16553 = vmatpush3.msra.mxu0 %v8885_v42  ;;  %v18053_v38 = vpack.c.bf16 %v19524_v39, %v19523_v0  ;;  %v19529_v41 = vunpack.i.h.bf16 %v19527_v27  ;;  %v19528_v48 = vunpack.i.l.bf16 %v19527_v27  ;;  %v13168_v42 = vld [vmem:[%s25177_s14 + $0x90] sm:$0xff]  ;;  %v13171_v39 = vld [vmem:[%s25177_s14 + $0xa8] sm:$0xf] }
 0xeec   :  { %19781 = vrot.lane.b32.xlu0 %v23393_v63, %s20385_s28  ;;  %v19532_v32 = vpop.permute.xlu1 %19531  ;;  %16555 = vmatmul.mubr.msk.f32.vlgmr.msra.gmra.mrb[110].mxu0 %vm8664_vm14, %v13161_v25  ;;  %v13170_v25 = vld [vmem:[%s25177_s14 + $0xa0] sm:$0xff] }
 0xeed   :  { %18049 = vmatprep.subr.bf16.mxu0 %v25187_v29  ;;  %16557 = vmatprep.mubr.msk.f32.mxu0 %vm20378_vm7, %v20379_v31  ;;  %v18056_v61 = vpack.c.bf16 %v19529_v41, %v19528_v48  ;;  %v19534_v45 = vunpack.i.h.bf16 %v19532_v32  ;;  %v19533_v35 = vunpack.i.l.bf16 %v19532_v32 }
 0xeee   :  { %18051 = vmatpush3.bf16.msra.mxu0 %v18050_v12  ;;  %v19537_v44 = vpop.permute.xlu0 %19536  ;;  %19786 = vrot.lane.b32.xlu1 %v23398_v7, %s20385_s28 }
 0xeef   :  { %18052 = vmatprep.subr.bf16.mxu0 %v25187_v29  ;;  %v18059_v37 = vpack.c.bf16 %v19534_v45, %v19533_v35  ;;  %v19539_v3 = vunpack.i.h.bf16 %v19537_v44  ;;  %v19538_v9 = vunpack.i.l.bf16 %v19537_v44  ;;  %v13183_v44 = vld [vmem:[%s25177_s14 + $0xb0] sm:$0xff] }
 0xef0   :  { %19791 = vrot.lane.b32.xlu0 %v23403_v14, %s20385_s28  ;;  %v19542_v33 = vpop.permute.xlu1 %19541  ;;  %16558 = vmatmul.mubr.msk.f32.gmra.mrb[112].mxu0 %vm8664_vm14, %v13162_v51 }
 0xef1   :  { %16560 = vmatprep.mubr.msk.f32.mxu0 %vm20378_vm7, %v20379_v31  ;;  %v18062_v17 = vpack.c.bf16 %v19539_v3, %v19538_v9  ;;  %v19544_v54 = vunpack.i.h.bf16 %v19542_v33  ;;  %v19543_v23 = vunpack.i.l.bf16 %v19542_v33 }
 0xef2   :  { %18054 = vmatpush3.bf16.msra.mxu0 %v18053_v38  ;;  %v19547_v59 = vpop.permute.xlu0 %19546  ;;  %11473 = vrot.lane.b32.xlu1 %v23405_v24, %s20385_s28 }
 0xef3   :  { %18055 = vmatprep.subr.bf16.mxu0 %v25187_v29  ;;  %v18065_v28 = vpack.c.bf16 %v19544_v54, %v19543_v23  ;;  %v19549_v50 = vunpack.i.h.bf16 %v19547_v59  ;;  %v19548_v1 = vunpack.i.l.bf16 %v19547_v59 }
 0xef4   :  { %19796 = vrot.lane.b32.xlu0 %v21422_v6, %s20373_s26  ;;  %v9106_v46 = vpop.permute.xlu1 %9105  ;;  %16561 = vmatmul.mubr.msk.f32.gmra.mrb[114].mxu0 %vm8664_vm14, %v13163_v62  ;;  %v13184_v62 = vld [vmem:[%s25177_s14 + $0xb8] sm:$0xff] }
 0xef5   :  { %16563 = vmatprep.mubr.msk.f32.mxu0 %vm20378_vm7, %v20379_v31  ;;  %v18068_v8 = vpack.c.bf16 %v19549_v50, %v19548_v1 }
 0xef6   :  { %18057 = vmatpush3.bf16.msra.mxu0 %v18056_v61  ;;  %v23649_v55 = vpop.permute.xlu0 %19551  ;;  %19801 = vrot.lane.b32.xlu1 %v21426_v16, %s20373_s26 }
 0xef7   :  { %18058 = vmatprep.subr.bf16.mxu0 %v25187_v29  ;;  %v19554_v32 = vunpack.i.h.bf16 %v23649_v55  ;;  %v19553_v51 = vunpack.i.l.bf16 %v23649_v55 }
 0xef8   :  { %19806 = vrot.lane.b32.xlu0 %v21430_v26, %s20373_s26  ;;  %v23656_v13 = vpop.permute.xlu1 %19556  ;;  %16564 = vmatmul.mubr.msk.f32.gmra.mrb[116].mxu0 %vm8664_vm14, %v13164_v43  ;;  %v13185_v43 = vld [vmem:[%s25177_s14 + $0xc0] sm:$0xff] }
 0xef9   :  { %16566 = vmatprep.mubr.msk.f32.mxu0 %vm20378_vm7, %v20379_v31  ;;  %v18071_v38 = vpack.c.bf16 %v19554_v32, %v19553_v51  ;;  %v19559_v41 = vunpack.i.h.bf16 %v23656_v13  ;;  %v19558_v48 = vunpack.i.l.bf16 %v23656_v13  ;;  %v13191_v51 = vld [vmem:[%s25177_s14 + $0xf0] sm:$0xff] }
 0xefa   :  { %18060 = vmatpush3.bf16.msra.mxu0 %v18059_v37  ;;  %v23664_v19 = vpop.permute.xlu0 %19561  ;;  %19811 = vrot.lane.b32.xlu1 %v21434_v40, %s20373_s26 }
 0xefb   :  { %18061 = vmatprep.subr.bf16.mxu0 %v25187_v29  ;;  %v18074_v61 = vpack.c.bf16 %v19559_v41, %v19558_v48  ;;  %v19564_v45 = vunpack.i.h.bf16 %v23664_v19  ;;  %v19563_v35 = vunpack.i.l.bf16 %v23664_v19  ;;  %v13193_v41 = vld [vmem:[%s25177_s14 + $0x100] sm:$0xf] }
 0xefc   :  { %19816 = vrot.lane.b32.xlu0 %v23373_v56, %s20386_s4  ;;  %v23671_v21 = vpop.permute.xlu1 %19566  ;;  %16567 = vmatmul.mubr.msk.f32.gmra.mrb[118].mxu0 %vm8664_vm14, %v13165_v53  ;;  %v13186_v53 = vld [vmem:[%s25177_s14 + $0xc8] sm:$0xff] }
 0xefd   :  { %16569 = vmatprep.mubr.msk.f32.mxu0 %vm20378_vm7, %v20379_v31  ;;  %v18077_v37 = vpack.c.bf16 %v19564_v45, %v19563_v35  ;;  %v19569_v3 = vunpack.i.h.bf16 %v23671_v21  ;;  %v19568_v9 = vunpack.i.l.bf16 %v23671_v21  ;;  %v13205_v45 = vld [vmem:[%s25177_s14 + $0x108] sm:$0xff] }
 0xefe   :  { %18063 = vmatpush3.bf16.msra.mxu0 %v18062_v17  ;;  %v23679_v47 = vpop.permute.xlu0 %19571  ;;  %19821 = vrot.lane.b32.xlu1 %v21438_v52, %s20373_s26  ;;  %s20389_s26 = smov 115  }
 0xeff   :  { %18064 = vmatprep.subr.bf16.mxu0 %v25187_v29  ;;  %v18080_v17 = vpack.c.bf16 %v19569_v3, %v19568_v9  ;;  %v19574_v54 = vunpack.i.h.bf16 %v23679_v47  ;;  %v19573_v23 = vunpack.i.l.bf16 %v23679_v47  ;;  %v13206_v3 = vld [vmem:[%s25177_s14 + $0x110] sm:$0xff] }
 0xf00   :  { %19826 = vrot.lane.b32.xlu0 %v23378_v20, %s20386_s4  ;;  %v23686_v18 = vpop.permute.xlu1 %19576  ;;  %16570 = vmatmul.mubr.msk.f32.gmra.mrb[120].mxu0 %vm8664_vm14, %v13166_v22 }
 0xf01   :  { %16572 = vmatprep.mubr.msk.f32.mxu0 %vm20378_vm7, %v20379_v31  ;;  %v18083_v47 = vpack.c.bf16 %v19574_v54, %v19573_v23  ;;  %v19578_v50 = vunpack.i.l.bf16 %v23686_v18  ;;  %v13207_v23 = vld [vmem:[%s25177_s14 + $0x118] sm:$0xff] }
 0xf02   :  { %18066 = vmatpush3.bf16.msra.mxu0 %v18065_v28  ;;  %v23697_v36 = vpop.permute.xlu0 %19581  ;;  %19831 = vrot.lane.b32.xlu1 %v21422_v6, %s20374_s0  ;;  %v19579_v28 = vunpack.i.h.bf16 %v23686_v18 }
 0xf03   :  { %18067 = vmatprep.subr.bf16.mxu0 %v25187_v29  ;;  %v19584_v58 = vunpack.i.h.bf16 %v23697_v36 }
 0xf04   :  { %19836 = vrot.lane.b32.xlu0 %v23383_v49, %s20386_s4  ;;  %v23705_v5 = vpop.permute.xlu1 %9326  ;;  %16573 = vmatmul.mubr.msk.f32.gmra.mrb[122].mxu0 %vm8664_vm14, %v13167_v4  ;;  %v18086_v18 = vpack.c.bf16 %v19579_v28, %v19578_v50 }
 0xf05   :  { %16575 = vmatprep.mubr.msk.f32.mxu0 %vm20378_vm7, %v20379_v31 }
 0xf06   :  { %18069 = vmatpush3.bf16.msra.mxu0 %v18068_v8  ;;  %v23713_v2 = vpop.permute.xlu0 %19586  ;;  %19841 = vrot.lane.b32.xlu1 %v21426_v16, %s20374_s0  ;;  %v19583_v8 = vunpack.i.l.bf16 %v23697_v36 }
 0xf07   :  { %16615 = vmatprep.subr.mxu0 %v20379_v31 }
 0xf08   :  { %19846 = vrot.lane.b32.xlu0 %v23388_v57, %s20386_s4  ;;  %v23720_v15 = vpop.permute.xlu1 %19591  ;;  %16576 = vmatmul.mubr.msk.f32.gmra.mrb[124].mxu0 %vm8664_vm14, %v13168_v42  ;;  %v18089_v36 = vpack.c.bf16 %v19584_v58, %v19583_v8 }
 0xf09   :  { %16578 = vmatprep.mubr.msk.f32.mxu0 %vm20378_vm7, %v20379_v31 }
 0xf0a   :  { %16616 = vmatpush3.msra.mxu0 %v9106_v46  ;;  %v23728_v34 = vpop.permute.xlu0 %19596  ;;  %19851 = vrot.lane.b32.xlu1 %v21430_v26, %s20374_s0 }
 0xf0b   :  { %18070 = vmatprep.subr.bf16.mxu0 %v25187_v29 }
 0xf0c   :  { %19856 = vrot.lane.b32.xlu0 %v23393_v63, %s20386_s4  ;;  %v23735_v10 = vpop.permute.xlu1 %19601  ;;  %16579 = vmatmul.mubr.msk.f32.gmra.mrb[126].mxu0 %vm8664_vm14, %v13169_v11 }
 0xf0d   :  { %16581 = vmatprep.mubr.msk.f32.mxu0 %vm20378_vm7, %v20379_v31  ;;  %v19603_v28 = vunpack.i.l.bf16 %v23735_v10 }
 0xf0e   :  { %v23743_v27 = vpop.permute.xlu0 %19606  ;;  %19861 = vrot.lane.b32.xlu1 %v21434_v40, %s20374_s0 }
 0xf0f   :  { %v19609_v58 = vunpack.i.h.bf16 %v23743_v27  ;;  %v19608_v8 = vunpack.i.l.bf16 %v23743_v27 }
 0xf10   :  { %19866 = vrot.lane.b32.xlu0 %v23398_v7, %s20386_s4  ;;  %v23749_v12 = vpop.permute.xlu1 %19611  ;;  %16582 = vmatmul.mubr.msk.f32.gmra.mrb[128].mxu0 %vm8664_vm14, %v13170_v25 }
 0xf11   :  { %16584 = vmatprep.mubr.msk.f32.mxu0 %vm20378_vm7, %v20379_v31  ;;  %v18104_v27 = vpack.c.bf16 %v19609_v58, %v19608_v8 }
 0xf12   :  { %v23757_v0 = vpop.permute.xlu0 %19616  ;;  %19871 = vrot.lane.b32.xlu1 %v21438_v52, %s20374_s0 }
 0xf14   :  { %19876 = vrot.lane.b32.xlu0 %v23403_v14, %s20386_s4  ;;  %v23765_v60 = vpop.permute.xlu1 %9547  ;;  %16585 = vmatmul.mubr.msk.f32.gmra.mrb[130].mxu0 %vm8664_vm14, %v13171_v39  ;;  %v13190_v39 = vld [vmem:[%s25177_s14 + $0xe8] sm:$0xff] }
 0xf15   :  { %16617 = vmatprep.mubr.msk.f32.mxu0 %vm20378_vm7, %v20379_v31 }
 0xf16   :  { %v23773_v30 = vpop.permute.xlu0 %19621  ;;  %19881 = vrot.lane.b32.xlu1 %v21422_v6, %s20375_s30 }
 0xf18   :  { %11649 = vrot.lane.b32.xlu0 %v23405_v24, %s20386_s4  ;;  %v23781_v33 = vpop.permute.xlu1 %19626  ;;  %16618 = vmatmul.mubr.msk.f32.vlgmr.msra.gmra.mrb[110].mxu0 %vm8664_vm14, %v13183_v44 }
 0xf19   :  { %18072 = vmatpush3.bf16.msra.mxu0 %v18071_v38  ;;  %16620 = vmatprep.mubr.msk.f32.mxu0 %vm20378_vm7, %v20379_v31 }
 0xf1a   :  { %v23789_v59 = vpop.permute.xlu0 %19631  ;;  %19886 = vrot.lane.b32.xlu1 %v21426_v16, %s20375_s30  ;;  %18073 = vmatprep.subr.bf16.mxu0 %v25187_v29 }
 0xf1c   :  { %19891 = vrot.lane.b32.xlu0 %v21430_v26, %s20375_s30  ;;  %v23798_v46 = vpop.permute.xlu1 %19636  ;;  %16621 = vmatmul.mubr.msk.f32.gmra.mrb[112].mxu0 %vm8664_vm14, %v13184_v62  ;;  %v19588_v62 = vunpack.i.l.bf16 %v23713_v2 }
 0xf1d   :  { %18075 = vmatpush3.bf16.msra.mxu0 %v18074_v61  ;;  %16623 = vmatprep.mubr.msk.f32.mxu0 %vm20378_vm7, %v20379_v31 }
 0xf1e   :  { %v23806_v55 = vpop.permute.xlu0 %19641  ;;  %19896 = vrot.lane.b32.xlu1 %v21434_v40, %s20375_s30  ;;  %18076 = vmatprep.subr.bf16.mxu0 %v25187_v29 }
 0xf20   :  { %v23813_v13 = vpop.permute.xlu1 %19646  ;;  %16624 = vmatmul.mubr.msk.f32.gmra.mrb[114].mxu0 %vm8664_vm14, %v13185_v43  ;;  %19901 = vrot.lane.b32.xlu0 %v21438_v52, %s20375_s30  ;;  %v19593_v43 = vunpack.i.l.bf16 %v23720_v15 }
 0xf21   :  { %18078 = vmatpush3.bf16.msra.mxu0 %v18077_v37  ;;  %16626 = vmatprep.mubr.msk.f32.mxu0 %vm20378_vm7, %v20379_v31 }
 0xf22   :  { %v23823_v19 = vpop.permute.xlu0 %19651  ;;  %19906 = vrot.lane.b32.xlu1 %v23373_v56, %s20387_s23  ;;  %18079 = vmatprep.subr.bf16.mxu0 %v25187_v29  ;;  %v13187_v56 = vld [vmem:[%s25177_s14 + $0xd0] sm:$0xff] }
 0xf24   :  { %v23830_v21 = vpop.permute.xlu1 %9768  ;;  %16627 = vmatmul.mubr.msk.f32.gmra.mrb[116].mxu0 %vm8664_vm14, %v13186_v53  ;;  %19911 = vrot.lane.b32.xlu0 %v21422_v6, %s20376_s20  ;;  %v19599_v53 = vunpack.i.h.bf16 %v23728_v34 }
 0xf25   :  { %18081 = vmatpush3.bf16.msra.mxu0 %v18080_v17  ;;  %16629 = vmatprep.mubr.msk.f32.mxu0 %vm20378_vm7, %v20379_v31  ;;  %v19598_v17 = vunpack.i.l.bf16 %v23728_v34 }
 0xf26   :  { %v23840_v22 = vpop.permute.xlu0 %19656  ;;  %19916 = vrot.lane.b32.xlu1 %v23378_v20, %s20387_s23  ;;  %18082 = vmatprep.subr.bf16.mxu0 %v25187_v29  ;;  %v13188_v20 = vld [vmem:[%s25177_s14 + $0xd8] sm:$0xff] }
 0xf27   :  { %v18098_v34 = vpack.c.bf16 %v19599_v53, %v19598_v17  ;;  %v13212_v53 = vld [vmem:[%s25177_s14 + $0x140] sm:$0xff] }
 0xf28   :  { %v23847_v1 = vpop.permute.xlu1 %19661  ;;  %16630 = vmatmul.mubr.msk.f32.gmra.mrb[118].mxu0 %vm8664_vm14, %v13187_v56  ;;  %19921 = vrot.lane.b32.xlu0 %v21426_v16, %s20376_s20 }
 0xf29   :  { %18084 = vmatpush3.bf16.msra.mxu0 %v18083_v47  ;;  %16632 = vmatprep.mubr.msk.f32.mxu0 %vm20378_vm7, %v20379_v31  ;;  %v19604_v47 = vunpack.i.h.bf16 %v23735_v10 }
 0xf2a   :  { %v23857_v4 = vpop.permute.xlu0 %19666  ;;  %19926 = vrot.lane.b32.xlu1 %v23383_v49, %s20387_s23  ;;  %18085 = vmatprep.subr.bf16.mxu0 %v25187_v29  ;;  %v13189_v49 = vld [vmem:[%s25177_s14 + $0xe0] sm:$0xff] }
 0xf2b   :  { %v18101_v10 = vpack.c.bf16 %v19604_v47, %v19603_v28 }
 0xf2c   :  { %v23864_v42 = vpop.permute.xlu1 %19671  ;;  %16633 = vmatmul.mubr.msk.f32.gmra.mrb[120].mxu0 %vm8664_vm14, %v13188_v20  ;;  %19931 = vrot.lane.b32.xlu0 %v21430_v26, %s20376_s20  ;;  %v13208_v20 = vld [vmem:[%s25177_s14 + $0x120] sm:$0xff] }
 0xf2d   :  { %18087 = vmatpush3.bf16.msra.mxu0 %v18086_v18  ;;  %16635 = vmatprep.mubr.msk.f32.mxu0 %vm20378_vm7, %v20379_v31 }
 0xf2e   :  { %v23874_v11 = vpop.permute.xlu0 %19676  ;;  %19936 = vrot.lane.b32.xlu1 %v23388_v57, %s20387_s23  ;;  %18088 = vmatprep.subr.bf16.mxu0 %v25187_v29 }
 0xf30   :  { %v23879_v25 = vpop.permute.xlu1 %19681  ;;  %16636 = vmatmul.mubr.msk.f32.gmra.mrb[122].mxu0 %vm8664_vm14, %v13189_v49  ;;  %19941 = vrot.lane.b32.xlu0 %v21434_v40, %s20376_s20 }
 0xf31   :  { %18090 = vmatpush3.bf16.msra.mxu0 %v18089_v36  ;;  %16638 = vmatprep.mubr.msk.f32.mxu0 %vm20378_vm7, %v20379_v31  ;;  %v13209_v36 = vld [vmem:[%s25177_s14 + $0x128] sm:$0xff] }
 0xf32   :  { %v23889_v32 = vpop.permute.xlu0 %19686  ;;  %19946 = vrot.lane.b32.xlu1 %v23393_v63, %s20387_s23  ;;  %16678 = vmatprep.subr.mxu0 %v20379_v31 }
 0xf34   :  { %v23894_v57 = vpop.permute.xlu1 %10945  ;;  %16639 = vmatmul.mubr.msk.f32.gmra.mrb[124].mxu0 %vm8664_vm14, %v13190_v39  ;;  %19951 = vrot.lane.b32.xlu0 %v21438_v52, %s20376_s20 }
 0xf35   :  { %16679 = vmatpush3.msra.mxu0 %v23705_v5  ;;  %16641 = vmatprep.mubr.msk.f32.mxu0 %vm20378_vm7, %v20379_v31  ;;  %v13192_v5 = vld [vmem:[%s25177_s14 + $0xf8] sm:$0xff] }
 0xf36   :  { %v23905_v44 = vpop.permute.xlu0 %19691  ;;  %19956 = vrot.lane.b32.xlu1 %v23398_v7, %s20387_s23  ;;  %18091 = vmatprep.subr.bf16.mxu0 %v25187_v29 }
 0xf38   :  { %v23910_v63 = vpop.permute.xlu1 %19696  ;;  %16642 = vmatmul.mubr.msk.f32.gmra.mrb[126].mxu0 %vm8664_vm14, %v13191_v51  ;;  %19961 = vrot.lane.b32.xlu0 %v21422_v6, %s20381_s7  ;;  %v19614_v51 = vunpack.i.h.bf16 %v23749_v12 }
 0xf39   :  { %16644 = vmatprep.mubr.msk.f32.mxu0 %vm20378_vm7, %v20379_v31 }
 0xf3a   :  { %v23920_v38 = vpop.permute.xlu0 %19701  ;;  %19966 = vrot.lane.b32.xlu1 %v23403_v14, %s20387_s23  ;;  %v19589_v14 = vunpack.i.h.bf16 %v23713_v2  ;;  %v19594_v2 = vunpack.i.h.bf16 %v23720_v15 }
 0xf3c   :  { %v23924_v7 = vpop.permute.xlu1 %19706  ;;  %16645 = vmatmul.mubr.msk.f32.gmra.mrb[128].mxu0 %vm8664_vm14, %v13192_v5  ;;  %19971 = vrot.lane.b32.xlu0 %v21426_v16, %s20381_s7  ;;  %v18095_v15 = vpack.c.bf16 %v19594_v2, %v19593_v43  ;;  %v19613_v5 = vunpack.i.l.bf16 %v23749_v12  ;;  %v13211_v43 = vld [vmem:[%s25177_s14 + $0x138] sm:$0xff] }
 0xf3d   :  { %16647 = vmatprep.mubr.msk.f32.mxu0 %vm20378_vm7, %v20379_v31 }
 0xf3e   :  { %v23934_v48 = vpop.permute.xlu0 %19711  ;;  %11825 = vrot.lane.b32.xlu1 %v23405_v24, %s20387_s23  ;;  %v18092_v24 = vpack.c.bf16 %v19589_v14, %v19588_v62  ;;  %v13210_v14 = vld [vmem:[%s25177_s14 + $0x130] sm:$0xff]  ;;  %v18107_v12 = vpack.c.bf16 %v19614_v51, %v19613_v5  ;;  %v13215_v5 = vld [vmem:[%s25177_s14 + $0x158] sm:$0xf] }
 0xf40   :  { %v23940_v61 = vpop.permute.xlu1 %19716  ;;  %16648 = vmatmul.mubr.msk.f32.gmra.mrb[130].mxu0 %vm8664_vm14, %v13193_v41  ;;  %19976 = vrot.lane.b32.xlu0 %v21430_v26, %s20381_s7 }
 0xf41   :  { %16680 = vmatprep.mubr.msk.f32.mxu0 %vm20378_vm7, %v20379_v31 }
 0xf42   :  { %v23950_v35 = vpop.permute.xlu0 %19721  ;;  %19981 = vrot.lane.b32.xlu1 %v21434_v40, %s20381_s7 }
 0xf44   :  { %v23956_v37 = vpop.permute.xlu1 %11121  ;;  %16681 = vmatmul.mubr.msk.f32.vlgmr.msra.gmra.mrb[110].mxu0 %vm8664_vm14, %v13205_v45  ;;  %19986 = vrot.lane.b32.xlu0 %v21438_v52, %s20381_s7  ;;  %v19619_v45 = vunpack.i.h.bf16 %v23757_v0 }
 0xf45   :  { %18093 = vmatpush3.bf16.msra.mxu0 %v18092_v24  ;;  %16683 = vmatprep.mubr.msk.f32.mxu0 %vm20378_vm7, %v20379_v31  ;;  %v19618_v24 = vunpack.i.l.bf16 %v23757_v0 }
 0xf46   :  { %v23966_v9 = vpop.permute.xlu0 %19726  ;;  %19991 = vrot.lane.b32.xlu1 %v21422_v6, %s20382_s2  ;;  %18094 = vmatprep.subr.bf16.mxu0 %v25187_v29 }
 0xf47   :  { %v18110_v0 = vpack.c.bf16 %v19619_v45, %v19618_v24  ;;  %v19623_v45 = vunpack.i.l.bf16 %v23773_v30 }
 0xf48   :  { %v23973_v54 = vpop.permute.xlu1 %19731  ;;  %16684 = vmatmul.mubr.msk.f32.gmra.mrb[112].mxu0 %vm8664_vm14, %v13206_v3  ;;  %19996 = vrot.lane.b32.xlu0 %v21426_v16, %s20382_s2 }
 0xf49   :  { %18096 = vmatpush3.bf16.msra.mxu0 %v18095_v15  ;;  %16686 = vmatprep.mubr.msk.f32.mxu0 %vm20378_vm7, %v20379_v31 }
 0xf4a   :  { %v23983_v56 = vpop.permute.xlu0 %19736  ;;  %20001 = vrot.lane.b32.xlu1 %v21430_v26, %s20382_s2  ;;  %18097 = vmatprep.subr.bf16.mxu0 %v25187_v29 }
 0xf4c   :  { %v23990_v50 = vpop.permute.xlu1 %19741  ;;  %16687 = vmatmul.mubr.msk.f32.gmra.mrb[114].mxu0 %vm8664_vm14, %v13207_v23  ;;  %20006 = vrot.lane.b32.xlu0 %v21434_v40, %s20382_s2 }
 0xf4d   :  { %18099 = vmatpush3.bf16.msra.mxu0 %v18098_v34  ;;  %16689 = vmatprep.mubr.msk.f32.mxu0 %vm20378_vm7, %v20379_v31  ;;  %v13213_v34 = vld [vmem:[%s25177_s14 + $0x148] sm:$0xff] }
 0xf4e   :  { %v24000_v18 = vpop.permute.xlu0 %19746  ;;  %20011 = vrot.lane.b32.xlu1 %v21438_v52, %s20382_s2  ;;  %18100 = vmatprep.subr.bf16.mxu0 %v25187_v29  ;;  %s20390_s2 = smov 114  }
 0xf50   :  { %v24007_v49 = vpop.permute.xlu1 %19751  ;;  %16690 = vmatmul.mubr.msk.f32.gmra.mrb[116].mxu0 %vm8664_vm14, %v13208_v20  ;;  %20016 = vrot.lane.b32.xlu0 %v21422_v6, %s20383_s3 }
 0xf51   :  { %18102 = vmatpush3.bf16.msra.mxu0 %v18101_v10  ;;  %16692 = vmatprep.mubr.msk.f32.mxu0 %vm20378_vm7, %v20379_v31 }
 0xf52   :  { %v24017_v39 = vpop.permute.xlu0 %19756  ;;  %20021 = vrot.lane.b32.xlu1 %v21426_v16, %s20383_s3  ;;  %18103 = vmatprep.subr.bf16.mxu0 %v25187_v29 }
 0xf54   :  { %v24024_v41 = vpop.permute.xlu1 %11297  ;;  %16693 = vmatmul.mubr.msk.f32.gmra.mrb[118].mxu0 %vm8664_vm14, %v13209_v36  ;;  %20026 = vrot.lane.b32.xlu0 %v21430_v26, %s20383_s3 }
 0xf55   :  { %18105 = vmatpush3.bf16.msra.mxu0 %v18104_v27  ;;  %16695 = vmatprep.mubr.msk.f32.mxu0 %vm20378_vm7, %v20379_v31 }
 0xf56   :  { %v24034_v62 = vpop.permute.xlu0 %19761  ;;  %20031 = vrot.lane.b32.xlu1 %v21434_v40, %s20383_s3  ;;  %18106 = vmatprep.subr.bf16.mxu0 %v25187_v29 }
 0xf58   :  { %v24041_v2 = vpop.permute.xlu1 %19766  ;;  %16696 = vmatmul.mubr.msk.f32.gmra.mrb[120].mxu0 %vm8664_vm14, %v13210_v14  ;;  %20036 = vrot.lane.b32.xlu0 %v21438_v52, %s20383_s3  ;;  %s20388_s3 = smov 116  }
 0xf59   :  { %18108 = vmatpush3.bf16.msra.mxu0 %v18107_v12  ;;  %16698 = vmatprep.mubr.msk.f32.mxu0 %vm20378_vm7, %v20379_v31  ;;  %v19624_v12 = vunpack.i.h.bf16 %v23773_v30 }
 0xf5a   :  { %v24051_v3 = vpop.permute.xlu0 %19771  ;;  %20041 = vrot.lane.b32.xlu1 %v21422_v6, %s20384_s27  ;;  %18109 = vmatprep.subr.bf16.mxu0 %v25187_v29 }
 0xf5c   :  { %v24056_v15 = vpop.permute.xlu1 %19776  ;;  %16699 = vmatmul.mubr.msk.f32.gmra.mrb[122].mxu0 %vm8664_vm14, %v13211_v43  ;;  %20046 = vrot.lane.b32.xlu0 %v21426_v16, %s20384_s27 }
 0xf5d   :  { %18111 = vmatpush3.bf16.msra.mxu0 %v18110_v0  ;;  %16701 = vmatprep.mubr.msk.f32.mxu0 %vm20378_vm7, %v20379_v31 }
 0xf5e   :  { %v24066_v17 = vpop.permute.xlu0 %19781  ;;  %20051 = vrot.lane.b32.xlu1 %v21430_v26, %s20384_s27  ;;  %16741 = vmatprep.subr.mxu0 %v20379_v31 }
 0xf60   :  { %v24071_v23 = vpop.permute.xlu1 %19786  ;;  %16702 = vmatmul.mubr.msk.f32.gmra.mrb[124].mxu0 %vm8664_vm14, %v13212_v53  ;;  %20056 = vrot.lane.b32.xlu0 %v21434_v40, %s20384_s27 }
 0xf61   :  { %16742 = vmatpush3.msra.mxu0 %v23765_v60  ;;  %16704 = vmatprep.mubr.msk.f32.mxu0 %vm20378_vm7, %v20379_v31  ;;  %v13214_v60 = vld [vmem:[%s25177_s14 + $0x150] sm:$0xff] }
 0xf62   :  { %v24082_v47 = vpop.permute.xlu0 %19791  ;;  %20061 = vrot.lane.b32.xlu1 %v21438_v52, %s20384_s27  ;;  %18112 = vmatprep.subr.bf16.mxu0 %v25187_v29 }
 0xf64   :  { %v24087_v28 = vpop.permute.xlu1 %11473  ;;  %16705 = vmatmul.mubr.msk.f32.gmra.mrb[126].mxu0 %vm8664_vm14, %v13213_v34  ;;  %20066 = vrot.lane.b32.xlu0 %v21422_v6, %s20385_s28  ;;  %v13227_v34 = vld [vmem:[%s25177_s14 + $0x160] sm:$0xff] }
 0xf65   :  { %16707 = vmatprep.mubr.msk.f32.mxu0 %vm20378_vm7, %v20379_v31 }
 0xf66   :  { %v19797_v20 = vpop.permute.xlu0 %19796  ;;  %20071 = vrot.lane.b32.xlu1 %v21426_v16, %s20385_s28 }
 0xf67   :  { %v19799_v10 = vunpack.i.h.bf16 %v19797_v20  ;;  %v19798_v58 = vunpack.i.l.bf16 %v19797_v20  ;;  %v19629_v20 = vunpack.i.h.bf16 %v23781_v33 }
 0xf68   :  { %v19802_v8 = vpop.permute.xlu1 %19801  ;;  %16708 = vmatmul.mubr.msk.f32.gmra.mrb[128].mxu0 %vm8664_vm14, %v13214_v60  ;;  %20076 = vrot.lane.b32.xlu0 %v21430_v26, %s20385_s28  ;;  %v18113_v60 = vpack.c.bf16 %v19624_v12, %v19623_v45  ;;  %v19633_v12 = vunpack.i.l.bf16 %v23789_v59 }
 0xf69   :  { %v19804_v36 = vunpack.i.h.bf16 %v19802_v8  ;;  %v19803_v27 = vunpack.i.l.bf16 %v19802_v8  ;;  %v17867_v51 = vpack.c.bf16 %v19799_v10, %v19798_v58  ;;  %16710 = vmatprep.mubr.msk.f32.mxu0 %vm20378_vm7, %v20379_v31  ;;  %v19628_v10 = vunpack.i.l.bf16 %v23781_v33 }
 0xf6a   :  { %v19807_v14 = vpop.permute.xlu0 %19806  ;;  %20081 = vrot.lane.b32.xlu1 %v21434_v40, %s20385_s28 }
 0xf6b   :  { %17868 = vmatprep.subr.bf16.mxu1 %v17867_v51  ;;  %v17871_v24 = vpack.c.bf16 %v19804_v36, %v19803_v27  ;;  %v19809_v43 = vunpack.i.h.bf16 %v19807_v14  ;;  %v19808_v0 = vunpack.i.l.bf16 %v19807_v14  ;;  %v18116_v33 = vpack.c.bf16 %v19629_v20, %v19628_v10 }
 0xf6c   :  { %v19812_v53 = vpop.permute.xlu1 %19811  ;;  %16711 = vmatmul.mubr.msk.f32.gmra.mrb[130].mxu0 %vm8664_vm14, %v13215_v5  ;;  %20086 = vrot.lane.b32.xlu0 %v21438_v52, %s20385_s28  ;;  %v19634_v14 = vunpack.i.h.bf16 %v23789_v59  ;;  %v13229_v59 = vld [vmem:[%s25177_s14 + $0x170] sm:$0xff]  ;;  %v19638_v20 = vunpack.i.l.bf16 %v23798_v46 }
 0xf6d   :  { %17870 = vmatpush3.bf16.msra.mxu1 %v17867_v51  ;;  %16743 = vmatprep.mubr.msk.f32.mxu0 %vm20378_vm7, %v20379_v31  ;;  %v17875_v58 = vpack.c.bf16 %v19809_v43, %v19808_v0  ;;  %v19814_v8 = vunpack.i.h.bf16 %v19812_v53  ;;  %v19813_v36 = vunpack.i.l.bf16 %v19812_v53  ;;  %v13228_v51 = vld [vmem:[%s25177_s14 + $0x168] sm:$0xff] }
 0xf6e   :  { %17872 = vmatprep.subr.bf16.mxu1 %v17871_v24  ;;  %v24119_v30 = vpop.permute.xlu0 %19816  ;;  %20091 = vrot.lane.b32.xlu1 %v21422_v6, %s20386_s4 }
 0xf6f   :  { %v17879_v0 = vpack.c.bf16 %v19814_v8, %v19813_v36 }
 0xf70   :  { %16744 = vmatmul.mubr.msk.f32.vlgmr.msra.gmra.mrb[110].mxu0 %vm8664_vm14, %v13227_v34  ;;  %20096 = vrot.lane.b32.xlu0 %v21426_v16, %s20386_s4  ;;  %v19822_v27 = vpop.permute.xlu1 %19821  ;;  %v18119_v34 = vpack.c.bf16 %v19634_v14, %v19633_v12  ;;  %v19643_v14 = vunpack.i.l.bf16 %v23806_v55 }
 0xf71   :  { %18114 = vmatpush3.bf16.msra.mxu0 %v18113_v60  ;;  %17874 = vmatpush3.bf16.msra.mxu1 %v17871_v24  ;;  %v19824_v45 = vunpack.i.h.bf16 %v19822_v27  ;;  %v19823_v24 = vunpack.i.l.bf16 %v19822_v27  ;;  %v19639_v60 = vunpack.i.h.bf16 %v23798_v46  ;;  %v13230_v46 = vld [vmem:[%s25177_s14 + $0x178] sm:$0xff] }
 0xf72   :  { %17876 = vmatprep.subr.bf16.mxu1 %v17875_v58  ;;  %v24131_v5 = vpop.permute.xlu0 %19826  ;;  %20101 = vrot.lane.b32.xlu1 %v21430_v26, %s20386_s4 }
 0xf73   :  { %16746 = vmatprep.mubr.msk.f32.mxu0 %vm20378_vm7, %v20379_v31  ;;  %18115 = vmatprep.subr.bf16.mxu0 %v25187_v29  ;;  %v17883_v10 = vpack.c.bf16 %v19824_v45, %v19823_v24 }
 0xf74   :  { %16747 = vmatmul.mubr.msk.f32.gmra.mrb[112].mxu0 %vm8664_vm14, %v13228_v51  ;;  %20106 = vrot.lane.b32.xlu0 %v21434_v40, %s20386_s4  ;;  %v19832_v43 = vpop.permute.xlu1 %19831  ;;  %v18122_v51 = vpack.c.bf16 %v19639_v60, %v19638_v20  ;;  %v19649_v60 = vunpack.i.h.bf16 %v23813_v13  ;;  %v19648_v20 = vunpack.i.l.bf16 %v23813_v13  ;;  %v13232_v13 = vld [vmem:[%s25177_s14 + $0x188] sm:$0xff] }
 0xf75   :  { %18117 = vmatpush3.bf16.msra.mxu0 %v18116_v33  ;;  %17878 = vmatpush3.bf16.msra.mxu1 %v17875_v58  ;;  %v19834_v58 = vunpack.i.h.bf16 %v19832_v43  ;;  %v19833_v8 = vunpack.i.l.bf16 %v19832_v43  ;;  %v19644_v33 = vunpack.i.h.bf16 %v23806_v55  ;;  %v13231_v55 = vld [vmem:[%s25177_s14 + $0x180] sm:$0xff] }
 0xf76   :  { %17880 = vmatprep.subr.bf16.mxu1 %v17879_v0  ;;  %v24146_v53 = vpop.permute.xlu0 %19836  ;;  %20111 = vrot.lane.b32.xlu1 %v21438_v52, %s20386_s4 }
 0xf77   :  { %16749 = vmatprep.mubr.msk.f32.mxu0 %vm20378_vm7, %v20379_v31  ;;  %18118 = vmatprep.subr.bf16.mxu0 %v25187_v29  ;;  %v17887_v12 = vpack.c.bf16 %v19834_v58, %v19833_v8 }
 0xf78   :  { %16750 = vmatmul.mubr.msk.f32.gmra.mrb[114].mxu0 %vm8664_vm14, %v13229_v59  ;;  %20116 = vrot.lane.b32.xlu0 %v21422_v6, %s20387_s23  ;;  %v19842_v36 = vpop.permute.xlu1 %19841  ;;  %v13123_v59 = vld [vmem:[%s25175_s12 + $0x18] sm:$0x3] }
 0xf79   :  { %18120 = vmatpush3.bf16.msra.mxu0 %v18119_v34  ;;  %17882 = vmatpush3.bf16.msra.mxu1 %v17879_v0  ;;  %v19844_v24 = vunpack.i.h.bf16 %v19842_v36  ;;  %v19843_v43 = vunpack.i.l.bf16 %v19842_v36  ;;  %v18125_v34 = vpack.c.bf16 %v19644_v33, %v19643_v14  ;;  %v19654_v33 = vunpack.i.h.bf16 %v23823_v19 }
 0xf7a   :  { %17884 = vmatprep.subr.bf16.mxu1 %v17883_v10  ;;  %v24161_v27 = vpop.permute.xlu0 %19846  ;;  %20121 = vrot.lane.b32.xlu1 %v21426_v16, %s20387_s23  ;;  %v19653_v14 = vunpack.i.l.bf16 %v23823_v19  ;;  %v13233_v19 = vld [vmem:[%s25177_s14 + $0x190] sm:$0xff] }
 0xf7b   :  { %16752 = vmatprep.mubr.msk.f32.mxu0 %vm20378_vm7, %v20379_v31  ;;  %18121 = vmatprep.subr.bf16.mxu0 %v25187_v29  ;;  %v17891_v58 = vpack.c.bf16 %v19844_v24, %v19843_v43 }
 0xf7c   :  { %16753 = vmatmul.mubr.msk.f32.gmra.mrb[116].mxu0 %vm8664_vm14, %v13230_v46  ;;  %20126 = vrot.lane.b32.xlu0 %v21430_v26, %s20387_s23  ;;  %v19852_v45 = vpop.permute.xlu1 %19851 }
 0xf7d   :  { %18123 = vmatpush3.bf16.msra.mxu0 %v18122_v51  ;;  %17886 = vmatpush3.bf16.msra.mxu1 %v17883_v10  ;;  %v19854_v8 = vunpack.i.h.bf16 %v19852_v45  ;;  %v19853_v36 = vunpack.i.l.bf16 %v19852_v45  ;;  %v18128_v51 = vpack.c.bf16 %v19649_v60, %v19648_v20 }
 0xf7e   :  { %17888 = vmatprep.subr.bf16.mxu1 %v17887_v12  ;;  %v24176_v0 = vpop.permute.xlu0 %19856  ;;  %20131 = vrot.lane.b32.xlu1 %v21434_v40, %s20387_s23 }
 0xf7f   :  { %16755 = vmatprep.mubr.msk.f32.mxu0 %vm20378_vm7, %v20379_v31  ;;  %18124 = vmatprep.subr.bf16.mxu0 %v25187_v29  ;;  %v17895_v45 = vpack.c.bf16 %v19854_v8, %v19853_v36 }
 0xf80   :  { %16756 = vmatmul.mubr.msk.f32.gmra.mrb[118].mxu0 %vm8664_vm14, %v13231_v55  ;;  %20136 = vrot.lane.b32.xlu0 %v21438_v52, %s20387_s23  ;;  %v19862_v10 = vpop.permute.xlu1 %19861 }
 0xf81   :  { %18126 = vmatpush3.bf16.msra.mxu0 %v18125_v34  ;;  %16321 = vmatmul.mubr.msk.f32.vlgmr.msra.gmra.mrb[2].mxu1 %vm1977_vm4, %v13123_v59  ;;  %v19864_v24 = vunpack.i.h.bf16 %v19862_v10  ;;  %v19863_v43 = vunpack.i.l.bf16 %v19862_v10  ;;  %v18131_v59 = vpack.c.bf16 %v19654_v33, %v19653_v14  ;;  %v13235_v14 = vld [vmem:[%s25177_s14 + $0x1a0] sm:$0xff] }
 0xf82   :  { %17890 = vmatpush3.bf16.msra.mxu1 %v17887_v12  ;;  %v24195_v46 = vpop.permute.xlu0 %19866  ;;  %20141 = vrot.lane.b32.xlu1 %v21422_v6, %s20388_s3 }
 0xf83   :  { %17892 = vmatprep.subr.bf16.mxu1 %v17891_v58  ;;  %16758 = vmatprep.mubr.msk.f32.mxu0 %vm20378_vm7, %v20379_v31  ;;  %v17899_v60 = vpack.c.bf16 %v19864_v24, %v19863_v43 }
 0xf84   :  { %18127 = vmatprep.subr.bf16.mxu0 %v25187_v29  ;;  %16759 = vmatmul.mubr.msk.f32.gmra.mrb[120].mxu0 %vm8664_vm14, %v13232_v13  ;;  %v19872_v12 = vpop.permute.xlu1 %19871 }
 0xf85   :  { %18129 = vmatpush3.bf16.msra.mxu0 %v18128_v51  ;;  %20146 = vrot.lane.b32.xlu0 %v21426_v16, %s20388_s3  ;;  %v19874_v20 = vunpack.i.h.bf16 %v19872_v12  ;;  %v19873_v10 = vunpack.i.l.bf16 %v19872_v12  ;;  %v13126_v12 = vld [vmem:[%s25175_s12 + $0x20] sm:$0xff] }
 0xf86   :  { %17894 = vmatpush3.bf16.msra.mxu1 %v17891_v58  ;;  %v24210_v55 = vpop.permute.xlu0 %19876  ;;  %20151 = vrot.lane.b32.xlu1 %v21430_v26, %s20388_s3  ;;  %v13234_v58 = vld [vmem:[%s25177_s14 + $0x198] sm:$0xff] }
 0xf87   :  { %17896 = vmatprep.subr.bf16.mxu1 %v17895_v45  ;;  %16761 = vmatprep.mubr.msk.f32.mxu0 %vm20378_vm7, %v20379_v31  ;;  %v17903_v13 = vpack.c.bf16 %v19874_v20, %v19873_v10 }
 0xf88   :  { %18130 = vmatprep.subr.bf16.mxu0 %v25187_v29  ;;  %16762 = vmatmul.mubr.msk.f32.gmra.mrb[122].mxu0 %vm8664_vm14, %v13233_v19  ;;  %v19882_v34 = vpop.permute.xlu1 %19881 }
 0xf89   :  { %18132 = vmatpush3.bf16.msra.mxu0 %v18131_v59  ;;  %20156 = vrot.lane.b32.xlu0 %v21434_v40, %s20388_s3  ;;  %v19884_v51 = vunpack.i.h.bf16 %v19882_v34  ;;  %v19883_v33 = vunpack.i.l.bf16 %v19882_v34  ;;  %v13236_v59 = vld [vmem:[%s25177_s14 + $0x1a8] sm:$0xff] }
 0xf8a   :  { %17898 = vmatpush3.bf16.msra.mxu1 %v17895_v45  ;;  %v24223_v8 = vpop.permute.xlu0 %11649  ;;  %20161 = vrot.lane.b32.xlu1 %v21438_v52, %s20388_s3  ;;  %s20391_s3 = smov 113  }
 0xf8b   :  { %17900 = vmatprep.subr.bf16.mxu1 %v17899_v60  ;;  %16764 = vmatprep.mubr.msk.f32.mxu0 %vm20378_vm7, %v20379_v31  ;;  %v17907_v24 = vpack.c.bf16 %v19884_v51, %v19883_v33  ;;  %v13130_v51 = vld [vmem:[%s25175_s12 + $0x30] sm:$0xff] }
 0xf8c   :  { %16804 = vmatprep.subr.mxu0 %v20379_v31  ;;  %16765 = vmatmul.mubr.msk.f32.gmra.mrb[124].mxu0 %vm8664_vm14, %v13234_v58  ;;  %v19887_v36 = vpop.permute.xlu1 %19886 }
 0xf8d   :  { %16805 = vmatpush3.msra.mxu0 %v23830_v21  ;;  %20166 = vrot.lane.b32.xlu0 %v21422_v6, %s20389_s26  ;;  %v19889_v43 = vunpack.i.h.bf16 %v19887_v36  ;;  %v19888_v19 = vunpack.i.l.bf16 %v19887_v36 }
 0xf8e   :  { %17902 = vmatpush3.bf16.msra.mxu1 %v17899_v60  ;;  %v19892_v45 = vpop.permute.xlu0 %19891  ;;  %20171 = vrot.lane.b32.xlu1 %v21426_v16, %s20389_s26  ;;  %v13127_v60 = vld [vmem:[%s25175_s12 + $0x28] sm:$0x3] }
 0xf8f   :  { %17904 = vmatprep.subr.bf16.mxu1 %v17903_v13  ;;  %16767 = vmatprep.mubr.msk.f32.mxu0 %vm20378_vm7, %v20379_v31  ;;  %v17911_v10 = vpack.c.bf16 %v19889_v43, %v19888_v19  ;;  %v19894_v58 = vunpack.i.h.bf16 %v19892_v45  ;;  %v19893_v36 = vunpack.i.l.bf16 %v19892_v45 }
 0xf90   :  { %16768 = vmatmul.mubr.msk.f32.gmra.mrb[126].mxu0 %vm8664_vm14, %v13235_v14  ;;  %v19897_v21 = vpop.permute.xlu1 %19896  ;;  %16343 = vmatprep.mubr.msk.f32.mxu1 %vm1977_vm4, %v13126_v12  ;;  %v19659_v14 = vunpack.i.h.bf16 %v23840_v22  ;;  %v19658_v12 = vunpack.i.l.bf16 %v23840_v22  ;;  %v13249_v22 = vld [vmem:[%s25177_s14 + $0x1b8] sm:$0xff] }
 0xf91   :  { %20176 = vrot.lane.b32.xlu0 %v21430_v26, %s20389_s26  ;;  %16770 = vmatprep.mubr.msk.f32.mxu0 %vm20378_vm7, %v20379_v31  ;;  %v19899_v43 = vunpack.i.h.bf16 %v19897_v21  ;;  %v19898_v19 = vunpack.i.l.bf16 %v19897_v21  ;;  %v19663_v21 = vunpack.i.l.bf16 %v23847_v1 }
 0xf92   :  { %17906 = vmatpush3.bf16.msra.mxu1 %v17903_v13  ;;  %v19902_v34 = vpop.permute.xlu0 %19901  ;;  %20181 = vrot.lane.b32.xlu1 %v21434_v40, %s20389_s26  ;;  %v13237_v13 = vld [vmem:[%s25177_s14 + $0x1b0] sm:$0xf] }
 0xf93   :  { %17908 = vmatprep.subr.bf16.mxu1 %v17907_v24  ;;  %18313 = vmatprep.subr.bf16.mxu0 %v25187_v29  ;;  %v19903_v29 = vunpack.i.l.bf16 %v19902_v34 }
 0xf94   :  { %16771 = vmatmul.mubr.msk.f32.gmra.mrb[128].mxu0 %vm8664_vm14, %v13236_v59  ;;  %v24256_v20 = vpop.permute.xlu1 %19906 }
 0xf95   :  { %20186 = vrot.lane.b32.xlu0 %v21438_v52, %s20389_s26  ;;  %16344 = vmatmul.mubr.msk.f32.vlgmr.msra.gmra.mrb[2].mxu1 %vm1977_vm4, %v13127_v60  ;;  %v18314_v60 = vpack.c.bf16 %v19659_v14, %v19658_v12  ;;  %v19669_v12 = vunpack.i.h.bf16 %v23857_v4 }
 0xf96   :  { %17910 = vmatpush3.bf16.msra.mxu1 %v17907_v24  ;;  %v19912_v33 = vpop.permute.xlu0 %19911  ;;  %20191 = vrot.lane.b32.xlu1 %v21422_v6, %s20390_s2  ;;  %v17915_v24 = vpack.c.bf16 %v19894_v58, %v19893_v36  ;;  %v19664_v58 = vunpack.i.h.bf16 %v23847_v1 }
 0xf97   :  { %17912 = vmatprep.subr.bf16.mxu1 %v17911_v10  ;;  %16773 = vmatprep.mubr.msk.f32.mxu0 %vm20378_vm7, %v20379_v31 }
 0xf98   :  { %16774 = vmatmul.mubr.msk.f32.gmra.mrb[130].mxu0 %vm8664_vm14, %v13237_v13  ;;  %v24273_v45 = vpop.permute.xlu1 %19916  ;;  %16366 = vmatprep.mubr.msk.f32.mxu1 %vm1977_vm4, %v13130_v51  ;;  %v17919_v13 = vpack.c.bf16 %v19899_v43, %v19898_v19  ;;  %v19904_v51 = vunpack.i.h.bf16 %v19902_v34  ;;  %v18317_v1 = vpack.c.bf16 %v19664_v58, %v19663_v21  ;;  %v19668_v43 = vunpack.i.l.bf16 %v23857_v4  ;;  %v13251_v4 = vld [vmem:[%s25177_s14 + $0x1c8] sm:$0xff] }
 0xf99   :  { %20196 = vrot.lane.b32.xlu0 %v21426_v16, %s20390_s2  ;;  %16806 = vmatprep.mubr.msk.f32.mxu0 %vm20378_vm7, %v20379_v31  ;;  %v25199_v34 = vmov 0.0|0.0  }
 0xf9a   :  { %17914 = vmatpush3.bf16.msra.mxu1 %v17911_v10  ;;  %v24283_v59 = vpop.permute.xlu0 %19921  ;;  %20201 = vrot.lane.b32.xlu1 %v21430_v26, %s20390_s2  ;;  %v13250_v10 = vld [vmem:[%s25177_s14 + $0x1c0] sm:$0xff]  ;;  %v17923_v19 = vpack.c.bf16 %v19904_v51, %v19903_v29  ;;  %v18320_v58 = vpack.c.bf16 %v19669_v12, %v19668_v43  ;;  %v19674_v29 = vunpack.i.h.bf16 %v23864_v42 }
 0xf9b   :  { %17916 = vmatprep.subr.bf16.mxu1 %v17915_v24 }
 0xf9c   :  { %16807 = vmatmul.mubr.msk.f32.vlgmr.msra.gmra.mrb[110].mxu0 %vm8664_vm14, %v13249_v22  ;;  %v24290_v36 = vpop.permute.xlu1 %19926  ;;  %v19913_v22 = vunpack.i.l.bf16 %v19912_v33 }
 0xf9d   :  { %18315 = vmatpush3.bf16.msra.mxu0 %v18314_v60  ;;  %20206 = vrot.lane.b32.xlu0 %v21434_v40, %s20390_s2 }
 0xf9e   :  { %17918 = vmatpush3.bf16.msra.mxu1 %v17915_v24  ;;  %v24297_v14 = vpop.permute.xlu0 %19931  ;;  %20211 = vrot.lane.b32.xlu1 %v21438_v52, %s20390_s2  ;;  %v19914_v24 = vunpack.i.h.bf16 %v19912_v33  ;;  %v19673_v33 = vunpack.i.l.bf16 %v23864_v42  ;;  %v19924_v42 = vunpack.i.h.bf16 %v24283_v59 }
 0xf9f   :  { %17920 = vmatprep.subr.bf16.mxu1 %v17919_v13  ;;  %16809 = vmatprep.mubr.msk.f32.mxu0 %vm20378_vm7, %v20379_v31  ;;  %v19934_v43 = vunpack.i.h.bf16 %v24297_v14 }
 0xfa0   :  { %18316 = vmatprep.subr.bf16.mxu0 %v25199_v34  ;;  %16810 = vmatmul.mubr.msk.f32.gmra.mrb[112].mxu0 %vm8664_vm14, %v13250_v10  ;;  %v24309_v60 = vpop.permute.xlu1 %19936  ;;  %v18323_v51 = vpack.c.bf16 %v19674_v29, %v19673_v33  ;;  %v19679_v10 = vunpack.i.h.bf16 %v23874_v11 }
 0xfa1   :  { %18318 = vmatpush3.bf16.msra.mxu0 %v18317_v1  ;;  %20216 = vrot.lane.b32.xlu0 %v21422_v6, %s20391_s3  ;;  %v17927_v6 = vpack.c.bf16 %v19914_v24, %v19913_v22  ;;  %v19678_v1 = vunpack.i.l.bf16 %v23874_v11  ;;  %v13253_v11 = vld [vmem:[%s25177_s14 + $0x1d8] sm:$0xff]  ;;  %v19684_v22 = vunpack.i.h.bf16 %v23879_v25 }
 0xfa2   :  { %17922 = vmatpush3.bf16.msra.mxu1 %v17919_v13  ;;  %20221 = vrot.lane.b32.xlu1 %v21426_v16, %s20391_s3  ;;  %v19942_v21 = vpop.permute.xlu0 %19941  ;;  %v13252_v16 = vld [vmem:[%s25177_s14 + $0x1d0] sm:$0xff]  ;;  %v19923_v13 = vunpack.i.l.bf16 %v24283_v59 }
 0xfa3   :  { %17924 = vmatprep.subr.bf16.mxu1 %v17923_v19  ;;  %16812 = vmatprep.mubr.msk.f32.mxu0 %vm20378_vm7, %v20379_v31  ;;  %v18326_v24 = vpack.c.bf16 %v19679_v10, %v19678_v1  ;;  %v19944_v29 = vunpack.i.h.bf16 %v19942_v21  ;;  %v19943_v33 = vunpack.i.l.bf16 %v19942_v21  ;;  %v13255_v21 = vld [vmem:[%s25177_s14 + $0x1e8] sm:$0xff] }
 0xfa4   :  { %18319 = vmatprep.subr.bf16.mxu0 %v25199_v34  ;;  %16813 = vmatmul.mubr.msk.f32.gmra.mrb[114].mxu0 %vm8664_vm14, %v13251_v4  ;;  %v24333_v12 = vpop.permute.xlu1 %19946  ;;  %v17931_v59 = vpack.c.bf16 %v19924_v42, %v19923_v13  ;;  %v19683_v4 = vunpack.i.l.bf16 %v23879_v25  ;;  %v13254_v25 = vld [vmem:[%s25177_s14 + $0x1e0] sm:$0xff]  ;;  %v19688_v42 = vunpack.i.l.bf16 %v23889_v32 }
 0xfa5   :  { %18321 = vmatpush3.bf16.msra.mxu0 %v18320_v58  ;;  %20226 = vrot.lane.b32.xlu0 %v21430_v26, %s20391_s3  ;;  %v13131_v26 = vld [vmem:[%s25175_s12 + $0x38] sm:$0x3] }
 0xfa6   :  { %17926 = vmatpush3.bf16.msra.mxu1 %v17923_v19  ;;  %20231 = vrot.lane.b32.xlu1 %v21434_v40, %s20391_s3  ;;  %v19952_v40 = vpop.permute.xlu0 %19951  ;;  %v19933_v19 = vunpack.i.l.bf16 %v24297_v14 }
 0xfa7   :  { %17928 = vmatprep.subr.bf16.mxu1 %v17927_v6  ;;  %16815 = vmatprep.mubr.msk.f32.mxu0 %vm20378_vm7, %v20379_v31  ;;  %v19954_v10 = vunpack.i.h.bf16 %v19952_v40  ;;  %v19953_v1 = vunpack.i.l.bf16 %v19952_v40 }
 0xfa8   :  { %18322 = vmatprep.subr.bf16.mxu0 %v25199_v34  ;;  %16816 = vmatmul.mubr.msk.f32.gmra.mrb[116].mxu0 %vm8664_vm14, %v13252_v16  ;;  %v24359_v14 = vpop.permute.xlu1 %19956  ;;  %v17935_v58 = vpack.c.bf16 %v19934_v43, %v19933_v19  ;;  %v19689_v16 = vunpack.i.h.bf16 %v23889_v32 }
 0xfa9   :  { %18324 = vmatpush3.bf16.msra.mxu0 %v18323_v51  ;;  %20236 = vrot.lane.b32.xlu0 %v21438_v52, %s20391_s3  ;;  %v13134_v52 = vld [vmem:[%s25175_s12 + $0x40] sm:$0xff]  ;;  %v17939_v51 = vpack.c.bf16 %v19944_v29, %v19943_v33  ;;  %v17943_v43 = vpack.c.bf16 %v19954_v10, %v19953_v1  ;;  %v13135_v29 = vld [vmem:[%s25175_s12 + $0x48] sm:$0x3] }
 0xfaa   :  { %16367 = vmatmul.mubr.msk.f32.vlgmr.msra.gmra.mrb[2].mxu1 %vm1977_vm4, %v13131_v26  ;;  %16818 = vmatprep.mubr.msk.f32.mxu0 %vm20378_vm7, %v20379_v31  ;;  %v19962_v13 = vpop.permute.xlu0 %19961  ;;  %v18332_v26 = vpack.c.bf16 %v19689_v16, %v19688_v42  ;;  %v13258_v33 = vld [vmem:[%s25177_s14 + $0x200] sm:$0xff] }
 0xfab   :  { %17930 = vmatpush3.bf16.msra.mxu1 %v17927_v6  ;;  %18325 = vmatprep.subr.bf16.mxu0 %v25199_v34  ;;  %v18329_v6 = vpack.c.bf16 %v19684_v22, %v19683_v4  ;;  %v19964_v40 = vunpack.i.h.bf16 %v19962_v13  ;;  %v19963_v19 = vunpack.i.l.bf16 %v19962_v13  ;;  %v13257_v22 = vld [vmem:[%s25177_s14 + $0x1f8] sm:$0xff] }
 0xfac   :  { %17932 = vmatprep.subr.bf16.mxu1 %v17931_v59  ;;  %16819 = vmatmul.mubr.msk.f32.gmra.mrb[118].mxu0 %vm8664_vm14, %v13253_v11  ;;  %v24377_v32 = vpop.permute.xlu1 %19966 }
 0xfad   :  { %18327 = vmatpush3.bf16.msra.mxu0 %v18326_v24  ;;  %16821 = vmatprep.mubr.msk.f32.mxu0 %vm20378_vm7, %v20379_v31  ;;  %v17947_v4 = vpack.c.bf16 %v19964_v40, %v19963_v19 }
 0xfae   :  { %18328 = vmatprep.subr.bf16.mxu0 %v25199_v34  ;;  %16389 = vmatprep.mubr.msk.f32.mxu1 %vm1977_vm4, %v13134_v52  ;;  %v19972_v11 = vpop.permute.xlu0 %19971 }
 0xfaf   :  { %17934 = vmatpush3.bf16.msra.mxu1 %v17931_v59  ;;  %v13256_v59 = vld [vmem:[%s25177_s14 + $0x1f0] sm:$0xff]  ;;  %v19974_v52 = vunpack.i.h.bf16 %v19972_v11 }
 0xfb0   :  { %17936 = vmatprep.subr.bf16.mxu1 %v17935_v58  ;;  %16822 = vmatmul.mubr.msk.f32.gmra.mrb[120].mxu0 %vm8664_vm14, %v13254_v25  ;;  %v24387_v24 = vpop.permute.xlu1 %11825  ;;  %v19973_v25 = vunpack.i.l.bf16 %v19972_v11  ;;  %v19693_v11 = vunpack.i.l.bf16 %v23905_v44 }
 0xfb1   :  { %18330 = vmatpush3.bf16.msra.mxu0 %v18329_v6  ;;  %16824 = vmatprep.mubr.msk.f32.mxu0 %vm20378_vm7, %v20379_v31 }
 0xfb2   :  { %18331 = vmatprep.subr.bf16.mxu0 %v25199_v34  ;;  %v17951_v6 = vpack.c.bf16 %v19974_v52, %v19973_v25  ;;  %v19698_v52 = vunpack.i.l.bf16 %v23910_v63 }
 0xfb3   :  { %17938 = vmatpush3.bf16.msra.mxu1 %v17935_v58  ;;  %v19977_v58 = vpop.permute.xlu0 %19976 }
 0xfb4   :  { %17940 = vmatprep.subr.bf16.mxu1 %v17939_v51  ;;  %16825 = vmatmul.mubr.msk.f32.gmra.mrb[122].mxu0 %vm8664_vm14, %v13255_v21  ;;  %v19979_v16 = vunpack.i.h.bf16 %v19977_v58  ;;  %v19978_v42 = vunpack.i.l.bf16 %v19977_v58  ;;  %v19982_v13 = vpop.permute.xlu1 %19981  ;;  %v13259_v21 = vld [vmem:[%s25177_s14 + $0x208] sm:$0xf] }
 0xfb5   :  { %18333 = vmatpush3.bf16.msra.mxu0 %v18332_v26  ;;  %16827 = vmatprep.mubr.msk.f32.mxu0 %vm20378_vm7, %v20379_v31  ;;  %v19984_v10 = vunpack.i.h.bf16 %v19982_v13  ;;  %v19983_v1 = vunpack.i.l.bf16 %v19982_v13  ;;  %v19694_v26 = vunpack.i.h.bf16 %v23905_v44  ;;  %v20242_v44 = vld [vmem:[%s25177_s14] sm:$0xff] }
 0xfb6   :  { %17076 = vmatprep.subr.mxu0 %v20379_v31 }
 0xfb7   :  { %17942 = vmatpush3.bf16.msra.mxu1 %v17939_v51  ;;  %v17955_v51 = vpack.c.bf16 %v19979_v16, %v19978_v42  ;;  %v20243_v42 = vld [vmem:[%s25177_s14 + $0x8] sm:$0xff] }
 0xfb8   :  { %17944 = vmatprep.subr.bf16.mxu1 %v17943_v43  ;;  %16828 = vmatmul.mubr.msk.f32.gmra.mrb[124].mxu0 %vm8664_vm14, %v13256_v59  ;;  %v19987_v59 = vpop.permute.xlu0 %19986  ;;  %v19992_v25 = vpop.permute.xlu1 %19991 }
 0xfb9   :  { %17077 = vmatpush3.msra.mxu0 %v23894_v57  ;;  %16830 = vmatprep.mubr.msk.f32.mxu0 %vm20378_vm7, %v20379_v31  ;;  %v13138_v57 = vld [vmem:[%s25175_s12 + $0x50] sm:$0xff]  ;;  %v19989_v40 = vunpack.i.h.bf16 %v19987_v59  ;;  %v19988_v19 = vunpack.i.l.bf16 %v19987_v59 }
 0xfba   :  { %18334 = vmatprep.subr.bf16.mxu0 %v25199_v34  ;;  %v20244_v59 = vld [vmem:[%s25177_s14 + $0x10] sm:$0xff] }
 0xfbb   :  { %17946 = vmatpush3.bf16.msra.mxu1 %v17943_v43  ;;  %v17959_v43 = vpack.c.bf16 %v19984_v10, %v19983_v1  ;;  %v17963_v58 = vpack.c.bf16 %v19989_v40, %v19988_v19  ;;  %v19708_v1 = vunpack.i.l.bf16 %v23924_v7 }
 0xfbc   :  { %17948 = vmatprep.subr.bf16.mxu1 %v17947_v4  ;;  %16831 = vmatmul.mubr.msk.f32.gmra.mrb[126].mxu0 %vm8664_vm14, %v13257_v22  ;;  %v18335_v22 = vpack.c.bf16 %v19694_v26, %v19693_v11  ;;  %v19997_v16 = vpop.permute.xlu0 %19996  ;;  %v20002_v26 = vpop.permute.xlu1 %20001  ;;  %v13139_v11 = vld [vmem:[%s25175_s12 + $0x58] sm:$0x3] }
 0xfbd   :  { %16833 = vmatprep.mubr.msk.f32.mxu0 %vm20378_vm7, %v20379_v31  ;;  %v20004_v40 = vunpack.i.h.bf16 %v20002_v26  ;;  %v20003_v19 = vunpack.i.l.bf16 %v20002_v26 }
 0xfbe   :  { %16390 = vmatmul.mubr.msk.f32.vlgmr.msra.gmra.mrb[2].mxu1 %vm1977_vm4, %v13135_v29  ;;  %v19994_v29 = vunpack.i.h.bf16 %v19992_v25 }
 0xfbf   :  { %17950 = vmatpush3.bf16.msra.mxu1 %v17947_v4  ;;  %16412 = vmatprep.mubr.msk.f32.mxu1 %vm1977_vm4, %v13138_v57  ;;  %v19699_v4 = vunpack.i.h.bf16 %v23910_v63  ;;  %v19993_v57 = vunpack.i.l.bf16 %v19992_v25  ;;  %v19704_v63 = vunpack.i.h.bf16 %v23920_v38 }
 0xfc0   :  { %17952 = vmatprep.subr.bf16.mxu1 %v17951_v6  ;;  %16834 = vmatmul.mubr.msk.f32.gmra.mrb[128].mxu0 %vm8664_vm14, %v13258_v33  ;;  %v20007_v25 = vpop.permute.xlu0 %20006 }
 0xfc1   :  { %16836 = vmatprep.mubr.msk.f32.mxu0 %vm20378_vm7, %v20379_v31  ;;  %v18338_v33 = vpack.c.bf16 %v19699_v4, %v19698_v52  ;;  %v17967_v13 = vpack.c.bf16 %v19994_v29, %v19993_v57  ;;  %v19714_v4 = vunpack.i.h.bf16 %v23934_v48  ;;  %v19713_v52 = vunpack.i.l.bf16 %v23934_v48 }
 0xfc2   :  { %v20009_v29 = vunpack.i.h.bf16 %v20007_v25  ;;  %v20008_v57 = vunpack.i.l.bf16 %v20007_v25  ;;  %v20249_v25 = vld [vmem:[%s25177_s14 + $0x38] sm:$0xff] }
 0xfc3   :  { %17954 = vmatpush3.bf16.msra.mxu1 %v17951_v6  ;;  %v19703_v6 = vunpack.i.l.bf16 %v23920_v38  ;;  %v19709_v38 = vunpack.i.h.bf16 %v23924_v7  ;;  %v18347_v48 = vpack.c.bf16 %v19714_v4, %v19713_v52  ;;  %v13143_v52 = vld [vmem:[%s25175_s12 + $0x68] sm:$0x3] }
 0xfc4   :  { %17956 = vmatprep.subr.bf16.mxu1 %v17955_v51  ;;  %16837 = vmatmul.mubr.msk.f32.gmra.mrb[130].mxu0 %vm8664_vm14, %v13259_v21  ;;  %v19999_v21 = vunpack.i.h.bf16 %v19997_v16 }
 0xfc5   :  { %17078 = vmatprep.mubr.msk.f32.mxu0 %vm20378_vm7, %v20379_v31  ;;  %v18341_v10 = vpack.c.bf16 %v19704_v63, %v19703_v6  ;;  %v19718_v63 = vunpack.i.l.bf16 %v23940_v61  ;;  %v20012_v6 = vpop.permute.xlu1 %20011 }
 0xfc7   :  { %17958 = vmatpush3.bf16.msra.mxu1 %v17955_v51  ;;  %v19998_v51 = vunpack.i.l.bf16 %v19997_v16  ;;  %v20246_v16 = vld [vmem:[%s25177_s14 + $0x20] sm:$0xff] }
 0xfc8   :  { %17960 = vmatprep.subr.bf16.mxu1 %v17959_v43  ;;  %17079 = vmatmul.mubr.msk.f32.vlgmr.msra.gmra.mrb[132].mxu0 %vm8664_vm14, %v20242_v44  ;;  %v20245_v44 = vld [vmem:[%s25177_s14 + $0x18] sm:$0xff] }
 0xfc9   :  { %18336 = vmatpush3.bf16.msra.mxu0 %v18335_v22  ;;  %17081 = vmatprep.mubr.msk.f32.mxu0 %vm20378_vm7, %v20379_v31  ;;  %v17971_v7 = vpack.c.bf16 %v19999_v21, %v19998_v51  ;;  %v18344_v22 = vpack.c.bf16 %v19709_v38, %v19708_v1  ;;  %v20013_v21 = vunpack.i.l.bf16 %v20012_v6  ;;  %v20017_v38 = vpop.permute.xlu0 %20016  ;;  %v20247_v1 = vld [vmem:[%s25177_s14 + $0x28] sm:$0xff] }
 0xfca   :  { %18337 = vmatprep.subr.bf16.mxu0 %v25199_v34 }
 0xfcb   :  { %17962 = vmatpush3.bf16.msra.mxu1 %v17959_v43  ;;  %v13142_v43 = vld [vmem:[%s25175_s12 + $0x60] sm:$0xff] }
 0xfcc   :  { %17964 = vmatprep.subr.bf16.mxu1 %v17963_v58  ;;  %17082 = vmatmul.mubr.msk.f32.gmra.mrb[134].mxu0 %vm8664_vm14, %v20243_v42  ;;  %v17979_v42 = vpack.c.bf16 %v20009_v29, %v20008_v57  ;;  %v13146_v57 = vld [vmem:[%s25175_s12 + $0x70] sm:$0xff] }
 0xfcd   :  { %18339 = vmatpush3.bf16.msra.mxu0 %v18338_v33  ;;  %17084 = vmatprep.mubr.msk.f32.mxu0 %vm20378_vm7, %v20379_v31  ;;  %v19719_v33 = vunpack.i.h.bf16 %v23940_v61  ;;  %v19724_v61 = vunpack.i.h.bf16 %v23950_v35  ;;  %v20027_v4 = vpop.permute.xlu0 %20026 }
 0xfce   :  { %18340 = vmatprep.subr.bf16.mxu0 %v25199_v34  ;;  %v20028_v29 = vunpack.i.l.bf16 %v20027_v4 }
 0xfcf   :  { %17966 = vmatpush3.bf16.msra.mxu1 %v17963_v58  ;;  %v17975_v58 = vpack.c.bf16 %v20004_v40, %v20003_v19  ;;  %v18350_v51 = vpack.c.bf16 %v19719_v33, %v19718_v63 }
 0xfd0   :  { %17968 = vmatprep.subr.bf16.mxu1 %v17967_v13  ;;  %17085 = vmatmul.mubr.msk.f32.gmra.mrb[136].mxu0 %vm8664_vm14, %v20244_v59  ;;  %v20018_v59 = vunpack.i.l.bf16 %v20017_v38 }
 0xfd1   :  { %18342 = vmatpush3.bf16.msra.mxu0 %v18341_v10  ;;  %17087 = vmatprep.mubr.msk.f32.mxu0 %vm20378_vm7, %v20379_v31  ;;  %v19723_v10 = vunpack.i.l.bf16 %v23950_v35  ;;  %v20022_v35 = vpop.permute.xlu1 %20021 }
 0xfd2   :  { %16413 = vmatmul.mubr.msk.f32.vlgmr.msra.gmra.mrb[2].mxu1 %vm1977_vm4, %v13139_v11  ;;  %18343 = vmatprep.subr.bf16.mxu0 %v25199_v34  ;;  %v20019_v11 = vunpack.i.h.bf16 %v20017_v38  ;;  %v20024_v19 = vunpack.i.h.bf16 %v20022_v35  ;;  %v20252_v38 = vld [vmem:[%s25177_s14 + $0x50] sm:$0xf] }
 0xfd3   :  { %17970 = vmatpush3.bf16.msra.mxu1 %v17967_v13  ;;  %16435 = vmatprep.mubr.msk.f32.mxu1 %vm1977_vm4, %v13142_v43  ;;  %v20014_v13 = vunpack.i.h.bf16 %v20012_v6  ;;  %v18353_v43 = vpack.c.bf16 %v19724_v61, %v19723_v10  ;;  %v19729_v61 = vunpack.i.h.bf16 %v23966_v9  ;;  %v19728_v10 = vunpack.i.l.bf16 %v23966_v9  ;;  %v20253_v9 = vld [vmem:[%s25177_s14 + $0x58] sm:$0xff] }
 0xfd4   :  { %17972 = vmatprep.subr.bf16.mxu1 %v17971_v7  ;;  %17088 = vmatmul.mubr.msk.f32.gmra.mrb[138].mxu0 %vm8664_vm14, %v20245_v44  ;;  %v17987_v40 = vpack.c.bf16 %v20019_v11, %v20018_v59  ;;  %v19734_v11 = vunpack.i.h.bf16 %v23973_v54  ;;  %v19733_v59 = vunpack.i.l.bf16 %v23973_v54  ;;  %v13147_v54 = vld [vmem:[%s25175_s12 + $0x78] sm:$0x3] }
 0xfd5   :  { %18345 = vmatpush3.bf16.msra.mxu0 %v18344_v22  ;;  %17090 = vmatprep.mubr.msk.f32.mxu0 %vm20378_vm7, %v20379_v31  ;;  %v17983_v26 = vpack.c.bf16 %v20014_v13, %v20013_v21  ;;  %v20023_v22 = vunpack.i.l.bf16 %v20022_v35  ;;  %v19739_v35 = vunpack.i.h.bf16 %v23983_v56 }
 0xfd6   :  { %18346 = vmatprep.subr.bf16.mxu0 %v25199_v34 }
 0xfd7   :  { %17974 = vmatpush3.bf16.msra.mxu1 %v17971_v7  ;;  %v20248_v7 = vld [vmem:[%s25177_s14 + $0x30] sm:$0xff]  ;;  %v17991_v44 = vpack.c.bf16 %v20024_v19, %v20023_v22  ;;  %v19744_v19 = vunpack.i.h.bf16 %v23990_v50  ;;  %v19743_v22 = vunpack.i.l.bf16 %v23990_v50 }
 0xfd8   :  { %17976 = vmatprep.subr.bf16.mxu1 %v17975_v58  ;;  %17091 = vmatmul.mubr.msk.f32.gmra.mrb[140].mxu0 %vm8664_vm14, %v20246_v16  ;;  %v20037_v16 = vpop.permute.xlu0 %20036  ;;  %v20256_v50 = vld [vmem:[%s25177_s14 + $0x70] sm:$0xff] }
 0xfd9   :  { %18348 = vmatpush3.bf16.msra.mxu0 %v18347_v48  ;;  %17093 = vmatprep.mubr.msk.f32.mxu0 %vm20378_vm7, %v20379_v31  ;;  %v20032_v48 = vpop.permute.xlu1 %20031  ;;  %v20039_v21 = vunpack.i.h.bf16 %v20037_v16 }
 0xfda   :  { %18349 = vmatprep.subr.bf16.mxu0 %v25199_v34  ;;  %v20034_v63 = vunpack.i.h.bf16 %v20032_v48  ;;  %v20033_v6 = vunpack.i.l.bf16 %v20032_v48 }
 0xfdb   :  { %17978 = vmatpush3.bf16.msra.mxu1 %v17975_v58  ;;  %v20029_v58 = vunpack.i.h.bf16 %v20027_v4  ;;  %v20255_v4 = vld [vmem:[%s25177_s14 + $0x68] sm:$0xff] }
 0xfdc   :  { %17980 = vmatprep.subr.bf16.mxu1 %v17979_v42  ;;  %17094 = vmatmul.mubr.msk.f32.gmra.mrb[142].mxu0 %vm8664_vm14, %v20247_v1  ;;  %v17999_v13 = vpack.c.bf16 %v20034_v63, %v20033_v6  ;;  %v20259_v6 = vld [vmem:[%s25177_s14 + $0x88] sm:$0xff] }
 0xfdd   :  { %18351 = vmatpush3.bf16.msra.mxu0 %v18350_v51  ;;  %17096 = vmatprep.mubr.msk.f32.mxu0 %vm20378_vm7, %v20379_v31  ;;  %v17995_v33 = vpack.c.bf16 %v20029_v58, %v20028_v29  ;;  %v20038_v51 = vunpack.i.l.bf16 %v20037_v16  ;;  %v19754_v29 = vunpack.i.h.bf16 %v24007_v49  ;;  %v20261_v16 = vld [vmem:[%s25177_s14 + $0x98] sm:$0xff] }
 0xfde   :  { %18352 = vmatprep.subr.bf16.mxu0 %v25199_v34 }
 0xfdf   :  { %17982 = vmatpush3.bf16.msra.mxu1 %v17979_v42  ;;  %v20251_v42 = vld [vmem:[%s25177_s14 + $0x48] sm:$0xff]  ;;  %v18003_v1 = vpack.c.bf16 %v20039_v21, %v20038_v51  ;;  %v7740_v51 = vld [vmem:[%s25179_s16] sm:$0xff] }
 0xfe0   :  { %17984 = vmatprep.subr.bf16.mxu1 %v17983_v26  ;;  %17097 = vmatmul.mubr.msk.f32.gmra.mrb[144].mxu0 %vm8664_vm14, %v20248_v7  ;;  %v19738_v7 = vunpack.i.l.bf16 %v23983_v56  ;;  %v20263_v21 = vld [vmem:[%s25177_s14 + $0xa8] sm:$0xf] }
 0xfe1   :  { %18354 = vmatpush3.bf16.msra.mxu0 %v18353_v43  ;;  %17099 = vmatprep.mubr.msk.f32.mxu0 %vm20378_vm7, %v20379_v31  ;;  %v18359_v43 = vpack.c.bf16 %v19734_v11, %v19733_v59  ;;  %v19773_v11 = vunpack.i.l.bf16 %v24051_v3 }
 0xfe2   :  { %17139 = vmatprep.subr.mxu0 %v20379_v31  ;;  %v18362_v56 = vpack.c.bf16 %v19739_v35, %v19738_v7  ;;  %v19784_v7 = vunpack.i.h.bf16 %v24066_v17 }
 0xfe3   :  { %17986 = vmatpush3.bf16.msra.mxu1 %v17983_v26  ;;  %v18356_v26 = vpack.c.bf16 %v19729_v61, %v19728_v10  ;;  %v19769_v10 = vunpack.i.h.bf16 %v24041_v2 }
 0xfe4   :  { %17988 = vmatprep.subr.bf16.mxu1 %v17987_v40  ;;  %17100 = vmatmul.mubr.msk.f32.gmra.mrb[146].mxu0 %vm8664_vm14, %v20249_v25  ;;  %v19749_v25 = vunpack.i.h.bf16 %v24000_v18 }
 0xfe5   :  { %17140 = vmatpush3.msra.mxu0 %v23956_v37  ;;  %17102 = vmatprep.mubr.msk.f32.mxu0 %vm20378_vm7, %v20379_v31  ;;  %v20250_v37 = vld [vmem:[%s25177_s14 + $0x40] sm:$0xff] }
 0xfe6   :  { %16436 = vmatmul.mubr.msk.f32.vlgmr.msra.gmra.mrb[2].mxu1 %vm1977_vm4, %v13143_v52  ;;  %18355 = vmatprep.subr.bf16.mxu0 %v25199_v34  ;;  %v18365_v52 = vpack.c.bf16 %v19744_v19, %v19743_v22  ;;  %v19788_v19 = vunpack.i.l.bf16 %v24071_v23 }
 0xfe7   :  { %17990 = vmatpush3.bf16.msra.mxu1 %v17987_v40  ;;  %16458 = vmatprep.mubr.msk.f32.mxu1 %vm1977_vm4, %v13146_v57  ;;  %v20254_v40 = vld [vmem:[%s25177_s14 + $0x60] sm:$0xff]  ;;  %v19753_v57 = vunpack.i.l.bf16 %v24007_v49 }
 0xfe8   :  { %17992 = vmatprep.subr.bf16.mxu1 %v17991_v44  ;;  %17103 = vmatmul.mubr.msk.f32.gmra.mrb[148].mxu0 %vm8664_vm14, %v20250_v37  ;;  %v19759_v37 = vunpack.i.h.bf16 %v24017_v39  ;;  %v20258_v49 = vld [vmem:[%s25177_s14 + $0x80] sm:$0xff] }
 0xfe9   :  { %17105 = vmatprep.mubr.msk.f32.mxu0 %vm20378_vm7, %v20379_v31  ;;  %v18371_v48 = vpack.c.bf16 %v19754_v29, %v19753_v57  ;;  %v19818_v29 = vunpack.i.l.bf16 %v24119_v30  ;;  %v20274_v57 = vld [vmem:[%s25177_s14 + $0x100] sm:$0xf] }
 0xfeb   :  { %17994 = vmatpush3.bf16.msra.mxu1 %v17991_v44  ;;  %v19748_v44 = vunpack.i.l.bf16 %v24000_v18  ;;  %v20257_v18 = vld [vmem:[%s25177_s14 + $0x78] sm:$0xff] }
 0xfec   :  { %17996 = vmatprep.subr.bf16.mxu1 %v17995_v33  ;;  %17106 = vmatmul.mubr.msk.f32.gmra.mrb[150].mxu0 %vm8664_vm14, %v20251_v42  ;;  %v20262_v42 = vld [vmem:[%s25177_s14 + $0xa0] sm:$0xff] }
 0xfed   :  { %17108 = vmatprep.mubr.msk.f32.mxu0 %vm20378_vm7, %v20379_v31  ;;  %v18368_v58 = vpack.c.bf16 %v19749_v25, %v19748_v44  ;;  %v20270_v44 = vld [vmem:[%s25177_s14 + $0xe0] sm:$0xff] }
 0xfef   :  { %17998 = vmatpush3.bf16.msra.mxu1 %v17995_v33  ;;  %v19758_v33 = vunpack.i.l.bf16 %v24017_v39  ;;  %v20260_v39 = vld [vmem:[%s25177_s14 + $0x90] sm:$0xff] }
 0xff0   :  { %18000 = vmatprep.subr.bf16.mxu1 %v17999_v13  ;;  %17109 = vmatmul.mubr.msk.f32.gmra.mrb[152].mxu0 %vm8664_vm14, %v20252_v38  ;;  %v20264_v38 = vld [vmem:[%s25177_s14 + $0xb0] sm:$0xff] }
 0xff1   :  { %17141 = vmatprep.mubr.msk.f32.mxu0 %vm20378_vm7, %v20379_v31  ;;  %v18374_v63 = vpack.c.bf16 %v19759_v37, %v19758_v33  ;;  %v19828_v37 = vunpack.i.l.bf16 %v24131_v5  ;;  %v20275_v33 = vld [vmem:[%s25177_s14 + $0x108] sm:$0xff] }
 0xff3   :  { %18002 = vmatpush3.bf16.msra.mxu1 %v17999_v13  ;;  %v19763_v13 = vunpack.i.l.bf16 %v24034_v62 }
 0xff4   :  { %18004 = vmatprep.subr.bf16.mxu1 %v18003_v1  ;;  %17142 = vmatmul.mubr.msk.f32.vlgmr.msra.gmra.mrb[132].mxu0 %vm8664_vm14, %v20253_v9  ;;  %v19779_v9 = vunpack.i.h.bf16 %v24056_v15 }
 0xff5   :  { %18357 = vmatpush3.bf16.msra.mxu0 %v18356_v26  ;;  %17144 = vmatprep.mubr.msk.f32.mxu0 %vm20378_vm7, %v20379_v31  ;;  %v19774_v26 = vunpack.i.h.bf16 %v24051_v3  ;;  %v20266_v3 = vld [vmem:[%s25177_s14 + $0xc0] sm:$0xff] }
 0xff6   :  { %18358 = vmatprep.subr.bf16.mxu0 %v25199_v34 }
 0xff7   :  { %18006 = vmatpush3.bf16.msra.mxu1 %v18003_v1  ;;  %v18383_v59 = vpack.c.bf16 %v19774_v26, %v19773_v11  ;;  %v20281_v26 = vld [vmem:[%s25177_s14 + $0x138] sm:$0xff]  ;;  %v20283_v11 = vld [vmem:[%s25177_s14 + $0x148] sm:$0xff] }
 0xff8   :  { %17145 = vmatmul.mubr.msk.f32.gmra.mrb[134].mxu0 %vm8664_vm14, %v20254_v40 }
 0xff9   :  { %18360 = vmatpush3.bf16.msra.mxu0 %v18359_v43  ;;  %17147 = vmatprep.mubr.msk.f32.mxu0 %vm20378_vm7, %v20379_v31  ;;  %v19778_v43 = vunpack.i.l.bf16 %v24056_v15  ;;  %v20267_v15 = vld [vmem:[%s25177_s14 + $0xc8] sm:$0xff] }
 0xffa   :  { %18361 = vmatprep.subr.bf16.mxu0 %v25199_v34  ;;  %16459 = vmatmul.mubr.msk.f32.vlgmr.msra.gmra.mrb[2].mxu1 %vm1977_vm4, %v13147_v54  ;;  %v19783_v54 = vunpack.i.l.bf16 %v24066_v17  ;;  %v20268_v17 = vld [vmem:[%s25177_s14 + $0xd0] sm:$0xff] }
 0xffb   :  { %16861 = vmatprep.mubr.msk.f32.mxu1 %vm9949_vm15, %v7740_v51  ;;  %v18386_v35 = vpack.c.bf16 %v19779_v9, %v19778_v43  ;;  %v19869_v51 = vunpack.i.h.bf16 %v24195_v46  ;;  %v24794_v9 = vld [vmem:[%s25178_s15] sm:$0xff]  ;;  %v24799_v43 = vld [vmem:[%s25178_s15 + $0x8] sm:$0xff] }
 0xffc   :  { %17148 = vmatmul.mubr.msk.f32.gmra.mrb[136].mxu0 %vm8664_vm14, %v20255_v4  ;;  %v18389_v40 = vpack.c.bf16 %v19784_v7, %v19783_v54  ;;  %v19794_v4 = vunpack.i.h.bf16 %v24082_v47 }
 0xffd   :  { %18363 = vmatpush3.bf16.msra.mxu0 %v18362_v56  ;;  %17150 = vmatprep.mubr.msk.f32.mxu0 %vm20378_vm7, %v20379_v31  ;;  %v19789_v56 = vunpack.i.h.bf16 %v24071_v23  ;;  %v20269_v23 = vld [vmem:[%s25177_s14 + $0xd8] sm:$0xff] }
 0xffe   :  { %18364 = vmatprep.subr.bf16.mxu0 %v25199_v34 }
 0xfff   :  { %v18392_v22 = vpack.c.bf16 %v19789_v56, %v19788_v19  ;;  %v20285_v56 = vld [vmem:[%s25177_s14 + $0x158] sm:$0xf] }
0x1000   :  { %17151 = vmatmul.mubr.msk.f32.gmra.mrb[138].mxu0 %vm8664_vm14, %v20256_v50  ;;  %v20272_v50 = vld [vmem:[%s25177_s14 + $0xf0] sm:$0xff] }
0x1001   :  { %18366 = vmatpush3.bf16.msra.mxu0 %v18365_v52  ;;  %17153 = vmatprep.mubr.msk.f32.mxu0 %vm20378_vm7, %v20379_v31  ;;  %v19793_v52 = vunpack.i.l.bf16 %v24082_v47  ;;  %v20271_v47 = vld [vmem:[%s25177_s14 + $0xe8] sm:$0xff] }
0x1002   :  { %18367 = vmatprep.subr.bf16.mxu0 %v25199_v34 }
0x1003   :  { %v18395_v25 = vpack.c.bf16 %v19794_v4, %v19793_v52 }
0x1004   :  { %17154 = vmatmul.mubr.msk.f32.gmra.mrb[140].mxu0 %vm8664_vm14, %v20257_v18 }
0x1005   :  { %18369 = vmatpush3.bf16.msra.mxu0 %v18368_v58  ;;  %17156 = vmatprep.mubr.msk.f32.mxu0 %vm20378_vm7, %v20379_v31  ;;  %v20273_v58 = vld [vmem:[%s25177_s14 + $0xf8] sm:$0xff] }
0x1006   :  { %18370 = vmatprep.subr.bf16.mxu0 %v25199_v34 }
0x1008   :  { %17157 = vmatmul.mubr.msk.f32.gmra.mrb[142].mxu0 %vm8664_vm14, %v20258_v49  ;;  %v19839_v49 = vunpack.i.h.bf16 %v24146_v53 }
0x1009   :  { %18372 = vmatpush3.bf16.msra.mxu0 %v18371_v48  ;;  %17159 = vmatprep.mubr.msk.f32.mxu0 %vm20378_vm7, %v20379_v31  ;;  %v19829_v48 = vunpack.i.h.bf16 %v24131_v5  ;;  %v20276_v5 = vld [vmem:[%s25177_s14 + $0x110] sm:$0xff] }
0x100a   :  { %18373 = vmatprep.subr.bf16.mxu0 %v25199_v34 }
0x100c   :  { %17160 = vmatmul.mubr.msk.f32.gmra.mrb[144].mxu0 %vm8664_vm14, %v20259_v6 }
0x100d   :  { %18375 = vmatpush3.bf16.msra.mxu0 %v18374_v63  ;;  %17162 = vmatprep.mubr.msk.f32.mxu0 %vm20378_vm7, %v20379_v31  ;;  %v19838_v63 = vunpack.i.l.bf16 %v24146_v53  ;;  %v20277_v53 = vld [vmem:[%s25177_s14 + $0x118] sm:$0xff] }
0x100e   :  { %17202 = vmatprep.subr.mxu0 %v20379_v31 }
0x100f   :  { %v18404_v6 = vpack.c.bf16 %v19839_v49, %v19838_v63  ;;  %v20288_v63 = vld [vmem:[%s25177_s14 + $0x170] sm:$0xff] }
0x1010   :  { %17163 = vmatmul.mubr.msk.f32.gmra.mrb[146].mxu0 %vm8664_vm14, %v20260_v39  ;;  %v19849_v39 = vunpack.i.h.bf16 %v24161_v27 }
0x1011   :  { %17203 = vmatpush3.msra.mxu0 %v24024_v41  ;;  %17165 = vmatprep.mubr.msk.f32.mxu0 %vm20378_vm7, %v20379_v31  ;;  %v19764_v41 = vunpack.i.h.bf16 %v24034_v62  ;;  %v19768_v62 = vunpack.i.l.bf16 %v24041_v2  ;;  %v20265_v2 = vld [vmem:[%s25177_s14 + $0xb8] sm:$0xff] }
0x1012   :  { %18376 = vmatprep.subr.bf16.mxu0 %v25199_v34 }
0x1013   :  { %v18377_v61 = vpack.c.bf16 %v19764_v41, %v19763_v13  ;;  %v18380_v1 = vpack.c.bf16 %v19769_v10, %v19768_v62  ;;  %v19859_v41 = vunpack.i.h.bf16 %v24176_v0  ;;  %v19858_v13 = vunpack.i.l.bf16 %v24176_v0  ;;  %v20279_v0 = vld [vmem:[%s25177_s14 + $0x128] sm:$0xff] }
0x1014   :  { %17166 = vmatmul.mubr.msk.f32.gmra.mrb[148].mxu0 %vm8664_vm14, %v20261_v16  ;;  %v19848_v16 = vunpack.i.l.bf16 %v24161_v27  ;;  %v20278_v27 = vld [vmem:[%s25177_s14 + $0x120] sm:$0xff]  ;;  %v19879_v62 = vunpack.i.h.bf16 %v24210_v55 }
0x1015   :  { %17168 = vmatprep.mubr.msk.f32.mxu0 %vm20378_vm7, %v20379_v31 }
0x1018   :  { %17169 = vmatmul.mubr.msk.f32.gmra.mrb[150].mxu0 %vm8664_vm14, %v20262_v42  ;;  %v18407_v42 = vpack.c.bf16 %v19849_v39, %v19848_v16  ;;  %v19949_v39 = vunpack.i.h.bf16 %v24333_v12  ;;  %v19948_v16 = vunpack.i.l.bf16 %v24333_v12 }
0x1019   :  { %17171 = vmatprep.mubr.msk.f32.mxu0 %vm20378_vm7, %v20379_v31 }
0x101a   :  { %v18431_v12 = vpack.c.bf16 %v19949_v39, %v19948_v16  ;;  %v20297_v39 = vld [vmem:[%s25177_s14 + $0x1b0] sm:$0xf] }
0x101c   :  { %17172 = vmatmul.mubr.msk.f32.gmra.mrb[152].mxu0 %vm8664_vm14, %v20263_v21  ;;  %v18410_v21 = vpack.c.bf16 %v19859_v41, %v19858_v13 }
0x101d   :  { %17204 = vmatprep.mubr.msk.f32.mxu0 %vm20378_vm7, %v20379_v31 }
0x1020   :  { %17205 = vmatmul.mubr.msk.f32.vlgmr.msra.gmra.mrb[132].mxu0 %vm8664_vm14, %v20264_v38  ;;  %v19878_v38 = vunpack.i.l.bf16 %v24210_v55  ;;  %v20282_v55 = vld [vmem:[%s25177_s14 + $0x140] sm:$0xff] }
0x1021   :  { %18378 = vmatpush3.bf16.msra.mxu0 %v18377_v61  ;;  %17207 = vmatprep.mubr.msk.f32.mxu0 %vm20378_vm7, %v20379_v31  ;;  %v19868_v61 = vunpack.i.l.bf16 %v24195_v46  ;;  %v20280_v46 = vld [vmem:[%s25177_s14 + $0x130] sm:$0xff] }
0x1022   :  { %18379 = vmatprep.subr.bf16.mxu0 %v25199_v34 }
0x1023   :  { %v18413_v10 = vpack.c.bf16 %v19869_v51, %v19868_v61  ;;  %v19959_v51 = vunpack.i.h.bf16 %v24359_v14  ;;  %v19958_v61 = vunpack.i.l.bf16 %v24359_v14  ;;  %v24887_v14 = vld [vmem:[%s25178_s15 + $0x38] sm:$0xff] }
0x1024   :  { %17208 = vmatmul.mubr.msk.f32.gmra.mrb[134].mxu0 %vm8664_vm14, %v20265_v2 }
0x1025   :  { %18381 = vmatpush3.bf16.msra.mxu0 %v18380_v1  ;;  %17210 = vmatprep.mubr.msk.f32.mxu0 %vm20378_vm7, %v20379_v31  ;;  %v18416_v1 = vpack.c.bf16 %v19879_v62, %v19878_v38  ;;  %v20290_v62 = vld [vmem:[%s25177_s14 + $0x180] sm:$0xff]  ;;  %v24882_v38 = vld [vmem:[%s25178_s15 + $0x30] sm:$0xff] }
0x1026   :  { %18382 = vmatprep.subr.bf16.mxu0 %v25199_v34 }
0x1028   :  { %17211 = vmatmul.mubr.msk.f32.gmra.mrb[136].mxu0 %vm8664_vm14, %v20266_v3  ;;  %v19909_v3 = vunpack.i.h.bf16 %v24256_v20 }
0x1029   :  { %18384 = vmatpush3.bf16.msra.mxu0 %v18383_v59  ;;  %17213 = vmatprep.mubr.msk.f32.mxu0 %vm20378_vm7, %v20379_v31 }
0x102a   :  { %18385 = vmatprep.subr.bf16.mxu0 %v25199_v34 }
0x102c   :  { %17214 = vmatmul.mubr.msk.f32.gmra.mrb[138].mxu0 %vm8664_vm14, %v20267_v15 }
0x102d   :  { %18387 = vmatpush3.bf16.msra.mxu0 %v18386_v35  ;;  %17216 = vmatprep.mubr.msk.f32.mxu0 %vm20378_vm7, %v20379_v31  ;;  %v19908_v35 = vunpack.i.l.bf16 %v24256_v20  ;;  %v19918_v20 = vunpack.i.l.bf16 %v24273_v45 }
0x102e   :  { %18388 = vmatprep.subr.bf16.mxu0 %v25199_v34 }
0x1030   :  { %17217 = vmatmul.mubr.msk.f32.gmra.mrb[140].mxu0 %vm8664_vm14, %v20268_v17  ;;  %v18419_v17 = vpack.c.bf16 %v19909_v3, %v19908_v35 }
0x1031   :  { %18390 = vmatpush3.bf16.msra.mxu0 %v18389_v40  ;;  %17219 = vmatprep.mubr.msk.f32.mxu0 %vm20378_vm7, %v20379_v31 }
0x1032   :  { %18391 = vmatprep.subr.bf16.mxu0 %v25199_v34 }
0x1034   :  { %17220 = vmatmul.mubr.msk.f32.gmra.mrb[142].mxu0 %vm8664_vm14, %v20269_v23  ;;  %v20286_v23 = vld [vmem:[%s25177_s14 + $0x160] sm:$0xff] }
0x1035   :  { %18393 = vmatpush3.bf16.msra.mxu0 %v18392_v22  ;;  %17222 = vmatprep.mubr.msk.f32.mxu0 %vm20378_vm7, %v20379_v31  ;;  %v19919_v22 = vunpack.i.h.bf16 %v24273_v45  ;;  %v24827_v45 = vld [vmem:[%s25178_s15 + $0x18] sm:$0xff] }
0x1036   :  { %18394 = vmatprep.subr.bf16.mxu0 %v25199_v34 }
0x1038   :  { %17223 = vmatmul.mubr.msk.f32.gmra.mrb[144].mxu0 %vm8664_vm14, %v20270_v44  ;;  %v18422_v44 = vpack.c.bf16 %v19919_v22, %v19918_v20  ;;  %v20293_v22 = vld [vmem:[%s25177_s14 + $0x198] sm:$0xff]  ;;  %v20042_v20 = vpop.permute.xlu1 %20041 }
0x1039   :  { %18396 = vmatpush3.bf16.msra.mxu0 %v18395_v25  ;;  %17225 = vmatprep.mubr.msk.f32.mxu0 %vm20378_vm7, %v20379_v31  ;;  %v24822_v25 = vld [vmem:[%s25178_s15 + $0x10] sm:$0xff] }
0x103a   :  { %17265 = vmatprep.subr.mxu0 %v20379_v31 }
0x103c   :  { %17226 = vmatmul.mubr.msk.f32.gmra.mrb[146].mxu0 %vm8664_vm14, %v20271_v47  ;;  %v19929_v47 = vunpack.i.h.bf16 %v24290_v36 }
0x103d   :  { %17266 = vmatpush3.msra.mxu0 %v24087_v28  ;;  %17228 = vmatprep.mubr.msk.f32.mxu0 %vm20378_vm7, %v20379_v31  ;;  %v19819_v28 = vunpack.i.h.bf16 %v24119_v30  ;;  %v18401_v30 = vpack.c.bf16 %v19829_v48, %v19828_v37  ;;  %v19939_v37 = vunpack.i.h.bf16 %v24309_v60 }
0x103e   :  { %18397 = vmatprep.subr.bf16.mxu0 %v25199_v34 }
0x103f   :  { %v18398_v18 = vpack.c.bf16 %v19819_v28, %v19818_v29 }
0x1040   :  { %17229 = vmatmul.mubr.msk.f32.gmra.mrb[148].mxu0 %vm8664_vm14, %v20272_v50  ;;  %v19928_v50 = vunpack.i.l.bf16 %v24290_v36 }
0x1041   :  { %17231 = vmatprep.mubr.msk.f32.mxu0 %vm20378_vm7, %v20379_v31 }
0x1042   :  { %v18425_v36 = vpack.c.bf16 %v19929_v47, %v19928_v50  ;;  %v20044_v47 = vunpack.i.h.bf16 %v20042_v20  ;;  %v20043_v50 = vunpack.i.l.bf16 %v20042_v20  ;;  %v20305_v20 = vld [vmem:[%s25177_s14 + $0x1e0] sm:$0xff] }
0x1044   :  { %17232 = vmatmul.mubr.msk.f32.gmra.mrb[150].mxu0 %vm8664_vm14, %v20273_v58 }
0x1045   :  { %17234 = vmatprep.mubr.msk.f32.mxu0 %vm20378_vm7, %v20379_v31 }
0x1048   :  { %17235 = vmatmul.mubr.msk.f32.gmra.mrb[152].mxu0 %vm8664_vm14, %v20274_v57 }
0x1049   :  { %17267 = vmatprep.mubr.msk.f32.mxu0 %vm20378_vm7, %v20379_v31 }
0x104c   :  { %17268 = vmatmul.mubr.msk.f32.vlgmr.msra.gmra.mrb[132].mxu0 %vm8664_vm14, %v20275_v33  ;;  %v19938_v33 = vunpack.i.l.bf16 %v24309_v60  ;;  %v24857_v60 = vld [vmem:[%s25178_s15 + $0x28] sm:$0xff] }
0x104d   :  { %18399 = vmatpush3.bf16.msra.mxu0 %v18398_v18  ;;  %17270 = vmatprep.mubr.msk.f32.mxu0 %vm20378_vm7, %v20379_v31  ;;  %v20287_v18 = vld [vmem:[%s25177_s14 + $0x168] sm:$0xff] }
0x104e   :  { %18400 = vmatprep.subr.bf16.mxu0 %v25199_v34 }
0x1050   :  { %17271 = vmatmul.mubr.msk.f32.gmra.mrb[134].mxu0 %vm8664_vm14, %v20276_v5  ;;  %v24852_v5 = vld [vmem:[%s25178_s15 + $0x20] sm:$0xff] }
0x1051   :  { %18402 = vmatpush3.bf16.msra.mxu0 %v18401_v30  ;;  %17273 = vmatprep.mubr.msk.f32.mxu0 %vm20378_vm7, %v20379_v31 }
0x1052   :  { %18403 = vmatprep.subr.bf16.mxu0 %v25199_v34 }
0x1054   :  { %17274 = vmatmul.mubr.msk.f32.gmra.mrb[136].mxu0 %vm8664_vm14, %v20277_v53 }
0x1055   :  { %18405 = vmatpush3.bf16.msra.mxu0 %v18404_v6  ;;  %17276 = vmatprep.mubr.msk.f32.mxu0 %vm20378_vm7, %v20379_v31  ;;  %v18428_v6 = vpack.c.bf16 %v19939_v37, %v19938_v33  ;;  %v20295_v37 = vld [vmem:[%s25177_s14 + $0x1a8] sm:$0xff] }
0x1056   :  { %18406 = vmatprep.subr.bf16.mxu0 %v25199_v34 }
0x1058   :  { %17277 = vmatmul.mubr.msk.f32.gmra.mrb[138].mxu0 %vm8664_vm14, %v20278_v27  ;;  %v20289_v27 = vld [vmem:[%s25177_s14 + $0x178] sm:$0xff] }
0x1059   :  { %18408 = vmatpush3.bf16.msra.mxu0 %v18407_v42  ;;  %17279 = vmatprep.mubr.msk.f32.mxu0 %vm20378_vm7, %v20379_v31 }
0x105a   :  { %18409 = vmatprep.subr.bf16.mxu0 %v25199_v34 }
0x105c   :  { %17280 = vmatmul.mubr.msk.f32.gmra.mrb[140].mxu0 %vm8664_vm14, %v20279_v0 }
0x105d   :  { %18411 = vmatpush3.bf16.msra.mxu0 %v18410_v21  ;;  %17282 = vmatprep.mubr.msk.f32.mxu0 %vm20378_vm7, %v20379_v31 }
0x105e   :  { %18412 = vmatprep.subr.bf16.mxu0 %v25199_v34 }
0x1060   :  { %17283 = vmatmul.mubr.msk.f32.gmra.mrb[142].mxu0 %vm8664_vm14, %v20280_v46  ;;  %v18434_v46 = vpack.c.bf16 %v19959_v51, %v19958_v61  ;;  %v20299_v61 = vld [vmem:[%s25177_s14 + $0x1c0] sm:$0xff] }
0x1061   :  { %18414 = vmatpush3.bf16.msra.mxu0 %v18413_v10  ;;  %17285 = vmatprep.mubr.msk.f32.mxu0 %vm20378_vm7, %v20379_v31 }
0x1062   :  { %18415 = vmatprep.subr.bf16.mxu0 %v25199_v34 }
0x1064   :  { %17286 = vmatmul.mubr.msk.f32.gmra.mrb[144].mxu0 %vm8664_vm14, %v20281_v26  ;;  %v19968_v26 = vunpack.i.l.bf16 %v24377_v32 }
0x1065   :  { %18417 = vmatpush3.bf16.msra.mxu0 %v18416_v1  ;;  %17288 = vmatprep.mubr.msk.f32.mxu0 %vm20378_vm7, %v20379_v31  ;;  %v19969_v1 = vunpack.i.h.bf16 %v24377_v32 }
0x1066   :  { %17328 = vmatprep.subr.mxu0 %v20379_v31 }
0x1067   :  { %v18437_v32 = vpack.c.bf16 %v19969_v1, %v19968_v26  ;;  %v20300_v1 = vld [vmem:[%s25177_s14 + $0x1c8] sm:$0xff] }
0x1068   :  { %17289 = vmatmul.mubr.msk.f32.gmra.mrb[146].mxu0 %vm8664_vm14, %v20282_v55 }
0x1069   :  { %17329 = vmatpush3.msra.mxu0 %v24223_v8  ;;  %17291 = vmatprep.mubr.msk.f32.mxu0 %vm20378_vm7, %v20379_v31  ;;  %v20284_v8 = vld [vmem:[%s25177_s14 + $0x150] sm:$0xff] }
0x106a   :  { %18418 = vmatprep.subr.bf16.mxu0 %v25199_v34 }
0x106c   :  { %17292 = vmatmul.mubr.msk.f32.gmra.mrb[148].mxu0 %vm8664_vm14, %v20283_v11 }
0x106d   :  { %17294 = vmatprep.mubr.msk.f32.mxu0 %vm20378_vm7, %v20379_v31 }
0x106f   :  { %v9884_v2 = vpop.f32.mrb[110].mxu0 }
0x1070   :  { %v16808_v59 = vpop.f32.mrb[111].mxu0  ;;  %17295 = vmatmul.mubr.msk.f32.gmra.mrb[150].mxu0 %vm8664_vm14, %v20284_v8  ;;  %v18486_v54 = vadd.f32 %v9884_v2, %v24794_v9  ;;  %v20291_v8 = vld [vmem:[%s25177_s14 + $0x188] sm:$0xff] }
0x1071   :  { %17297 = vmatprep.mubr.msk.f32.mxu0 %vm20378_vm7, %v20379_v31 }
0x1073   :  { %v9889_v7 = vpop.f32.mrb[112].mxu0 }
0x1074   :  { %v18487_v15 = vadd.f32 %v9889_v7, %v24799_v43  ;;  %v16811_v40 = vpop.f32.mrb[113].mxu0  ;;  %17298 = vmatmul.mubr.msk.f32.gmra.mrb[152].mxu0 %vm8664_vm14, %v20285_v56 }
0x1075   :  { %17330 = vmatprep.mubr.msk.f32.mxu0 %vm20378_vm7, %v20379_v31 }
0x1076   :  { %v18133_v19 = vpack.c.bf16 %v18487_v15, %v18486_v54  ;;  %v20292_v54 = vld [vmem:[%s25177_s14 + $0x190] sm:$0xff]  ;;  %v24910_v15 = vld [vmem:[%s25178_s15 + $0x40] sm:$0xff] }
0x1077   :  { %v9894_v4 = vpop.f32.mrb[114].mxu0 }
0x1078   :  { %v16814_v52 = vpop.f32.mrb[115].mxu0  ;;  %18134 = vmatprep.subr.bf16.mxu1 %v18133_v19  ;;  %17331 = vmatmul.mubr.msk.f32.vlgmr.msra.gmra.mrb[132].mxu0 %vm8664_vm14, %v20286_v23  ;;  %v18488_v28 = vadd.f32 %v9894_v4, %v24822_v25  ;;  %v24930_v4 = vld [vmem:[%s25178_s15 + $0x50] sm:$0xf]  ;;  %v20047_v23 = vpop.permute.xlu0 %20046 }
0x1079   :  { %18420 = vmatpush3.bf16.msra.mxu0 %v18419_v17  ;;  %18136 = vmatpush3.bf16.msra.mxu1 %v18133_v19 }
0x107a   :  { %17333 = vmatprep.mubr.msk.f32.mxu0 %vm20378_vm7, %v20379_v31  ;;  %18421 = vmatprep.subr.bf16.mxu0 %v25199_v34 }
0x107b   :  { %v9899_v58 = vpop.f32.mrb[116].mxu0 }
0x107c   :  { %v18489_v29 = vadd.f32 %v9899_v58, %v24827_v45  ;;  %v16817_v57 = vpop.f32.mrb[117].mxu0  ;;  %17334 = vmatmul.mubr.msk.f32.gmra.mrb[134].mxu0 %vm8664_vm14, %v20287_v18  ;;  %v20052_v18 = vpop.permute.xlu1 %20051 }
0x107d   :  { %18423 = vmatpush3.bf16.msra.mxu0 %v18422_v44  ;;  %17336 = vmatprep.mubr.msk.f32.mxu0 %vm20378_vm7, %v20379_v31  ;;  %v20048_v57 = vunpack.i.l.bf16 %v20047_v23 }
0x107e   :  { %v18137_v48 = vpack.c.bf16 %v18489_v29, %v18488_v28  ;;  %18424 = vmatprep.subr.bf16.mxu0 %v25199_v34  ;;  %v20049_v29 = vunpack.i.h.bf16 %v20047_v23 }
0x107f   :  { %v9904_v30 = vpop.f32.mrb[118].mxu0 }
0x1080   :  { %v16820_v49 = vpop.f32.mrb[119].mxu0  ;;  %18138 = vmatprep.subr.bf16.mxu1 %v18137_v48  ;;  %17337 = vmatmul.mubr.msk.f32.gmra.mrb[136].mxu0 %vm8664_vm14, %v20288_v63  ;;  %v18490_v42 = vadd.f32 %v9904_v30, %v24852_v5  ;;  %v18157_v33 = vpack.c.bf16 %v20049_v29, %v20048_v57  ;;  %v20054_v30 = vunpack.i.h.bf16 %v20052_v18  ;;  %v20057_v63 = vpop.permute.xlu0 %20056  ;;  %v20392_v29 = vmov 0  }
0x1081   :  { %18426 = vmatpush3.bf16.msra.mxu0 %v18425_v36  ;;  %18140 = vmatpush3.bf16.msra.mxu1 %v18137_v48  ;;  %v24945_v48 = vld [vmem:[%s25179_s16 + $0x8] sm:$0x3]  ;;  %v18153_v36 = vpack.c.bf16 %v20044_v47, %v20043_v50  ;;  %v20053_v49 = vunpack.i.l.bf16 %v20052_v18  ;;  %v20307_v18 = vld [vmem:[%s25177_s14 + $0x1f0] sm:$0xff] }
0x1082   :  { %17339 = vmatprep.mubr.msk.f32.mxu0 %vm20378_vm7, %v20379_v31  ;;  %18427 = vmatprep.subr.bf16.mxu0 %v25199_v34  ;;  %v20306_v50 = vld [vmem:[%s25177_s14 + $0x1e8] sm:$0xff] }
0x1083   :  { %v9909_v53 = vpop.f32.mrb[120].mxu0  ;;  %v18161_v16 = vpack.c.bf16 %v20054_v30, %v20053_v49  ;;  %20241 = vset.pattern.permute.xlu1 %v20392_v29  ;;  %20240 = vset.pattern.permute.xlu0 %v20392_v29  ;;  %v20308_v49 = vld [vmem:[%s25177_s14 + $0x1f8] sm:$0xff] }
0x1084   :  { %v18491_v41 = vadd.f32 %v9909_v53, %v24857_v60  ;;  %v16823_v13 = vpop.f32.mrb[121].mxu0  ;;  %17340 = vmatmul.mubr.msk.f32.gmra.mrb[138].mxu0 %vm8664_vm14, %v20289_v27  ;;  %v20059_v53 = vunpack.i.h.bf16 %v20057_v63  ;;  %v20067_v51 = vpop.permute.xlu0 %20066 }
0x1085   :  { %18429 = vmatpush3.bf16.msra.mxu0 %v18428_v6  ;;  %17342 = vmatprep.mubr.msk.f32.mxu0 %vm20378_vm7, %v20379_v31  ;;  %v20296_v6 = vld [vmem:[%s25175_s12] sm:$0xff]  ;;  %v20298_v13 = vld [vmem:[%s25177_s14 + $0x1b8] sm:$0xff] }
0x1086   :  { %v18141_v21 = vpack.c.bf16 %v18491_v41, %v18490_v42  ;;  %18430 = vmatprep.subr.bf16.mxu0 %v25199_v34  ;;  %v20058_v42 = vunpack.i.l.bf16 %v20057_v63  ;;  %v20062_v41 = vpop.permute.xlu1 %20061 }
0x1087   :  { %v9914_v0 = vpop.f32.mrb[122].mxu0 }
0x1088   :  { %v16826_v10 = vpop.f32.mrb[123].mxu0  ;;  %18142 = vmatprep.subr.bf16.mxu1 %v18141_v21  ;;  %17343 = vmatmul.mubr.msk.f32.gmra.mrb[140].mxu0 %vm8664_vm14, %v20290_v62  ;;  %v18492_v11 = vadd.f32 %v9914_v0, %v24882_v38  ;;  %v18165_v27 = vpack.c.bf16 %v20059_v53, %v20058_v42  ;;  %v20068_v62 = vunpack.i.l.bf16 %v20067_v51  ;;  %v20310_v42 = vld [vmem:[%s25175_s12 + $0x20] sm:$0xff] }
0x1089   :  { %18432 = vmatpush3.bf16.msra.mxu0 %v18431_v12  ;;  %18144 = vmatpush3.bf16.msra.mxu1 %v18141_v21  ;;  %v20064_v21 = vunpack.i.h.bf16 %v20062_v41  ;;  %v20063_v12 = vunpack.i.l.bf16 %v20062_v41  ;;  %v20069_v10 = vunpack.i.h.bf16 %v20067_v51  ;;  %v20311_v41 = vld [vmem:[%s25177_s14 + $0x200] sm:$0xff]  ;;  %v25045_v51 = vld [vmem:[%s25176_s13 + $0x8] sm:$0x3] }
0x108a   :  { %17345 = vmatprep.mubr.msk.f32.mxu0 %vm20378_vm7, %v20379_v31  ;;  %18433 = vmatprep.subr.bf16.mxu0 %v25199_v34 }
0x108b   :  { %v9919_v55 = vpop.f32.mrb[124].mxu0  ;;  %v18169_v0 = vpack.c.bf16 %v20064_v21, %v20063_v12  ;;  %v18173_v26 = vpack.c.bf16 %v20069_v10, %v20068_v62 }
0x108c   :  { %v18493_v2 = vadd.f32 %v9919_v55, %v24887_v14  ;;  %v16829_v59 = vpop.f32.mrb[125].mxu0  ;;  %17346 = vmatmul.mubr.msk.f32.gmra.mrb[142].mxu0 %vm8664_vm14, %v20291_v8 }
0x108d   :  { %18435 = vmatpush3.bf16.msra.mxu0 %v18434_v46  ;;  %17348 = vmatprep.mubr.msk.f32.mxu0 %vm20378_vm7, %v20379_v31  ;;  %v20072_v46 = vpop.permute.xlu1 %20071  ;;  %v20301_v59 = vld [vmem:[%s25177_s14 + $0x1d0] sm:$0xff] }
0x108e   :  { %v18145_v3 = vpack.c.bf16 %v18493_v2, %v18492_v11  ;;  %18436 = vmatprep.subr.bf16.mxu0 %v25199_v34  ;;  %v24915_v34 = vld [vmem:[%s25178_s15 + $0x48] sm:$0xff]  ;;  %v20074_v55 = vunpack.i.h.bf16 %v20072_v46  ;;  %v20073_v11 = vunpack.i.l.bf16 %v20072_v46  ;;  %v20077_v2 = vpop.permute.xlu0 %20076 }
0x108f   :  { %v9924_v35 = vpop.f32.mrb[126].mxu0 }
0x1090   :  { %v16832_v7 = vpop.f32.mrb[127].mxu0  ;;  %18146 = vmatprep.subr.bf16.mxu1 %v18145_v3  ;;  %17349 = vmatmul.mubr.msk.f32.gmra.mrb[144].mxu0 %vm8664_vm14, %v20292_v54  ;;  %v18494_v56 = vadd.f32 %v9924_v35, %v24910_v15  ;;  %v18177_v8 = vpack.c.bf16 %v20074_v55, %v20073_v11  ;;  %v20302_v35 = vld [vmem:[%s25175_s12 + $0x8] sm:$0x3]  ;;  %v20303_v54 = vld [vmem:[%s25175_s12 + $0x10] sm:$0xff] }
0x1091   :  { %18438 = vmatpush3.bf16.msra.mxu0 %v18437_v32  ;;  %18148 = vmatpush3.bf16.msra.mxu1 %v18145_v3  ;;  %v20079_v3 = vunpack.i.h.bf16 %v20077_v2  ;;  %v20078_v32 = vunpack.i.l.bf16 %v20077_v2  ;;  %v20082_v7 = vpop.permute.xlu1 %20081 }
0x1092   :  { %17351 = vmatprep.mubr.msk.f32.mxu0 %vm20378_vm7, %v20379_v31  ;;  %17391 = vmatprep.subr.mxu0 %v20379_v31 }
0x1093   :  { %v9929_v40 = vpop.f32.mrb[128].mxu0 }
0x1094   :  { %v18495_v19 = vadd.f32 %v9929_v40, %v24915_v34  ;;  %v16835_v17 = vpop.f32.mrb[129].mxu0  ;;  %17352 = vmatmul.mubr.msk.f32.gmra.mrb[146].mxu0 %vm8664_vm14, %v20293_v22  ;;  %v20304_v40 = vld [vmem:[%s25177_s14 + $0x1d8] sm:$0xff]  ;;  %v20087_v22 = vpop.permute.xlu0 %20086 }
0x1095   :  { %17392 = vmatpush3.msra.mxu0 %v24387_v24  ;;  %17354 = vmatprep.mubr.msk.f32.mxu0 %vm20378_vm7, %v20379_v31  ;;  %v20294_v24 = vld [vmem:[%s25177_s14 + $0x1a0] sm:$0xff]  ;;  %v20083_v17 = vunpack.i.l.bf16 %v20082_v7  ;;  %v20089_v23 = vunpack.i.h.bf16 %v20087_v22  ;;  %v20092_v47 = vpop.permute.xlu1 %20091 }
0x1096   :  { %v18149_v52 = vpack.c.bf16 %v18495_v19, %v18494_v56  ;;  %v18181_v56 = vpack.c.bf16 %v20079_v3, %v20078_v32  ;;  %v20084_v19 = vunpack.i.h.bf16 %v20082_v7 }
0x1097   :  { %v9934_v44 = vpop.f32.mrb[130].mxu0 }
0x1098   :  { %v18496_v58 = vadd.f32 %v9934_v44, %v24930_v4  ;;  %v16838_v28 = vpop.f32.mrb[131].mxu0  ;;  %18150 = vmatprep.subr.bf16.mxu1 %v18149_v52  ;;  %17355 = vmatmul.mubr.msk.f32.gmra.mrb[148].mxu0 %vm8664_vm14, %v20294_v24  ;;  %v20088_v44 = vunpack.i.l.bf16 %v20087_v22  ;;  %v20093_v24 = vunpack.i.l.bf16 %v20092_v47  ;;  %v20097_v57 = vpop.permute.xlu0 %20096 }
0x1099   :  { %18152 = vmatpush3.bf16.msra.mxu1 %v18149_v52  ;;  %17357 = vmatprep.mubr.msk.f32.mxu0 %vm20378_vm7, %v20379_v31  ;;  %v18185_v52 = vpack.c.bf16 %v20084_v19, %v20083_v17  ;;  %v20094_v28 = vunpack.i.h.bf16 %v20092_v47  ;;  %v20102_v30 = vpop.permute.xlu1 %20101  ;;  %v20313_v17 = vld [vmem:[%s25175_s12 + $0x28] sm:$0x3] }
0x109a   :  { %16859 = vmatprep.subr.msk.mxu1 %vm189_vm1, %v18496_v58 }
0x109c   :  { %17358 = vmatmul.mubr.msk.f32.gmra.mrb[150].mxu0 %vm8664_vm14, %v20295_v37  ;;  %v20099_v37 = vunpack.i.h.bf16 %v20097_v57  ;;  %v20107_v53 = vpop.permute.xlu0 %20106 }
0x109d   :  { %16860 = vmatpush3.msk.msra.mxu1 %vm189_vm1, %v18496_v58  ;;  %17360 = vmatprep.mubr.msk.f32.mxu0 %vm20378_vm7, %v20379_v31  ;;  %v18189_v58 = vpack.c.bf16 %v20089_v23, %v20088_v44  ;;  %v20108_v21 = vunpack.i.l.bf16 %v20107_v53  ;;  %v20112_v12 = vpop.permute.xlu1 %20111 }
0x109e   :  { %18154 = vmatprep.subr.bf16.mxu1 %v18153_v36  ;;  %16862 = vmatmul.mubr.msk.f32.vlgmr.msra.gmra.mrb[4].mxu1 %vm9949_vm15, %v24945_v48  ;;  %v20114_v62 = vunpack.i.h.bf16 %v20112_v12  ;;  %v20113_v46 = vunpack.i.l.bf16 %v20112_v12 }
0x109f   :  { %18156 = vmatpush3.bf16.msra.mxu1 %v18153_v36  ;;  %16884 = vmatprep.mubr.msk.f32.mxu1 %vm1977_vm4, %v20296_v6  ;;  %v18193_v36 = vpack.c.bf16 %v20094_v28, %v20093_v24  ;;  %v20104_v6 = vunpack.i.h.bf16 %v20102_v30 }
0x10a0   :  { %18158 = vmatprep.subr.bf16.mxu1 %v18157_v33  ;;  %17361 = vmatmul.mubr.msk.f32.gmra.mrb[152].mxu0 %vm8664_vm14, %v20297_v39  ;;  %v20103_v39 = vunpack.i.l.bf16 %v20102_v30  ;;  %v20117_v55 = vpop.permute.xlu0 %20116  ;;  %v18209_v2 = vpack.c.bf16 %v20114_v62, %v20113_v46 }
0x10a1   :  { %17393 = vmatprep.mubr.msk.f32.mxu0 %vm20378_vm7, %v20379_v31  ;;  %v20122_v3 = vpop.permute.xlu1 %20121 }
0x10a2   :  { %v20123_v7 = vunpack.i.l.bf16 %v20122_v3 }
0x10a3   :  { %18160 = vmatpush3.bf16.msra.mxu1 %v18157_v33  ;;  %v20098_v33 = vunpack.i.l.bf16 %v20097_v57 }
0x10a4   :  { %18162 = vmatprep.subr.bf16.mxu1 %v18161_v16  ;;  %17394 = vmatmul.mubr.msk.f32.vlgmr.msra.gmra.mrb[132].mxu0 %vm8664_vm14, %v20298_v13  ;;  %v18201_v13 = vpack.c.bf16 %v20104_v6, %v20103_v39 }
0x10a5   :  { %17396 = vmatprep.mubr.msk.f32.mxu0 %vm20378_vm7, %v20379_v31  ;;  %v18197_v63 = vpack.c.bf16 %v20099_v37, %v20098_v33  ;;  %v20132_v22 = vpop.permute.xlu1 %20131 }
0x10a6   :  { %v20134_v23 = vunpack.i.h.bf16 %v20132_v22  ;;  %v20133_v44 = vunpack.i.l.bf16 %v20132_v22 }
0x10a7   :  { %18164 = vmatpush3.bf16.msra.mxu1 %v18161_v16  ;;  %v20309_v16 = vld [vmem:[%s25175_s12 + $0x18] sm:$0x3] }
0x10a8   :  { %18166 = vmatprep.subr.bf16.mxu1 %v18165_v27  ;;  %17397 = vmatmul.mubr.msk.f32.gmra.mrb[134].mxu0 %vm8664_vm14, %v20299_v61  ;;  %v20312_v61 = vld [vmem:[%s25177_s14 + $0x208] sm:$0xf] }
0x10a9   :  { %17399 = vmatprep.mubr.msk.f32.mxu0 %vm20378_vm7, %v20379_v31  ;;  %v20142_v24 = vpop.permute.xlu1 %20141 }
0x10aa   :  { %v20144_v57 = vunpack.i.h.bf16 %v20142_v24 }
0x10ab   :  { %18168 = vmatpush3.bf16.msra.mxu1 %v18165_v27  ;;  %v20109_v27 = vunpack.i.h.bf16 %v20107_v53 }
0x10ac   :  { %18170 = vmatprep.subr.bf16.mxu1 %v18169_v0  ;;  %17400 = vmatmul.mubr.msk.f32.gmra.mrb[136].mxu0 %vm8664_vm14, %v20300_v1 }
0x10ad   :  { %17402 = vmatprep.mubr.msk.f32.mxu0 %vm20378_vm7, %v20379_v31  ;;  %v18205_v10 = vpack.c.bf16 %v20109_v27, %v20108_v21 }
0x10af   :  { %18172 = vmatpush3.bf16.msra.mxu1 %v18169_v0 }
0x10b0   :  { %18174 = vmatprep.subr.bf16.mxu1 %v18173_v26  ;;  %17403 = vmatmul.mubr.msk.f32.gmra.mrb[138].mxu0 %vm8664_vm14, %v20301_v59  ;;  %v20119_v59 = vunpack.i.h.bf16 %v20117_v55 }
0x10b1   :  { %17405 = vmatprep.mubr.msk.f32.mxu0 %vm20378_vm7, %v20379_v31 }
0x10b2   :  { %16885 = vmatmul.mubr.msk.f32.vlgmr.msra.gmra.mrb[6].mxu1 %vm1977_vm4, %v20302_v35  ;;  %v20124_v35 = vunpack.i.h.bf16 %v20122_v3 }
0x10b3   :  { %18176 = vmatpush3.bf16.msra.mxu1 %v18173_v26  ;;  %16907 = vmatprep.mubr.msk.f32.mxu1 %vm1977_vm4, %v20303_v54  ;;  %v20127_v54 = vpop.permute.xlu0 %20126 }
0x10b4   :  { %18178 = vmatprep.subr.bf16.mxu1 %v18177_v8  ;;  %17406 = vmatmul.mubr.msk.f32.gmra.mrb[140].mxu0 %vm8664_vm14, %v20304_v40  ;;  %v18217_v40 = vpack.c.bf16 %v20124_v35, %v20123_v7  ;;  %v20128_v19 = vunpack.i.l.bf16 %v20127_v54  ;;  %v20317_v35 = vld [vmem:[%s25175_s12 + $0x48] sm:$0x3] }
0x10b5   :  { %17408 = vmatprep.mubr.msk.f32.mxu0 %vm20378_vm7, %v20379_v31 }
0x10b7   :  { %18180 = vmatpush3.bf16.msra.mxu1 %v18177_v8  ;;  %v20118_v8 = vunpack.i.l.bf16 %v20117_v55  ;;  %v20137_v47 = vpop.permute.xlu0 %20136 }
0x10b8   :  { %18182 = vmatprep.subr.bf16.mxu1 %v18181_v56  ;;  %17409 = vmatmul.mubr.msk.f32.gmra.mrb[142].mxu0 %vm8664_vm14, %v20305_v20  ;;  %v20314_v20 = vld [vmem:[%s25175_s12 + $0x30] sm:$0xff]  ;;  %v20138_v28 = vunpack.i.l.bf16 %v20137_v47 }
0x10b9   :  { %17411 = vmatprep.mubr.msk.f32.mxu0 %vm20378_vm7, %v20379_v31  ;;  %v18213_v32 = vpack.c.bf16 %v20119_v59, %v20118_v8 }
0x10bb   :  { %18184 = vmatpush3.bf16.msra.mxu1 %v18181_v56  ;;  %v20129_v56 = vunpack.i.h.bf16 %v20127_v54  ;;  %v20318_v54 = vld [vmem:[%s25175_s12 + $0x50] sm:$0xff] }
0x10bc   :  { %18186 = vmatprep.subr.bf16.mxu1 %v18185_v52  ;;  %17412 = vmatmul.mubr.msk.f32.gmra.mrb[144].mxu0 %vm8664_vm14, %v20306_v50  ;;  %v18225_v50 = vpack.c.bf16 %v20134_v23, %v20133_v44 }
0x10bd   :  { %17414 = vmatprep.mubr.msk.f32.mxu0 %vm20378_vm7, %v20379_v31 }
0x10bf   :  { %18188 = vmatpush3.bf16.msra.mxu1 %v18185_v52  ;;  %v18221_v52 = vpack.c.bf16 %v20129_v56, %v20128_v19 }
0x10c0   :  { %18190 = vmatprep.subr.bf16.mxu1 %v18189_v58  ;;  %17415 = vmatmul.mubr.msk.f32.gmra.mrb[146].mxu0 %vm8664_vm14, %v20307_v18  ;;  %v20143_v18 = vunpack.i.l.bf16 %v20142_v24 }
0x10c1   :  { %17417 = vmatprep.mubr.msk.f32.mxu0 %vm20378_vm7, %v20379_v31 }
0x10c2   :  { %v18233_v37 = vpack.c.bf16 %v20144_v57, %v20143_v18 }
0x10c3   :  { %18192 = vmatpush3.bf16.msra.mxu1 %v18189_v58  ;;  %v20139_v58 = vunpack.i.h.bf16 %v20137_v47 }
0x10c4   :  { %18194 = vmatprep.subr.bf16.mxu1 %v18193_v36  ;;  %17418 = vmatmul.mubr.msk.f32.gmra.mrb[148].mxu0 %vm8664_vm14, %v20308_v49  ;;  %v20152_v49 = vpop.permute.xlu1 %20151 }
0x10c5   :  { %17420 = vmatprep.mubr.msk.f32.mxu0 %vm20378_vm7, %v20379_v31  ;;  %v18229_v29 = vpack.c.bf16 %v20139_v58, %v20138_v28  ;;  %v20154_v6 = vunpack.i.h.bf16 %v20152_v49  ;;  %v20153_v39 = vunpack.i.l.bf16 %v20152_v49  ;;  %v20320_v49 = vld [vmem:[%s25175_s12 + $0x60] sm:$0xff] }
0x10c6   :  { %16908 = vmatmul.mubr.msk.f32.vlgmr.msra.gmra.mrb[6].mxu1 %vm1977_vm4, %v20309_v16  ;;  %v20315_v16 = vld [vmem:[%s25175_s12 + $0x38] sm:$0x3] }
0x10c7   :  { %18196 = vmatpush3.bf16.msra.mxu1 %v18193_v36  ;;  %16930 = vmatprep.mubr.msk.f32.mxu1 %vm1977_vm4, %v20310_v42  ;;  %v20147_v36 = vpop.permute.xlu0 %20146  ;;  %v20316_v42 = vld [vmem:[%s25175_s12 + $0x40] sm:$0xff] }
0x10c8   :  { %18198 = vmatprep.subr.bf16.mxu1 %v18197_v63  ;;  %17421 = vmatmul.mubr.msk.f32.gmra.mrb[150].mxu0 %vm8664_vm14, %v20311_v41  ;;  %v20149_v33 = vunpack.i.h.bf16 %v20147_v36  ;;  %v20148_v30 = vunpack.i.l.bf16 %v20147_v36  ;;  %v18241_v41 = vpack.c.bf16 %v20154_v6, %v20153_v39  ;;  %v20162_v21 = vpop.permute.xlu1 %20161 }
0x10c9   :  { %17423 = vmatprep.mubr.msk.f32.mxu0 %vm20378_vm7, %v20379_v31  ;;  %v25054_v31 = vld [vmem:[%s25176_s13] sm:$0xff] }
0x10cb   :  { %18200 = vmatpush3.bf16.msra.mxu1 %v18197_v63  ;;  %v18237_v63 = vpack.c.bf16 %v20149_v33, %v20148_v30  ;;  %v20157_v53 = vpop.permute.xlu0 %20156  ;;  %v20319_v33 = vld [vmem:[%s25175_s12 + $0x58] sm:$0x3] }
0x10cc   :  { %18202 = vmatprep.subr.bf16.mxu1 %v18201_v13  ;;  %17424 = vmatmul.mubr.msk.f32.gmra.mrb[152].mxu0 %vm8664_vm14, %v20312_v61  ;;  %v20158_v27 = vunpack.i.l.bf16 %v20157_v53  ;;  %v20164_v61 = vunpack.i.h.bf16 %v20162_v21 }
0x10cd   :  { %v16460_v0 = vpop.f32.mrb[2].mxu1 }
0x10ce   :  { %v18484_v1 = vadd.f32 %v16460_v0, %v25045_v51  ;;  %v8642_v26 = vpop.f32.mrb[3].mxu1  ;;  %v20163_v0 = vunpack.i.l.bf16 %v20162_v21 }
0x10cf   :  { %18204 = vmatpush3.bf16.msra.mxu1 %v18201_v13  ;;  %v18485_v11 = vadd.f32 %v8642_v26, %v25054_v31  ;;  %v20159_v13 = vunpack.i.h.bf16 %v20157_v53  ;;  %v20172_v26 = vpop.permute.xlu1 %20171 }
0x10d0   :  { %18206 = vmatprep.subr.bf16.mxu1 %v18205_v10  ;;  %10044 = vperm.xlu0 %20240, %v18484_v1   ;;  %v18249_v62 = vpack.c.bf16 %v20164_v61, %v20163_v0 }
0x10d1   :  { %10039 = vperm.xlu1 %20241, %v18485_v11   ;;  %v18245_v12 = vpack.c.bf16 %v20159_v13, %v20158_v27  ;;  %v20174_v11 = vunpack.i.h.bf16 %v20172_v26 }
0x10d3   :  { %18208 = vmatpush3.bf16.msra.mxu1 %v18205_v10  ;;  %v20167_v10 = vpop.permute.xlu0 %20166  ;;  %v20182_v7 = vpop.permute.xlu1 %20181 }
0x10d4   :  { %18210 = vmatprep.subr.bf16.mxu1 %v18209_v2  ;;  %v20169_v46 = vunpack.i.h.bf16 %v20167_v10  ;;  %v20168_v1 = vunpack.i.l.bf16 %v20167_v10  ;;  %v20184_v56 = vunpack.i.h.bf16 %v20182_v7  ;;  %v20183_v19 = vunpack.i.l.bf16 %v20182_v7 }
0x10d6   :  { %v18253_v55 = vpack.c.bf16 %v20169_v46, %v20168_v1  ;;  %v18265_v22 = vpack.c.bf16 %v20184_v56, %v20183_v19  ;;  %v20323_v19 = vld [vmem:[%s25175_s12 + $0x78] sm:$0x3] }
0x10d7   :  { %18212 = vmatpush3.bf16.msra.mxu1 %v18209_v2  ;;  %v20173_v2 = vunpack.i.l.bf16 %v20172_v26  ;;  %v20177_v59 = vpop.permute.xlu0 %20176  ;;  %v20192_v23 = vpop.permute.xlu1 %20191 }
0x10d8   :  { %18214 = vmatprep.subr.bf16.mxu1 %v18213_v32  ;;  %v20179_v3 = vunpack.i.h.bf16 %v20177_v59  ;;  %v20194_v47 = vunpack.i.h.bf16 %v20192_v23 }
0x10d9   :  { %v18257_v8 = vpack.c.bf16 %v20174_v11, %v20173_v2  ;;  %v20321_v11 = vld [vmem:[%s25175_s12 + $0x68] sm:$0x3] }
0x10da   :  { %16931 = vmatmul.mubr.msk.f32.vlgmr.msra.gmra.mrb[6].mxu1 %vm1977_vm4, %v20313_v17 }
0x10db   :  { %18216 = vmatpush3.bf16.msra.mxu1 %v18213_v32  ;;  %16953 = vmatprep.mubr.msk.f32.mxu1 %vm1977_vm4, %v20314_v20  ;;  %v20178_v32 = vunpack.i.l.bf16 %v20177_v59  ;;  %v20187_v17 = vpop.permute.xlu0 %20186  ;;  %v20202_v57 = vpop.permute.xlu1 %20201  ;;  %v20322_v59 = vld [vmem:[%s25175_s12 + $0x70] sm:$0xff]  ;;  %s20393_s12 = smov [#allocation2]  }
0x10dc   :  { %18218 = vmatprep.subr.bf16.mxu1 %v18217_v40  ;;  %v20189_v20 = vunpack.i.h.bf16 %v20187_v17  ;;  %v20204_v36 = vunpack.i.h.bf16 %v20202_v57 }
0x10df   :  { %18220 = vmatpush3.bf16.msra.mxu1 %v18217_v40  ;;  %v18261_v40 = vpack.c.bf16 %v20179_v3, %v20178_v32  ;;  %v20197_v58 = vpop.permute.xlu0 %20196 }
0x10e0   :  { %18222 = vmatprep.subr.bf16.mxu1 %v18221_v52  ;;  %v20199_v24 = vunpack.i.h.bf16 %v20197_v58 }
0x10e3   :  { %18224 = vmatpush3.bf16.msra.mxu1 %v18221_v52  ;;  %v20188_v52 = vunpack.i.l.bf16 %v20187_v17  ;;  %v20207_v30 = vpop.permute.xlu0 %20206  ;;  %v20324_v17 = vld [vmem:[%s25179_s16] sm:$0xff]  ;;  %s12151_s16 = sshll.u32 %s20393_s12, 4  ;;  %s12152_s16 = int_to_ptr.vmem [resolvable:$true] %s12151_s16 }
0x10e4   :  { %18226 = vmatprep.subr.bf16.mxu1 %v18225_v50  ;;  %v20209_v6 = vunpack.i.h.bf16 %v20207_v30  ;;  %v20208_v39 = vunpack.i.l.bf16 %v20207_v30  ;;  %p20330_p1 = scmp.lt.s32.totalorder %s12152_s16, %s12152_s16 }
0x10e5   :  { %v18269_v44 = vpack.c.bf16 %v20189_v20, %v20188_v52  ;;  %v25114_v20 = vld [vmem:[%s25180_s17] sm:$0xff] }
0x10e6   :  { %v18285_v53 = vpack.c.bf16 %v20209_v6, %v20208_v39 }
0x10e7   :  { %18228 = vmatpush3.bf16.msra.mxu1 %v18225_v50  ;;  %v20193_v50 = vunpack.i.l.bf16 %v20192_v23  ;;  %v20217_v13 = vpop.permute.xlu0 %20216 }
0x10e8   :  { %18230 = vmatprep.subr.bf16.mxu1 %v18229_v29  ;;  %v20219_v21 = vunpack.i.h.bf16 %v20217_v13 }
0x10e9   :  { %v18273_v28 = vpack.c.bf16 %v20194_v47, %v20193_v50 }
0x10eb   :  { %18232 = vmatpush3.bf16.msra.mxu1 %v18229_v29  ;;  %v20198_v29 = vunpack.i.l.bf16 %v20197_v58  ;;  %v20227_v46 = vpop.permute.xlu0 %20226 }
0x10ec   :  { %18234 = vmatprep.subr.bf16.mxu1 %v18233_v37  ;;  %v20229_v26 = vunpack.i.h.bf16 %v20227_v46 }
0x10ed   :  { %v18277_v18 = vpack.c.bf16 %v20199_v24, %v20198_v29 }
0x10ee   :  { %16954 = vmatmul.mubr.msk.f32.vlgmr.msra.gmra.mrb[6].mxu1 %vm1977_vm4, %v20315_v16  ;;  %v20212_v16 = vpop.permute.xlu1 %20211 }
0x10ef   :  { %18236 = vmatpush3.bf16.msra.mxu1 %v18233_v37  ;;  %16976 = vmatprep.mubr.msk.f32.mxu1 %vm1977_vm4, %v20316_v42  ;;  %v20203_v37 = vunpack.i.l.bf16 %v20202_v57  ;;  %v20214_v42 = vunpack.i.h.bf16 %v20212_v16 }
0x10f0   :  { %18238 = vmatprep.subr.bf16.mxu1 %v18237_v63 }
0x10f2   :  { %v20222_v61 = vpop.permute.xlu1 %20221 }
0x10f3   :  { %18240 = vmatpush3.bf16.msra.mxu1 %v18237_v63  ;;  %v18281_v63 = vpack.c.bf16 %v20204_v36, %v20203_v37  ;;  %v20224_v10 = vunpack.i.h.bf16 %v20222_v61 }
0x10f4   :  { %18242 = vmatprep.subr.bf16.mxu1 %v18241_v41 }
0x10f6   :  { %v20232_v2 = vpop.permute.xlu1 %20231 }
0x10f7   :  { %18244 = vmatpush3.bf16.msra.mxu1 %v18241_v41  ;;  %v20213_v41 = vunpack.i.l.bf16 %v20212_v16  ;;  %v20234_v3 = vunpack.i.h.bf16 %v20232_v2  ;;  %v20233_v32 = vunpack.i.l.bf16 %v20232_v2 }
0x10f8   :  { %18246 = vmatprep.subr.bf16.mxu1 %v18245_v12 }
0x10f9   :  { %v18289_v27 = vpack.c.bf16 %v20214_v42, %v20213_v41  ;;  %v18305_v7 = vpack.c.bf16 %v20234_v3, %v20233_v32  ;;  %v7744_v3 = vlaneseq }
0x10fb   :  { %18248 = vmatpush3.bf16.msra.mxu1 %v18245_v12  ;;  %v20218_v12 = vunpack.i.l.bf16 %v20217_v13 }
0x10fc   :  { %18250 = vmatprep.subr.bf16.mxu1 %v18249_v62 }
0x10fd   :  { %v18293_v0 = vpack.c.bf16 %v20219_v21, %v20218_v12 }
0x10ff   :  { %18252 = vmatpush3.bf16.msra.mxu1 %v18249_v62  ;;  %v20223_v62 = vunpack.i.l.bf16 %v20222_v61 }
0x1100   :  { %18254 = vmatprep.subr.bf16.mxu1 %v18253_v55 }
0x1101   :  { %v18297_v1 = vpack.c.bf16 %v20224_v10, %v20223_v62 }
0x1102   :  { %16977 = vmatmul.mubr.msk.f32.vlgmr.msra.gmra.mrb[6].mxu1 %vm1977_vm4, %v20317_v35  ;;  %v20237_v35 = vpop.permute.xlu0 %20236 }
0x1103   :  { %18256 = vmatpush3.bf16.msra.mxu1 %v18253_v55  ;;  %16999 = vmatprep.mubr.msk.f32.mxu1 %vm1977_vm4, %v20318_v54  ;;  %v20228_v55 = vunpack.i.l.bf16 %v20227_v46  ;;  %v20239_v54 = vunpack.i.h.bf16 %v20237_v35 }
0x1104   :  { %18258 = vmatprep.subr.bf16.mxu1 %v18257_v8 }
0x1107   :  { %18260 = vmatpush3.bf16.msra.mxu1 %v18257_v8  ;;  %v18301_v8 = vpack.c.bf16 %v20229_v26, %v20228_v55 }
0x1108   :  { %18262 = vmatprep.subr.bf16.mxu1 %v18261_v40 }
0x110b   :  { %18264 = vmatpush3.bf16.msra.mxu1 %v18261_v40  ;;  %v20238_v40 = vunpack.i.l.bf16 %v20237_v35  ;;  %v7745_v35 = vand.u32 127, %v7744_v3 }
0x110c   :  { %18266 = vmatprep.subr.bf16.mxu1 %v18265_v22 }
0x110d   :  { %v18309_v56 = vpack.c.bf16 %v20239_v54, %v20238_v40  ;;  %vm10034_vm0 = vcmp.eq.s32.totalorder %v7745_v35, 0 }
0x110f   :  { %18268 = vmatpush3.bf16.msra.mxu1 %v18265_v22  ;;  %v25109_v22 = vld [vmem:[%s25180_s17 + $0x8] sm:$0x3]  ;;  %s20325_s17 = scalar_lea.vmem %s12152_s16, 32 }
0x1110   :  { %18270 = vmatprep.subr.bf16.mxu1 %v18269_v44  ;;  %p20326_p0 = scmp.ne.s32.totalorder %s12152_s16, %s20325_s17  ;;  %p20331_p2 = scmp.lt.s32.totalorder %s20325_s17, %s20325_s17 }
0x1112   :  { %p20332_p3 = por %p20331_p2, %p20330_p1 }
0x1113   :  { %18272 = vmatpush3.bf16.msra.mxu1 %v18269_v44 }
0x1114   :  { %18274 = vmatprep.subr.bf16.mxu1 %v18273_v28  ;;  %p20333_p4 = pnand %p20332_p3, %p20326_p0 }
0x1116   :  { %17000 = vmatmul.mubr.msk.f32.vlgmr.msra.gmra.mrb[6].mxu1 %vm1977_vm4, %v20319_v33 }
0x1117   :  { %18276 = vmatpush3.bf16.msra.mxu1 %v18273_v28  ;;  %17022 = vmatprep.mubr.msk.f32.mxu1 %vm1977_vm4, %v20320_v49 }
0x1118   :  { %18278 = vmatprep.subr.bf16.mxu1 %v18277_v18 }
0x111b   :  { %18280 = vmatpush3.bf16.msra.mxu1 %v18277_v18 }
0x111c   :  { %18282 = vmatprep.subr.bf16.mxu1 %v18281_v63 }
0x111f   :  { %18284 = vmatpush3.bf16.msra.mxu1 %v18281_v63 }
0x1120   :  { %18286 = vmatprep.subr.bf16.mxu1 %v18285_v53 }
0x1123   :  { %18288 = vmatpush3.bf16.msra.mxu1 %v18285_v53 }
0x1124   :  { %18290 = vmatprep.subr.bf16.mxu1 %v18289_v27 }
0x1127   :  { %18292 = vmatpush3.bf16.msra.mxu1 %v18289_v27 }
0x1128   :  { %18294 = vmatprep.subr.bf16.mxu1 %v18293_v0 }
0x112a   :  { %17023 = vmatmul.mubr.msk.f32.vlgmr.msra.gmra.mrb[6].mxu1 %vm1977_vm4, %v20321_v11 }
0x112b   :  { %18296 = vmatpush3.bf16.msra.mxu1 %v18293_v0  ;;  %17045 = vmatprep.mubr.msk.f32.mxu1 %vm1977_vm4, %v20322_v59 }
0x112c   :  { %18298 = vmatprep.subr.bf16.mxu1 %v18297_v1 }
0x112f   :  { %18300 = vmatpush3.bf16.msra.mxu1 %v18297_v1 }
0x1130   :  { %18302 = vmatprep.subr.bf16.mxu1 %v18301_v8 }
0x1133   :  { %18304 = vmatpush3.bf16.msra.mxu1 %v18301_v8 }
0x1134   :  { %18306 = vmatprep.subr.bf16.mxu1 %v18305_v7 }
0x1137   :  { %18308 = vmatpush3.bf16.msra.mxu1 %v18305_v7 }
0x1138   :  { %18310 = vmatprep.subr.bf16.mxu1 %v18309_v56 }
0x113b   :  { %18312 = vmatpush3.bf16.msra.mxu1 %v18309_v56 }
0x113e   :  { %17046 = vmatmul.mubr.msk.f32.vlgmr.msra.gmra.mrb[6].mxu1 %vm1977_vm4, %v20323_v19 }
0x113f   :  { %17448 = vmatprep.mubr.msk.f32.mxu1 %vm9949_vm15, %v20324_v17 }
0x1150   :  { %v10040_v32 = vpop.permute.xlu1 %10039 }
0x1151   :  { %v10047_v54 = vsel %vm10034_vm0, %v10040_v32, 0.0 }
0x1171   :  { %v16863_v52 = vpop.f32.mrb[4].mxu1 }
0x1172   :  { %v10031_v23 = vadd.f32 %v16863_v52, %v25109_v22  ;;  %v10025_v44 = vpop.f32.mrb[5].mxu1 }
0x1173   :  { %v10026_v47 = vadd.f32 %v10025_v44, %v25114_v20 }
0x1174   :  { %10056 = vperm.xlu1 %20241, %v10031_v23  }
0x1175   :  { %10051 = vperm.xlu0 %20240, %v10026_v47  }
0x1177   :  { %v11908_v50 = vpop.f32.mrb[132].mxu0 }
0x1178   :  { %v17395_v58 = vpop.f32.mrb[133].mxu0  ;;  %v18499_v24 = vadd.f32 %v11908_v50, %v24794_v9 }
0x117b   :  { %v11913_v28 = vpop.f32.mrb[134].mxu0 }
0x117c   :  { %v18500_v29 = vadd.f32 %v11913_v28, %v24799_v43  ;;  %v17398_v57 = vpop.f32.mrb[135].mxu0 }
0x117e   :  { %v18439_v18 = vpack.c.bf16 %v18500_v29, %v18499_v24 }
0x117f   :  { %v11918_v36 = vpop.f32.mrb[136].mxu0 }
0x1180   :  { %v17401_v37 = vpop.f32.mrb[137].mxu0  ;;  %18440 = vmatprep.subr.bf16.mxu1 %v18439_v18  ;;  %v18501_v30 = vadd.f32 %v11918_v36, %v24822_v25 }
0x1181   :  { %18442 = vmatpush3.bf16.msra.mxu1 %v18439_v18 }
0x1183   :  { %v11923_v33 = vpop.f32.mrb[138].mxu0 }
0x1184   :  { %v18502_v49 = vadd.f32 %v11923_v33, %v24827_v45  ;;  %v17404_v63 = vpop.f32.mrb[139].mxu0 }
0x1186   :  { %v18443_v6 = vpack.c.bf16 %v18502_v49, %v18501_v30 }
0x1187   :  { %v11928_v39 = vpop.f32.mrb[140].mxu0 }
0x1188   :  { %v17407_v16 = vpop.f32.mrb[141].mxu0  ;;  %18444 = vmatprep.subr.bf16.mxu1 %v18443_v6  ;;  %v18503_v43 = vadd.f32 %v11928_v39, %v24852_v5 }
0x1189   :  { %18446 = vmatpush3.bf16.msra.mxu1 %v18443_v6 }
0x118b   :  { %v11933_v9 = vpop.f32.mrb[142].mxu0 }
0x118c   :  { %v18504_v53 = vadd.f32 %v11933_v9, %v24857_v60  ;;  %v17410_v42 = vpop.f32.mrb[143].mxu0 }
0x118e   :  { %v18447_v41 = vpack.c.bf16 %v18504_v53, %v18503_v43 }
0x118f   :  { %v11938_v13 = vpop.f32.mrb[144].mxu0 }
0x1190   :  { %v17413_v27 = vpop.f32.mrb[145].mxu0  ;;  %18448 = vmatprep.subr.bf16.mxu1 %v18447_v41  ;;  %v18505_v45 = vadd.f32 %v11938_v13, %v24882_v38 }
0x1191   :  { %18450 = vmatpush3.bf16.msra.mxu1 %v18447_v41 }
0x1193   :  { %v11943_v25 = vpop.f32.mrb[146].mxu0 }
0x1194   :  { %v18506_v21 = vadd.f32 %v11943_v25, %v24887_v14  ;;  %v17416_v12 = vpop.f32.mrb[147].mxu0 }
0x1196   :  { %v18451_v61 = vpack.c.bf16 %v18506_v21, %v18505_v45 }
0x1197   :  { %v11948_v0 = vpop.f32.mrb[148].mxu0 }
0x1198   :  { %v17419_v10 = vpop.f32.mrb[149].mxu0  ;;  %18452 = vmatprep.subr.bf16.mxu1 %v18451_v61  ;;  %v18507_v60 = vadd.f32 %v11948_v0, %v24910_v15 }
0x1199   :  { %18454 = vmatpush3.bf16.msra.mxu1 %v18451_v61 }
0x119b   :  { %v11953_v5 = vpop.f32.mrb[150].mxu0 }
0x119c   :  { %v18508_v62 = vadd.f32 %v11953_v5, %v24915_v34  ;;  %v17422_v46 = vpop.f32.mrb[151].mxu0 }
0x119e   :  { %v18455_v1 = vpack.c.bf16 %v18508_v62, %v18507_v60 }
0x119f   :  { %v11958_v26 = vpop.f32.mrb[152].mxu0 }
0x11a0   :  { %v18509_v55 = vadd.f32 %v11958_v26, %v24930_v4  ;;  %v17425_v11 = vpop.f32.mrb[153].mxu0  ;;  %18456 = vmatprep.subr.bf16.mxu1 %v18455_v1 }
0x11a1   :  { %18458 = vmatpush3.bf16.msra.mxu1 %v18455_v1 }
0x11a2   :  { %17446 = vmatprep.subr.msk.mxu1 %vm189_vm1, %v18509_v55 }
0x11a5   :  { %17447 = vmatpush3.msk.msra.mxu1 %vm189_vm1, %v18509_v55  ;;  %vm12051_vm1 = vcmp.eq.s32.totalorder %v7745_v35, 1 }
0x11a6   :  { %17449 = vmatmul.mubr.msk.f32.vlgmr.msra.gmra.mrb[8].mxu1 %vm9949_vm15, %v24945_v48  ;;  %v10045_v48 = vpop.permute.xlu0 %10044 }
0x11a7   :  { %v10048_v19 = vsel %vm10034_vm0, %v10045_v48, 0.0 }
0x11f3   :  { %v10057_v7 = vpop.permute.xlu1 %10056 }
0x11f4   :  { %v10060_v23 = vsel %vm10034_vm0, %v10057_v7, 0.0 }
0x1211   :  { %v17047_v38 = vpop.f32.mrb[6].mxu1 }
0x1212   :  { %v18497_v14 = vadd.f32 %v17047_v38, %v25045_v51  ;;  %v10906_v15 = vpop.f32.mrb[7].mxu1  ;;  %v10052_v51 = vpop.permute.xlu0 %10051 }
0x1213   :  { %v18498_v34 = vadd.f32 %v10906_v15, %v25054_v31 }
0x1214   :  { %12061 = vperm.xlu0 %20240, %v18497_v14  }
0x1215   :  { %12056 = vperm.xlu1 %20241, %v18498_v34  }
0x1279   :  { %v17450_v2 = vpop.f32.mrb[8].mxu1 }
0x127a   :  { %v12042_v4 = vpop.f32.mrb[9].mxu1  ;;  %v12048_v8 = vadd.f32 %v17450_v2, %v25109_v22 }
0x127b   :  { %v12043_v59 = vadd.f32 %v12042_v4, %v25114_v20  ;;  %v10059_v20 = vsel %vm10034_vm0, %v10052_v51, 0.0 }
0x127d   :  { %12068 = vperm.xlu1 %20241, %v12043_v59  }
0x1281   :  { %12073 = vperm.xlu1 %20241, %v12048_v8  }
0x1293   :  { %v12062_v56 = vpop.permute.xlu0 %12061 }
0x1294   :  { %v12057_v31 = vpop.permute.xlu1 %12056  ;;  %v12065_v17 = vsel %vm12051_vm1, %v12062_v56, %v10048_v19 }
0x1295   :  { %v12064_v40 = vsel %vm12051_vm1, %v12057_v31, %v10047_v54 }
0x1296   :  { %12078 = vxpose.xlu0.b32.start [1/2] (short) (narrow) %v12064_v40, 8 }
0x129a   :  { %12079 = vxpose.xlu0.b32.end [2/2] (short) (narrow) %v12065_v17, 8 }
0x12fc   :  { %v12069_v52 = vpop.permute.xlu1 %12068 }
0x12fd   :  { %v12076_v22 = vsel %vm12051_vm1, %v12069_v52, %v10059_v20 }
0x12fe   :  { %12112 = vxpose.xlu1.b32.start [1/2] (short) (narrow) %v12076_v22, 8 }
0x1300   :  { %v12074_v44 = vpop.permute.xlu1 %12073 }
0x1301   :  { %v12077_v47 = vsel %vm12051_vm1, %v12074_v44, %v10060_v23 }
0x1302   :  { %12113 = vxpose.xlu1.b32.end [2/2] (short) (narrow) %v12077_v47, 8 }
0x1316   :  { %v12094_v50 = vpop.trf.xlu0 }
0x1317   :  { %12111 = vst.msk [vmem:[#allocation2] sm:$0x3] %vm12110_vm2, %v12094_v50 }
0x1318   :  { %20336 = shalt.err (!%p20333_p4)
}
0x1319   :  { %s20337_s20 = scalar_lea.hbm %s25181_s18, 32 }
0x131a   :  { %p20338_p5 = scmp.ne.s32.totalorder %s25181_s18, %s20337_s20  ;;  %p20341_p6 = scmp.lt.u32.totalorder %s20337_s20, %s25181_s18 }
0x131c   :  { %p20343_p7 = pnand %p20341_p6, %p20338_p5 }
0x131e   :  { %20346 = shalt.err (!%p20343_p7)
}
0x131f   :  { %12154 = dma.vmem_to_hbm [thread:$0]  %s12152_s16, 32, %s25181_s18, [#allocation3]  }
0x1320   :  { %s20394_s8 = smov [#allocation4]  }
0x1321   :  { %s12161_s30 = sshll.u32 %s20394_s8, 4  ;;  %s12162_s30 = int_to_ptr.vmem [resolvable:$true] %s12161_s30 }
0x1322   :  { %s20347_s21 = scalar_lea.vmem %s12162_s30, 32  ;;  %p20352_p9 = scmp.lt.s32.totalorder %s12162_s30, %s12162_s30 }
0x1323   :  { %p20348_p8 = scmp.ne.s32.totalorder %s12162_s30, %s20347_s21  ;;  %p20353_p10 = scmp.lt.s32.totalorder %s20347_s21, %s20347_s21 }
0x1325   :  { %p20354_p11 = por %p20353_p10, %p20352_p9 }
0x1327   :  { %p20355_p12 = pnand %p20354_p11, %p20348_p8 }
0x137e   :  { %v12128_v58 = vpop.trf.xlu1 }
0x137f   :  { %12144 = vst.msk [vmem:[#allocation4] sm:$0x3] %vm12110_vm2, %v12128_v58 }
0x1380   :  { %20358 = shalt.err (!%p20355_p12)
}
0x1381   :  { %s20359_s9 = scalar_lea.hbm %s25182_s19, 32 }
0x1382   :  { %p20360_p13 = scmp.ne.s32.totalorder %s25182_s19, %s20359_s9  ;;  %p20363_p0 = scmp.lt.u32.totalorder %s20359_s9, %s25182_s19 }
0x1384   :  { %p20365_p1 = pnand %p20363_p0, %p20360_p13 }
0x1386   :  { %20368 = shalt.err (!%p20365_p1)
}
0x1387   :  { %12164 = dma.vmem_to_hbm [thread:$0]  %s12162_s30, 32, %s25182_s19, [#allocation5]  }
0x1388   :  { %20369 = dma.done.wait [#allocation3], 32  }
0x1389   :  { %20370 = vsyncadd [#allocation3], 4294967264 }
0x138a   :  { %20371 = dma.done.wait [#allocation5], 32  }
0x138b   :  { %20372 = vsyncadd [#allocation5], 4294967264 }
0x138c   :  { %12171 = vsyncpa [#allocation3], 1 }
0x138d   :  { %12172 = vsyncpa [#allocation5], 1 }

</bundles_post_ra>
